<compile_context>
chip_gen: v6e
topology: v6e:2x2x1
jax: 0.10.0
libtpu: 0.0.40
codegen_flags: <defaults>
</compile_context>

<pallas_src>
import functools

import jax
import jax.numpy as jnp
from jax import lax
from jax.experimental import pallas as pl
from jax.experimental.pallas import tpu as pltpu

NEG_SLOPE = 0.01          # nn.LeakyReLU default negative_slope
TOPK_RATIO = 0.125        # cfg.TRAIN.FEAT_TOPK_RATIO stand-in
SMOOTH_RATIO = 0.25       # cfg.MODEL.SMOOTH_RATIO stand-in
VMEM_LIMIT = 64 * 1024 * 1024


def _stack_taps(x):
    """x: (T, C) f32 -> (T, 3C) bf16 = [x[t-1] | x[t] | x[t+1]] with zero padding."""
    T = x.shape[0]
    row = lax.broadcasted_iota(jnp.int32, x.shape, 0)
    x_prev = jnp.where(row == 0, 0.0, pltpu.roll(x, 1, axis=0))        # x[t-1]
    x_next = jnp.where(row == T - 1, 0.0, pltpu.roll(x, T - 1, axis=0))  # x[t+1]
    return jnp.concatenate([x_prev, x, x_next], axis=1).astype(jnp.bfloat16)


# --------------------------------------------------------------------------
# Kernel 1 (per branch): conv1(k=3)+LReLU -> conv2(k=3)+LReLU -> head partial.
# Grid = (B, Cout_tiles).  conv1 runs once per batch (ct == 0) into VMEM
# scratch; conv2 + head-partial run per output-channel tile.
#   head partial (T, 8): cols 0..2 = [frame_prob, cm0, cm1] linear contribution
#   of this branch (no bias), col 3 = per-frame squared L2 norm contribution.
# --------------------------------------------------------------------------
def _branch_kernel(x_ref, w1_ref, b1_ref, w2_ref, b2_ref, wh_ref,
                   feat_ref, head_ref, taps_ref, acc_ref):
    ct = pl.program_id(1)

    @pl.when(ct == 0)
    def _():
        x = x_ref[0].astype(jnp.float32)                         # (T, Cin)
        lhs1 = _stack_taps(x)                                    # (T, 3Cin) bf16
        y1 = jnp.dot(lhs1, w1_ref[...],
                     preferred_element_type=jnp.float32) + b1_ref[...]
        h1 = jnp.where(y1 > 0, y1, NEG_SLOPE * y1)               # (T, C) f32
        taps_ref[...] = _stack_taps(h1)                          # (T, 3C) bf16
        acc_ref[...] = jnp.zeros_like(acc_ref)

    # conv2 for this Cout tile: single (T, 3C) @ (3C, TN) contraction.
    y2 = jnp.dot(taps_ref[...], w2_ref[...],
                 preferred_element_type=jnp.float32) + b2_ref[...]
    feat = jnp.where(y2 > 0, y2, NEG_SLOPE * y2)                 # (T, TN) f32
    feat_bf = feat.astype(jnp.bfloat16)
    feat_ref[0] = feat_bf

    # head partial (frame_prob / cost_matrix linear part) + squared L2 norm.
    hp = jnp.dot(feat_bf, wh_ref[...],
                 preferred_element_type=jnp.float32)             # (T, 8)
    nrm = jnp.sum(feat * feat, axis=1, keepdims=True)            # (T, 1)
    col3 = (lax.broadcasted_iota(jnp.int32, (1, 8), 1) == 3).astype(jnp.float32)
    acc_ref[...] += hp + nrm * col3

    @pl.when(ct == pl.num_programs(1) - 1)
    def _():
        head_ref[0] = acc_ref[...]


def branch_fused(x, w1, b1, w2, b2, wh, *, tn=128):
    B, T, Cin = x.shape
    C = w1.shape[1]
    assert C % tn == 0
    n_ct = C // tn
    return pl.pallas_call(
        _branch_kernel,
        out_shape=(jax.ShapeDtypeStruct((B, T, C), jnp.bfloat16),
                   jax.ShapeDtypeStruct((B, T, 8), jnp.float32)),
        grid_spec=pltpu.PrefetchScalarGridSpec(
            num_scalar_prefetch=0,
            grid=(B, n_ct),
            in_specs=[
                pl.BlockSpec((1, T, Cin), lambda b, ct: (b, 0, 0)),
                pl.BlockSpec((3 * Cin, C), lambda b, ct: (0, 0)),
                pl.BlockSpec((1, C), lambda b, ct: (0, 0)),
                pl.BlockSpec((3 * C, tn), lambda b, ct: (0, ct)),   # conv2 weight tiled
                pl.BlockSpec((1, tn), lambda b, ct: (0, ct)),
                pl.BlockSpec((tn, 8), lambda b, ct: (ct, 0)),
            ],
            out_specs=[
                pl.BlockSpec((1, T, tn), lambda b, ct: (b, 0, ct)),
                pl.BlockSpec((1, T, 8), lambda b, ct: (b, 0, 0)),   # accumulator
            ],
            scratch_shapes=[
                pltpu.VMEM((T, 3 * C), jnp.bfloat16),   # tap-stacked conv1 output
                pltpu.VMEM((T, 8), jnp.float32),        # head partial accumulator
            ],
        ),
        compiler_params=pltpu.CompilerParams(
            dimension_semantics=("parallel", "arbitrary"),
            vmem_limit_bytes=VMEM_LIMIT),
    )(x, w1, b1, w2, b2, wh)


# --------------------------------------------------------------------------
# Kernel 2: top-k pooled feature (VPU masked reduction) -> mod_prob softmax ->
# weights = mod_prob (x) frame_prob -> re-weighted concat feature.
# --------------------------------------------------------------------------
def _mix_kernel(spa_ref, tem_ref, sel_ref, fp_ref, wm_s_ref, wm_t_ref, bm_ref,
                out_ref, mode_ref):
    spa = spa_ref[0].astype(jnp.float32)                         # (T, C)
    tem = tem_ref[0].astype(jnp.float32)                         # (T, C)
    sel = sel_ref[0]                                             # (T, 1) mask/num_sel
    fp = fp_ref[0]                                               # (T, 1) frame prob

    # mean of top-k frames == masked reduction over T (VPU mul + XLU reduce).
    pooled_spa = jnp.sum(spa * sel, axis=0, keepdims=True)       # (1, C)
    pooled_tem = jnp.sum(tem * sel, axis=0, keepdims=True)       # (1, C)

    logits = (jnp.dot(pooled_spa.astype(jnp.bfloat16), wm_s_ref[...],
                      preferred_element_type=jnp.float32)
              + jnp.dot(pooled_tem.astype(jnp.bfloat16), wm_t_ref[...],
                        preferred_element_type=jnp.float32)
              + bm_ref[...])                                     # (1, 2)
    logits = logits - jnp.max(logits, axis=1, keepdims=True)
    e = jnp.exp(logits)
    mode_prob = e / jnp.sum(e, axis=1, keepdims=True)            # (1, 2)
    mode_ref[0] = mode_prob

    spa_w = fp * mode_prob[:, 0:1]                               # (T, 1)
    tem_w = fp * mode_prob[:, 1:2]                               # (T, 1)
    C = spa.shape[1]
    out_ref[0, :, :C] = (spa * spa_w).astype(out_ref.dtype)
    out_ref[0, :, C:] = (tem * tem_w).astype(out_ref.dtype)


def mix_call(spa, tem, sel, fp, wm_s, wm_t, bm):
    B, T, C = spa.shape
    return pl.pallas_call(
        _mix_kernel,
        out_shape=(jax.ShapeDtypeStruct((B, T, 2 * C), jnp.float32),
                   jax.ShapeDtypeStruct((B, 1, 2), jnp.float32)),
        grid_spec=pltpu.PrefetchScalarGridSpec(
            num_scalar_prefetch=0,
            grid=(B,),
            in_specs=[
                pl.BlockSpec((1, T, C), lambda b: (b, 0, 0)),
                pl.BlockSpec((1, T, C), lambda b: (b, 0, 0)),
                pl.BlockSpec((1, T, 1), lambda b: (b, 0, 0)),
                pl.BlockSpec((1, T, 1), lambda b: (b, 0, 0)),
                pl.BlockSpec((C, 2), lambda b: (0, 0)),
                pl.BlockSpec((C, 2), lambda b: (0, 0)),
                pl.BlockSpec((1, 2), lambda b: (0, 0)),
            ],
            out_specs=[
                pl.BlockSpec((1, T, 2 * C), lambda b: (b, 0, 0)),
                pl.BlockSpec((1, 1, 2), lambda b: (b, 0, 0)),
            ],
        ),
        compiler_params=pltpu.CompilerParams(
            dimension_semantics=("parallel",),
            vmem_limit_bytes=VMEM_LIMIT),
    )(spa, tem, sel, fp, wm_s, wm_t, bm)


# --------------------------------------------------------------------------
# Parameter setup (deterministic, PyTorch-Conv1d-style uniform init), stored in
# the fused/bf16 layouts the kernels expect.
# --------------------------------------------------------------------------
def init_params(key, c_half):
    def uconv(k, cin, cout, ksize):
        bound = 1.0 / (cin * ksize) ** 0.5
        kw, kb = jax.random.split(k)
        w = jax.random.uniform(kw, (ksize, cin, cout), jnp.float32, -bound, bound)
        b = jax.random.uniform(kb, (1, cout), jnp.float32, -bound, bound)
        return w, b

    def conv3(k, c):
        w, b = uconv(k, c, c, 3)
        # (3, Cin, Cout) -> (3*Cin, Cout): row k*Cin + c = tap k, input channel c
        return w.reshape(3 * c, c).astype(jnp.bfloat16), b

    keys = jax.random.split(key, 7)
    p = {}
    p["w_spa1"], p["b_spa1"] = conv3(keys[0], c_half)
    p["w_spa2"], p["b_spa2"] = conv3(keys[1], c_half)
    p["w_tem1"], p["b_tem1"] = conv3(keys[2], c_half)
    p["w_tem2"], p["b_tem2"] = conv3(keys[3], c_half)

    # frame_prob: Conv1d(2C,1,k=1) and cost_matrix: Conv1d(2C,2,k=1), fused to
    # a (2C, 3) weight, padded to lane-packed width 8 (cols 3..7 zero).
    wf, bf = uconv(keys[4], 2 * c_half, 1, 1)
    wc, bc = uconv(keys[5], 2 * c_half, 2, 1)
    w_head = jnp.concatenate([wf[0], wc[0]], axis=1)             # (2C, 3)
    w_head = jnp.pad(w_head, ((0, 0), (0, 5)))                   # (2C, 8)
    p["wh_spa"] = w_head[:c_half].astype(jnp.bfloat16)
    p["wh_tem"] = w_head[c_half:].astype(jnp.bfloat16)
    p["bh"] = jnp.concatenate([bf, bc], axis=1)                  # (1, 3)

    # mod_prob: Conv1d(2C, 2, k=1)
    wm, bm = uconv(keys[6], 2 * c_half, 2, 1)
    p["wm_spa"] = wm[0][:c_half].astype(jnp.bfloat16)
    p["wm_tem"] = wm[0][c_half:].astype(jnp.bfloat16)
    p["bm"] = bm
    return p


# --------------------------------------------------------------------------
# Full forward pass (JAX glue around the two Pallas kernels)
# --------------------------------------------------------------------------
@functools.partial(jax.jit, static_argnames=("is_train",))
def network_forward(params, in_feature_spatial, in_feature_temporal, *, is_train):
    B, T, C = in_feature_spatial.shape
    num_sel = int(round(T * TOPK_RATIO))

    x_spa = in_feature_spatial.astype(jnp.bfloat16)
    x_tem = in_feature_temporal.astype(jnp.bfloat16)

    # Fused per-branch: conv1+LReLU -> conv2+LReLU -> head partial + L2 norm.
    feat_spa, head_spa = branch_fused(x_spa, params["w_spa1"], params["b_spa1"],
                                      params["w_spa2"], params["b_spa2"],
                                      params["wh_spa"])
    feat_tem, head_tem = branch_fused(x_tem, params["w_tem1"], params["b_tem1"],
                                      params["w_tem2"], params["b_tem2"],
                                      params["wh_tem"])

    # frame_prob / cost_matrix from the summed partials (tiny XLA ops).
    head_lin = head_spa[..., :3] + head_tem[..., :3] + params["bh"].reshape(1, 1, 3)
    head = jax.nn.sigmoid(head_lin)                              # (B, T, 3)
    frame_prob = head[..., 0:1]                                  # torch: [B, 1, T]
    cost_matrix = head[..., 1:3]                                 # torch: [B, 2, T]

    # top-k frame selection by (squared) L2 norm of the concatenated feature.
    normsq = head_spa[..., 3] + head_tem[..., 3]                 # (B, T)
    _, idxs = jax.lax.top_k(normsq, num_sel)
    mask = jnp.zeros((B, T), jnp.float32).at[
        jnp.arange(B)[:, None], idxs].set(1.0)
    sel = (mask / float(num_sel))[..., None]                     # (B, T, 1)

    # mod_prob softmax, mode/frame weighting, re-weighted concat feature.
    feature_sim, mode_prob = mix_call(feat_spa, feat_tem, sel, frame_prob,
                                      params["wm_spa"], params["wm_tem"],
                                      params["bm"])

    # TODO(synk): pred_cat = SSAD(feature_sim) — SSAD is an external module not
    # defined in the reference; feature_sim (SSAD's input) is returned instead.
    if not is_train:
        return feature_sim

    # smooth loss (cal_smooth_loss): BCE(amp, 0) == -log(1 - amp)
    num_k = int(round((T - 1) * SMOOTH_RATIO))
    vector = jnp.sum(cost_matrix, axis=2)                        # (B, T)
    diff_abs = jnp.abs(vector[:, :-1] - vector[:, 1:])           # (B, T-1)
    smallest = -jax.lax.top_k(-diff_abs, num_k)[0]               # (B, num_k)
    amp = jnp.mean(smallest, axis=1)                             # (B,)
    # NOTE: torch.BCELoss requires inputs in [0,1]; clip guards against
    # 1 - amp < 0 (sum of two sigmoids can differ by more than 1).
    smooth_loss = jnp.mean(-jnp.log(jnp.clip(1.0 - amp, 1e-12, 1.0)))

    # TODO(synk): ot_loss uses SinkhornDistance, an external module not defined
    # in the reference; only smooth_loss is returned here.
    loss = smooth_loss
    return feature_sim, loss


# --------------------------------------------------------------------------
if __name__ == "__main__":
    B, T, C_HALF = 2, 128, 256   # scaled-down stand-ins for (B, 128, 1024)
    key = jax.random.PRNGKey(0)
    kx, kt, kp = jax.random.split(key, 3)
    in_feature_spatial = jax.random.normal(kx, (B, T, C_HALF), jnp.float32)
    in_feature_temporal = jax.random.normal(kt, (B, T, C_HALF), jnp.float32)
    params = init_params(kp, C_HALF)

    feature_sim, loss = network_forward(params, in_feature_spatial,
                                        in_feature_temporal, is_train=True)
    jax.block_until_ready((feature_sim, loss))
    assert feature_sim.shape == (B, T, 2 * C_HALF)
    assert bool(jnp.isfinite(loss))
    print("KERNEL_OK")
</pallas_src>

<mosaic_0001>
module attributes {stable_mosaic.version = 11 : i64} {
  func.func @_branch_kernel(%arg0: i32, %arg1: i32, %arg2: memref<1x128x256xbf16, #tpu.memory_space<vmem>>, %arg3: memref<768x256xbf16, #tpu.memory_space<vmem>>, %arg4: memref<1x256xf32, #tpu.memory_space<vmem>>, %arg5: memref<768x128xbf16, #tpu.memory_space<vmem>>, %arg6: memref<1x128xf32, #tpu.memory_space<vmem>>, %arg7: memref<128x8xbf16, #tpu.memory_space<vmem>>, %arg8: memref<1x128x128xbf16, #tpu.memory_space<vmem>>, %arg9: memref<1x128x8xf32, #tpu.memory_space<vmem>>, %arg10: memref<128x768xbf16, #tpu.memory_space<vmem>>, %arg11: memref<128x8xf32, #tpu.memory_space<vmem>>) attributes {dimension_semantics = [#tpu.dimension_semantics<parallel>, #tpu.dimension_semantics<arbitrary>], iteration_bounds = array<i64: 2, 2>, scalar_prefetch = 0 : i64, scratch_operands = 2 : i64, tpu.core_type = #tpu.core_type<tc>, window_params = [{transform_indices = @transform_0, window_bounds = array<i64: 1, 128, 256>}, {pipeline_mode = #tpu.pipeline_mode<synchronous>, transform_indices = @transform_1, window_bounds = array<i64: 768, 256>}, {pipeline_mode = #tpu.pipeline_mode<synchronous>, transform_indices = @transform_2, window_bounds = array<i64: 1, 256>}, {transform_indices = @transform_3, window_bounds = array<i64: 768, 128>}, {transform_indices = @transform_4, window_bounds = array<i64: 1, 128>}, {transform_indices = @transform_5, window_bounds = array<i64: 128, 8>}, {transform_indices = @transform_6, window_bounds = array<i64: 1, 128, 128>}, {transform_indices = @transform_7, window_bounds = array<i64: 1, 128, 8>}]} {
    %c0_i32 = arith.constant 0 : i32
    %0 = arith.cmpi eq, %arg1, %c0_i32 : i32
    %1 = arith.extui %0 : i1 to i32
    %c0_i32_0 = arith.constant 0 : i32
    %2 = arith.cmpi ne, %1, %c0_i32_0 : i32
    scf.if %2 {
      %c0_20 = arith.constant 0 : index
      %c0_21 = arith.constant 0 : index
      %c0_22 = arith.constant 0 : index
      %38 = vector.load %arg2[%c0_20, %c0_21, %c0_22] : memref<1x128x256xbf16, #tpu.memory_space<vmem>>, vector<1x128x256xbf16>
      %39 = vector.shape_cast %38 : vector<1x128x256xbf16> to vector<128x256xbf16>
      %40 = arith.extf %39 : vector<128x256xbf16> to vector<128x256xf32>
      %41 = tpu.iota {dimensions = array<i32: 0>} : vector<128x256xi32>
      %c0_i32_23 = arith.constant 0 : i32
      %42 = vector.broadcast %c0_i32_23 : i32 to vector<128x256xi32>
      %43 = arith.cmpi eq, %41, %42 : vector<128x256xi32>
      %c1_i32_24 = arith.constant 1 : i32
      %44 = tpu.dynamic_rotate %40 by %c1_i32_24 dim 0 : vector<128x256xf32>, i32 -> vector<128x256xf32>
      %cst_25 = arith.constant 0.000000e+00 : f32
      %45 = vector.broadcast %cst_25 : f32 to vector<128x256xf32>
      %46 = arith.select %43, %45, %44 : vector<128x256xi1>, vector<128x256xf32>
      %c127_i32 = arith.constant 127 : i32
      %47 = vector.broadcast %c127_i32 : i32 to vector<128x256xi32>
      %48 = arith.cmpi eq, %41, %47 : vector<128x256xi32>
      %c127_i32_26 = arith.constant 127 : i32
      %49 = tpu.dynamic_rotate %40 by %c127_i32_26 dim 0 : vector<128x256xf32>, i32 -> vector<128x256xf32>
      %cst_27 = arith.constant 0.000000e+00 : f32
      %50 = vector.broadcast %cst_27 : f32 to vector<128x256xf32>
      %51 = arith.select %48, %50, %49 : vector<128x256xi1>, vector<128x256xf32>
      %52 = tpu.concatenate %46, %40, %51 in 1 : vector<128x256xf32>, vector<128x256xf32>, vector<128x256xf32> -> vector<128x768xf32>
      %53 = arith.truncf %52 : vector<128x768xf32> to vector<128x768xbf16>
      %c0_28 = arith.constant 0 : index
      %c0_29 = arith.constant 0 : index
      %54 = vector.load %arg3[%c0_28, %c0_29] : memref<768x256xbf16, #tpu.memory_space<vmem>>, vector<768x256xbf16>
      %cst_30 = arith.constant dense<0.000000e+00> : vector<128x256xf32>
      %55 = tpu.matmul %53, %54, %cst_30 {dimension_numbers = #tpu.dot_dimension_numbers<[1], [0], [0], [1], [0, 0, 1, 1], [], []>} : vector<128x768xbf16>, vector<768x256xbf16>, vector<128x256xf32> -> vector<128x256xf32>
      %c0_31 = arith.constant 0 : index
      %c0_32 = arith.constant 0 : index
      %56 = vector.load %arg4[%c0_31, %c0_32] : memref<1x256xf32, #tpu.memory_space<vmem>>, vector<1x256xf32>
      %57 = vector.broadcast %56 : vector<1x256xf32> to vector<128x256xf32>
      %58 = arith.addf %55, %57 : vector<128x256xf32>
      %cst_33 = arith.constant 0.000000e+00 : f32
      %59 = vector.broadcast %cst_33 : f32 to vector<128x256xf32>
      %60 = arith.cmpf ogt, %58, %59 : vector<128x256xf32>
      %cst_34 = arith.constant 0.00999999977 : f32
      %61 = vector.broadcast %cst_34 : f32 to vector<128x256xf32>
      %62 = arith.mulf %61, %58 : vector<128x256xf32>
      %63 = arith.select %60, %58, %62 : vector<128x256xi1>, vector<128x256xf32>
      %64 = tpu.iota {dimensions = array<i32: 0>} : vector<128x256xi32>
      %c0_i32_35 = arith.constant 0 : i32
      %65 = vector.broadcast %c0_i32_35 : i32 to vector<128x256xi32>
      %66 = arith.cmpi eq, %64, %65 : vector<128x256xi32>
      %c1_i32_36 = arith.constant 1 : i32
      %67 = tpu.dynamic_rotate %63 by %c1_i32_36 dim 0 : vector<128x256xf32>, i32 -> vector<128x256xf32>
      %cst_37 = arith.constant 0.000000e+00 : f32
      %68 = vector.broadcast %cst_37 : f32 to vector<128x256xf32>
      %69 = arith.select %66, %68, %67 : vector<128x256xi1>, vector<128x256xf32>
      %c127_i32_38 = arith.constant 127 : i32
      %70 = vector.broadcast %c127_i32_38 : i32 to vector<128x256xi32>
      %71 = arith.cmpi eq, %64, %70 : vector<128x256xi32>
      %c127_i32_39 = arith.constant 127 : i32
      %72 = tpu.dynamic_rotate %63 by %c127_i32_39 dim 0 : vector<128x256xf32>, i32 -> vector<128x256xf32>
      %cst_40 = arith.constant 0.000000e+00 : f32
      %73 = vector.broadcast %cst_40 : f32 to vector<128x256xf32>
      %74 = arith.select %71, %73, %72 : vector<128x256xi1>, vector<128x256xf32>
      %75 = tpu.concatenate %69, %63, %74 in 1 : vector<128x256xf32>, vector<128x256xf32>, vector<128x256xf32> -> vector<128x768xf32>
      %76 = arith.truncf %75 : vector<128x768xf32> to vector<128x768xbf16>
      %c0_41 = arith.constant 0 : index
      %c0_42 = arith.constant 0 : index
      %77 = vector.load %arg10[%c0_41, %c0_42] : memref<128x768xbf16, #tpu.memory_space<vmem>>, vector<128x768xbf16>
      tpu.vector_store %arg10[%c0_41, %c0_42], %76 {strides = array<i32>} : memref<128x768xbf16, #tpu.memory_space<vmem>>, vector<128x768xbf16>,
      %cst_43 = arith.constant 0.000000e+00 : f32
      %78 = vector.broadcast %cst_43 : f32 to vector<128x8xf32>
      %c0_44 = arith.constant 0 : index
      %c0_45 = arith.constant 0 : index
      %79 = vector.load %arg11[%c0_44, %c0_45] : memref<128x8xf32, #tpu.memory_space<vmem>>, vector<128x8xf32>
      tpu.vector_store %arg11[%c0_44, %c0_45], %78 {strides = array<i32>} : memref<128x8xf32, #tpu.memory_space<vmem>>, vector<128x8xf32>,
    } else {
    }
    %c0 = arith.constant 0 : index
    %c0_1 = arith.constant 0 : index
    %3 = vector.load %arg10[%c0, %c0_1] : memref<128x768xbf16, #tpu.memory_space<vmem>>, vector<128x768xbf16>
    %c0_2 = arith.constant 0 : index
    %c0_3 = arith.constant 0 : index
    %4 = vector.load %arg5[%c0_2, %c0_3] : memref<768x128xbf16, #tpu.memory_space<vmem>>, vector<768x128xbf16>
    %cst = arith.constant dense<0.000000e+00> : vector<128x128xf32>
    %5 = tpu.matmul %3, %4, %cst {dimension_numbers = #tpu.dot_dimension_numbers<[1], [0], [0], [1], [0, 0, 1, 1], [], []>} : vector<128x768xbf16>, vector<768x128xbf16>, vector<128x128xf32> -> vector<128x128xf32>
    %c0_4 = arith.constant 0 : index
    %c0_5 = arith.constant 0 : index
    %6 = vector.load %arg6[%c0_4, %c0_5] : memref<1x128xf32, #tpu.memory_space<vmem>>, vector<1x128xf32>
    %7 = vector.broadcast %6 : vector<1x128xf32> to vector<128x128xf32>
    %8 = arith.addf %5, %7 : vector<128x128xf32>
    %cst_6 = arith.constant 0.000000e+00 : f32
    %9 = vector.broadcast %cst_6 : f32 to vector<128x128xf32>
    %10 = arith.cmpf ogt, %8, %9 : vector<128x128xf32>
    %cst_7 = arith.constant 0.00999999977 : f32
    %11 = vector.broadcast %cst_7 : f32 to vector<128x128xf32>
    %12 = arith.mulf %11, %8 : vector<128x128xf32>
    %13 = arith.select %10, %8, %12 : vector<128x128xi1>, vector<128x128xf32>
    %14 = arith.truncf %13 : vector<128x128xf32> to vector<128x128xbf16>
    %c0_8 = arith.constant 0 : index
    %c0_9 = arith.constant 0 : index
    %c0_10 = arith.constant 0 : index
    %15 = vector.load %arg8[%c0_8, %c0_9, %c0_10] : memref<1x128x128xbf16, #tpu.memory_space<vmem>>, vector<1x128x128xbf16>
    %16 = vector.shape_cast %15 : vector<1x128x128xbf16> to vector<128x128xbf16>
    %17 = vector.shape_cast %14 : vector<128x128xbf16> to vector<1x128x128xbf16>
    tpu.vector_store %arg8[%c0_8, %c0_9, %c0_10], %17 {strides = array<i32>} : memref<1x128x128xbf16, #tpu.memory_space<vmem>>, vector<1x128x128xbf16>,
    %c0_11 = arith.constant 0 : index
    %c0_12 = arith.constant 0 : index
    %18 = vector.load %arg7[%c0_11, %c0_12] : memref<128x8xbf16, #tpu.memory_space<vmem>>, vector<128x8xbf16>
    %cst_13 = arith.constant dense<0.000000e+00> : vector<128x8xf32>
    %19 = tpu.matmul %14, %18, %cst_13 {dimension_numbers = #tpu.dot_dimension_numbers<[1], [0], [0], [1], [0, 0, 1, 1], [], []>} : vector<128x128xbf16>, vector<128x8xbf16>, vector<128x8xf32> -> vector<128x8xf32>
    %20 = arith.mulf %13, %13 : vector<128x128xf32>
    %cst_14 = arith.constant dense<0.000000e+00> : vector<128xf32>
    %21 = vector.multi_reduction <add>, %20, %cst_14 [1] : vector<128x128xf32> to vector<128xf32>
    %22 = vector.shape_cast %21 : vector<128xf32> to vector<128x1xf32>
    %23 = tpu.iota {dimensions = array<i32: 1>} : vector<1x8xi32>
    %c3_i32 = arith.constant 3 : i32
    %24 = vector.broadcast %c3_i32 : i32 to vector<1x8xi32>
    %25 = arith.cmpi eq, %23, %24 : vector<1x8xi32>
    %26 = arith.extui %25 : vector<1x8xi1> to vector<1x8xi32>
    %27 = arith.sitofp %26 : vector<1x8xi32> to vector<1x8xf32>
    %c0_15 = arith.constant 0 : index
    %c0_16 = arith.constant 0 : index
    %28 = vector.load %arg11[%c0_15, %c0_16] : memref<128x8xf32, #tpu.memory_space<vmem>>, vector<128x8xf32>
    %29 = vector.broadcast %22 : vector<128x1xf32> to vector<128x8xf32>
    %30 = vector.broadcast %27 : vector<1x8xf32> to vector<128x8xf32>
    %31 = arith.mulf %29, %30 : vector<128x8xf32>
    %32 = arith.addf %19, %31 : vector<128x8xf32>
    %33 = arith.addf %28, %32 : vector<128x8xf32>
    %c0_17 = arith.constant 0 : index
    %c0_18 = arith.constant 0 : index
    %34 = vector.load %arg11[%c0_17, %c0_18] : memref<128x8xf32, #tpu.memory_space<vmem>>, vector<128x8xf32>
    tpu.vector_store %arg11[%c0_17, %c0_18], %33 {strides = array<i32>} : memref<128x8xf32, #tpu.memory_space<vmem>>, vector<128x8xf32>,
    %c1_i32 = arith.constant 1 : i32
    %35 = arith.cmpi eq, %arg1, %c1_i32 : i32
    %36 = arith.extui %35 : i1 to i32
    %c0_i32_19 = arith.constant 0 : i32
    %37 = arith.cmpi ne, %36, %c0_i32_19 : i32
    scf.if %37 {
      %c0_20 = arith.constant 0 : index
      %c0_21 = arith.constant 0 : index
      %38 = vector.load %arg11[%c0_20, %c0_21] : memref<128x8xf32, #tpu.memory_space<vmem>>, vector<128x8xf32>
      %c0_22 = arith.constant 0 : index
      %c0_23 = arith.constant 0 : index
      %c0_24 = arith.constant 0 : index
      %39 = vector.load %arg9[%c0_22, %c0_23, %c0_24] : memref<1x128x8xf32, #tpu.memory_space<vmem>>, vector<1x128x8xf32>
      %40 = vector.shape_cast %39 : vector<1x128x8xf32> to vector<128x8xf32>
      %41 = vector.shape_cast %38 : vector<128x8xf32> to vector<1x128x8xf32>
      tpu.vector_store %arg9[%c0_22, %c0_23, %c0_24], %41 {strides = array<i32>} : memref<1x128x8xf32, #tpu.memory_space<vmem>>, vector<1x128x8xf32>,
    } else {
    }
    return
  }
  func.func @transform_0(%arg0: i32, %arg1: i32) -> (i32, i32, i32) {
    %c0_i32 = arith.constant 0 : i32
    %c0_i32_0 = arith.constant 0 : i32
    %c0_i32_1 = arith.constant 0 : i32
    return %arg0, %c0_i32, %c0_i32_0 : i32, i32, i32
  }
  func.func @transform_1(%arg0: i32, %arg1: i32) -> (i32, i32) {
    %c0_i32 = arith.constant 0 : i32
    %c0_i32_0 = arith.constant 0 : i32
    %c0_i32_1 = arith.constant 0 : i32
    return %c0_i32, %c0_i32_0 : i32, i32
  }
  func.func @transform_2(%arg0: i32, %arg1: i32) -> (i32, i32) {
    %c0_i32 = arith.constant 0 : i32
    %c0_i32_0 = arith.constant 0 : i32
    %c0_i32_1 = arith.constant 0 : i32
    return %c0_i32, %c0_i32_0 : i32, i32
  }
  func.func @transform_3(%arg0: i32, %arg1: i32) -> (i32, i32) {
    %c0_i32 = arith.constant 0 : i32
    %c0_i32_0 = arith.constant 0 : i32
    return %c0_i32, %arg1 : i32, i32
  }
  func.func @transform_4(%arg0: i32, %arg1: i32) -> (i32, i32) {
    %c0_i32 = arith.constant 0 : i32
    %c0_i32_0 = arith.constant 0 : i32
    return %c0_i32, %arg1 : i32, i32
  }
  func.func @transform_5(%arg0: i32, %arg1: i32) -> (i32, i32) {
    %c0_i32 = arith.constant 0 : i32
    %c0_i32_0 = arith.constant 0 : i32
    return %arg1, %c0_i32 : i32, i32
  }
  func.func @transform_6(%arg0: i32, %arg1: i32) -> (i32, i32, i32) {
    %c0_i32 = arith.constant 0 : i32
    %c0_i32_0 = arith.constant 0 : i32
    return %arg0, %c0_i32, %arg1 : i32, i32, i32
  }
  func.func @transform_7(%arg0: i32, %arg1: i32) -> (i32, i32, i32) {
    %c0_i32 = arith.constant 0 : i32
    %c0_i32_0 = arith.constant 0 : i32
    %c0_i32_1 = arith.constant 0 : i32
    return %arg0, %c0_i32, %c0_i32_0 : i32, i32, i32
  }
}

module attributes {stable_mosaic.version = 11 : i64} {
  func.func @_branch_kernel(%arg0: i32, %arg1: i32, %arg2: memref<1x128x256xbf16, #tpu.memory_space<vmem>>, %arg3: memref<768x256xbf16, #tpu.memory_space<vmem>>, %arg4: memref<1x256xf32, #tpu.memory_space<vmem>>, %arg5: memref<768x128xbf16, #tpu.memory_space<vmem>>, %arg6: memref<1x128xf32, #tpu.memory_space<vmem>>, %arg7: memref<128x8xbf16, #tpu.memory_space<vmem>>, %arg8: memref<1x128x128xbf16, #tpu.memory_space<vmem>>, %arg9: memref<1x128x8xf32, #tpu.memory_space<vmem>>, %arg10: memref<128x768xbf16, #tpu.memory_space<vmem>>, %arg11: memref<128x8xf32, #tpu.memory_space<vmem>>) attributes {dimension_semantics = [#tpu.dimension_semantics<parallel>, #tpu.dimension_semantics<arbitrary>], iteration_bounds = array<i64: 2, 2>, scalar_prefetch = 0 : i64, scratch_operands = 2 : i64, tpu.core_type = #tpu.core_type<tc>, window_params = [{transform_indices = @transform_0, window_bounds = array<i64: 1, 128, 256>}, {pipeline_mode = #tpu.pipeline_mode<synchronous>, transform_indices = @transform_1, window_bounds = array<i64: 768, 256>}, {pipeline_mode = #tpu.pipeline_mode<synchronous>, transform_indices = @transform_2, window_bounds = array<i64: 1, 256>}, {transform_indices = @transform_3, window_bounds = array<i64: 768, 128>}, {transform_indices = @transform_4, window_bounds = array<i64: 1, 128>}, {transform_indices = @transform_5, window_bounds = array<i64: 128, 8>}, {transform_indices = @transform_6, window_bounds = array<i64: 1, 128, 128>}, {transform_indices = @transform_7, window_bounds = array<i64: 1, 128, 8>}]} {
    %c0_i32 = arith.constant 0 : i32
    %0 = arith.cmpi eq, %arg1, %c0_i32 : i32
    %1 = arith.extui %0 : i1 to i32
    %c0_i32_0 = arith.constant 0 : i32
    %2 = arith.cmpi ne, %1, %c0_i32_0 : i32
    scf.if %2 {
      %c0_20 = arith.constant 0 : index
      %c0_21 = arith.constant 0 : index
      %c0_22 = arith.constant 0 : index
      %38 = vector.load %arg2[%c0_20, %c0_21, %c0_22] : memref<1x128x256xbf16, #tpu.memory_space<vmem>>, vector<1x128x256xbf16>
      %39 = vector.shape_cast %38 : vector<1x128x256xbf16> to vector<128x256xbf16>
      %40 = arith.extf %39 : vector<128x256xbf16> to vector<128x256xf32>
      %41 = tpu.iota {dimensions = array<i32: 0>} : vector<128x256xi32>
      %c0_i32_23 = arith.constant 0 : i32
      %42 = vector.broadcast %c0_i32_23 : i32 to vector<128x256xi32>
      %43 = arith.cmpi eq, %41, %42 : vector<128x256xi32>
      %c1_i32_24 = arith.constant 1 : i32
      %44 = tpu.dynamic_rotate %40 by %c1_i32_24 dim 0 : vector<128x256xf32>, i32 -> vector<128x256xf32>
      %cst_25 = arith.constant 0.000000e+00 : f32
      %45 = vector.broadcast %cst_25 : f32 to vector<128x256xf32>
      %46 = arith.select %43, %45, %44 : vector<128x256xi1>, vector<128x256xf32>
      %c127_i32 = arith.constant 127 : i32
      %47 = vector.broadcast %c127_i32 : i32 to vector<128x256xi32>
      %48 = arith.cmpi eq, %41, %47 : vector<128x256xi32>
      %c127_i32_26 = arith.constant 127 : i32
      %49 = tpu.dynamic_rotate %40 by %c127_i32_26 dim 0 : vector<128x256xf32>, i32 -> vector<128x256xf32>
      %cst_27 = arith.constant 0.000000e+00 : f32
      %50 = vector.broadcast %cst_27 : f32 to vector<128x256xf32>
      %51 = arith.select %48, %50, %49 : vector<128x256xi1>, vector<128x256xf32>
      %52 = tpu.concatenate %46, %40, %51 in 1 : vector<128x256xf32>, vector<128x256xf32>, vector<128x256xf32> -> vector<128x768xf32>
      %53 = arith.truncf %52 : vector<128x768xf32> to vector<128x768xbf16>
      %c0_28 = arith.constant 0 : index
      %c0_29 = arith.constant 0 : index
      %54 = vector.load %arg3[%c0_28, %c0_29] : memref<768x256xbf16, #tpu.memory_space<vmem>>, vector<768x256xbf16>
      %cst_30 = arith.constant dense<0.000000e+00> : vector<128x256xf32>
      %55 = tpu.matmul %53, %54, %cst_30 {dimension_numbers = #tpu.dot_dimension_numbers<[1], [0], [0], [1], [0, 0, 1, 1], [], []>} : vector<128x768xbf16>, vector<768x256xbf16>, vector<128x256xf32> -> vector<128x256xf32>
      %c0_31 = arith.constant 0 : index
      %c0_32 = arith.constant 0 : index
      %56 = vector.load %arg4[%c0_31, %c0_32] : memref<1x256xf32, #tpu.memory_space<vmem>>, vector<1x256xf32>
      %57 = vector.broadcast %56 : vector<1x256xf32> to vector<128x256xf32>
      %58 = arith.addf %55, %57 : vector<128x256xf32>
      %cst_33 = arith.constant 0.000000e+00 : f32
      %59 = vector.broadcast %cst_33 : f32 to vector<128x256xf32>
      %60 = arith.cmpf ogt, %58, %59 : vector<128x256xf32>
      %cst_34 = arith.constant 0.00999999977 : f32
      %61 = vector.broadcast %cst_34 : f32 to vector<128x256xf32>
      %62 = arith.mulf %61, %58 : vector<128x256xf32>
      %63 = arith.select %60, %58, %62 : vector<128x256xi1>, vector<128x256xf32>
      %64 = tpu.iota {dimensions = array<i32: 0>} : vector<128x256xi32>
      %c0_i32_35 = arith.constant 0 : i32
      %65 = vector.broadcast %c0_i32_35 : i32 to vector<128x256xi32>
      %66 = arith.cmpi eq, %64, %65 : vector<128x256xi32>
      %c1_i32_36 = arith.constant 1 : i32
      %67 = tpu.dynamic_rotate %63 by %c1_i32_36 dim 0 : vector<128x256xf32>, i32 -> vector<128x256xf32>
      %cst_37 = arith.constant 0.000000e+00 : f32
      %68 = vector.broadcast %cst_37 : f32 to vector<128x256xf32>
      %69 = arith.select %66, %68, %67 : vector<128x256xi1>, vector<128x256xf32>
      %c127_i32_38 = arith.constant 127 : i32
      %70 = vector.broadcast %c127_i32_38 : i32 to vector<128x256xi32>
      %71 = arith.cmpi eq, %64, %70 : vector<128x256xi32>
      %c127_i32_39 = arith.constant 127 : i32
      %72 = tpu.dynamic_rotate %63 by %c127_i32_39 dim 0 : vector<128x256xf32>, i32 -> vector<128x256xf32>
      %cst_40 = arith.constant 0.000000e+00 : f32
      %73 = vector.broadcast %cst_40 : f32 to vector<128x256xf32>
      %74 = arith.select %71, %73, %72 : vector<128x256xi1>, vector<128x256xf32>
      %75 = tpu.concatenate %69, %63, %74 in 1 : vector<128x256xf32>, vector<128x256xf32>, vector<128x256xf32> -> vector<128x768xf32>
      %76 = arith.truncf %75 : vector<128x768xf32> to vector<128x768xbf16>
      %c0_41 = arith.constant 0 : index
      %c0_42 = arith.constant 0 : index
      %77 = vector.load %arg10[%c0_41, %c0_42] : memref<128x768xbf16, #tpu.memory_space<vmem>>, vector<128x768xbf16>
      tpu.vector_store %arg10[%c0_41, %c0_42], %76 {strides = array<i32>} : memref<128x768xbf16, #tpu.memory_space<vmem>>, vector<128x768xbf16>,
      %cst_43 = arith.constant 0.000000e+00 : f32
      %78 = vector.broadcast %cst_43 : f32 to vector<128x8xf32>
      %c0_44 = arith.constant 0 : index
      %c0_45 = arith.constant 0 : index
      %79 = vector.load %arg11[%c0_44, %c0_45] : memref<128x8xf32, #tpu.memory_space<vmem>>, vector<128x8xf32>
      tpu.vector_store %arg11[%c0_44, %c0_45], %78 {strides = array<i32>} : memref<128x8xf32, #tpu.memory_space<vmem>>, vector<128x8xf32>,
    } else {
    }
    %c0 = arith.constant 0 : index
    %c0_1 = arith.constant 0 : index
    %3 = vector.load %arg10[%c0, %c0_1] : memref<128x768xbf16, #tpu.memory_space<vmem>>, vector<128x768xbf16>
    %c0_2 = arith.constant 0 : index
    %c0_3 = arith.constant 0 : index
    %4 = vector.load %arg5[%c0_2, %c0_3] : memref<768x128xbf16, #tpu.memory_space<vmem>>, vector<768x128xbf16>
    %cst = arith.constant dense<0.000000e+00> : vector<128x128xf32>
    %5 = tpu.matmul %3, %4, %cst {dimension_numbers = #tpu.dot_dimension_numbers<[1], [0], [0], [1], [0, 0, 1, 1], [], []>} : vector<128x768xbf16>, vector<768x128xbf16>, vector<128x128xf32> -> vector<128x128xf32>
    %c0_4 = arith.constant 0 : index
    %c0_5 = arith.constant 0 : index
    %6 = vector.load %arg6[%c0_4, %c0_5] : memref<1x128xf32, #tpu.memory_space<vmem>>, vector<1x128xf32>
    %7 = vector.broadcast %6 : vector<1x128xf32> to vector<128x128xf32>
    %8 = arith.addf %5, %7 : vector<128x128xf32>
    %cst_6 = arith.constant 0.000000e+00 : f32
    %9 = vector.broadcast %cst_6 : f32 to vector<128x128xf32>
    %10 = arith.cmpf ogt, %8, %9 : vector<128x128xf32>
    %cst_7 = arith.constant 0.00999999977 : f32
    %11 = vector.broadcast %cst_7 : f32 to vector<128x128xf32>
    %12 = arith.mulf %11, %8 : vector<128x128xf32>
    %13 = arith.select %10, %8, %12 : vector<128x128xi1>, vector<128x128xf32>
    %14 = arith.truncf %13 : vector<128x128xf32> to vector<128x128xbf16>
    %c0_8 = arith.constant 0 : index
    %c0_9 = arith.constant 0 : index
    %c0_10 = arith.constant 0 : index
    %15 = vector.load %arg8[%c0_8, %c0_9, %c0_10] : memref<1x128x128xbf16, #tpu.memory_space<vmem>>, vector<1x128x128xbf16>
    %16 = vector.shape_cast %15 : vector<1x128x128xbf16> to vector<128x128xbf16>
    %17 = vector.shape_cast %14 : vector<128x128xbf16> to vector<1x128x128xbf16>
    tpu.vector_store %arg8[%c0_8, %c0_9, %c0_10], %17 {strides = array<i32>} : memref<1x128x128xbf16, #tpu.memory_space<vmem>>, vector<1x128x128xbf16>,
    %c0_11 = arith.constant 0 : index
    %c0_12 = arith.constant 0 : index
    %18 = vector.load %arg7[%c0_11, %c0_12] : memref<128x8xbf16, #tpu.memory_space<vmem>>, vector<128x8xbf16>
    %cst_13 = arith.constant dense<0.000000e+00> : vector<128x8xf32>
    %19 = tpu.matmul %14, %18, %cst_13 {dimension_numbers = #tpu.dot_dimension_numbers<[1], [0], [0], [1], [0, 0, 1, 1], [], []>} : vector<128x128xbf16>, vector<128x8xbf16>, vector<128x8xf32> -> vector<128x8xf32>
    %20 = arith.mulf %13, %13 : vector<128x128xf32>
    %cst_14 = arith.constant dense<0.000000e+00> : vector<128xf32>
    %21 = vector.multi_reduction <add>, %20, %cst_14 [1] : vector<128x128xf32> to vector<128xf32>
    %22 = vector.shape_cast %21 : vector<128xf32> to vector<128x1xf32>
    %23 = tpu.iota {dimensions = array<i32: 1>} : vector<1x8xi32>
    %c3_i32 = arith.constant 3 : i32
    %24 = vector.broadcast %c3_i32 : i32 to vector<1x8xi32>
    %25 = arith.cmpi eq, %23, %24 : vector<1x8xi32>
    %26 = arith.extui %25 : vector<1x8xi1> to vector<1x8xi32>
    %27 = arith.sitofp %26 : vector<1x8xi32> to vector<1x8xf32>
    %c0_15 = arith.constant 0 : index
    %c0_16 = arith.constant 0 : index
    %28 = vector.load %arg11[%c0_15, %c0_16] : memref<128x8xf32, #tpu.memory_space<vmem>>, vector<128x8xf32>
    %29 = vector.broadcast %22 : vector<128x1xf32> to vector<128x8xf32>
    %30 = vector.broadcast %27 : vector<1x8xf32> to vector<128x8xf32>
    %31 = arith.mulf %29, %30 : vector<128x8xf32>
    %32 = arith.addf %19, %31 : vector<128x8xf32>
    %33 = arith.addf %28, %32 : vector<128x8xf32>
    %c0_17 = arith.constant 0 : index
    %c0_18 = arith.constant 0 : index
    %34 = vector.load %arg11[%c0_17, %c0_18] : memref<128x8xf32, #tpu.memory_space<vmem>>, vector<128x8xf32>
    tpu.vector_store %arg11[%c0_17, %c0_18], %33 {strides = array<i32>} : memref<128x8xf32, #tpu.memory_space<vmem>>, vector<128x8xf32>,
    %c1_i32 = arith.constant 1 : i32
    %35 = arith.cmpi eq, %arg1, %c1_i32 : i32
    %36 = arith.extui %35 : i1 to i32
    %c0_i32_19 = arith.constant 0 : i32
    %37 = arith.cmpi ne, %36, %c0_i32_19 : i32
    scf.if %37 {
      %c0_20 = arith.constant 0 : index
      %c0_21 = arith.constant 0 : index
      %38 = vector.load %arg11[%c0_20, %c0_21] : memref<128x8xf32, #tpu.memory_space<vmem>>, vector<128x8xf32>
      %c0_22 = arith.constant 0 : index
      %c0_23 = arith.constant 0 : index
      %c0_24 = arith.constant 0 : index
      %39 = vector.load %arg9[%c0_22, %c0_23, %c0_24] : memref<1x128x8xf32, #tpu.memory_space<vmem>>, vector<1x128x8xf32>
      %40 = vector.shape_cast %39 : vector<1x128x8xf32> to vector<128x8xf32>
      %41 = vector.shape_cast %38 : vector<128x8xf32> to vector<1x128x8xf32>
      tpu.vector_store %arg9[%c0_22, %c0_23, %c0_24], %41 {strides = array<i32>} : memref<1x128x8xf32, #tpu.memory_space<vmem>>, vector<1x128x8xf32>,
    } else {
    }
    return
  }
  func.func @transform_0(%arg0: i32, %arg1: i32) -> (i32, i32, i32) {
    %c0_i32 = arith.constant 0 : i32
    %c0_i32_0 = arith.constant 0 : i32
    %c0_i32_1 = arith.constant 0 : i32
    return %arg0, %c0_i32, %c0_i32_0 : i32, i32, i32
  }
  func.func @transform_1(%arg0: i32, %arg1: i32) -> (i32, i32) {
    %c0_i32 = arith.constant 0 : i32
    %c0_i32_0 = arith.constant 0 : i32
    %c0_i32_1 = arith.constant 0 : i32
    return %c0_i32, %c0_i32_0 : i32, i32
  }
  func.func @transform_2(%arg0: i32, %arg1: i32) -> (i32, i32) {
    %c0_i32 = arith.constant 0 : i32
    %c0_i32_0 = arith.constant 0 : i32
    %c0_i32_1 = arith.constant 0 : i32
    return %c0_i32, %c0_i32_0 : i32, i32
  }
  func.func @transform_3(%arg0: i32, %arg1: i32) -> (i32, i32) {
    %c0_i32 = arith.constant 0 : i32
    %c0_i32_0 = arith.constant 0 : i32
    return %c0_i32, %arg1 : i32, i32
  }
  func.func @transform_4(%arg0: i32, %arg1: i32) -> (i32, i32) {
    %c0_i32 = arith.constant 0 : i32
    %c0_i32_0 = arith.constant 0 : i32
    return %c0_i32, %arg1 : i32, i32
  }
  func.func @transform_5(%arg0: i32, %arg1: i32) -> (i32, i32) {
    %c0_i32 = arith.constant 0 : i32
    %c0_i32_0 = arith.constant 0 : i32
    return %arg1, %c0_i32 : i32, i32
  }
  func.func @transform_6(%arg0: i32, %arg1: i32) -> (i32, i32, i32) {
    %c0_i32 = arith.constant 0 : i32
    %c0_i32_0 = arith.constant 0 : i32
    return %arg0, %c0_i32, %arg1 : i32, i32, i32
  }
  func.func @transform_7(%arg0: i32, %arg1: i32) -> (i32, i32, i32) {
    %c0_i32 = arith.constant 0 : i32
    %c0_i32_0 = arith.constant 0 : i32
    %c0_i32_1 = arith.constant 0 : i32
    return %arg0, %c0_i32, %c0_i32_0 : i32, i32, i32
  }
}

module attributes {stable_mosaic.version = 11 : i64} {
  func.func @_mix_kernel(%arg0: i32, %arg1: memref<1x128x256xbf16, #tpu.memory_space<vmem>>, %arg2: memref<1x128x256xbf16, #tpu.memory_space<vmem>>, %arg3: memref<1x128x1xf32, #tpu.memory_space<vmem>>, %arg4: memref<1x128x1xf32, #tpu.memory_space<vmem>>, %arg5: memref<256x2xbf16, #tpu.memory_space<vmem>>, %arg6: memref<256x2xbf16, #tpu.memory_space<vmem>>, %arg7: memref<1x2xf32, #tpu.memory_space<vmem>>, %arg8: memref<1x128x512xf32, #tpu.memory_space<vmem>>, %arg9: memref<1x1x2xf32, #tpu.memory_space<vmem>>) attributes {dimension_semantics = [#tpu.dimension_semantics<parallel>], iteration_bounds = array<i64: 2>, scalar_prefetch = 0 : i64, scratch_operands = 0 : i64, tpu.core_type = #tpu.core_type<tc>, window_params = [{transform_indices = @transform_0, window_bounds = array<i64: 1, 128, 256>}, {transform_indices = @transform_1, window_bounds = array<i64: 1, 128, 256>}, {transform_indices = @transform_2, window_bounds = array<i64: 1, 128, 1>}, {transform_indices = @transform_3, window_bounds = array<i64: 1, 128, 1>}, {pipeline_mode = #tpu.pipeline_mode<synchronous>, transform_indices = @transform_4, window_bounds = array<i64: 256, 2>}, {pipeline_mode = #tpu.pipeline_mode<synchronous>, transform_indices = @transform_5, window_bounds = array<i64: 256, 2>}, {pipeline_mode = #tpu.pipeline_mode<synchronous>, transform_indices = @transform_6, window_bounds = array<i64: 1, 2>}, {transform_indices = @transform_7, window_bounds = array<i64: 1, 128, 512>}, {transform_indices = @transform_8, window_bounds = array<i64: 1, 1, 2>}]} {
    %c0 = arith.constant 0 : index
    %c0_0 = arith.constant 0 : index
    %c0_1 = arith.constant 0 : index
    %0 = vector.load %arg1[%c0, %c0_0, %c0_1] : memref<1x128x256xbf16, #tpu.memory_space<vmem>>, vector<1x128x256xbf16>
    %1 = vector.shape_cast %0 : vector<1x128x256xbf16> to vector<128x256xbf16>
    %2 = arith.extf %1 : vector<128x256xbf16> to vector<128x256xf32>
    %c0_2 = arith.constant 0 : index
    %c0_3 = arith.constant 0 : index
    %c0_4 = arith.constant 0 : index
    %3 = vector.load %arg2[%c0_2, %c0_3, %c0_4] : memref<1x128x256xbf16, #tpu.memory_space<vmem>>, vector<1x128x256xbf16>
    %4 = vector.shape_cast %3 : vector<1x128x256xbf16> to vector<128x256xbf16>
    %5 = arith.extf %4 : vector<128x256xbf16> to vector<128x256xf32>
    %c0_5 = arith.constant 0 : index
    %c0_6 = arith.constant 0 : index
    %c0_7 = arith.constant 0 : index
    %6 = vector.load %arg3[%c0_5, %c0_6, %c0_7] : memref<1x128x1xf32, #tpu.memory_space<vmem>>, vector<1x128x1xf32>
    %7 = vector.shape_cast %6 : vector<1x128x1xf32> to vector<128x1xf32>
    %c0_8 = arith.constant 0 : index
    %c0_9 = arith.constant 0 : index
    %c0_10 = arith.constant 0 : index
    %8 = vector.load %arg4[%c0_8, %c0_9, %c0_10] : memref<1x128x1xf32, #tpu.memory_space<vmem>>, vector<1x128x1xf32>
    %9 = vector.shape_cast %8 : vector<1x128x1xf32> to vector<128x1xf32>
    %10 = vector.broadcast %7 : vector<128x1xf32> to vector<128x256xf32>
    %11 = arith.mulf %2, %10 : vector<128x256xf32>
    %cst = arith.constant dense<0.000000e+00> : vector<256xf32>
    %12 = vector.multi_reduction <add>, %11, %cst [0] : vector<128x256xf32> to vector<256xf32>
    %13 = vector.shape_cast %12 : vector<256xf32> to vector<1x256xf32>
    %14 = vector.broadcast %7 : vector<128x1xf32> to vector<128x256xf32>
    %15 = arith.mulf %5, %14 : vector<128x256xf32>
    %cst_11 = arith.constant dense<0.000000e+00> : vector<256xf32>
    %16 = vector.multi_reduction <add>, %15, %cst_11 [0] : vector<128x256xf32> to vector<256xf32>
    %17 = vector.shape_cast %16 : vector<256xf32> to vector<1x256xf32>
    %18 = arith.truncf %13 : vector<1x256xf32> to vector<1x256xbf16>
    %c0_12 = arith.constant 0 : index
    %c0_13 = arith.constant 0 : index
    %19 = vector.load %arg5[%c0_12, %c0_13] : memref<256x2xbf16, #tpu.memory_space<vmem>>, vector<256x2xbf16>
    %cst_14 = arith.constant dense<0.000000e+00> : vector<1x2xf32>
    %20 = tpu.matmul %18, %19, %cst_14 {dimension_numbers = #tpu.dot_dimension_numbers<[1], [0], [0], [1], [0, 0, 1, 1], [], []>} : vector<1x256xbf16>, vector<256x2xbf16>, vector<1x2xf32> -> vector<1x2xf32>
    %21 = arith.truncf %17 : vector<1x256xf32> to vector<1x256xbf16>
    %c0_15 = arith.constant 0 : index
    %c0_16 = arith.constant 0 : index
    %22 = vector.load %arg6[%c0_15, %c0_16] : memref<256x2xbf16, #tpu.memory_space<vmem>>, vector<256x2xbf16>
    %cst_17 = arith.constant dense<0.000000e+00> : vector<1x2xf32>
    %23 = tpu.matmul %21, %22, %cst_17 {dimension_numbers = #tpu.dot_dimension_numbers<[1], [0], [0], [1], [0, 0, 1, 1], [], []>} : vector<1x256xbf16>, vector<256x2xbf16>, vector<1x2xf32> -> vector<1x2xf32>
    %24 = arith.addf %20, %23 : vector<1x2xf32>
    %c0_18 = arith.constant 0 : index
    %c0_19 = arith.constant 0 : index
    %25 = vector.load %arg7[%c0_18, %c0_19] : memref<1x2xf32, #tpu.memory_space<vmem>>, vector<1x2xf32>
    %26 = arith.addf %24, %25 : vector<1x2xf32>
    %cst_20 = arith.constant dense<0xFF800000> : vector<1xf32>
    %27 = vector.multi_reduction <maximumf>, %26, %cst_20 [1] : vector<1x2xf32> to vector<1xf32>
    %28 = vector.shape_cast %27 : vector<1xf32> to vector<1x1xf32>
    %29 = vector.broadcast %28 : vector<1x1xf32> to vector<1x2xf32>
    %30 = arith.subf %26, %29 : vector<1x2xf32>
    %31 = math.exp %30 : vector<1x2xf32>
    %cst_21 = arith.constant dense<0.000000e+00> : vector<1xf32>
    %32 = vector.multi_reduction <add>, %31, %cst_21 [1] : vector<1x2xf32> to vector<1xf32>
    %33 = vector.shape_cast %32 : vector<1xf32> to vector<1x1xf32>
    %34 = vector.broadcast %33 : vector<1x1xf32> to vector<1x2xf32>
    %35 = arith.divf %31, %34 : vector<1x2xf32>
    %c0_22 = arith.constant 0 : index
    %c0_23 = arith.constant 0 : index
    %c0_24 = arith.constant 0 : index
    %36 = vector.load %arg9[%c0_22, %c0_23, %c0_24] : memref<1x1x2xf32, #tpu.memory_space<vmem>>, vector<1x1x2xf32>
    %37 = vector.shape_cast %36 : vector<1x1x2xf32> to vector<1x2xf32>
    %38 = vector.shape_cast %35 : vector<1x2xf32> to vector<1x1x2xf32>
    tpu.vector_store %arg9[%c0_22, %c0_23, %c0_24], %38 {strides = array<i32>} : memref<1x1x2xf32, #tpu.memory_space<vmem>>, vector<1x1x2xf32>,
    %39 = vector.extract_strided_slice %35 {offsets = [0, 0], sizes = [1, 1], strides = [1, 1]} : vector<1x2xf32> to vector<1x1xf32>
    %40 = vector.broadcast %39 : vector<1x1xf32> to vector<128x1xf32>
    %41 = arith.mulf %9, %40 : vector<128x1xf32>
    %42 = vector.extract_strided_slice %35 {offsets = [0, 1], sizes = [1, 1], strides = [1, 1]} : vector<1x2xf32> to vector<1x1xf32>
    %43 = vector.broadcast %42 : vector<1x1xf32> to vector<128x1xf32>
    %44 = arith.mulf %9, %43 : vector<128x1xf32>
    %45 = vector.broadcast %41 : vector<128x1xf32> to vector<128x256xf32>
    %46 = arith.mulf %2, %45 : vector<128x256xf32>
    %c0_25 = arith.constant 0 : index
    %c0_26 = arith.constant 0 : index
    %c0_27 = arith.constant 0 : index
    %47 = vector.load %arg8[%c0_25, %c0_26, %c0_27] : memref<1x128x512xf32, #tpu.memory_space<vmem>>, vector<1x128x256xf32>
    %48 = vector.shape_cast %47 : vector<1x128x256xf32> to vector<128x256xf32>
    %49 = vector.shape_cast %46 : vector<128x256xf32> to vector<1x128x256xf32>
    tpu.vector_store %arg8[%c0_25, %c0_26, %c0_27], %49 {strides = array<i32>} : memref<1x128x512xf32, #tpu.memory_space<vmem>>, vector<1x128x256xf32>,
    %50 = vector.broadcast %44 : vector<128x1xf32> to vector<128x256xf32>
    %51 = arith.mulf %5, %50 : vector<128x256xf32>
    %c0_28 = arith.constant 0 : index
    %c0_29 = arith.constant 0 : index
    %c256 = arith.constant 256 : index
    %52 = vector.load %arg8[%c0_28, %c0_29, %c256] : memref<1x128x512xf32, #tpu.memory_space<vmem>>, vector<1x128x256xf32>
    %53 = vector.shape_cast %52 : vector<1x128x256xf32> to vector<128x256xf32>
    %54 = vector.shape_cast %51 : vector<128x256xf32> to vector<1x128x256xf32>
    tpu.vector_store %arg8[%c0_28, %c0_29, %c256], %54 {strides = array<i32>} : memref<1x128x512xf32, #tpu.memory_space<vmem>>, vector<1x128x256xf32>,
    return
  }
  func.func @transform_0(%arg0: i32) -> (i32, i32, i32) {
    %c0_i32 = arith.constant 0 : i32
    %c0_i32_0 = arith.constant 0 : i32
    %c0_i32_1 = arith.constant 0 : i32
    return %arg0, %c0_i32, %c0_i32_0 : i32, i32, i32
  }
  func.func @transform_1(%arg0: i32) -> (i32, i32, i32) {
    %c0_i32 = arith.constant 0 : i32
    %c0_i32_0 = arith.constant 0 : i32
    %c0_i32_1 = arith.constant 0 : i32
    return %arg0, %c0_i32, %c0_i32_0 : i32, i32, i32
  }
  func.func @transform_2(%arg0: i32) -> (i32, i32, i32) {
    %c0_i32 = arith.constant 0 : i32
    %c0_i32_0 = arith.constant 0 : i32
    %c0_i32_1 = arith.constant 0 : i32
    return %arg0, %c0_i32, %c0_i32_0 : i32, i32, i32
  }
  func.func @transform_3(%arg0: i32) -> (i32, i32, i32) {
    %c0_i32 = arith.constant 0 : i32
    %c0_i32_0 = arith.constant 0 : i32
    %c0_i32_1 = arith.constant 0 : i32
    return %arg0, %c0_i32, %c0_i32_0 : i32, i32, i32
  }
  func.func @transform_4(%arg0: i32) -> (i32, i32) {
    %c0_i32 = arith.constant 0 : i32
    %c0_i32_0 = arith.constant 0 : i32
    %c0_i32_1 = arith.constant 0 : i32
    return %c0_i32, %c0_i32_0 : i32, i32
  }
  func.func @transform_5(%arg0: i32) -> (i32, i32) {
    %c0_i32 = arith.constant 0 : i32
    %c0_i32_0 = arith.constant 0 : i32
    %c0_i32_1 = arith.constant 0 : i32
    return %c0_i32, %c0_i32_0 : i32, i32
  }
  func.func @transform_6(%arg0: i32) -> (i32, i32) {
    %c0_i32 = arith.constant 0 : i32
    %c0_i32_0 = arith.constant 0 : i32
    %c0_i32_1 = arith.constant 0 : i32
    return %c0_i32, %c0_i32_0 : i32, i32
  }
  func.func @transform_7(%arg0: i32) -> (i32, i32, i32) {
    %c0_i32 = arith.constant 0 : i32
    %c0_i32_0 = arith.constant 0 : i32
    %c0_i32_1 = arith.constant 0 : i32
    return %arg0, %c0_i32, %c0_i32_0 : i32, i32, i32
  }
  func.func @transform_8(%arg0: i32) -> (i32, i32, i32) {
    %c0_i32 = arith.constant 0 : i32
    %c0_i32_0 = arith.constant 0 : i32
    %c0_i32_1 = arith.constant 0 : i32
    return %arg0, %c0_i32, %c0_i32_0 : i32, i32, i32
  }
}

</mosaic_0001>

<bundles_post_ra>
// kernel: network_forward.4
= control target key start
LH: loop header
LB: loop body
LE: loop exit
PB: predicated region body
PF: predicated region fallthrough
CT: control target
= control target key end

     0   :  { %s7393_s0 = inlined_call_operand.vmem [shape: bf16[2,128,256], index: 0, kind: input, shape index: {}]   ;;  %s7394_s1 = inlined_call_operand.vmem [shape: bf16[768,256], index: 1, kind: input, shape index: {}]   ;;  %s7395_s2 = inlined_call_operand.vmem [shape: f32[1,256], index: 2, kind: input, shape index: {}]   ;;  %s7396_s3 = inlined_call_operand.vmem [shape: bf16[768,256], index: 3, kind: input, shape index: {}]   ;;  %s7397_s4 = inlined_call_operand.vmem [shape: f32[1,256], index: 4, kind: input, shape index: {}]   ;;  %s7398_s5 = inlined_call_operand.vmem [shape: bf16[256,8], index: 5, kind: input, shape index: {}]   ;;  %s7399_s6 = inlined_call_operand.vmem [shape: bf16[2,128,256], index: 6, kind: output, shape index: {0}]   ;;  %s7400_s7 = inlined_call_operand.vmem [shape: f32[2,128,8], index: 7, kind: output, shape index: {1}]  }
   0x1   :  { %7417 = sst [smem:[#allocation13_spill]] %s7396_s3 }
   0x2   :  { %s5520_s24 = smov 0   ;;  %s5522_s25 = smov 0  }
   0x3   :  { %s5524_s26 = smov 0   ;;  %s5526_s27 = smov 0  }
   0x4   :  { %s5528_s28 = smov 0   ;;  %s5530_s29 = smov 0  }
   0x5   :  { %s5532_s30 = smov 0   ;;  %s5534_s8 = smov 0  }
   0x6   :  { %s5536_s9 = smov 0  }
   0x7 LB: > { %7418 = sst [smem:[#allocation6_spill]] %s5455_s27  ;;  %s4352_s10 = sadd.s32 4294967295, %s5475_s9   ;;  %s5475_s9 = sphi %s5536_s9, %s18_s9   ;;  %s5471_s8 = sphi %s5534_s8, %s7451_s8   ;;  %s5467_s30 = sphi %s5532_s30, %s7450_s30   ;;  %s5463_s29 = sphi %s5530_s29, %s7449_s29   ;;  %s5459_s28 = sphi %s5528_s28, %s7448_s28   ;;  %s5455_s27 = sphi %s5526_s27, %s7447_s27   ;;  %s5451_s26 = sphi %s5524_s26, %s7446_s26   ;;  %s5447_s25 = sphi %s5522_s25, %s7453_s25   ;;  %s5443_s24 = sphi %s5520_s24, %s7452_s24  }
   0x8   : > { %7419 = sst [smem:[#allocation7_spill]] %s5467_s30  ;;  %s27_s11 = sadd.s32 1, %s5467_s30 }
   0x9   : > { %7420 = sst [smem:[#allocation8_spill]] %s5471_s8  ;;  %p28_p0 = scmp.ge.s32.totalorder %s27_s11, 2 }
   0xa   : > { %s30_s12 = sadd.s32 1, %s5471_s8  ;;  %s105_s13 = sadd.s32 1, %s5455_s27 }
   0xb   : > { %p112_p1 = scmp.ne.s32.totalorder %s5455_s27, %s5451_s26  ;;  %s7455_s11 = smov (%p28_p0, %s27_s11), 0 }
   0xc   : > { %7421 = sst [smem:[#allocation9_spill]] %s7455_s11  ;;  %s7457_s12 = smov (!%p28_p0, %s30_s12), %s5471_s8 }
   0xd   : > { %s102_s14 = ssub.s32 %s5467_s30, %s7455_s11  ;;  %p113_p2 = scmp.eq.s32.totalorder %s5475_s9, 0 }
   0xe   : > { %p32_p3 = scmp.ge.s32.totalorder %s7457_s12, 2  ;;  %p103_p4 = scmp.eq.s32.totalorder %s102_s14, 0 }
   0xf   : > { %p114_p5 = por %p113_p2, %p112_p1  ;;  %s185_s15 = sadd.s32 1, %s5447_s25 }
  0x10   : > { %s7459_s12 = smov (%p32_p3, %s7457_s12), 0  ;;  %p195_p6 = scmp.ne.s32.totalorder %s5447_s25, %s5443_s24 }
  0x11   : > { %7422 = sst [smem:[#allocation10_spill]] %s7459_s12  ;;  %s180_s17 = ssub.s32 %s5471_s8, %s7459_s12 }
  0x12   : > { %s5581_s16 = scalar_select %p103_p4, %s5455_s27, %s105_s13  }
  0x13   : > { %s182_s18 = sor.u32 %s180_s17, %s102_s14  ;;  %p196_p7 = scmp.eq.s32.totalorder %s4352_s10, 3 }
  0x14   : > { %7423 = sst [smem:[#allocation11_spill]] %s5581_s16  ;;  %p183_p8 = scmp.eq.s32.totalorder %s182_s18, 0 }
  0x15   : > { %p5587_p9 = por %p196_p7, %p195_p6  ;;  %p4355_p10 = scmp.ge.s32.totalorder %s5475_s9, 4 }
  0x16   : > { %s5592_s20 = scalar_select %p183_p8, %s5447_s25, %s185_s15  }
  0x17   : > { %250 = sbr.rel (%p4355_p10) target bundleno = 102 (0x66), region = 24 }
  0x1c   : > { %261 = sbr.rel (!%p114_p5) target bundleno = 102 (0x66), region = 32  ;;  %s263_s21 = sand.u32 (%p114_p5), 1, %s5455_s27  }
  0x1d   : > { %s4356_s22 = sshll.u32 (%p114_p5), %s5467_s30, 2  ;;  %s5055_s23 = smul.u32 (%p114_p5), 384, %s263_s21 }
  0x1e   : > { %s7425_s3 = sld [smem:[#allocation13_spill]] (%p114_p5) }
  0x1f   : > { %s5607_s14 = scalar_lea.vmem (%p114_p5), [#allocation4], %s5055_s23 }
  0x24   : > { %s5600_s10 = scalar_lea.vmem %s7425_s3, %s4356_s22 }
  0x25   : > { %v284_v0 = vld [vmem:[%s5600_s10] sm:$0xf]  ;;  %v286_v1 = vld [vmem:[%s5600_s10 + $0x8] sm:$0xf]  ;;  %v288_v2 = vld [vmem:[%s5600_s10 + $0x10] sm:$0xf] }
  0x26   : > { %v290_v3 = vld [vmem:[%s5600_s10 + $0x18] sm:$0xf]  ;;  %v292_v4 = vld [vmem:[%s5600_s10 + $0x20] sm:$0xf]  ;;  %285 = vst [vmem:[%s5607_s14] sm:$0xf] %v284_v0 }
  0x27   : > { %287 = vst [vmem:[%s5607_s14 + $0x4] sm:$0xf] %v286_v1  ;;  %289 = vst [vmem:[%s5607_s14 + $0x8] sm:$0xf] %v288_v2  ;;  %v294_v5 = vld [vmem:[%s5600_s10 + $0x28] sm:$0xf] }
  0x28   : > { %291 = vst [vmem:[%s5607_s14 + $0xc] sm:$0xf] %v290_v3  ;;  %293 = vst [vmem:[%s5607_s14 + $0x10] sm:$0xf] %v292_v4  ;;  %v296_v6 = vld [vmem:[%s5600_s10 + $0x30] sm:$0xf] }
  0x29   : > { %v298_v7 = vld [vmem:[%s5600_s10 + $0x38] sm:$0xf]  ;;  %295 = vst [vmem:[%s5607_s14 + $0x14] sm:$0xf] %v294_v5  ;;  %297 = vst [vmem:[%s5607_s14 + $0x18] sm:$0xf] %v296_v6 }
  0x2a   : > { %299 = vst [vmem:[%s5607_s14 + $0x1c] sm:$0xf] %v298_v7  ;;  %v300_v8 = vld [vmem:[%s5600_s10 + $0x40] sm:$0xf]  ;;  %v302_v9 = vld [vmem:[%s5600_s10 + $0x48] sm:$0xf] }
  0x2b   : > { %v304_v10 = vld [vmem:[%s5600_s10 + $0x50] sm:$0xf]  ;;  %301 = vst [vmem:[%s5607_s14 + $0x20] sm:$0xf] %v300_v8  ;;  %303 = vst [vmem:[%s5607_s14 + $0x24] sm:$0xf] %v302_v9 }
  0x2c   : > { %305 = vst [vmem:[%s5607_s14 + $0x28] sm:$0xf] %v304_v10  ;;  %v306_v11 = vld [vmem:[%s5600_s10 + $0x58] sm:$0xf]  ;;  %v308_v12 = vld [vmem:[%s5600_s10 + $0x60] sm:$0xf] }
  0x2d   : > { %v310_v13 = vld [vmem:[%s5600_s10 + $0x68] sm:$0xf]  ;;  %307 = vst [vmem:[%s5607_s14 + $0x2c] sm:$0xf] %v306_v11  ;;  %309 = vst [vmem:[%s5607_s14 + $0x30] sm:$0xf] %v308_v12 }
  0x2e   : > { %311 = vst [vmem:[%s5607_s14 + $0x34] sm:$0xf] %v310_v13  ;;  %v312_v14 = vld [vmem:[%s5600_s10 + $0x70] sm:$0xf]  ;;  %v314_v15 = vld [vmem:[%s5600_s10 + $0x78] sm:$0xf] }
  0x2f   : > { %v316_v16 = vld [vmem:[%s5600_s10 + $0x80] sm:$0xf]  ;;  %313 = vst [vmem:[%s5607_s14 + $0x38] sm:$0xf] %v312_v14  ;;  %315 = vst [vmem:[%s5607_s14 + $0x3c] sm:$0xf] %v314_v15 }
  0x30   : > { %317 = vst [vmem:[%s5607_s14 + $0x40] sm:$0xf] %v316_v16  ;;  %v318_v17 = vld [vmem:[%s5600_s10 + $0x88] sm:$0xf]  ;;  %v320_v18 = vld [vmem:[%s5600_s10 + $0x90] sm:$0xf] }
  0x31   : > { %v322_v19 = vld [vmem:[%s5600_s10 + $0x98] sm:$0xf]  ;;  %319 = vst [vmem:[%s5607_s14 + $0x44] sm:$0xf] %v318_v17  ;;  %321 = vst [vmem:[%s5607_s14 + $0x48] sm:$0xf] %v320_v18 }
  0x32   : > { %323 = vst [vmem:[%s5607_s14 + $0x4c] sm:$0xf] %v322_v19  ;;  %v324_v20 = vld [vmem:[%s5600_s10 + $0xa0] sm:$0xf]  ;;  %v326_v21 = vld [vmem:[%s5600_s10 + $0xa8] sm:$0xf] }
  0x33   : > { %v328_v22 = vld [vmem:[%s5600_s10 + $0xb0] sm:$0xf]  ;;  %325 = vst [vmem:[%s5607_s14 + $0x50] sm:$0xf] %v324_v20  ;;  %327 = vst [vmem:[%s5607_s14 + $0x54] sm:$0xf] %v326_v21 }
  0x34   : > { %329 = vst [vmem:[%s5607_s14 + $0x58] sm:$0xf] %v328_v22  ;;  %v330_v23 = vld [vmem:[%s5600_s10 + $0xb8] sm:$0xf]  ;;  %v332_v24 = vld [vmem:[%s5600_s10 + $0xc0] sm:$0xf] }
  0x35   : > { %v334_v25 = vld [vmem:[%s5600_s10 + $0xc8] sm:$0xf]  ;;  %331 = vst [vmem:[%s5607_s14 + $0x5c] sm:$0xf] %v330_v23  ;;  %333 = vst [vmem:[%s5607_s14 + $0x60] sm:$0xf] %v332_v24 }
  0x36   : > { %335 = vst [vmem:[%s5607_s14 + $0x64] sm:$0xf] %v334_v25  ;;  %v336_v26 = vld [vmem:[%s5600_s10 + $0xd0] sm:$0xf]  ;;  %v338_v27 = vld [vmem:[%s5600_s10 + $0xd8] sm:$0xf] }
  0x37   : > { %v340_v28 = vld [vmem:[%s5600_s10 + $0xe0] sm:$0xf]  ;;  %337 = vst [vmem:[%s5607_s14 + $0x68] sm:$0xf] %v336_v26  ;;  %339 = vst [vmem:[%s5607_s14 + $0x6c] sm:$0xf] %v338_v27 }
  0x38   : > { %341 = vst [vmem:[%s5607_s14 + $0x70] sm:$0xf] %v340_v28  ;;  %v342_v29 = vld [vmem:[%s5600_s10 + $0xe8] sm:$0xf]  ;;  %v344_v30 = vld [vmem:[%s5600_s10 + $0xf0] sm:$0xf] }
  0x39   : > { %v346_v31 = vld [vmem:[%s5600_s10 + $0xf8] sm:$0xf]  ;;  %343 = vst [vmem:[%s5607_s14 + $0x74] sm:$0xf] %v342_v29  ;;  %345 = vst [vmem:[%s5607_s14 + $0x78] sm:$0xf] %v344_v30 }
  0x3a   : > { %347 = vst [vmem:[%s5607_s14 + $0x7c] sm:$0xf] %v346_v31  ;;  %v348_v32 = vld [vmem:[%s5600_s10 + $0x100] sm:$0xf]  ;;  %v350_v33 = vld [vmem:[%s5600_s10 + $0x108] sm:$0xf] }
  0x3b   : > { %v352_v34 = vld [vmem:[%s5600_s10 + $0x110] sm:$0xf]  ;;  %349 = vst [vmem:[%s5607_s14 + $0x80] sm:$0xf] %v348_v32  ;;  %351 = vst [vmem:[%s5607_s14 + $0x84] sm:$0xf] %v350_v33 }
  0x3c   : > { %353 = vst [vmem:[%s5607_s14 + $0x88] sm:$0xf] %v352_v34  ;;  %v354_v35 = vld [vmem:[%s5600_s10 + $0x118] sm:$0xf]  ;;  %v356_v36 = vld [vmem:[%s5600_s10 + $0x120] sm:$0xf] }
  0x3d   : > { %v358_v37 = vld [vmem:[%s5600_s10 + $0x128] sm:$0xf]  ;;  %355 = vst [vmem:[%s5607_s14 + $0x8c] sm:$0xf] %v354_v35  ;;  %357 = vst [vmem:[%s5607_s14 + $0x90] sm:$0xf] %v356_v36 }
  0x3e   : > { %359 = vst [vmem:[%s5607_s14 + $0x94] sm:$0xf] %v358_v37  ;;  %v360_v38 = vld [vmem:[%s5600_s10 + $0x130] sm:$0xf]  ;;  %v362_v39 = vld [vmem:[%s5600_s10 + $0x138] sm:$0xf] }
  0x3f   : > { %v364_v40 = vld [vmem:[%s5600_s10 + $0x140] sm:$0xf]  ;;  %361 = vst [vmem:[%s5607_s14 + $0x98] sm:$0xf] %v360_v38  ;;  %363 = vst [vmem:[%s5607_s14 + $0x9c] sm:$0xf] %v362_v39 }
  0x40   : > { %365 = vst [vmem:[%s5607_s14 + $0xa0] sm:$0xf] %v364_v40  ;;  %v366_v41 = vld [vmem:[%s5600_s10 + $0x148] sm:$0xf]  ;;  %v368_v42 = vld [vmem:[%s5600_s10 + $0x150] sm:$0xf] }
  0x41   : > { %v370_v43 = vld [vmem:[%s5600_s10 + $0x158] sm:$0xf]  ;;  %367 = vst [vmem:[%s5607_s14 + $0xa4] sm:$0xf] %v366_v41  ;;  %369 = vst [vmem:[%s5607_s14 + $0xa8] sm:$0xf] %v368_v42 }
  0x42   : > { %371 = vst [vmem:[%s5607_s14 + $0xac] sm:$0xf] %v370_v43  ;;  %v372_v44 = vld [vmem:[%s5600_s10 + $0x160] sm:$0xf]  ;;  %v374_v45 = vld [vmem:[%s5600_s10 + $0x168] sm:$0xf] }
  0x43   : > { %v376_v46 = vld [vmem:[%s5600_s10 + $0x170] sm:$0xf]  ;;  %373 = vst [vmem:[%s5607_s14 + $0xb0] sm:$0xf] %v372_v44  ;;  %375 = vst [vmem:[%s5607_s14 + $0xb4] sm:$0xf] %v374_v45 }
  0x44   : > { %377 = vst [vmem:[%s5607_s14 + $0xb8] sm:$0xf] %v376_v46  ;;  %v378_v47 = vld [vmem:[%s5600_s10 + $0x178] sm:$0xf]  ;;  %v380_v48 = vld [vmem:[%s5600_s10 + $0x180] sm:$0xf] }
  0x45   : > { %v382_v49 = vld [vmem:[%s5600_s10 + $0x188] sm:$0xf]  ;;  %379 = vst [vmem:[%s5607_s14 + $0xbc] sm:$0xf] %v378_v47  ;;  %381 = vst [vmem:[%s5607_s14 + $0xc0] sm:$0xf] %v380_v48 }
  0x46   : > { %383 = vst [vmem:[%s5607_s14 + $0xc4] sm:$0xf] %v382_v49  ;;  %v384_v50 = vld [vmem:[%s5600_s10 + $0x190] sm:$0xf]  ;;  %v386_v51 = vld [vmem:[%s5600_s10 + $0x198] sm:$0xf] }
  0x47   : > { %v388_v52 = vld [vmem:[%s5600_s10 + $0x1a0] sm:$0xf]  ;;  %385 = vst [vmem:[%s5607_s14 + $0xc8] sm:$0xf] %v384_v50  ;;  %387 = vst [vmem:[%s5607_s14 + $0xcc] sm:$0xf] %v386_v51 }
  0x48   : > { %389 = vst [vmem:[%s5607_s14 + $0xd0] sm:$0xf] %v388_v52  ;;  %v390_v53 = vld [vmem:[%s5600_s10 + $0x1a8] sm:$0xf]  ;;  %v392_v54 = vld [vmem:[%s5600_s10 + $0x1b0] sm:$0xf] }
  0x49   : > { %v394_v55 = vld [vmem:[%s5600_s10 + $0x1b8] sm:$0xf]  ;;  %391 = vst [vmem:[%s5607_s14 + $0xd4] sm:$0xf] %v390_v53  ;;  %393 = vst [vmem:[%s5607_s14 + $0xd8] sm:$0xf] %v392_v54 }
  0x4a   : > { %395 = vst [vmem:[%s5607_s14 + $0xdc] sm:$0xf] %v394_v55  ;;  %v396_v56 = vld [vmem:[%s5600_s10 + $0x1c0] sm:$0xf]  ;;  %v398_v57 = vld [vmem:[%s5600_s10 + $0x1c8] sm:$0xf] }
  0x4b   : > { %v400_v58 = vld [vmem:[%s5600_s10 + $0x1d0] sm:$0xf]  ;;  %397 = vst [vmem:[%s5607_s14 + $0xe0] sm:$0xf] %v396_v56  ;;  %399 = vst [vmem:[%s5607_s14 + $0xe4] sm:$0xf] %v398_v57 }
  0x4c   : > { %401 = vst [vmem:[%s5607_s14 + $0xe8] sm:$0xf] %v400_v58  ;;  %v402_v59 = vld [vmem:[%s5600_s10 + $0x1d8] sm:$0xf]  ;;  %v404_v60 = vld [vmem:[%s5600_s10 + $0x1e0] sm:$0xf] }
  0x4d   : > { %v406_v61 = vld [vmem:[%s5600_s10 + $0x1e8] sm:$0xf]  ;;  %403 = vst [vmem:[%s5607_s14 + $0xec] sm:$0xf] %v402_v59  ;;  %405 = vst [vmem:[%s5607_s14 + $0xf0] sm:$0xf] %v404_v60 }
  0x4e   : > { %407 = vst [vmem:[%s5607_s14 + $0xf4] sm:$0xf] %v406_v61  ;;  %v408_v62 = vld [vmem:[%s5600_s10 + $0x1f0] sm:$0xf]  ;;  %v410_v63 = vld [vmem:[%s5600_s10 + $0x1f8] sm:$0xf] }
  0x4f   : > { %v412_v0 = vld [vmem:[%s5600_s10 + $0x200] sm:$0xf]  ;;  %409 = vst [vmem:[%s5607_s14 + $0xf8] sm:$0xf] %v408_v62  ;;  %411 = vst [vmem:[%s5607_s14 + $0xfc] sm:$0xf] %v410_v63 }
  0x50   : > { %413 = vst [vmem:[%s5607_s14 + $0x100] sm:$0xf] %v412_v0  ;;  %v414_v1 = vld [vmem:[%s5600_s10 + $0x208] sm:$0xf]  ;;  %v416_v2 = vld [vmem:[%s5600_s10 + $0x210] sm:$0xf] }
  0x51   : > { %v418_v3 = vld [vmem:[%s5600_s10 + $0x218] sm:$0xf]  ;;  %415 = vst [vmem:[%s5607_s14 + $0x104] sm:$0xf] %v414_v1  ;;  %417 = vst [vmem:[%s5607_s14 + $0x108] sm:$0xf] %v416_v2 }
  0x52   : > { %419 = vst [vmem:[%s5607_s14 + $0x10c] sm:$0xf] %v418_v3  ;;  %v420_v4 = vld [vmem:[%s5600_s10 + $0x220] sm:$0xf]  ;;  %v422_v5 = vld [vmem:[%s5600_s10 + $0x228] sm:$0xf] }
  0x53   : > { %v424_v6 = vld [vmem:[%s5600_s10 + $0x230] sm:$0xf]  ;;  %421 = vst [vmem:[%s5607_s14 + $0x110] sm:$0xf] %v420_v4  ;;  %423 = vst [vmem:[%s5607_s14 + $0x114] sm:$0xf] %v422_v5 }
  0x54   : > { %425 = vst [vmem:[%s5607_s14 + $0x118] sm:$0xf] %v424_v6  ;;  %v426_v7 = vld [vmem:[%s5600_s10 + $0x238] sm:$0xf]  ;;  %v428_v8 = vld [vmem:[%s5600_s10 + $0x240] sm:$0xf] }
  0x55   : > { %v430_v9 = vld [vmem:[%s5600_s10 + $0x248] sm:$0xf]  ;;  %427 = vst [vmem:[%s5607_s14 + $0x11c] sm:$0xf] %v426_v7  ;;  %429 = vst [vmem:[%s5607_s14 + $0x120] sm:$0xf] %v428_v8 }
  0x56   : > { %431 = vst [vmem:[%s5607_s14 + $0x124] sm:$0xf] %v430_v9  ;;  %v432_v10 = vld [vmem:[%s5600_s10 + $0x250] sm:$0xf]  ;;  %v434_v11 = vld [vmem:[%s5600_s10 + $0x258] sm:$0xf] }
  0x57   : > { %v436_v12 = vld [vmem:[%s5600_s10 + $0x260] sm:$0xf]  ;;  %433 = vst [vmem:[%s5607_s14 + $0x128] sm:$0xf] %v432_v10  ;;  %435 = vst [vmem:[%s5607_s14 + $0x12c] sm:$0xf] %v434_v11 }
  0x58   : > { %437 = vst [vmem:[%s5607_s14 + $0x130] sm:$0xf] %v436_v12  ;;  %v438_v13 = vld [vmem:[%s5600_s10 + $0x268] sm:$0xf]  ;;  %v440_v14 = vld [vmem:[%s5600_s10 + $0x270] sm:$0xf] }
  0x59   : > { %v442_v15 = vld [vmem:[%s5600_s10 + $0x278] sm:$0xf]  ;;  %439 = vst [vmem:[%s5607_s14 + $0x134] sm:$0xf] %v438_v13  ;;  %441 = vst [vmem:[%s5607_s14 + $0x138] sm:$0xf] %v440_v14 }
  0x5a   : > { %443 = vst [vmem:[%s5607_s14 + $0x13c] sm:$0xf] %v442_v15  ;;  %v444_v16 = vld [vmem:[%s5600_s10 + $0x280] sm:$0xf]  ;;  %v446_v17 = vld [vmem:[%s5600_s10 + $0x288] sm:$0xf] }
  0x5b   : > { %v448_v18 = vld [vmem:[%s5600_s10 + $0x290] sm:$0xf]  ;;  %445 = vst [vmem:[%s5607_s14 + $0x140] sm:$0xf] %v444_v16  ;;  %447 = vst [vmem:[%s5607_s14 + $0x144] sm:$0xf] %v446_v17 }
  0x5c   : > { %449 = vst [vmem:[%s5607_s14 + $0x148] sm:$0xf] %v448_v18  ;;  %v450_v19 = vld [vmem:[%s5600_s10 + $0x298] sm:$0xf]  ;;  %v452_v20 = vld [vmem:[%s5600_s10 + $0x2a0] sm:$0xf] }
  0x5d   : > { %v454_v21 = vld [vmem:[%s5600_s10 + $0x2a8] sm:$0xf]  ;;  %451 = vst [vmem:[%s5607_s14 + $0x14c] sm:$0xf] %v450_v19  ;;  %453 = vst [vmem:[%s5607_s14 + $0x150] sm:$0xf] %v452_v20 }
  0x5e   : > { %455 = vst [vmem:[%s5607_s14 + $0x154] sm:$0xf] %v454_v21  ;;  %v456_v22 = vld [vmem:[%s5600_s10 + $0x2b0] sm:$0xf]  ;;  %v458_v23 = vld [vmem:[%s5600_s10 + $0x2b8] sm:$0xf] }
  0x5f   : > { %v460_v24 = vld [vmem:[%s5600_s10 + $0x2c0] sm:$0xf]  ;;  %457 = vst [vmem:[%s5607_s14 + $0x158] sm:$0xf] %v456_v22  ;;  %459 = vst [vmem:[%s5607_s14 + $0x15c] sm:$0xf] %v458_v23 }
  0x60   : > { %461 = vst [vmem:[%s5607_s14 + $0x160] sm:$0xf] %v460_v24  ;;  %v462_v25 = vld [vmem:[%s5600_s10 + $0x2c8] sm:$0xf]  ;;  %v464_v26 = vld [vmem:[%s5600_s10 + $0x2d0] sm:$0xf] }
  0x61   : > { %v466_v27 = vld [vmem:[%s5600_s10 + $0x2d8] sm:$0xf]  ;;  %463 = vst [vmem:[%s5607_s14 + $0x164] sm:$0xf] %v462_v25  ;;  %465 = vst [vmem:[%s5607_s14 + $0x168] sm:$0xf] %v464_v26 }
  0x62   : > { %467 = vst [vmem:[%s5607_s14 + $0x16c] sm:$0xf] %v466_v27  ;;  %v468_v28 = vld [vmem:[%s5600_s10 + $0x2e0] sm:$0xf]  ;;  %v470_v29 = vld [vmem:[%s5600_s10 + $0x2e8] sm:$0xf] }
  0x63   : > { %v472_v30 = vld [vmem:[%s5600_s10 + $0x2f0] sm:$0xf]  ;;  %469 = vst [vmem:[%s5607_s14 + $0x170] sm:$0xf] %v468_v28  ;;  %471 = vst [vmem:[%s5607_s14 + $0x174] sm:$0xf] %v470_v29 }
  0x64   : > { %473 = vst [vmem:[%s5607_s14 + $0x178] sm:$0xf] %v472_v30  ;;  %v474_v31 = vld [vmem:[%s5600_s10 + $0x2f8] sm:$0xf] }
  0x65   : > { %475 = vst [vmem:[%s5607_s14 + $0x17c] sm:$0xf] %v474_v31 }
  0x66 PF: > { %p4357_p11 = scmp.ge.s32.totalorder %s5475_s9, 1  ;;  %p705_p12 = scmp.lt.s32.totalorder %s5475_s9, 5 }
  0x68   : > { %p706_p13 = pnand %p4357_p11, %p705_p12 }
  0x6a   : > { %709 = sbr.rel (%p706_p13) target bundleno = 1121 (0x461), region = 81 }
  0x6f   : > { %s712_s12 = sand.u32 1, %s5451_s26   ;;  %s750_s15 = sand.u32 1, %s5443_s24  }
  0x70   : > { %s5056_s17 = smul.u32 384, %s712_s12  ;;  %s4358_s18 = sshll.u32 %s750_s15, 6 }
  0x71   : > { %p760_p0 = scmp.lt.s32.totalorder %s5463_s29, 1  ;;  %p765_p1 = scmp.lt.s32.totalorder %s5459_s28, 1 }
  0x72   : > { %s4361_s13 = sshll.u32 %s5459_s28, 4  ;;  %s5826_s10 = scalar_lea.vmem [#allocation4], %s5056_s17 }
  0x73   : > { %s761_s21 = scalar_select %p760_p0, %s5463_s29, 1 }
  0x74   : > { %s5804_s22 = scalar_select %p765_p1, %s5459_s28, 1 }
  0x75   : > { %s4670_s23 = sshll.u32 %s761_s21, 7  ;;  %p769_p2 = scmp.lt.s32.totalorder %s4361_s13, 31 }
  0x76   : > { %s5810_s3 = scalar_lea.vmem %s7393_s0, %s4670_s23  ;;  %s767_s26 = scalar_lea.vmem %s7397_s4, %s5804_s22 }
  0x77   : > { %s5819_s15 = scalar_lea.vmem %s7400_s7, %s4670_s23  ;;  %s7461_s13 = smov (!%p769_p2, %s4361_s13), 31 }
  0x78   : > { %s4362_s30 = sshll.u32 %s7461_s13, 2  ;;  %s5828_s14 = scalar_lea.vmem [#allocation5], %s4358_s18 }
  0x79   : > { %s5824_s27 = scalar_lea.vmem %s7398_s5, %s4362_s30  ;;  %p4365_p3 = scmp.ne.s32.totalorder %s5459_s28, 0 }
  0x7b   : > { %783 = sbr.rel (%p4365_p3) target bundleno = 535 (0x217), region = 89 }
  0x80   : > { %v5132_v32 = vld [vmem:[%s7394_s1 + $0x74] ss:$8 sps:$4 sm:$0xff]   ;;  %v5136_v34 = vld [vmem:[%s7394_s1 + $0x70] ss:$8 sps:$4 sm:$0xff]   ;;  %v5138_v36 = vld [vmem:[%s7394_s1 + $0x64] ss:$8 sps:$4 sm:$0xff]   ;;  %v832_v6 = vlaneseq }
  0x81   : > { %v5134_v33 = vld [vmem:[%s7394_s1 + $0x174] ss:$8 sps:$4 sm:$0xff]   ;;  %1711 = vmatprep.subr.bf16.mxu0 %v5132_v32  ;;  %v5137_v35 = vld [vmem:[%s7394_s1 + $0x170] ss:$8 sps:$4 sm:$0xff]   ;;  %v5140_v37 = vld [vmem:[%s7394_s1 + $0x164] ss:$8 sps:$4 sm:$0xff]  }
  0x82   : > { %1824 = vmatprep.subr.bf16.mxu1 %v5134_v33  ;;  %1712 = vmatpush1.bf16.msra.mxu0 %v5136_v34  ;;  %v5142_v38 = vld [vmem:[%s7394_s1 + $0x60] ss:$8 sps:$4 sm:$0xff]   ;;  %v5144_v40 = vld [vmem:[%s7394_s1 + $0x54] ss:$8 sps:$4 sm:$0xff]   ;;  %v5148_v42 = vld [vmem:[%s7394_s1 + $0x50] ss:$8 sps:$4 sm:$0xff]  }
  0x83   : > { %1825 = vmatpush1.bf16.msra.mxu1 %v5137_v35  ;;  %1713 = vmatprep.subr.bf16.mxu0 %v5138_v36  ;;  %v5143_v39 = vld [vmem:[%s7394_s1 + $0x160] ss:$8 sps:$4 sm:$0xff]   ;;  %v5146_v41 = vld [vmem:[%s7394_s1 + $0x154] ss:$8 sps:$4 sm:$0xff]   ;;  %v5149_v43 = vld [vmem:[%s7394_s1 + $0x150] ss:$8 sps:$4 sm:$0xff]  }
  0x84   : > { %1826 = vmatprep.subr.bf16.mxu1 %v5140_v37  ;;  %v5150_v44 = vld [vmem:[%s7394_s1 + $0x44] ss:$8 sps:$4 sm:$0xff]   ;;  %v5154_v46 = vld [vmem:[%s7394_s1 + $0x40] ss:$8 sps:$4 sm:$0xff]   ;;  %v5156_v48 = vld [vmem:[%s7394_s1 + $0x34] ss:$8 sps:$4 sm:$0xff]  }
  0x85   : > { %v5152_v45 = vld [vmem:[%s7394_s1 + $0x144] ss:$8 sps:$4 sm:$0xff]   ;;  %v5155_v47 = vld [vmem:[%s7394_s1 + $0x140] ss:$8 sps:$4 sm:$0xff]   ;;  %v5158_v49 = vld [vmem:[%s7394_s1 + $0x134] ss:$8 sps:$4 sm:$0xff]  }
  0x86   : > { %1714 = vmatpush1.bf16.msra.mxu0 %v5142_v38  ;;  %v5160_v50 = vld [vmem:[%s7394_s1 + $0x30] ss:$8 sps:$4 sm:$0xff]   ;;  %v5162_v52 = vld [vmem:[%s7394_s1 + $0x24] ss:$8 sps:$4 sm:$0xff]   ;;  %v5166_v54 = vld [vmem:[%s7394_s1 + $0x20] ss:$8 sps:$4 sm:$0xff]  }
  0x87   : > { %1827 = vmatpush1.bf16.msra.mxu1 %v5143_v39  ;;  %1715 = vmatprep.subr.bf16.mxu0 %v5144_v40  ;;  %v5161_v51 = vld [vmem:[%s7394_s1 + $0x130] ss:$8 sps:$4 sm:$0xff]   ;;  %v5164_v53 = vld [vmem:[%s7394_s1 + $0x124] ss:$8 sps:$4 sm:$0xff]   ;;  %v5167_v55 = vld [vmem:[%s7394_s1 + $0x120] ss:$8 sps:$4 sm:$0xff]  }
  0x88   : > { %1828 = vmatprep.subr.bf16.mxu1 %v5146_v41  ;;  %v5168_v56 = vld [vmem:[%s7394_s1 + $0x14] ss:$8 sps:$4 sm:$0xff]   ;;  %v5172_v58 = vld [vmem:[%s7394_s1 + $0x10] ss:$8 sps:$4 sm:$0xff]   ;;  %v5174_v60 = vld [vmem:[%s7394_s1 + $0x4] ss:$8 sps:$4 sm:$0xff]  }
  0x89   : > { %v5170_v57 = vld [vmem:[%s7394_s1 + $0x114] ss:$8 sps:$4 sm:$0xff]   ;;  %v5173_v59 = vld [vmem:[%s7394_s1 + $0x110] ss:$8 sps:$4 sm:$0xff]   ;;  %v5176_v61 = vld [vmem:[%s7394_s1 + $0x104] ss:$8 sps:$4 sm:$0xff]  }
  0x8a   : > { %1716 = vmatpush1.bf16.msra.mxu0 %v5148_v42  ;;  %v5178_v62 = vld [vmem:[%s7394_s1] ss:$8 sps:$4 sm:$0xff]   ;;  %v5180_v0 = vld [vmem:[%s7394_s1 + $0xf4] ss:$8 sps:$4 sm:$0xff]   ;;  %v5184_v2 = vld [vmem:[%s7394_s1 + $0xf0] ss:$8 sps:$4 sm:$0xff]  }
  0x8b   : > { %1829 = vmatpush1.bf16.msra.mxu1 %v5149_v43  ;;  %1717 = vmatprep.subr.bf16.mxu0 %v5150_v44  ;;  %v5179_v63 = vld [vmem:[%s7394_s1 + $0x100] ss:$8 sps:$4 sm:$0xff]   ;;  %v5182_v1 = vld [vmem:[%s7394_s1 + $0x1f4] ss:$8 sps:$4 sm:$0xff]   ;;  %v5185_v3 = vld [vmem:[%s7394_s1 + $0x1f0] ss:$8 sps:$4 sm:$0xff]  }
  0x8c   : > { %1830 = vmatprep.subr.bf16.mxu1 %v5152_v45  ;;  %v5186_v4 = vld [vmem:[%s7394_s1 + $0xe4] ss:$8 sps:$4 sm:$0xff]   ;;  %v5190_v7 = vld [vmem:[%s7394_s1 + $0xe0] ss:$8 sps:$4 sm:$0xff]   ;;  %v5192_v9 = vld [vmem:[%s7394_s1 + $0xd4] ss:$8 sps:$4 sm:$0xff]  }
  0x8d   : > { %v5188_v5 = vld [vmem:[%s7394_s1 + $0x1e4] ss:$8 sps:$4 sm:$0xff]   ;;  %v5191_v8 = vld [vmem:[%s7394_s1 + $0x1e0] ss:$8 sps:$4 sm:$0xff]   ;;  %v5194_v10 = vld [vmem:[%s7394_s1 + $0x1d4] ss:$8 sps:$4 sm:$0xff]  }
  0x8e   : > { %1718 = vmatpush1.bf16.msra.mxu0 %v5154_v46  ;;  %v5957_v11 = vshrl.u32 %v832_v6, 7  ;;  %v5196_v12 = vld [vmem:[%s7394_s1 + $0xd0] ss:$8 sps:$4 sm:$0xff]   ;;  %v5198_v14 = vld [vmem:[%s7394_s1 + $0xc4] ss:$8 sps:$4 sm:$0xff]   ;;  %vm5477_vm3 = vmmov 1  }
  0x8f   : > { %1831 = vmatpush1.bf16.msra.mxu1 %v5155_v47  ;;  %1719 = vmatprep.subr.bf16.mxu0 %v5156_v48  ;;  %v5197_v13 = vld [vmem:[%s7394_s1 + $0x1d0] ss:$8 sps:$4 sm:$0xff]   ;;  %v5200_v15 = vld [vmem:[%s7394_s1 + $0x1c4] ss:$8 sps:$4 sm:$0xff]   ;;  %v5202_v16 = vld [vmem:[%s7394_s1 + $0xc0] ss:$8 sps:$4 sm:$0xff]  }
  0x90   : > { %1832 = vmatprep.subr.bf16.mxu1 %v5158_v49  ;;  %v5975_v17 = vld [vmem:[%s5810_s3] sm:$0xff]  ;;  %vm849_vm0 = vcmp.eq.s32.totalorder %v5957_v11, 0  ;;  %v5982_v19 = vld [vmem:[%s5810_s3 + $0x8] sm:$0xff]  ;;  %v5985_v20 = vld [vmem:[%s5810_s3 + $0x78] sm:$0xff]  ;;  %vm897_vm1 = vcmp.lt.s32.totalorder %v5957_v11, 1  ;;  %vm1010_vm5 = vcmp.lt.s32.totalorder %v5957_v11, 7 }
  0x91   : > { %v5203_v18 = vld [vmem:[%s7394_s1 + $0x1c0] ss:$8 sps:$4 sm:$0xff]   ;;  %v801_v21 = vunpack.c.h.bf16 %v5975_v17  ;;  %v5204_v22 = vld [vmem:[%s7394_s1 + $0xb4] ss:$8 sps:$4 sm:$0xff]   ;;  %v803_v23 = vunpack.c.h.bf16 %v5982_v19  ;;  %v831_v24 = vunpack.c.h.bf16 %v5985_v20  ;;  %v4367_v25 = vcombine.high %v5975_v17, %v5982_v19  ;;  %vm6003_vm2 = vmneg %vm849_vm0 }
  0x92   : > { %1720 = vmatpush1.bf16.msra.mxu0 %v5160_v50  ;;  %v5206_v26 = vld [vmem:[%s7394_s1 + $0x1b4] ss:$8 sps:$4 sm:$0xff]   ;;  %v800_v29 = vunpack.c.l.bf16 %v5975_v17  ;;  %v802_v30 = vunpack.c.l.bf16 %v5982_v19  ;;  %v5208_v33 = vld [vmem:[%s7394_s1 + $0xb0] ss:$8 sps:$4 sm:$0xff]   ;;  %vm6036_vm4 = vmpackc.low %vm5477_vm3, %vm6003_vm2  ;;  %v830_v48 = vunpack.c.l.bf16 %v5985_v20  ;;  %vm2674_vm9 = vcmask 64512  }
  0x93   : > { %1833 = vmatpush1.bf16.msra.mxu1 %v5161_v51  ;;  %1721 = vmatprep.subr.bf16.mxu0 %v5162_v52  ;;  %v866_v27 = vrot.slane %v801_v21, 7  ;;  %v6011_v31 = vrot.slane %v803_v23, 7  ;;  %v6015_v32 = vrot.slane %v831_v24, 7  ;;  %v5209_v36 = vld [vmem:[%s7394_s1 + $0x1b0] ss:$8 sps:$4 sm:$0xff]  }
  0x94   : > { %1834 = vmatprep.subr.bf16.mxu1 %v5164_v53  ;;  %1856 = vmatprep.mubr.bf16.mxu1 %v4367_v25  ;;  %v6020_v34 = vrot.slane %v800_v29, 1  ;;  %v6022_v35 = vrot.slane %v802_v30, 1  ;;  %v5210_v40 = vld [vmem:[%s7394_s1 + $0xa4] ss:$8 sps:$4 sm:$0xff]   ;;  %v5214_v43 = vld [vmem:[%s7394_s1 + $0xa0] ss:$8 sps:$4 sm:$0xff]  }
  0x95   : > { %v927_v37 = vsel %vm897_vm1, %v866_v27, %v6011_v31  ;;  %v929_v38 = vsel %vm897_vm1, %v6015_v32, %v866_v27  ;;  %v5212_v41 = vld [vmem:[%s7394_s1 + $0x1a4] ss:$8 sps:$4 sm:$0xff]   ;;  %v5215_v44 = vld [vmem:[%s7394_s1 + $0x1a0] ss:$8 sps:$4 sm:$0xff]   ;;  %v6056_v45 = vld [vmem:[%s5810_s3 + $0x10] sm:$0xff] }
  0x96   : > { %1722 = vmatpush1.bf16.msra.mxu0 %v5166_v54  ;;  %v4480_v42 = vpack.c.bf16 %v927_v37, %v929_v38  ;;  %v6059_v46 = vld [vmem:[%s5810_s3 + $0x18] sm:$0xff]  ;;  %v6065_v47 = vsel %vm1010_vm5, %v6020_v34, %v6022_v35  ;;  %v805_v52 = vunpack.c.h.bf16 %v6056_v45 }
  0x97   : > { %1835 = vmatpush1.bf16.msra.mxu1 %v5167_v55  ;;  %1723 = vmatprep.subr.bf16.mxu0 %v5168_v56  ;;  %v5216_v49 = vld [vmem:[%s7394_s1 + $0x94] ss:$8 sps:$4 sm:$0xff]   ;;  %v5220_v51 = vld [vmem:[%s7394_s1 + $0x90] ss:$8 sps:$4 sm:$0xff]   ;;  %v807_v53 = vunpack.c.h.bf16 %v6059_v46  ;;  %v865_v55 = vrot.slane %v800_v29, 7  ;;  %v867_v56 = vrot.slane %v802_v30, 7 }
  0x98   : > { %1836 = vmatprep.subr.bf16.mxu1 %v5170_v57  ;;  %4481 = vmatprep.mubr.msk.bf16.mxu0 %vm6036_vm4, %v4480_v42  ;;  %v5218_v50 = vld [vmem:[%s7394_s1 + $0x194] ss:$8 sps:$4 sm:$0xff]   ;;  %v5221_v54 = vld [vmem:[%s7394_s1 + $0x190] ss:$8 sps:$4 sm:$0xff]   ;;  %v6084_v57 = vrot.slane %v830_v48, 7 }
  0x99   : > { %v5232_v6 = vld [vmem:[%s7394_s1 + $0x274] ss:$8 sps:$4 sm:$0xff]  }
  0x9a   : > { %1724 = vmatpush1.bf16.msra.mxu0 %v5172_v58  ;;  %v5222_v58 = vld [vmem:[%s7394_s1 + $0x84] ss:$8 sps:$4 sm:$0xff]   ;;  %v6146_v30 = vld [vmem:[%s5810_s3 + $0x30] sm:$0xff] }
  0x9b   : > { %1837 = vmatpush1.bf16.msra.mxu1 %v5173_v59  ;;  %1725 = vmatprep.subr.bf16.mxu0 %v5174_v60  ;;  %v5224_v59 = vld [vmem:[%s7394_s1 + $0x184] ss:$8 sps:$4 sm:$0xff]   ;;  %v5226_v60 = vld [vmem:[%s7394_s1 + $0x80] ss:$8 sps:$4 sm:$0xff]   ;;  %v5240_v38 = vld [vmem:[%s7394_s1 + $0x254] ss:$8 sps:$4 sm:$0xff]  }
  0x9c   : > { %1838 = vmatprep.subr.bf16.mxu1 %v5176_v61  ;;  %v870_v61 = vrot.slane %v805_v52, 7 }
  0x9e   : > { %1726 = vmatpush1.bf16.msra.mxu0 %v5178_v62  ;;  %v872_v62 = vrot.slane %v807_v53, 7 }
  0x9f   : > { %1839 = vmatpush1.bf16.msra.mxu1 %v5179_v63  ;;  %1727 = vmatprep.subr.bf16.mxu0 %v5180_v0  ;;  %v6100_v63 = vld [vmem:[%s5810_s3 + $0x20] sm:$0xff]  ;;  %v6103_v0 = vld [vmem:[%s5810_s3 + $0x28] sm:$0xff] }
  0xa0   : > { %1840 = vmatprep.subr.bf16.mxu1 %v5182_v1  ;;  %v5227_v1 = vld [vmem:[%s7394_s1 + $0x180] ss:$8 sps:$4 sm:$0xff]   ;;  %v808_v25 = vunpack.c.l.bf16 %v6100_v63  ;;  %v7409_v29 = vunpack.c.l.bf16 %v6103_v0 }
  0xa2   : > { %1728 = vmatpush2.bf16.msra.mxu0 %v5184_v2  ;;  %v926_v2 = vsel %vm897_vm1, %v865_v55, %v867_v56  ;;  %v873_v39 = vrot.slane %v808_v25, 7 }
  0xa3   : > { %1841 = vmatpush2.bf16.msra.mxu1 %v5185_v3  ;;  %1729 = vmatprep.subr.bf16.mxu0 %v5186_v4  ;;  %v928_v3 = vsel %vm897_vm1, %v6084_v57, %v865_v55  ;;  %v804_v4 = vunpack.c.l.bf16 %v6056_v45 }
  0xa4   : > { %1842 = vmatprep.subr.bf16.mxu1 %v5188_v5  ;;  %v806_v5 = vunpack.c.l.bf16 %v6059_v46 }
  0xa6   : > { %1730 = vmatpush2.bf16.msra.mxu0 %v5190_v7  ;;  %v809_v7 = vunpack.c.h.bf16 %v6100_v63 }
  0xa7   : > { %1843 = vmatpush2.bf16.msra.mxu1 %v5191_v8  ;;  %1731 = vmatprep.subr.bf16.mxu0 %v5192_v9  ;;  %v811_v8 = vunpack.c.h.bf16 %v6103_v0  ;;  %v4484_v9 = vpack.c.bf16 %v926_v2, %v928_v3  ;;  %v6196_v2 = vld [vmem:[%s5810_s3 + $0x40] sm:$0xff]  ;;  %v6200_v3 = vrot.slane %v801_v21, 1  ;;  %v4370_v21 = vcombine.low %v6100_v63, %v6103_v0 }
  0xa8   : > { %1844 = vmatprep.subr.bf16.mxu1 %v5194_v10  ;;  %v4366_v10 = vcombine.low %v5975_v17, %v5982_v19  ;;  %v874_v27 = vrot.slane %v809_v7, 7  ;;  %v6216_v17 = vrot.slane %v805_v52, 1 }
  0xa9   : > { %v876_v28 = vrot.slane %v811_v8, 7 }
  0xaa   : > { %1732 = vmatpush2.bf16.msra.mxu0 %v5196_v12  ;;  %v923_v12 = vsel %vm897_vm1, %v870_v61, %v872_v62  ;;  %v921_v42 = vsel %vm897_vm1, %v872_v62, %v874_v27  ;;  %v7408_v62 = vunpack.c.l.bf16 %v6146_v30 }
  0xab   : > { %1845 = vmatpush2.bf16.msra.mxu1 %v5197_v13  ;;  %1733 = vmatprep.subr.bf16.mxu0 %v5198_v14  ;;  %v925_v13 = vsel %vm897_vm1, %v6011_v31, %v870_v61  ;;  %v5230_v14 = vld [vmem:[%s7394_s1 + $0x270] ss:$8 sps:$4 sm:$0xff]  }
  0xac   : > { %1846 = vmatprep.subr.bf16.mxu1 %v5200_v15  ;;  %v869_v15 = vrot.slane %v804_v4, 7  ;;  %v6151_v31 = vld [vmem:[%s5810_s3 + $0x38] sm:$0xff]  ;;  %v877_v52 = vrot.slane %v7408_v62, 7 }
  0xae   : > { %1734 = vmatpush2.bf16.msra.mxu0 %v5202_v16  ;;  %v871_v16 = vrot.slane %v806_v5, 7  ;;  %v924_v37 = vsel %vm897_vm1, %v867_v56, %v869_v15  ;;  %v4371_v56 = vcombine.high %v6100_v63, %v6103_v0 }
  0xaf   : > { %1847 = vmatpush2.bf16.msra.mxu1 %v5203_v18  ;;  %1735 = vmatprep.subr.bf16.mxu0 %v5204_v22  ;;  %v5235_v18 = vld [vmem:[%s7394_s1 + $0x264] ss:$8 sps:$4 sm:$0xff]   ;;  %v4369_v22 = vcombine.high %v6056_v45, %v6059_v46 }
  0xb0   : > { %1848 = vmatprep.subr.bf16.mxu1 %v5206_v26  ;;  %v1082_v26 = vpack.c.bf16 %v923_v12, %v925_v13  ;;  %v6212_v12 = vld [vmem:[%s5810_s3 + $0x48] sm:$0xff]  ;;  %v817_v13 = vunpack.c.h.bf16 %v6196_v2 }
  0xb2   : > { %1736 = vmatpush2.bf16.msra.mxu0 %v5208_v33  ;;  %v5233_v33 = vld [vmem:[%s7394_s1 + $0x260] ss:$8 sps:$4 sm:$0xff]  }
  0xb3   : > { %1849 = vmatpush2.bf16.msra.mxu1 %v5209_v36  ;;  %1737 = vmatprep.subr.bf16.mxu0 %v5210_v40  ;;  %v922_v36 = vsel %vm897_vm1, %v869_v15, %v871_v16  ;;  %v813_v40 = vunpack.c.h.bf16 %v6146_v30  ;;  %v819_v15 = vunpack.c.h.bf16 %v6212_v12 }
  0xb4   : > { %1850 = vmatprep.subr.bf16.mxu1 %v5212_v41  ;;  %v919_v41 = vsel %vm897_vm1, %v874_v27, %v876_v28 }
  0xb5   : > { %v1088_v55 = vpack.c.bf16 %v919_v41, %v921_v42  ;;  %v882_v42 = vrot.slane %v817_v13, 7 }
  0xb6   : > { %1738 = vmatpush2.bf16.msra.mxu0 %v5214_v43  ;;  %v875_v43 = vrot.slane %v7409_v29, 7 }
  0xb7   : > { %1851 = vmatpush2.bf16.msra.mxu1 %v5215_v44  ;;  %1739 = vmatprep.subr.bf16.mxu0 %v5216_v49  ;;  %v7407_v44 = vunpack.c.h.bf16 %v6151_v31  ;;  %v1081_v49 = vpack.c.bf16 %v922_v36, %v924_v37  ;;  %v4373_v37 = vcombine.high %v6146_v30, %v6151_v31 }
  0xb8   : > { %1852 = vmatprep.subr.bf16.mxu1 %v5218_v50  ;;  %v4368_v50 = vcombine.low %v6056_v45, %v6059_v46  ;;  %v916_v41 = vsel %vm897_vm1, %v875_v43, %v877_v52  ;;  %v991_v46 = vrot.slane %v813_v40, 1 }
  0xb9   : > { %v6191_v61 = vrot.slane %v7407_v44, 7 }
  0xba   : > { %1740 = vmatpush2.bf16.msra.mxu0 %v5220_v51  ;;  %v5238_v51 = vld [vmem:[%s7394_s1 + $0x250] ss:$8 sps:$4 sm:$0xff]  }
  0xbb   : > { %1853 = vmatpush2.bf16.msra.mxu1 %v5221_v54  ;;  %1741 = vmatprep.subr.bf16.mxu0 %v5222_v58  ;;  %v5243_v54 = vld [vmem:[%s7394_s1 + $0x244] ss:$8 sps:$4 sm:$0xff]   ;;  %v920_v58 = vsel %vm897_vm1, %v871_v16, %v873_v39 }
  0xbc   : > { %1854 = vmatprep.subr.bf16.mxu1 %v5224_v59  ;;  %v918_v59 = vsel %vm897_vm1, %v873_v39, %v875_v43  ;;  %v1009_v43 = vrot.slane %v831_v24, 1 }
  0xbd   : > { %v1087_v19 = vpack.c.bf16 %v918_v59, %v920_v58  ;;  %v5256_v58 = vld [vmem:[%s7394_s1 + $0x214] ss:$8 sps:$4 sm:$0xff]  }
  0xbe   : > { %1742 = vmatpush2.bf16.msra.mxu0 %v5226_v60  ;;  %v878_v60 = vrot.slane %v813_v40, 7 }
  0xbf   : > { %1855 = vmatpush2.bf16.msra.mxu1 %v5227_v1  ;;  %1937 = vmatprep.subr.bf16.mxu0 %v5232_v6  ;;  %v7406_v1 = vunpack.c.l.bf16 %v6151_v31 }
  0xc0   : > { %5023 = vmatprep.subr.bf16.mxu1 %v5232_v6  ;;  %v981_v6 = vrot.slane %v803_v23, 1  ;;  %v5248_v23 = vld [vmem:[%s7394_s1 + $0x234] ss:$8 sps:$4 sm:$0xff]   ;;  %v917_v45 = vsel %vm897_vm1, %v876_v28, %v878_v60  ;;  %v5251_v28 = vld [vmem:[%s7394_s1 + $0x224] ss:$8 sps:$4 sm:$0xff]  }
  0xc1   : > { %4485 = vmatmul.mubr.msk.bf16.vlgmr.msra.gmra.mxu0 %vm6036_vm4, %v4484_v9  ;;  %v6206_v9 = vrot.slane %v804_v4, 1  ;;  %v915_v4 = vsel %vm897_vm1, %v878_v60, %v6191_v61 }
  0xc2   : > { %1857 = vmatmul.mubr.bf16.vlgmr.msra.gmra.mxu1 %v4366_v10  ;;  %1938 = vmatpush1.bf16.msra.mxu0 %v5230_v14  ;;  %v5241_v10 = vld [vmem:[%s7394_s1 + $0x240] ss:$8 sps:$4 sm:$0xff]   ;;  %v6237_v16 = vsel %vm1010_vm5, %v981_v6, %v6216_v17  ;;  %v1094_v36 = vpack.c.bf16 %v915_v4, %v917_v45  ;;  %v5254_v4 = vld [vmem:[%s7394_s1 + $0x210] ss:$8 sps:$4 sm:$0xff]   ;;  %v5259_v45 = vld [vmem:[%s7394_s1 + $0x204] ss:$8 sps:$4 sm:$0xff]  }
  0xc3   : > { %5039 = vmatpush1.bf16.msra.mxu1 %v5230_v14  ;;  %1939 = vmatprep.subr.bf16.mxu0 %v5235_v18  ;;  %v879_v14 = vrot.slane %v7406_v1, 7  ;;  %v6253_v27 = vsel %vm1010_vm5, %v6022_v35, %v6206_v9  ;;  %v818_v35 = vunpack.c.l.bf16 %v6212_v12 }
  0xc4   : > { %5024 = vmatprep.subr.bf16.mxu1 %v5235_v18  ;;  %1753 = vmatprep.mubr.bf16.mxu0 %v1082_v26  ;;  %v6242_v18 = vsel %vm1010_vm5, %v6200_v3, %v981_v6 }
  0xc5   : > { %1866 = vmatprep.mubr.bf16.mxu1 %v4369_v22  ;;  %v5246_v22 = vld [vmem:[%s7394_s1 + $0x230] ss:$8 sps:$4 sm:$0xff]   ;;  %v1080_v26 = vpack.c.bf16 %v6237_v16, %v6242_v18  ;;  %v914_v39 = vsel %vm897_vm1, %v877_v52, %v879_v14  ;;  %v6295_v6 = vrot.slane %v818_v35, 7  ;;  %v989_v16 = vrot.slane %v811_v8, 1 }
  0xc6   : > { %1940 = vmatpush1.bf16.msra.mxu0 %v5233_v33  ;;  %v1093_v59 = vpack.c.bf16 %v914_v39, %v916_v41  ;;  %v6327_v41 = vld [vmem:[%s5810_s3 + $0x60] sm:$0xff] }
  0xc7   : > { %5040 = vmatpush1.bf16.msra.mxu1 %v5233_v33  ;;  %1941 = vmatprep.subr.bf16.mxu0 %v5240_v38 }
  0xc8   : > { %5025 = vmatprep.subr.bf16.mxu1 %v5240_v38  ;;  %v816_v38 = vunpack.c.l.bf16 %v6196_v2 }
  0xc9   : > { %1754 = vmatmul.mubr.bf16.gmra.mxu0 %v1081_v49  ;;  %v884_v49 = vrot.slane %v819_v15, 7 }
  0xca   : > { %1867 = vmatmul.mubr.bf16.gmra.mxu1 %v4368_v50  ;;  %1942 = vmatpush1.bf16.msra.mxu0 %v5238_v51  ;;  %v6273_v50 = vld [vmem:[%s5810_s3 + $0x50] sm:$0xff]  ;;  %v881_v60 = vrot.slane %v816_v38, 7 }
  0xcb   : > { %5041 = vmatpush1.bf16.msra.mxu1 %v5238_v51  ;;  %1943 = vmatprep.subr.bf16.mxu0 %v5243_v54  ;;  %v5249_v51 = vld [vmem:[%s7394_s1 + $0x220] ss:$8 sps:$4 sm:$0xff]   ;;  %v821_v24 = vunpack.c.h.bf16 %v6273_v50 }
  0xcc   : > { %5026 = vmatprep.subr.bf16.mxu1 %v5243_v54  ;;  %1763 = vmatprep.mubr.bf16.mxu0 %v1088_v55  ;;  %v6279_v54 = vld [vmem:[%s5810_s3 + $0x58] sm:$0xff]  ;;  %v6282_v55 = vld [vmem:[%s5810_s3 + $0x70] sm:$0xff] }
  0xcd   : > { %1876 = vmatprep.mubr.bf16.mxu1 %v4371_v56  ;;  %v4372_v56 = vcombine.low %v6146_v30, %v6151_v31  ;;  %v4376_v33 = vcombine.low %v6273_v50, %v6279_v54 }
  0xce   : > { %1944 = vmatpush1.bf16.msra.mxu0 %v5241_v10 }
  0xcf   : > { %5042 = vmatpush1.bf16.msra.mxu1 %v5241_v10  ;;  %1945 = vmatprep.subr.bf16.mxu0 %v5248_v23  ;;  %v911_v10 = vsel %vm897_vm1, %v882_v42, %v884_v49 }
  0xd0   : > { %5027 = vmatprep.subr.bf16.mxu1 %v5248_v23  ;;  %v829_v23 = vunpack.c.h.bf16 %v6282_v55 }
  0xd1   : > { %1764 = vmatmul.mubr.bf16.gmra.mxu0 %v1087_v19  ;;  %v913_v19 = vsel %vm897_vm1, %v6191_v61, %v882_v42  ;;  %v828_v42 = vunpack.c.l.bf16 %v6282_v55 }
  0xd2   : > { %1877 = vmatmul.mubr.bf16.gmra.mxu1 %v4370_v21  ;;  %1946 = vmatpush1.bf16.msra.mxu0 %v5246_v22  ;;  %v823_v21 = vunpack.c.h.bf16 %v6279_v54  ;;  %v6313_v61 = vrot.slane %v829_v23, 1  ;;  %v1100_v52 = vpack.c.bf16 %v911_v10, %v913_v19  ;;  %v1008_v10 = vrot.slane %v830_v48, 1 }
  0xd3   : > { %5043 = vmatpush1.bf16.msra.mxu1 %v5246_v22  ;;  %1947 = vmatprep.subr.bf16.mxu0 %v5251_v28  ;;  %v4375_v22 = vcombine.high %v6196_v2, %v6212_v12  ;;  %v4374_v19 = vcombine.low %v6196_v2, %v6212_v12  ;;  %v6357_v1 = vrot.slane %v828_v42, 1  ;;  %v825_v48 = vunpack.c.h.bf16 %v6327_v41  ;;  %v5291_v2 = vld [vmem:[%s7394_s1 + $0x284] ss:$8 sps:$4 sm:$0xff]  }
  0xd4   : > { %5028 = vmatprep.subr.bf16.mxu1 %v5251_v28  ;;  %1773 = vmatprep.mubr.bf16.mxu0 %v1094_v36  ;;  %v910_v28 = vsel %vm897_vm1, %v881_v60, %v6295_v6  ;;  %v886_v36 = vrot.slane %v821_v24, 7  ;;  %v888_v39 = vrot.slane %v823_v21, 7  ;;  %v987_v12 = vrot.slane %v809_v7, 1 }
  0xd5   : > { %1886 = vmatprep.mubr.bf16.mxu1 %v4373_v37  ;;  %v912_v37 = vsel %vm897_vm1, %v879_v14, %v881_v60  ;;  %v820_v14 = vunpack.c.l.bf16 %v6273_v50  ;;  %v6346_v60 = vsel %vm1010_vm5, %v1009_v43, %v6200_v3  ;;  %v6370_v29 = vsel %vm1010_vm5, %v6357_v1, %v1008_v10 }
  0xd6   : > { %1948 = vmatpush1.bf16.msra.mxu0 %v5249_v51  ;;  %v1099_v3 = vpack.c.bf16 %v910_v28, %v912_v37  ;;  %v907_v44 = vsel %vm897_vm1, %v886_v36, %v888_v39 }
  0xd7   : > { %5044 = vmatpush1.bf16.msra.mxu1 %v5249_v51  ;;  %1949 = vmatprep.subr.bf16.mxu0 %v5256_v58  ;;  %v6333_v51 = vsel %vm1010_vm5, %v6313_v61, %v1009_v43  ;;  %v909_v43 = vsel %vm897_vm1, %v884_v49, %v886_v36  ;;  %v5262_v49 = vld [vmem:[%s7394_s1 + $0x2f0] ss:$8 sps:$4 sm:$0xff]  }
  0xd8   : > { %5029 = vmatprep.subr.bf16.mxu1 %v5256_v58  ;;  %v822_v58 = vunpack.c.l.bf16 %v6279_v54  ;;  %v1106_v37 = vpack.c.bf16 %v907_v44, %v909_v43 }
  0xd9   : > { %1774 = vmatmul.mubr.bf16.gmra.mxu0 %v1093_v59  ;;  %v6341_v59 = vld [vmem:[%s5810_s3 + $0x68] sm:$0xff] }
  0xda   : > { %1887 = vmatmul.mubr.bf16.gmra.mxu1 %v4372_v56  ;;  %1950 = vmatpush1.bf16.msra.mxu0 %v5254_v4  ;;  %v5257_v56 = vld [vmem:[%s7394_s1 + $0x200] ss:$8 sps:$4 sm:$0xff]   ;;  %v7410_v62 = vunpack.c.h.bf16 %v6341_v59  ;;  %v887_v28 = vrot.slane %v822_v58, 7  ;;  %v826_v43 = vunpack.c.l.bf16 %v6341_v59 }
  0xdb   : > { %5045 = vmatpush1.bf16.msra.mxu1 %v5254_v4  ;;  %1951 = vmatprep.subr.bf16.mxu0 %v5259_v45  ;;  %v5264_v4 = vld [vmem:[%s7394_s1 + $0x2f4] ss:$8 sps:$4 sm:$0xff]  }
  0xdc   : > { %5030 = vmatprep.subr.bf16.mxu1 %v5259_v45  ;;  %1783 = vmatprep.mubr.bf16.mxu0 %v1100_v52  ;;  %v6375_v52 = vsel %vm1010_vm5, %v1008_v10, %v6020_v34  ;;  %v5267_v34 = vld [vmem:[%s7394_s1 + $0x2e4] ss:$8 sps:$4 sm:$0xff]   ;;  %v890_v10 = vrot.slane %v825_v48, 7  ;;  %v892_v45 = vrot.slane %v7410_v62, 7 }
  0xdd   : > { %1896 = vmatprep.mubr.bf16.mxu1 %v4375_v22  ;;  %v885_v22 = vrot.slane %v820_v14, 7 }
  0xde   : > { %1952 = vmatpush1.bf16.msra.mxu0 %v5257_v56  ;;  %v903_v62 = vsel %vm897_vm1, %v890_v10, %v892_v45 }
  0xdf   : > { %5046 = vmatpush1.bf16.msra.mxu1 %v5257_v56  ;;  %1953 = vmatprep.subr.bf16.mxu0 %v5264_v4  ;;  %v4377_v56 = vcombine.high %v6273_v50, %v6279_v54  ;;  %v906_v44 = vsel %vm897_vm1, %v885_v22, %v887_v28 }
  0xe0   : > { %5031 = vmatprep.subr.bf16.mxu1 %v5264_v4  ;;  %v5265_v4 = vld [vmem:[%s7394_s1 + $0x2e0] ss:$8 sps:$4 sm:$0xff]  }
  0xe1   : > { %1784 = vmatmul.mubr.bf16.gmra.mxu0 %v1099_v3  ;;  %v908_v3 = vsel %vm897_vm1, %v6295_v6, %v885_v22  ;;  %v905_v6 = vsel %vm897_vm1, %v888_v39, %v890_v10  ;;  %v5270_v22 = vld [vmem:[%s7394_s1 + $0x2d0] ss:$8 sps:$4 sm:$0xff]   ;;  %v4379_v39 = vcombine.high %v6327_v41, %v6341_v59  ;;  %v894_v10 = vrot.slane %v829_v23, 7 }
  0xe2   : > { %1897 = vmatmul.mubr.bf16.gmra.mxu1 %v4374_v19  ;;  %1954 = vmatpush2.bf16.msra.mxu0 %v5262_v49  ;;  %v824_v19 = vunpack.c.l.bf16 %v6327_v41  ;;  %v1105_v36 = vpack.c.bf16 %v906_v44, %v908_v3  ;;  %v1112_v44 = vpack.c.bf16 %v903_v62, %v905_v6 }
  0xe3   : > { %5047 = vmatpush2.bf16.msra.mxu1 %v5262_v49  ;;  %1955 = vmatprep.subr.bf16.mxu0 %v5267_v34  ;;  %v5272_v49 = vld [vmem:[%s7394_s1 + $0x2d4] ss:$8 sps:$4 sm:$0xff]   ;;  %v901_v6 = vsel %vm897_vm1, %v892_v45, %v894_v10  ;;  %v6457_v45 = vrot.slane %v817_v13, 1 }
  0xe4   : > { %5032 = vmatprep.subr.bf16.mxu1 %v5267_v34  ;;  %1793 = vmatprep.mubr.bf16.mxu0 %v1106_v37  ;;  %v889_v34 = vrot.slane %v824_v19, 7  ;;  %v891_v37 = vrot.slane %v826_v43, 7 }
  0xe5   : > { %1906 = vmatprep.mubr.bf16.mxu1 %v4377_v56  ;;  %v5275_v56 = vld [vmem:[%s7394_s1 + $0x2c4] ss:$8 sps:$4 sm:$0xff]  }
  0xe6   : > { %1956 = vmatpush2.bf16.msra.mxu0 %v5265_v4  ;;  %v902_v3 = vsel %vm897_vm1, %v889_v34, %v891_v37  ;;  %v904_v62 = vsel %vm897_vm1, %v887_v28, %v889_v34  ;;  %v5278_v28 = vld [vmem:[%s7394_s1 + $0x2b0] ss:$8 sps:$4 sm:$0xff]   ;;  %v5283_v34 = vld [vmem:[%s7394_s1 + $0x2a4] ss:$8 sps:$4 sm:$0xff]  }
  0xe7   : > { %5048 = vmatpush2.bf16.msra.mxu1 %v5265_v4  ;;  %1957 = vmatprep.subr.bf16.mxu0 %v5272_v49  ;;  %v5273_v4 = vld [vmem:[%s7394_s1 + $0x2c0] ss:$8 sps:$4 sm:$0xff]   ;;  %v1111_v23 = vpack.c.bf16 %v902_v3, %v904_v62  ;;  %v996_v62 = vrot.slane %v818_v35, 1  ;;  %v1003_v35 = vrot.slane %v825_v48, 1 }
  0xe8   : > { %5033 = vmatprep.subr.bf16.mxu1 %v5272_v49  ;;  %v899_v49 = vsel %vm897_vm1, %v894_v10, %v6015_v32  ;;  %v4381_v32 = vcombine.high %v6282_v55, %v5985_v20 }
  0xe9   : > { %1794 = vmatmul.mubr.bf16.gmra.mxu0 %v1105_v36  ;;  %v4378_v36 = vcombine.low %v6327_v41, %v6341_v59 }
  0xea   : > { %1907 = vmatmul.mubr.bf16.gmra.mxu1 %v4376_v33  ;;  %1958 = vmatpush2.bf16.msra.mxu0 %v5270_v22  ;;  %v5280_v33 = vld [vmem:[%s7394_s1 + $0x2b4] ss:$8 sps:$4 sm:$0xff]  }
  0xeb   : > { %5049 = vmatpush2.bf16.msra.mxu1 %v5270_v22  ;;  %1959 = vmatprep.subr.bf16.mxu0 %v5275_v56  ;;  %v893_v22 = vrot.slane %v828_v42, 7  ;;  %v999_v42 = vrot.slane %v821_v24, 1 }
  0xec   : > { %5034 = vmatprep.subr.bf16.mxu1 %v5275_v56  ;;  %1803 = vmatprep.mubr.bf16.mxu0 %v1112_v44  ;;  %v1118_v56 = vpack.c.bf16 %v899_v49, %v901_v6  ;;  %v997_v44 = vrot.slane %v819_v15, 1  ;;  %v5288_v15 = vld [vmem:[%s7394_s1 + $0x294] ss:$8 sps:$4 sm:$0xff]   ;;  %v986_v6 = vrot.slane %v808_v25, 1  ;;  %v7431_v25 = vpack.c.bf16 %v6253_v27, %v6065_v47 }
  0xed   : > { %1916 = vmatprep.mubr.bf16.mxu1 %v4379_v39  ;;  %v5281_v39 = vld [vmem:[%s7394_s1 + $0x2a0] ss:$8 sps:$4 sm:$0xff]   ;;  %v898_v10 = vsel %vm897_vm1, %v893_v22, %v6084_v57  ;;  %v900_v13 = vsel %vm897_vm1, %v891_v37, %v893_v22  ;;  %v6483_v37 = vrot.slane %v816_v38, 1  ;;  %v1001_v38 = vrot.slane %v823_v21, 1 }
  0xee   : > { %1960 = vmatpush2.bf16.msra.mxu0 %v5273_v4  ;;  %v1117_v24 = vpack.c.bf16 %v898_v10, %v900_v13  ;;  %v1022_v3 = vsel %vm1010_vm5, %v997_v44, %v999_v42  ;;  %v1024_v57 = vsel %vm1010_vm5, %v6457_v45, %v997_v44  ;;  %v1030_v47 = vsel %vm1010_vm5, %v989_v16, %v991_v46 }
  0xef   : > { %5050 = vmatpush2.bf16.msra.mxu1 %v5273_v4  ;;  %1961 = vmatprep.subr.bf16.mxu0 %v5280_v33  ;;  %v4380_v4 = vcombine.low %v6282_v55, %v5985_v20  ;;  %v5286_v20 = vld [vmem:[%s7394_s1 + $0x290] ss:$8 sps:$4 sm:$0xff]   ;;  %v985_v55 = vrot.slane %v807_v53, 1  ;;  %v1104_v50 = vpack.c.bf16 %v1022_v3, %v1024_v57  ;;  %v5289_v53 = vld [vmem:[%s7394_s1 + $0x280] ss:$8 sps:$4 sm:$0xff]   ;;  %v1023_v7 = vsel %vm1010_vm5, %v6483_v37, %v996_v62 }
  0xf0   : > { %5035 = vmatprep.subr.bf16.mxu1 %v5280_v33  ;;  %v998_v33 = vrot.slane %v820_v14, 1  ;;  %v1032_v27 = vsel %vm1010_vm5, %v987_v12, %v989_v16 }
  0xf1   : > { %1804 = vmatmul.mubr.bf16.gmra.mxu0 %v1111_v23  ;;  %v1036_v21 = vsel %vm1010_vm5, %v6216_v17, %v985_v55  ;;  %v1034_v48 = vsel %vm1010_vm5, %v985_v55, %v987_v12  ;;  %v1018_v23 = vsel %vm1010_vm5, %v1001_v38, %v1003_v35  ;;  %v984_v17 = vrot.slane %v806_v5, 1 }
  0xf2   : > { %1917 = vmatmul.mubr.bf16.gmra.mxu1 %v4378_v36  ;;  %1962 = vmatpush2.bf16.msra.mxu0 %v5278_v28  ;;  %v1021_v14 = vsel %vm1010_vm5, %v996_v62, %v998_v33  ;;  %v1020_v36 = vsel %vm1010_vm5, %v999_v42, %v1001_v38  ;;  %v7430_v5 = vunpack.c.h.bf16 %v6341_v59  ;;  %v7433_v42 = vunpack.c.l.bf16 %v6146_v30 }
  0xf3   : > { %5051 = vmatpush2.bf16.msra.mxu1 %v5278_v28  ;;  %1963 = vmatprep.subr.bf16.mxu0 %v5283_v34  ;;  %v1103_v49 = vpack.c.bf16 %v1021_v14, %v1023_v7  ;;  %v1086_v28 = vpack.c.bf16 %v1034_v48, %v1036_v21  ;;  %v1110_v22 = vpack.c.bf16 %v1018_v23, %v1020_v36  ;;  %v1223_v38 = vsub.s32 0, %v5957_v11 }
  0xf4   : > { %5036 = vmatprep.subr.bf16.mxu1 %v5283_v34  ;;  %1813 = vmatprep.mubr.bf16.mxu0 %v1118_v56  ;;  %v1000_v34 = vrot.slane %v822_v58, 1  ;;  %v1002_v56 = vrot.slane %v824_v19, 1  ;;  %v1005_v63 = vrot.slane %v7430_v5, 1  ;;  %v1033_v18 = vsel %vm1010_vm5, %v984_v17, %v986_v6 }
  0xf5   : > { %1926 = vmatprep.mubr.bf16.mxu1 %v4381_v32  ;;  %v1035_v8 = vsel %vm1010_vm5, %v6206_v9, %v984_v17  ;;  %v6559_v9 = vadd.s32 120, %v5957_v11  ;;  %v7432_v32 = vunpack.c.l.bf16 %v6103_v0  ;;  %v1092_v10 = vpack.c.bf16 %v1030_v47, %v1032_v27 }
  0xf6   : > { %1964 = vmatpush2.bf16.msra.mxu0 %v5281_v39  ;;  %v1017_v40 = vsel %vm1010_vm5, %v1000_v34, %v1002_v56  ;;  %v1014_v54 = vsel %vm1010_vm5, %v1005_v63, %v6313_v61  ;;  %v1016_v41 = vsel %vm1010_vm5, %v1003_v35, %v1005_v63  ;;  %v1085_v58 = vpack.c.bf16 %v1033_v18, %v1035_v8 }
  0xf7   : > { %5052 = vmatpush2.bf16.msra.mxu1 %v5281_v39  ;;  %1965 = vmatprep.subr.bf16.mxu0 %v5288_v15  ;;  %v988_v44 = vrot.slane %v7432_v32, 1  ;;  %v990_v39 = vrot.slane %v7433_v42, 1  ;;  %v1116_v13 = vpack.c.bf16 %v1014_v54, %v1016_v41  ;;  %v7434_v61 = vunpack.c.h.bf16 %v6151_v31 }
  0xf8   : > { %5037 = vmatprep.subr.bf16.mxu1 %v5288_v15  ;;  %v1004_v15 = vrot.slane %v826_v43, 1  ;;  %vm977_vm6 = vcmp.eq.s32.totalorder %v6559_v9, 127 }
  0xf9   : > { %1814 = vmatmul.mubr.bf16.gmra.mxu0 %v1117_v24  ;;  %v993_v24 = vrot.slane %v7434_v61, 1  ;;  %v1031_v0 = vsel %vm1010_vm5, %v986_v6, %v988_v44  ;;  %vm4486_vm7 = vmneg %vm977_vm6 }
  0xfa   : > { %1927 = vmatmul.mubr.bf16.gmra.mxu1 %v4380_v4  ;;  %1966 = vmatpush2.bf16.msra.mxu0 %v5286_v20  ;;  %v1029_v4 = vsel %vm1010_vm5, %v988_v44, %v990_v39  ;;  %v1013_v30 = vsel %vm1010_vm5, %v1004_v15, %v6357_v1  ;;  %v1015_v59 = vsel %vm1010_vm5, %v1002_v56, %v1004_v15  ;;  %vm4487_vm8 = vmpackc.low %vm4486_vm7, %vm5477_vm3 }
  0xfb   : > { %5053 = vmatpush2.bf16.msra.mxu1 %v5286_v20  ;;  %1967 = vmatprep.subr.bf16.mxu0 %v5291_v2  ;;  %v1026_v43 = vsel %vm1010_vm5, %v993_v24, %v6457_v45  ;;  %v1028_v3 = vsel %vm1010_vm5, %v991_v46, %v993_v24  ;;  %v1091_v57 = vpack.c.bf16 %v1029_v4, %v1031_v0  ;;  %v7435_v20 = vunpack.c.l.bf16 %v6151_v31 }
  0xfc   : > { %5038 = vmatprep.subr.bf16.mxu1 %v5291_v2  ;;  %1969 = vmatprep.mubr.bf16.mxu0 %v1080_v26  ;;  %v1019_v26 = vsel %vm1010_vm5, %v998_v33, %v1000_v34  ;;  %v1115_v62 = vpack.c.bf16 %v1013_v30, %v1015_v59  ;;  %v1098_v33 = vpack.c.bf16 %v1026_v43, %v1028_v3 }
  0xfd   : > { %2009 = vmatprep.mubr.bf16.mxu1 %v1104_v50  ;;  %v1109_v19 = vpack.c.bf16 %v1017_v40, %v1019_v26  ;;  %v992_v55 = vrot.slane %v7435_v20, 1  ;;  %v7436_v1 = vpack.c.bf16 %v6346_v60, %v6333_v51  ;;  %v7437_v31 = vpack.c.bf16 %v6375_v52, %v6370_v29  ;;  %v1219_v51 = vld [vmem:[%s7395_s2] sm:$0x3] }
  0xfe   : > { %1968 = vmatpush2.bf16.msra.mxu0 %v5289_v53  ;;  %v1227_v29 = vsub.s32 1, %v5957_v11 }
  0xff   : > { %5054 = vmatpush2.bf16.msra.mxu1 %v5289_v53  ;;  %v1025_v45 = vsel %vm1010_vm5, %v992_v55, %v6483_v37  ;;  %v1027_v2 = vsel %vm1010_vm5, %v990_v39, %v992_v55  ;;  %v6612_v53 = vrot.slane %v1219_v51, %v1223_v38 }
 0x100   : > { %v1097_v12 = vpack.c.bf16 %v1025_v45, %v1027_v2  ;;  %v6622_v17 = vrot.slane %v1219_v51, %v1227_v29 }
 0x101   : > { %1970 = vmatmul.mubr.bf16.vlgmr.msra.gmra.mxu0 %v7431_v25 }
 0x102   : > { %2010 = vmatmul.mubr.bf16.vlgmr.msra.gmra.mxu1 %v1103_v49  ;;  %1979 = vmatprep.mubr.bf16.mxu0 %v1086_v28 }
 0x103   : > { %2019 = vmatprep.mubr.bf16.mxu1 %v1110_v22 }
 0x109   : > { %1980 = vmatmul.mubr.bf16.gmra.mxu0 %v1085_v58 }
 0x10a   : > { %2020 = vmatmul.mubr.bf16.gmra.mxu1 %v1109_v19  ;;  %1989 = vmatprep.mubr.bf16.mxu0 %v1092_v10 }
 0x10b   : > { %2029 = vmatprep.mubr.bf16.mxu1 %v1116_v13  ;;  %v5478_v13 = vmov 0.0  }
 0x10c   : > { %2675 = vst.msk [vmem:[#allocation3] sm:$0xff] %vm2674_vm9, %v5478_v13  ;;  %2676 = vst.msk [vmem:[#allocation3 + $0x8] sm:$0xff] %vm2674_vm9, %v5478_v13 }
 0x10d   : > { %2677 = vst.msk [vmem:[#allocation3 + $0x10] sm:$0xff] %vm2674_vm9, %v5478_v13  ;;  %2678 = vst.msk [vmem:[#allocation3 + $0x18] sm:$0xff] %vm2674_vm9, %v5478_v13 }
 0x10e   : > { %2679 = vst.msk [vmem:[#allocation3 + $0x20] sm:$0xff] %vm2674_vm9, %v5478_v13  ;;  %2680 = vst.msk [vmem:[#allocation3 + $0x28] sm:$0xff] %vm2674_vm9, %v5478_v13 }
 0x10f   : > { %2681 = vst.msk [vmem:[#allocation3 + $0x30] sm:$0xff] %vm2674_vm9, %v5478_v13  ;;  %2682 = vst.msk [vmem:[#allocation3 + $0x38] sm:$0xff] %vm2674_vm9, %v5478_v13 }
 0x110   : > { %2683 = vst.msk [vmem:[#allocation3 + $0x40] sm:$0xff] %vm2674_vm9, %v5478_v13  ;;  %2684 = vst.msk [vmem:[#allocation3 + $0x48] sm:$0xff] %vm2674_vm9, %v5478_v13 }
 0x111   : > { %1990 = vmatmul.mubr.bf16.gmra.mxu0 %v1091_v57  ;;  %2685 = vst.msk [vmem:[#allocation3 + $0x50] sm:$0xff] %vm2674_vm9, %v5478_v13  ;;  %2686 = vst.msk [vmem:[#allocation3 + $0x58] sm:$0xff] %vm2674_vm9, %v5478_v13 }
 0x112   : > { %2030 = vmatmul.mubr.bf16.gmra.mxu1 %v1115_v62  ;;  %1999 = vmatprep.mubr.bf16.mxu0 %v1098_v33  ;;  %2687 = vst.msk [vmem:[#allocation3 + $0x60] sm:$0xff] %vm2674_vm9, %v5478_v13  ;;  %2688 = vst.msk [vmem:[#allocation3 + $0x68] sm:$0xff] %vm2674_vm9, %v5478_v13 }
 0x113   : > { %4489 = vmatprep.mubr.msk.bf16.mxu1 %vm4487_vm8, %v7436_v1  ;;  %2689 = vst.msk [vmem:[#allocation3 + $0x70] sm:$0xff] %vm2674_vm9, %v5478_v13  ;;  %2690 = vst.msk [vmem:[#allocation3 + $0x78] sm:$0xff] %vm2674_vm9, %v5478_v13 }
 0x119   : > { %2000 = vmatmul.mubr.bf16.gmra.mxu0 %v1097_v12 }
 0x11a   : > { %4493 = vmatmul.mubr.msk.bf16.gmra.mxu1 %vm4487_vm8, %v7437_v31 }
 0x181   : > { %v6604_v60 = vpop.f32.mrf.mxu0 }
 0x182   : > { %v6606_v35 = vpop.f32.mrf.mxu1 }
 0x183   : > { %v6608_v37 = vpop.f32.mrf.mxu0 }
 0x184   : > { %v6610_v50 = vpop.f32.mrf.mxu1  ;;  %v1748_v13 = vadd.f32 %v6608_v37, %v6622_v17 }
 0x185   : > { %v1749_v14 = vpop.f32.mrf.mxu0 }
 0x186   : > { %v1862_v7 = vpop.f32.mrf.mxu1  ;;  %v1750_v52 = vadd.f32 %v1749_v14, %v6612_v53 }
 0x187   : > { %v6616_v21 = vpop.f32.mrf.mxu0 }
 0x188   : > { %v6618_v48 = vpop.f32.mrf.mxu1  ;;  %v6620_v23 = vadd.f32 %v1862_v7, %v1750_v52 }
 0x189   : > { %v1755_v36 = vpop.f32.mrf.mxu0 }
 0x18a   : > { %v1868_v49 = vpop.f32.mrf.mxu1  ;;  %v1756_v6 = vadd.f32 %v1755_v36, %v6612_v53 }
 0x18b   : > { %v1757_v28 = vpop.f32.mrf.mxu0 }
 0x18c   : > { %v1870_v22 = vpop.f32.mrf.mxu1  ;;  %v6625_v34 = vadd.f32 %v1868_v49, %v1756_v6  ;;  %v1758_v56 = vadd.f32 %v1757_v28, %v6622_v17 }
 0x18d   : > { %v1759_v16 = vpop.f32.mrf.mxu0 }
 0x18e   : > { %v1872_v46 = vpop.f32.mrf.mxu1  ;;  %v6628_v5 = vadd.f32 %v1870_v22, %v1758_v56  ;;  %v1760_v63 = vadd.f32 %v1759_v16, %v6612_v53 }
 0x18f   : > { %v1761_v25 = vpop.f32.mrf.mxu0 }
 0x190   : > { %v1874_v18 = vpop.f32.mrf.mxu1  ;;  %v6631_v8 = vadd.f32 %v1872_v46, %v1760_v63  ;;  %v1762_v40 = vadd.f32 %v1761_v25, %v6622_v17 }
 0x191   : > { %v1765_v26 = vpop.f32.mrf.mxu0 }
 0x192   : > { %v1878_v47 = vpop.f32.mrf.mxu1  ;;  %v6634_v27 = vadd.f32 %v1874_v18, %v1762_v40  ;;  %v1766_v54 = vadd.f32 %v1765_v26, %v6612_v53 }
 0x193   : > { %v1767_v41 = vpop.f32.mrf.mxu0 }
 0x194   : > { %v1880_v58 = vpop.f32.mrf.mxu1  ;;  %v6637_v19 = vadd.f32 %v1878_v47, %v1766_v54  ;;  %v1768_v32 = vadd.f32 %v1767_v41, %v6622_v17 }
 0x195   : > { %v1769_v44 = vpop.f32.mrf.mxu0 }
 0x196   : > { %v1882_v42 = vpop.f32.mrf.mxu1  ;;  %v6640_v39 = vadd.f32 %v1880_v58, %v1768_v32  ;;  %v1770_v10 = vadd.f32 %v1769_v44, %v6612_v53 }
 0x197   : > { %v1771_v15 = vpop.f32.mrf.mxu0 }
 0x198   : > { %v1884_v61 = vpop.f32.mrf.mxu1  ;;  %v6659_v24 = vadd.f32 %v1882_v42, %v1770_v10  ;;  %v1772_v4 = vadd.f32 %v1771_v15, %v6622_v17  ;;  %v1746_v10 = vadd.f32 %v6604_v60, %v6612_v53  ;;  %v1752_v15 = vadd.f32 %v6616_v21, %v6622_v17 }
 0x199   : > { %v1775_v0 = vpop.f32.mrf.mxu0  ;;  %v1861_v60 = vadd.f32 %v6610_v50, %v1748_v13 }
 0x19a   : > { %v1888_v30 = vpop.f32.mrf.mxu1  ;;  %v6662_v59 = vadd.f32 %v1884_v61, %v1772_v4  ;;  %v1776_v43 = vadd.f32 %v1775_v0, %v6612_v53  ;;  %v6690_v21 = vadd.f32 %v6618_v48, %v1752_v15 }
 0x19b   : > { %v1777_v3 = vpop.f32.mrf.mxu0 }
 0x19c   : > { %v1890_v57 = vpop.f32.mrf.mxu1  ;;  %v6665_v62 = vadd.f32 %v1888_v30, %v1776_v43  ;;  %v1778_v33 = vadd.f32 %v1777_v3, %v6622_v17 }
 0x19d   : > { %v1779_v20 = vpop.f32.mrf.mxu0 }
 0x19e   : > { %v1892_v55 = vpop.f32.mrf.mxu1  ;;  %v6668_v1 = vadd.f32 %v1890_v57, %v1778_v33  ;;  %v1780_v45 = vadd.f32 %v1779_v20, %v6612_v53  ;;  %v1859_v33 = vadd.f32 %v6606_v35, %v1746_v10 }
 0x19f   : > { %v1781_v2 = vpop.f32.mrf.mxu0 }
 0x1a0   : > { %v1894_v12 = vpop.f32.mrf.mxu1  ;;  %v6671_v31 = vadd.f32 %v1892_v55, %v1780_v45  ;;  %v1782_v38 = vadd.f32 %v1781_v2, %v6622_v17 }
 0x1a1   : > { %v1785_v51 = vpop.f32.mrf.mxu0 }
 0x1a2   : > { %v1898_v14 = vpop.f32.mrf.mxu1  ;;  %v6674_v7 = vadd.f32 %v1894_v12, %v1782_v38  ;;  %v1786_v61 = vadd.f32 %v1785_v51, %v6612_v53 }
 0x1a3   : > { %v1787_v29 = vpop.f32.mrf.mxu0 }
 0x1a4   : > { %v1900_v52 = vpop.f32.mrf.mxu1  ;;  %v1788_v30 = vadd.f32 %v1787_v29, %v6622_v17  ;;  %v1899_v55 = vadd.f32 %v1898_v14, %v1786_v61 }
 0x1a5   : > { %v1789_v36 = vpop.f32.mrf.mxu0 }
 0x1a6   : > { %v1902_v49 = vpop.f32.mrf.mxu1  ;;  %v1790_v43 = vadd.f32 %v1789_v36, %v6612_v53  ;;  %v1901_v51 = vadd.f32 %v1900_v52, %v1788_v30 }
 0x1a7   : > { %v1791_v6 = vpop.f32.mrf.mxu0 }
 0x1a8   : > { %v1904_v28 = vpop.f32.mrf.mxu1  ;;  %v1792_v20 = vadd.f32 %v1791_v6, %v6622_v17  ;;  %v1903_v29 = vadd.f32 %v1902_v49, %v1790_v43 }
 0x1a9   : > { %v1795_v22 = vpop.f32.mrf.mxu0 }
 0x1aa   : > { %v1908_v56 = vpop.f32.mrf.mxu1  ;;  %v1796_v37 = vadd.f32 %v1795_v22, %v6612_v53  ;;  %v1905_v10 = vadd.f32 %v1904_v28, %v1792_v20 }
 0x1ab   : > { %v1797_v16 = vpop.f32.mrf.mxu0 }
 0x1ac   : > { %v1910_v46 = vpop.f32.mrf.mxu1  ;;  %v1798_v45 = vadd.f32 %v1797_v16, %v6622_v17 }
 0x1ad   : > { %v1799_v63 = vpop.f32.mrf.mxu0 }
 0x1ae   : > { %v1912_v25 = vpop.f32.mrf.mxu1  ;;  %v1800_v2 = vadd.f32 %v1799_v63, %v6612_v53  ;;  %v6700_v63 = vadd.f32 %v1908_v56, %v1796_v37  ;;  %v6705_v49 = vadd.f32 %v1910_v46, %v1798_v45 }
 0x1af   : > { %v1801_v18 = vpop.f32.mrf.mxu0 }
 0x1b0   : > { %v1914_v40 = vpop.f32.mrf.mxu1  ;;  %v1802_v35 = vadd.f32 %v1801_v18, %v6622_v17  ;;  %v6707_v18 = vadd.f32 %v1912_v25, %v1800_v2 }
 0x1b1   : > { %v1805_v26 = vpop.f32.mrf.mxu0 }
 0x1b2   : > { %v1918_v47 = vpop.f32.mrf.mxu1  ;;  %v1806_v36 = vadd.f32 %v1805_v26, %v6612_v53 }
 0x1b3   : > { %v1807_v54 = vpop.f32.mrf.mxu0 }
 0x1b4   : > { %v1920_v41 = vpop.f32.mrf.mxu1  ;;  %v1808_v6 = vadd.f32 %v1807_v54, %v6622_v17  ;;  %v6715_v30 = vadd.f32 %v1918_v47, %v1806_v36 }
 0x1b5   : > { %v1809_v58 = vpop.f32.mrf.mxu0 }
 0x1b6   : > { %v1922_v32 = vpop.f32.mrf.mxu1  ;;  %v1810_v48 = vadd.f32 %v1809_v58, %v6612_v53  ;;  %v6717_v43 = vadd.f32 %v1920_v41, %v1808_v6 }
 0x1b7   : > { %v1811_v44 = vpop.f32.mrf.mxu0 }
 0x1b8   : > { %v1924_v42 = vpop.f32.mrf.mxu1  ;;  %v1812_v14 = vadd.f32 %v1811_v44, %v6622_v17  ;;  %v6711_v44 = vadd.f32 %v1914_v40, %v1802_v35  ;;  %v6719_v46 = vadd.f32 %v1922_v32, %v1810_v48 }
 0x1b9   : > { %v1815_v4 = vpop.f32.mrf.mxu0 }
 0x1ba   : > { %v1928_v0 = vpop.f32.mrf.mxu1  ;;  %v1816_v26 = vadd.f32 %v1815_v4, %v6612_v53  ;;  %v6721_v25 = vadd.f32 %v1924_v42, %v1812_v14 }
 0x1bb   : > { %v1817_v3 = vpop.f32.mrf.mxu0 }
 0x1bc   : > { %v1930_v57 = vpop.f32.mrf.mxu1  ;;  %v1818_v54 = vadd.f32 %v1817_v3, %v6622_v17  ;;  %v6723_v40 = vadd.f32 %v1928_v0, %v1816_v26 }
 0x1bd   : > { %v1819_v12 = vpop.f32.mrf.mxu0 }
 0x1be   : > { %v1932_v38 = vpop.f32.mrf.mxu1  ;;  %v1820_v50 = vadd.f32 %v1819_v12, %v6612_v53  ;;  %v6725_v3 = vadd.f32 %v1930_v57, %v1818_v54 }
 0x1bf   : > { %v1821_v22 = vpop.f32.mrf.mxu0 }
 0x1c0   : > { %v1934_v16 = vpop.f32.mrf.mxu1  ;;  %v6702_v13 = vadd.f32 %v1932_v38, %v1820_v50  ;;  %v1822_v52 = vadd.f32 %v1821_v22, %v6622_v17 }
 0x1c1   : > { %v1971_v58 = vpop.f32.mrf.mxu0 }
 0x1c2   : > { %v2011_v15 = vpop.f32.mrf.mxu1  ;;  %v6713_v61 = vadd.f32 %v1934_v16, %v1822_v52  ;;  %v1972_v28 = vadd.f32 %v1971_v58, %v1859_v33 }
 0x1c3   : > { %v2012_v56 = vadd.f32 %v2011_v15, %v1899_v55  ;;  %v1973_v20 = vpop.f32.mrf.mxu0 }
 0x1c4   : > { %v2013_v53 = vpop.f32.mrf.mxu1  ;;  %vm2050_vm10 = vcmp.gt.f32.partialorder %v1972_v28, 0.0  ;;  %v2082_v17 = vmul.f32 0.01, %v1972_v28  ;;  %v1974_v33 = vadd.f32 %v1973_v20, %v1861_v60 }
 0x1c5   : > { %vm2066_vm11 = vcmp.gt.f32.partialorder %v2012_v56, 0.0  ;;  %v2098_v4 = vmul.f32 0.01, %v2012_v56  ;;  %v2014_v37 = vadd.f32 %v2013_v53, %v1901_v51  ;;  %v1975_v47 = vpop.f32.mrf.mxu0 }
 0x1c6   : > { %v2015_v55 = vpop.f32.mrf.mxu1  ;;  %v6727_v41 = vsel %vm2050_vm10, %v1972_v28, %v2082_v17  ;;  %v1976_v42 = vadd.f32 %v1975_v47, %v6620_v23  ;;  %vm2051_vm12 = vcmp.gt.f32.partialorder %v1974_v33, 0.0  ;;  %v2083_v51 = vmul.f32 0.01, %v1974_v33 }
 0x1c7   : > { %v6729_v32 = vsel %vm2066_vm11, %v2012_v56, %v2098_v4  ;;  %v2016_v45 = vadd.f32 %v2015_v55, %v1903_v29  ;;  %v7412_v2 = vrot.slane %v6727_v41, 7  ;;  %v7411_v12 = vrot.slane %v6727_v41, 1  ;;  %v1977_v38 = vpop.f32.mrf.mxu0 }
 0x1c8   : > { %v2162_v0 = vrot.slane %v6729_v32, 7  ;;  %v7413_v57 = vrot.slane %v6729_v32, 1  ;;  %v2017_v60 = vpop.f32.mrf.mxu1  ;;  %vm2067_vm13 = vcmp.gt.f32.partialorder %v2014_v37, 0.0  ;;  %v2099_v35 = vmul.f32 0.01, %v2014_v37 }
 0x1c9   : > { %vm2052_vm14 = vcmp.gt.f32.partialorder %v1976_v42, 0.0  ;;  %v2084_v50 = vmul.f32 0.01, %v1976_v42  ;;  %vm2068_vm15 = vcmp.gt.f32.partialorder %v2016_v45, 0.0  ;;  %v2100_v36 = vmul.f32 0.01, %v2016_v45  ;;  %v1981_v26 = vpop.f32.mrf.mxu0 }
 0x1ca   : > { %v6736_v23 = vsel %vm2051_vm12, %v1974_v33, %v2083_v51  ;;  %v6738_v29 = vsel %vm2067_vm13, %v2014_v37, %v2099_v35  ;;  %v1978_v6 = vadd.f32 %v1977_v38, %v6690_v21  ;;  %v2018_v48 = vadd.f32 %v2017_v60, %v1905_v10  ;;  %v2021_v21 = vpop.f32.mrf.mxu1 }
 0x1cb   : > { %v7415_v14 = vrot.slane %v6736_v23, 7  ;;  %v7414_v22 = vrot.slane %v6736_v23, 1  ;;  %v4673_v16 = vpack.c.bf16 %v6736_v23, %v6727_v41  ;;  %v7416_v52 = vrot.slane %v6738_v29, 7 }
 0x1cc   : > { %v2259_v54 = vrot.slane %v6738_v29, 1  ;;  %v4697_v58 = vpack.c.bf16 %v6738_v29, %v6729_v32  ;;  %v2116_v15 = vsel %vm2052_vm14, %v1976_v42, %v2084_v50  ;;  %v6749_v28 = vsel %vm2068_vm15, %v2016_v45, %v2100_v36  ;;  %v1983_v42 = vpop.f32.mrf.mxu0  ;;  %v2023_v35 = vpop.f32.mrf.mxu1 }
 0x1cd   : > { %2627 = vst [vmem:[#allocation2 + $0xd0] sm:$0xff] %v4673_v16  ;;  %v2148_v10 = vrot.slane %v2116_v15, 7  ;;  %v2244_v56 = vrot.slane %v2116_v15, 1  ;;  %v2164_v20 = vrot.slane %v6749_v28, 7  ;;  %v2260_v53 = vrot.slane %v6749_v28, 1 }
 0x1ce   : > { %2651 = vst [vmem:[#allocation2 + $0xf8] sm:$0xff] %v4697_v58  ;;  %vm2053_vm2 = vcmp.gt.f32.partialorder %v1978_v6, 0.0  ;;  %v2085_v17 = vmul.f32 0.01, %v1978_v6  ;;  %vm2069_vm3 = vcmp.gt.f32.partialorder %v2018_v48, 0.0  ;;  %v1982_v60 = vadd.f32 %v1981_v26, %v6625_v34 }
 0x1cf   : > { %v2101_v4 = vmul.f32 0.01, %v2018_v48  ;;  %v2206_v33 = vsel %vm897_vm1, %v7412_v2, %v2148_v10  ;;  %v2302_v37 = vsel %vm1010_vm5, %v7411_v12, %v2244_v56  ;;  %v2190_v47 = vsel %vm897_vm1, %v2162_v0, %v2164_v20 }
 0x1d0   : > { %v2286_v55 = vsel %vm1010_vm5, %v7413_v57, %v2260_v53  ;;  %v2117_v45 = vsel %vm2053_vm2, %v1978_v6, %v2085_v17  ;;  %v2022_v51 = vadd.f32 %v2021_v21, %v6700_v63  ;;  %vm2054_vm4 = vcmp.gt.f32.partialorder %v1982_v60, 0.0 }
 0x1d1   : > { %v6773_v38 = vsel %vm2069_vm3, %v2018_v48, %v2101_v4  ;;  %v2149_v50 = vrot.slane %v2117_v45, 7  ;;  %v2245_v36 = vrot.slane %v2117_v45, 1  ;;  %v4676_v16 = vpack.c.bf16 %v2117_v45, %v2116_v15  ;;  %v1985_v48 = vpop.f32.mrf.mxu0  ;;  %v2025_v4 = vpop.f32.mrf.mxu1 }
 0x1d2   : > { %v2165_v58 = vrot.slane %v6773_v38, 7  ;;  %v2261_v12 = vrot.slane %v6773_v38, 1  ;;  %v4700_v2 = vpack.c.bf16 %v6773_v38, %v6749_v28  ;;  %v2086_v57 = vmul.f32 0.01, %v1982_v60 }
 0x1d3   : > { %v2207_v34 = vsel %vm897_vm1, %v7415_v14, %v2149_v50  ;;  %v2303_v63 = vsel %vm1010_vm5, %v7414_v22, %v2245_v36  ;;  %2630 = vst [vmem:[#allocation2 + $0x160] sm:$0xff] %v4676_v16  ;;  %vm2070_vm7 = vcmp.gt.f32.partialorder %v2022_v51, 0.0  ;;  %v2102_v16 = vmul.f32 0.01, %v2022_v51 }
 0x1d4   : > { %v2191_v6 = vsel %vm897_vm1, %v7416_v52, %v2165_v58  ;;  %v4674_v26 = vpack.c.bf16 %v2303_v63, %v2302_v37  ;;  %v4675_v15 = vpack.c.bf16 %v2207_v34, %v2206_v33  ;;  %v2287_v21 = vsel %vm1010_vm5, %v2259_v54, %v2261_v12  ;;  %2654 = vst [vmem:[#allocation2 + $0xa0] sm:$0xff] %v4700_v2 }
 0x1d5   : > { %v4699_v17 = vpack.c.bf16 %v2191_v6, %v2190_v47  ;;  %v4698_v45 = vpack.c.bf16 %v2287_v21, %v2286_v55  ;;  %v2118_v38 = vsel %vm2054_vm4, %v1982_v60, %v2086_v57  ;;  %v1984_v22 = vadd.f32 %v1983_v42, %v6628_v5  ;;  %v1987_v42 = vpop.f32.mrf.mxu0 }
 0x1d6   : > { %2628 = vst [vmem:[#allocation2 + $0x10] sm:$0xff] %v4674_v26  ;;  %2629 = vst [vmem:[#allocation2 + $0x48] sm:$0xff] %v4675_v15  ;;  %v2150_v14 = vrot.slane %v2118_v38, 7  ;;  %v2246_v52 = vrot.slane %v2118_v38, 1  ;;  %v2024_v33 = vadd.f32 %v2023_v35, %v6705_v49  ;;  %v1986_v37 = vadd.f32 %v1985_v48, %v6631_v8  ;;  %v2027_v35 = vpop.f32.mrf.mxu1 }
 0x1d7   : > { %2653 = vst [vmem:[#allocation2 + $0x88] sm:$0xff] %v4699_v17  ;;  %2652 = vst [vmem:[#allocation2 + $0x20] sm:$0xff] %v4698_v45  ;;  %v6801_v34 = vsel %vm2070_vm7, %v2022_v51, %v2102_v16  ;;  %vm2055_vm8 = vcmp.gt.f32.partialorder %v1984_v22, 0.0  ;;  %v2087_v2 = vmul.f32 0.01, %v1984_v22  ;;  %v2026_v57 = vadd.f32 %v2025_v4, %v6707_v18  ;;  %v1991_v26 = vpop.f32.mrf.mxu0 }
 0x1d8   : > { %v2204_v5 = vsel %vm897_vm1, %v2148_v10, %v2150_v14  ;;  %v2300_v47 = vsel %vm1010_vm5, %v2244_v56, %v2246_v52  ;;  %v2166_v55 = vrot.slane %v6801_v34, 7  ;;  %v2262_v49 = vrot.slane %v6801_v34, 1  ;;  %v2031_v16 = vpop.f32.mrf.mxu1 }
 0x1d9   : > { %v6810_v8 = vsel %vm2055_vm8, %v1984_v22, %v2087_v2  ;;  %vm2071_vm9 = vcmp.gt.f32.partialorder %v2024_v33, 0.0  ;;  %v2103_v60 = vmul.f32 0.01, %v2024_v33  ;;  %vm2056_vm10 = vcmp.gt.f32.partialorder %v1986_v37, 0.0 }
 0x1da   : > { %v2188_v18 = vsel %vm897_vm1, %v2164_v20, %v2166_v55  ;;  %v2284_v10 = vsel %vm1010_vm5, %v2260_v53, %v2262_v49  ;;  %v2151_v56 = vrot.slane %v6810_v8, 7  ;;  %v2247_v51 = vrot.slane %v6810_v8, 1 }
 0x1db   : > { %v4679_v22 = vpack.c.bf16 %v6810_v8, %v2118_v38  ;;  %v6823_v63 = vsel %vm2071_vm9, %v2024_v33, %v2103_v60  ;;  %v2088_v6 = vmul.f32 0.01, %v1986_v37  ;;  %vm2072_vm11 = vcmp.gt.f32.partialorder %v2026_v57, 0.0  ;;  %v1993_v8 = vpop.f32.mrf.mxu0 }
 0x1dc   : > { %v2205_v48 = vsel %vm897_vm1, %v2149_v50, %v2151_v56  ;;  %v2301_v28 = vsel %vm1010_vm5, %v2245_v36, %v2247_v51  ;;  %v2167_v20 = vrot.slane %v6823_v63, 7  ;;  %v2263_v53 = vrot.slane %v6823_v63, 1 }
 0x1dd   : > { %v4677_v15 = vpack.c.bf16 %v2301_v28, %v2300_v47  ;;  %v4678_v21 = vpack.c.bf16 %v2205_v48, %v2204_v5  ;;  %2633 = vst [vmem:[#allocation2 + $0x178] sm:$0xff] %v4679_v22  ;;  %v4703_v17 = vpack.c.bf16 %v6823_v63, %v6801_v34  ;;  %v6834_v4 = vsel %vm2056_vm10, %v1986_v37, %v2088_v6  ;;  %v1995_v63 = vpop.f32.mrf.mxu0 }
 0x1de   : > { %v2189_v50 = vsel %vm897_vm1, %v2165_v58, %v2167_v20  ;;  %v2285_v36 = vsel %vm1010_vm5, %v2261_v12, %v2263_v53  ;;  %v2152_v45 = vrot.slane %v6834_v4, 7  ;;  %v2248_v38 = vrot.slane %v6834_v4, 1 }
 0x1df   : > { %2631 = vst [vmem:[#allocation2 + $0x128] sm:$0xff] %v4677_v15  ;;  %2632 = vst [vmem:[#allocation2 + $0x40] sm:$0xff] %v4678_v21  ;;  %v4701_v33 = vpack.c.bf16 %v2285_v36, %v2284_v10  ;;  %v4702_v2 = vpack.c.bf16 %v2189_v50, %v2188_v18  ;;  %v2104_v34 = vmul.f32 0.01, %v2026_v57  ;;  %v1988_v37 = vadd.f32 %v1987_v42, %v6634_v27 }
 0x1e0   : > { %2657 = vst [vmem:[#allocation2 + $0x140] sm:$0xff] %v4703_v17  ;;  %v2202_v5 = vsel %vm897_vm1, %v2150_v14, %v2152_v45  ;;  %v2298_v58 = vsel %vm1010_vm5, %v2246_v52, %v2248_v38  ;;  %v2028_v12 = vadd.f32 %v2027_v35, %v6711_v44  ;;  %v1992_v47 = vadd.f32 %v1991_v26, %v6637_v19 }
 0x1e1   : > { %2655 = vst [vmem:[#allocation2 + $0x170] sm:$0xff] %v4701_v33  ;;  %2656 = vst [vmem:[#allocation2 + $0xf0] sm:$0xff] %v4702_v2  ;;  %v2136_v60 = vsel %vm2072_vm11, %v2026_v57, %v2104_v34  ;;  %vm2057_vm12 = vcmp.gt.f32.partialorder %v1988_v37, 0.0  ;;  %v2089_v18 = vmul.f32 0.01, %v1988_v37  ;;  %v2032_v10 = vadd.f32 %v2031_v16, %v6715_v30  ;;  %v2033_v30 = vpop.f32.mrf.mxu1  ;;  %v1997_v34 = vpop.f32.mrf.mxu0 }
 0x1e2   : > { %v2168_v27 = vrot.slane %v2136_v60, 7  ;;  %v2264_v42 = vrot.slane %v2136_v60, 1  ;;  %vm2073_vm13 = vcmp.gt.f32.partialorder %v2028_v12, 0.0  ;;  %v2105_v14 = vmul.f32 0.01, %v2028_v12 }
 0x1e3   : > { %v6851_v22 = vsel %vm2057_vm12, %v1988_v37, %v2089_v18  ;;  %vm2058_vm14 = vcmp.gt.f32.partialorder %v1992_v47, 0.0  ;;  %v2090_v52 = vmul.f32 0.01, %v1992_v47  ;;  %vm2074_vm15 = vcmp.gt.f32.partialorder %v2032_v10, 0.0  ;;  %v2035_v2 = vpop.f32.mrf.mxu1 }
 0x1e4   : > { %v2186_v19 = vsel %vm897_vm1, %v2166_v55, %v2168_v27  ;;  %v2282_v44 = vsel %vm1010_vm5, %v2262_v49, %v2264_v42  ;;  %v2153_v57 = vrot.slane %v6851_v22, 7  ;;  %v2249_v35 = vrot.slane %v6851_v22, 1 }
 0x1e5   : > { %v4682_v6 = vpack.c.bf16 %v6851_v22, %v6834_v4  ;;  %v6861_v48 = vsel %vm2073_vm13, %v2028_v12, %v2105_v14  ;;  %v6863_v28 = vsel %vm2058_vm14, %v1992_v47, %v2090_v52  ;;  %v2106_v26 = vmul.f32 0.01, %v2032_v10 }
 0x1e6   : > { %v2203_v55 = vsel %vm897_vm1, %v2151_v56, %v2153_v57  ;;  %v2299_v49 = vsel %vm1010_vm5, %v2247_v51, %v2249_v35  ;;  %v2169_v15 = vrot.slane %v6861_v48, 7  ;;  %v2265_v21 = vrot.slane %v6861_v48, 1 }
 0x1e7   : > { %v4680_v17 = vpack.c.bf16 %v2299_v49, %v2298_v58  ;;  %v4681_v4 = vpack.c.bf16 %v2203_v55, %v2202_v5  ;;  %2636 = vst [vmem:[#allocation2 + $0x90] sm:$0xff] %v4682_v6  ;;  %v4706_v50 = vpack.c.bf16 %v6861_v48, %v2136_v60  ;;  %v2154_v36 = vrot.slane %v6863_v28, 7 }
 0x1e8   : > { %v2187_v16 = vsel %vm897_vm1, %v2167_v20, %v2169_v15  ;;  %v2283_v56 = vsel %vm1010_vm5, %v2263_v53, %v2265_v21  ;;  %v2250_v33 = vrot.slane %v6863_v28, 1  ;;  %v6883_v51 = vsel %vm2074_vm15, %v2032_v10, %v2106_v26 }
 0x1e9   : > { %2634 = vst [vmem:[#allocation2 + $0x108] sm:$0xff] %v4680_v17  ;;  %2635 = vst [vmem:[#allocation2 + $0x110] sm:$0xff] %v4681_v4  ;;  %v4704_v37 = vpack.c.bf16 %v2283_v56, %v2282_v44  ;;  %v4705_v5 = vpack.c.bf16 %v2187_v16, %v2186_v19  ;;  %v2200_v58 = vsel %vm897_vm1, %v2152_v45, %v2154_v36  ;;  %v2170_v20 = vrot.slane %v6883_v51, 7 }
 0x1ea   : > { %2660 = vst [vmem:[#allocation2 + $0x28] sm:$0xff] %v4706_v50  ;;  %v2296_v53 = vsel %vm1010_vm5, %v2248_v38, %v2250_v33  ;;  %v2266_v12 = vrot.slane %v6883_v51, 1  ;;  %v1994_v47 = vadd.f32 %v1993_v8, %v6640_v39  ;;  %v2034_v60 = vadd.f32 %v2033_v30, %v6717_v43  ;;  %v2037_v30 = vpop.f32.mrf.mxu1 }
 0x1eb   : > { %2658 = vst [vmem:[#allocation2 + $0x60] sm:$0xff] %v4704_v37  ;;  %2659 = vst [vmem:[#allocation2 + $0xc8] sm:$0xff] %v4705_v5  ;;  %v2184_v18 = vsel %vm897_vm1, %v2168_v27, %v2170_v20  ;;  %v1996_v45 = vadd.f32 %v1995_v63, %v6659_v24  ;;  %v2036_v10 = vadd.f32 %v2035_v2, %v6719_v46  ;;  %v2001_v63 = vpop.f32.mrf.mxu0 }
 0x1ec   : > { %v1998_v14 = vadd.f32 %v1997_v34, %v6662_v59  ;;  %v2280_v39 = vsel %vm1010_vm5, %v2264_v42, %v2266_v12  ;;  %vm2059_vm2 = vcmp.gt.f32.partialorder %v1994_v47, 0.0  ;;  %v2091_v43 = vmul.f32 0.01, %v1994_v47  ;;  %v2041_v34 = vpop.f32.mrf.mxu1 }
 0x1ed   : > { %vm2075_vm3 = vcmp.gt.f32.partialorder %v2034_v60, 0.0  ;;  %v2107_v38 = vmul.f32 0.01, %v2034_v60  ;;  %vm2060_vm4 = vcmp.gt.f32.partialorder %v1996_v45, 0.0  ;;  %v2092_v8 = vmul.f32 0.01, %v1996_v45  ;;  %v2003_v37 = vpop.f32.mrf.mxu0 }
 0x1ee   : > { %vm2076_vm7 = vcmp.gt.f32.partialorder %v2036_v10, 0.0  ;;  %v2123_v52 = vsel %vm2059_vm2, %v1994_v47, %v2091_v43  ;;  %v2108_v27 = vmul.f32 0.01, %v2036_v10  ;;  %vm2061_vm8 = vcmp.gt.f32.partialorder %v1998_v14, 0.0 }
 0x1ef   : > { %v2093_v24 = vmul.f32 0.01, %v1998_v14  ;;  %v2155_v19 = vrot.slane %v2123_v52, 7  ;;  %v2251_v46 = vrot.slane %v2123_v52, 1  ;;  %v4685_v59 = vpack.c.bf16 %v2123_v52, %v6863_v28 }
 0x1f0   : > { %v6905_v44 = vsel %vm2075_vm3, %v2034_v60, %v2107_v38  ;;  %v6912_v26 = vsel %vm2060_vm4, %v1996_v45, %v2092_v8  ;;  %v6933_v5 = vsel %vm2076_vm7, %v2036_v10, %v2108_v27 }
 0x1f1   : > { %v2171_v42 = vrot.slane %v6905_v44, 7  ;;  %v2267_v6 = vrot.slane %v6905_v44, 1  ;;  %v4709_v48 = vpack.c.bf16 %v6905_v44, %v6883_v51  ;;  %v2201_v55 = vsel %vm897_vm1, %v2153_v57, %v2155_v19  ;;  %2639 = vst [vmem:[#allocation2 + $0x100] sm:$0xff] %v4685_v59 }
 0x1f2   : > { %v2297_v28 = vsel %vm1010_vm5, %v2249_v35, %v2251_v46  ;;  %v2156_v49 = vrot.slane %v6912_v26, 7  ;;  %v2252_v17 = vrot.slane %v6912_v26, 1  ;;  %v4684_v50 = vpack.c.bf16 %v2201_v55, %v2200_v58 }
 0x1f3   : > { %v4683_v4 = vpack.c.bf16 %v2297_v28, %v2296_v53  ;;  %v2185_v16 = vsel %vm897_vm1, %v2169_v15, %v2171_v42  ;;  %v2281_v56 = vsel %vm1010_vm5, %v2265_v21, %v2267_v6  ;;  %2663 = vst [vmem:[#allocation2 + $0x18] sm:$0xff] %v4709_v48  ;;  %v6936_v15 = vsel %vm2061_vm8, %v1998_v14, %v2093_v24  ;;  %v2043_v14 = vpop.f32.mrf.mxu1 }
 0x1f4   : > { %v4707_v57 = vpack.c.bf16 %v2281_v56, %v2280_v39  ;;  %v4708_v2 = vpack.c.bf16 %v2185_v16, %v2184_v18  ;;  %v2198_v22 = vsel %vm897_vm1, %v2154_v36, %v2156_v49  ;;  %v2294_v35 = vsel %vm1010_vm5, %v2250_v33, %v2252_v17  ;;  %2638 = vst [vmem:[#allocation2 + $0x148] sm:$0xff] %v4684_v50  ;;  %v2005_v39 = vpop.f32.mrf.mxu0 }
 0x1f5   : > { %2637 = vst [vmem:[#allocation2 + $0x118] sm:$0xff] %v4683_v4  ;;  %v2038_v21 = vadd.f32 %v2037_v30, %v6721_v25  ;;  %v2002_v58 = vadd.f32 %v2001_v63, %v6665_v62  ;;  %v2172_v36 = vrot.slane %v6933_v5, 7  ;;  %v2268_v33 = vrot.slane %v6933_v5, 1  ;;  %v2045_v28 = vpop.f32.mrf.mxu1 }
 0x1f6   : > { %2661 = vst [vmem:[#allocation2 + $0x38] sm:$0xff] %v4707_v57  ;;  %2662 = vst [vmem:[#allocation2 + $0xc0] sm:$0xff] %v4708_v2  ;;  %v2157_v53 = vrot.slane %v6936_v15, 7  ;;  %v2253_v47 = vrot.slane %v6936_v15, 1  ;;  %v4688_v60 = vpack.c.bf16 %v6936_v15, %v6912_v26  ;;  %v2042_v24 = vadd.f32 %v2041_v34, %v6723_v40 }
 0x1f7   : > { %vm2077_vm9 = vcmp.gt.f32.partialorder %v2038_v21, 0.0  ;;  %v2109_v18 = vmul.f32 0.01, %v2038_v21  ;;  %vm2062_vm10 = vcmp.gt.f32.partialorder %v2002_v58, 0.0  ;;  %v2182_v62 = vsel %vm897_vm1, %v2170_v20, %v2172_v36 }
 0x1f8   : > { %v2278_v25 = vsel %vm1010_vm5, %v2266_v12, %v2268_v33  ;;  %v2199_v45 = vsel %vm897_vm1, %v2155_v19, %v2157_v53  ;;  %v2295_v10 = vsel %vm1010_vm5, %v2251_v46, %v2253_v47  ;;  %2642 = vst [vmem:[#allocation2 + $0x80] sm:$0xff] %v4688_v60  ;;  %v2094_v52 = vmul.f32 0.01, %v2002_v58  ;;  %v2047_v60 = vpop.f32.mrf.mxu1 }
 0x1f9   : > { %v4686_v43 = vpack.c.bf16 %v2295_v10, %v2294_v35  ;;  %v4687_v38 = vpack.c.bf16 %v2199_v45, %v2198_v22  ;;  %v2141_v8 = vsel %vm2077_vm9, %v2038_v21, %v2109_v18  ;;  %v2004_v19 = vadd.f32 %v2003_v37, %v6668_v1 }
 0x1fa   : > { %v2173_v27 = vrot.slane %v2141_v8, 7  ;;  %v2269_v20 = vrot.slane %v2141_v8, 1  ;;  %v4712_v51 = vpack.c.bf16 %v2141_v8, %v6933_v5  ;;  %v2126_v12 = vsel %vm2062_vm10, %v2002_v58, %v2094_v52 }
 0x1fb   : > { %2640 = vst [vmem:[#allocation2 + $0x58] sm:$0xff] %v4686_v43  ;;  %2641 = vst [vmem:[#allocation2 + $0xd8] sm:$0xff] %v4687_v38  ;;  %v2044_v46 = vadd.f32 %v2043_v14, %v6725_v3  ;;  %v2006_v59 = vadd.f32 %v2005_v39, %v6671_v31  ;;  %v2158_v63 = vrot.slane %v2126_v12, 7  ;;  %v2254_v48 = vrot.slane %v2126_v12, 1 }
 0x1fc   : > { %v2183_v44 = vsel %vm897_vm1, %v2171_v42, %v2173_v27  ;;  %v2279_v30 = vsel %vm1010_vm5, %v2267_v6, %v2269_v20  ;;  %2666 = vst [vmem:[#allocation2] sm:$0xff] %v4712_v51  ;;  %vm2078_vm11 = vcmp.gt.f32.partialorder %v2042_v24, 0.0  ;;  %v2110_v55 = vmul.f32 0.01, %v2042_v24 }
 0x1fd   : > { %v4710_v40 = vpack.c.bf16 %v2279_v30, %v2278_v25  ;;  %v4711_v26 = vpack.c.bf16 %v2183_v44, %v2182_v62  ;;  %v2196_v1 = vsel %vm897_vm1, %v2156_v49, %v2158_v63  ;;  %v2292_v3 = vsel %vm1010_vm5, %v2252_v17, %v2254_v48 }
 0x1fe   : > { %vm2063_vm12 = vcmp.gt.f32.partialorder %v2004_v19, 0.0  ;;  %v2095_v31 = vmul.f32 0.01, %v2004_v19  ;;  %v6972_v42 = vsel %vm2078_vm11, %v2042_v24, %v2110_v55  ;;  %vm2079_vm13 = vcmp.gt.f32.partialorder %v2044_v46, 0.0 }
 0x1ff   : > { %2664 = vst [vmem:[#allocation2 + $0x98] sm:$0xff] %v4710_v40  ;;  %2665 = vst [vmem:[#allocation2 + $0x8] sm:$0xff] %v4711_v26  ;;  %v2111_v6 = vmul.f32 0.01, %v2044_v46  ;;  %vm2064_vm14 = vcmp.gt.f32.partialorder %v2006_v59, 0.0  ;;  %v2174_v4 = vrot.slane %v6972_v42, 7  ;;  %v2046_v14 = vadd.f32 %v2045_v28, %v6702_v13 }
 0x200   : > { %v2270_v50 = vrot.slane %v6972_v42, 1  ;;  %v2127_v16 = vsel %vm2063_vm12, %v2004_v19, %v2095_v31  ;;  %v2096_v56 = vmul.f32 0.01, %v2006_v59  ;;  %v2048_v43 = vadd.f32 %v2047_v60, %v6713_v61 }
 0x201   : > { %v2159_v49 = vrot.slane %v2127_v16, 7  ;;  %v2255_v57 = vrot.slane %v2127_v16, 1  ;;  %v4691_v2 = vpack.c.bf16 %v2127_v16, %v2126_v12  ;;  %v6976_v17 = vsel %vm2079_vm13, %v2044_v46, %v2111_v6 }
 0x202   : > { %v2180_v22 = vsel %vm897_vm1, %v2172_v36, %v2174_v4  ;;  %v2276_v35 = vsel %vm1010_vm5, %v2268_v33, %v2270_v50  ;;  %v2175_v34 = vrot.slane %v6976_v17, 7  ;;  %v2271_v37 = vrot.slane %v6976_v17, 1  ;;  %v2007_v36 = vpop.f32.mrf.mxu0 }
 0x203   : > { %v2197_v5 = vsel %vm897_vm1, %v2157_v53, %v2159_v49  ;;  %v2293_v15 = vsel %vm1010_vm5, %v2253_v47, %v2255_v57  ;;  %2645 = vst [vmem:[#allocation2 + $0x120] sm:$0xff] %v4691_v2  ;;  %v4715_v21 = vpack.c.bf16 %v6976_v17, %v6972_v42  ;;  %v2128_v58 = vsel %vm2064_vm14, %v2006_v59, %v2096_v56 }
 0x204   : > { %v4689_v18 = vpack.c.bf16 %v2293_v15, %v2292_v3  ;;  %v4690_v33 = vpack.c.bf16 %v2197_v5, %v2196_v1  ;;  %v2181_v62 = vsel %vm897_vm1, %v2173_v27, %v2175_v34  ;;  %v2277_v53 = vsel %vm1010_vm5, %v2269_v20, %v2271_v37 }
 0x205   : > { %v4713_v47 = vpack.c.bf16 %v2277_v53, %v2276_v35  ;;  %v4714_v25 = vpack.c.bf16 %v2181_v62, %v2180_v22  ;;  %2669 = vst [vmem:[#allocation2 + $0x68] sm:$0xff] %v4715_v21  ;;  %v2160_v45 = vrot.slane %v2128_v58, 7  ;;  %v2256_v10 = vrot.slane %v2128_v58, 1 }
 0x206   : > { %2643 = vst [vmem:[#allocation2 + $0x130] sm:$0xff] %v4689_v18  ;;  %2644 = vst [vmem:[#allocation2 + $0x138] sm:$0xff] %v4690_v33  ;;  %v2008_v39 = vadd.f32 %v2007_v36, %v6674_v7  ;;  %vm2080_vm15 = vcmp.gt.f32.partialorder %v2046_v14, 0.0  ;;  %v2112_v52 = vmul.f32 0.01, %v2046_v14  ;;  %vm2081_vm3 = vcmp.gt.f32.partialorder %v2048_v43, 0.0 }
 0x207   : > { %2667 = vst [vmem:[#allocation2 + $0x78] sm:$0xff] %v4713_v47  ;;  %2668 = vst [vmem:[#allocation2 + $0x50] sm:$0xff] %v4714_v25  ;;  %v2194_v38 = vsel %vm897_vm1, %v2158_v63, %v2160_v45  ;;  %v2290_v8 = vsel %vm1010_vm5, %v2254_v48, %v2256_v10  ;;  %v2113_v20 = vmul.f32 0.01, %v2048_v43  ;;  %v2192_v46 = vsel %vm897_vm1, %v2160_v45, %v2162_v0 }
 0x208   : > { %vm2065_vm2 = vcmp.gt.f32.partialorder %v2008_v39, 0.0  ;;  %v2097_v27 = vmul.f32 0.01, %v2008_v39  ;;  %v2144_v51 = vsel %vm2080_vm15, %v2046_v14, %v2112_v52  ;;  %v7438_v59 = vrot.slane %v6729_v32, 1 }
 0x209   : > { %v2176_v13 = vrot.slane %v2144_v51, 7  ;;  %v2272_v7 = vrot.slane %v2144_v51, 1  ;;  %v2145_v63 = vsel %vm2081_vm3, %v2048_v43, %v2113_v20  ;;  %v7439_v48 = vrot.slane %v6727_v41, 7 }
 0x20a   : > { %v2129_v24 = vsel %vm2065_vm2, %v2008_v39, %v2097_v27  ;;  %v2288_v44 = vsel %vm1010_vm5, %v2256_v10, %v7438_v59  ;;  %v7440_v26 = vrot.slane %v6727_v41, 1  ;;  %v7441_v0 = vrot.slane %v6738_v29, 7 }
 0x20b   : > { %v2161_v12 = vrot.slane %v2129_v24, 7  ;;  %v2257_v61 = vrot.slane %v2129_v24, 1  ;;  %v4694_v19 = vpack.c.bf16 %v2129_v24, %v2128_v58  ;;  %v2178_v30 = vsel %vm897_vm1, %v2174_v4, %v2176_v13 }
 0x20c   : > { %v2208_v40 = vsel %vm897_vm1, %v2176_v13, %v7439_v48  ;;  %v2304_v55 = vsel %vm1010_vm5, %v2272_v7, %v7440_v26  ;;  %v2177_v16 = vrot.slane %v2145_v63, 7  ;;  %v2273_v56 = vrot.slane %v2145_v63, 1 }
 0x20d   : > { %v2193_v32 = vsel %vm897_vm1, %v2161_v12, %v7441_v0  ;;  %v2195_v1 = vsel %vm897_vm1, %v2159_v49, %v2161_v12  ;;  %2648 = vst [vmem:[#allocation2 + $0xb8] sm:$0xff] %v4694_v19  ;;  %v2289_v3 = vsel %vm1010_vm5, %v2257_v61, %v2259_v54  ;;  %v2291_v41 = vsel %vm1010_vm5, %v2255_v57, %v2257_v61 }
 0x20e   : > { %v4693_v31 = vpack.c.bf16 %v2195_v1, %v2194_v38  ;;  %v4696_v6 = vpack.c.bf16 %v2193_v32, %v2192_v46  ;;  %v4692_v28 = vpack.c.bf16 %v2291_v41, %v2290_v8  ;;  %v4695_v4 = vpack.c.bf16 %v2289_v3, %v2288_v44 }
 0x20f   : > { %v2210_v2 = vsel %vm849_vm0, 0.0, %v2208_v40  ;;  %v2274_v29 = vsel %vm1010_vm5, %v2270_v50, %v2272_v7  ;;  %v2336_v54 = vsel %vm977_vm6, 0.0, %v2304_v55  ;;  %v4718_v49 = vpack.c.bf16 %v2145_v63, %v2144_v51 }
 0x210   : > { %2647 = vst [vmem:[#allocation2 + $0xa8] sm:$0xff] %v4693_v31  ;;  %2650 = vst [vmem:[#allocation2 + $0xe8] sm:$0xff] %v4696_v6  ;;  %v2179_v57 = vsel %vm897_vm1, %v2175_v34, %v2177_v16  ;;  %v7442_v22 = vrot.slane %v6736_v23, 7  ;;  %v2275_v50 = vsel %vm1010_vm5, %v2271_v37, %v2273_v56  ;;  %v7443_v35 = vrot.slane %v6736_v23, 1 }
 0x211   : > { %2646 = vst [vmem:[#allocation2 + $0xe0] sm:$0xff] %v4692_v28  ;;  %2649 = vst [vmem:[#allocation2 + $0x168] sm:$0xff] %v4695_v4  ;;  %v4716_v21 = vpack.c.bf16 %v2275_v50, %v2274_v29  ;;  %v4717_v58 = vpack.c.bf16 %v2179_v57, %v2178_v30 }
 0x212   : > { %v2209_v42 = vsel %vm897_vm1, %v2177_v16, %v7442_v22  ;;  %v2305_v5 = vsel %vm1010_vm5, %v2273_v56, %v7443_v35  ;;  %2672 = vst [vmem:[#allocation2 + $0x158] sm:$0xff] %v4718_v49 }
 0x213   : > { %v2211_v15 = vsel %vm849_vm0, 0.0, %v2209_v42  ;;  %v2337_v34 = vsel %vm977_vm6, 0.0, %v2305_v5  ;;  %2670 = vst [vmem:[#allocation2 + $0x70] sm:$0xff] %v4716_v21  ;;  %2671 = vst [vmem:[#allocation2 + $0x30] sm:$0xff] %v4717_v58 }
 0x214   : > { %v4672_v36 = vpack.c.bf16 %v2211_v15, %v2210_v2  ;;  %v4719_v60 = vpack.c.bf16 %v2337_v34, %v2336_v54 }
 0x216   : > { %2626 = vst [vmem:[#allocation2 + $0xb0] sm:$0xff] %v4672_v36  ;;  %2673 = vst [vmem:[#allocation2 + $0x150] sm:$0xff] %v4719_v60 }
 0x217 PF: > { %v5292_v11 = vld [vmem:[%s5826_s10 + $0x78] sm:$0xff]   ;;  %v5296_v37 = vld [vmem:[%s5826_s10 + $0x70] sm:$0xff]   ;;  %v5300_v53 = vld [vmem:[%s5826_s10 + $0x68] sm:$0xff]   ;;  %p4664_p4 = scmp.ne.s32.totalorder %s5459_s28, 1 }
 0x218   : > { %v5293_v9 = vld [vmem:[%s5826_s10 + $0x38] sm:$0xff]   ;;  %4783 = vmatprep.subr.bf16.mxu0 %v5292_v11  ;;  %v5297_v18 = vld [vmem:[%s5826_s10 + $0x30] sm:$0xff]   ;;  %v5301_v47 = vld [vmem:[%s5826_s10 + $0x28] sm:$0xff]  }
 0x219   : > { %v5294_v23 = vld [vmem:[%s5826_s10 + $0xf8] sm:$0xff]   ;;  %4784 = vmatpush3.bf16.msra.mxu0 %v5293_v9  ;;  %v5298_v33 = vld [vmem:[%s5826_s10 + $0xf0] sm:$0xff]   ;;  %v5302_v25 = vld [vmem:[%s5826_s10 + $0xe8] sm:$0xff]  }
 0x21a   : > { %v5295_v17 = vld [vmem:[%s5826_s10 + $0xb8] sm:$0xff]   ;;  %4847 = vmatprep.subr.bf16.mxu1 %v5294_v23  ;;  %4785 = vmatprep.subr.bf16.mxu0 %v5296_v37  ;;  %v5299_v62 = vld [vmem:[%s5826_s10 + $0xb0] sm:$0xff]   ;;  %v5303_v45 = vld [vmem:[%s5826_s10 + $0xa8] sm:$0xff]  }
 0x21b   : > { %4848 = vmatpush3.bf16.msra.mxu1 %v5295_v17  ;;  %v5304_v10 = vld [vmem:[%s5826_s10 + $0x60] sm:$0xff]   ;;  %v5308_v38 = vld [vmem:[%s5826_s10 + $0x58] sm:$0xff]   ;;  %v5312_v20 = vld [vmem:[%s5826_s10 + $0x50] sm:$0xff]  }
 0x21c   : > { %4849 = vmatprep.subr.bf16.mxu1 %v5298_v33  ;;  %v5305_v14 = vld [vmem:[%s5826_s10 + $0x20] sm:$0xff]   ;;  %v5309_v8 = vld [vmem:[%s5826_s10 + $0x18] sm:$0xff]   ;;  %v5313_v51 = vld [vmem:[%s5826_s10 + $0x10] sm:$0xff]  }
 0x21d   : > { %4786 = vmatpush3.bf16.msra.mxu0 %v5297_v18  ;;  %v5306_v39 = vld [vmem:[%s5826_s10 + $0xe0] sm:$0xff]   ;;  %v5310_v52 = vld [vmem:[%s5826_s10 + $0xd8] sm:$0xff]   ;;  %v5314_v24 = vld [vmem:[%s5826_s10 + $0xd0] sm:$0xff]  }
 0x21e   : > { %4787 = vmatprep.subr.bf16.mxu0 %v5300_v53  ;;  %v5307_v43 = vld [vmem:[%s5826_s10 + $0xa0] sm:$0xff]   ;;  %v5311_v27 = vld [vmem:[%s5826_s10 + $0x98] sm:$0xff]   ;;  %v5315_v13 = vld [vmem:[%s5826_s10 + $0x90] sm:$0xff]  }
 0x21f   : > { %4850 = vmatpush3.bf16.msra.mxu1 %v5299_v62  ;;  %v5316_v7 = vld [vmem:[%s5826_s10 + $0x48] sm:$0xff]   ;;  %v5320_v46 = vld [vmem:[%s5826_s10 + $0x40] sm:$0xff]   ;;  %v5327_v40 = vld [vmem:[%s5826_s10 + $0x178] sm:$0xff]  }
 0x220   : > { %4851 = vmatprep.subr.bf16.mxu1 %v5302_v25  ;;  %v5317_v12 = vld [vmem:[%s5826_s10 + $0x8] sm:$0xff]   ;;  %v5321_v59 = vld [vmem:[%s5826_s10] sm:$0xff]   ;;  %v5331_v0 = vld [vmem:[%s5826_s10 + $0x138] sm:$0xff]  }
 0x221   : > { %4788 = vmatpush3.bf16.msra.mxu0 %v5301_v47  ;;  %v5318_v61 = vld [vmem:[%s5826_s10 + $0xc8] sm:$0xff]   ;;  %v5322_v44 = vld [vmem:[%s5826_s10 + $0xc0] sm:$0xff]   ;;  %v5335_v3 = vld [vmem:[%s5826_s10 + $0x170] sm:$0xff]  }
 0x222   : > { %4789 = vmatprep.subr.bf16.mxu0 %v5304_v10  ;;  %v5319_v19 = vld [vmem:[%s5826_s10 + $0x88] sm:$0xff]   ;;  %v5326_v48 = vld [vmem:[%s5826_s10 + $0x80] sm:$0xff]   ;;  %v5336_v41 = vld [vmem:[#allocation2 + $0x17c] ss:$-232 sps:$4 sm:$0xff]  }
 0x223   : > { %4852 = vmatpush3.bf16.msra.mxu1 %v5303_v45  ;;  %v5323_v30 = vld [vmem:[#allocation2 + $0xb0] ss:$-104 sps:$4 sm:$0xff]   ;;  %v5325_v63 = vld [vmem:[#allocation2 + $0xb4] ss:$-104 sps:$4 sm:$0xff]   ;;  %v2704_v16 = vld [vmem:[#allocation2 + $0x100] sm:$0xff] }
 0x224   : > { %4853 = vmatprep.subr.bf16.mxu1 %v5306_v39  ;;  %3402 = vmatprep.mubr.bf16.mxu0 %v5325_v63  ;;  %v5328_v26 = vld [vmem:[#allocation2 + $0xd0] ss:$144 sps:$4 sm:$0xff]   ;;  %v5330_v55 = vld [vmem:[#allocation2 + $0xd4] ss:$144 sps:$4 sm:$0xff]   ;;  %v5340_v28 = vld [vmem:[#allocation2 + $0x14c] ss:$-112 sps:$4 sm:$0xff]  }
 0x225   : > { %4790 = vmatpush3.bf16.msra.mxu0 %v5305_v14  ;;  %3499 = vmatprep.mubr.bf16.mxu1 %v5330_v55  ;;  %v5332_v32 = vld [vmem:[#allocation2 + $0x44] ss:$208 sps:$4 sm:$0xff]   ;;  %v5334_v1 = vld [vmem:[#allocation2 + $0x40] ss:$208 sps:$4 sm:$0xff]   ;;  %v5343_v4 = vld [vmem:[%s5826_s10 + $0x168] sm:$0xff]  }
 0x226   : > { %4791 = vmatprep.subr.bf16.mxu0 %v5308_v38  ;;  %v5338_v31 = vld [vmem:[%s5826_s10 + $0x130] sm:$0xff]   ;;  %v2707_v56 = vld [vmem:[#allocation2 + $0x80] sm:$0xff]  ;;  %v5344_v29 = vld [vmem:[%s5826_s10 + $0x128] sm:$0xff]  }
 0x227   : > { %4854 = vmatpush3.bf16.msra.mxu1 %v5307_v43  ;;  %v5339_v6 = vld [vmem:[#allocation2 + $0x178] ss:$-232 sps:$4 sm:$0xff]   ;;  %v4558_v2 = vcombine.high %v2704_v16, %v2707_v56  ;;  %v5348_v49 = vld [vmem:[%s5826_s10 + $0x160] sm:$0xff]   ;;  %v5345_v57 = vld [vmem:[#allocation2 + $0x13c] ss:$-144 sps:$4 sm:$0xff]   ;;  %v4557_v42 = vcombine.low %v2704_v16, %v2707_v56 }
 0x228   : > { %4855 = vmatprep.subr.bf16.mxu1 %v5310_v52  ;;  %v5342_v54 = vld [vmem:[#allocation2 + $0x148] ss:$-112 sps:$4 sm:$0xff]   ;;  %v5351_v22 = vld [vmem:[%s5826_s10 + $0x120] sm:$0xff]   ;;  %v5361_v36 = vld [vmem:[%s5826_s10 + $0x150] sm:$0xff]  }
 0x229   : > { %4792 = vmatpush3.bf16.msra.mxu0 %v5309_v8  ;;  %v5349_v50 = vld [vmem:[#allocation2 + $0x124] ss:$-104 sps:$4 sm:$0xff]   ;;  %v2715_v5 = vld [vmem:[#allocation2 + $0xe8] sm:$0xff]  ;;  %v5352_v60 = vld [vmem:[#allocation2 + $0x120] ss:$-104 sps:$4 sm:$0xff]  }
 0x22a   : > { %4793 = vmatprep.subr.bf16.mxu0 %v5312_v20  ;;  %v5353_v35 = vld [vmem:[%s5826_s10 + $0x158] sm:$0xff]   ;;  %v2718_v15 = vld [vmem:[#allocation2 + $0x88] sm:$0xff]  ;;  %v5364_v11 = vld [vmem:[%s5826_s10 + $0x110] sm:$0xff]  }
 0x22b   : > { %4856 = vmatpush3.bf16.msra.mxu1 %v5311_v27  ;;  %v5356_v34 = vld [vmem:[%s5826_s10 + $0x118] sm:$0xff]   ;;  %v4568_v58 = vcombine.high %v2715_v5, %v2718_v15  ;;  %v5369_v23 = vld [vmem:[%s5826_s10 + $0x148] sm:$0xff]   ;;  %v4567_v37 = vcombine.low %v2715_v5, %v2718_v15  ;;  %v5374_v33 = vld [vmem:[%s5826_s10 + $0x140] sm:$0xff]  }
 0x22c   : > { %4857 = vmatprep.subr.bf16.mxu1 %v5314_v24  ;;  %v5347_v21 = vld [vmem:[#allocation2 + $0x138] ss:$-144 sps:$4 sm:$0xff]   ;;  %v5354_v9 = vld [vmem:[#allocation2 + $0xfc] ss:$-88 sps:$4 sm:$0xff]   ;;  %v5358_v18 = vld [vmem:[#allocation2 + $0xf4] ss:$-40 sps:$4 sm:$0xff]  }
 0x22d   : > { %4794 = vmatpush3.bf16.msra.mxu0 %v5313_v51  ;;  %v5372_v17 = vld [vmem:[%s5826_s10 + $0x108] sm:$0xff]   ;;  %v5357_v62 = vld [vmem:[#allocation2 + $0xf8] ss:$-88 sps:$4 sm:$0xff]   ;;  %v5370_v14 = vld [vmem:[#allocation2 + $0x1c] ss:$-24 sps:$4 sm:$0xff]  }
 0x22e   : > { %4795 = vmatprep.subr.bf16.mxu0 %v5316_v7  ;;  %v5377_v53 = vld [vmem:[%s5826_s10 + $0x100] sm:$0xff]   ;;  %v5360_v25 = vld [vmem:[#allocation2 + $0xf0] ss:$-40 sps:$4 sm:$0xff]   ;;  %v5375_v27 = vld [vmem:[#allocation2 + $0x6c] ss:$240 sps:$4 sm:$0xff]  }
 0x22f   : > { %4858 = vmatpush3.bf16.msra.mxu1 %v5315_v13  ;;  %v5362_v47 = vld [vmem:[#allocation2 + $0x144] ss:$-280 sps:$4 sm:$0xff]   ;;  %v5365_v10 = vld [vmem:[#allocation2 + $0x140] ss:$-280 sps:$4 sm:$0xff]   ;;  %v2733_v39 = vld [vmem:[#allocation2 + $0x50] sm:$0xff] }
 0x230   : > { %4859 = vmatprep.subr.bf16.mxu1 %v5318_v61  ;;  %v5366_v45 = vld [vmem:[#allocation2 + $0xc4] ss:$-184 sps:$4 sm:$0xff]   ;;  %v2736_v43 = vld [vmem:[#allocation2 + $0x30] sm:$0xff]  ;;  %v5368_v38 = vld [vmem:[#allocation2 + $0xc0] ss:$-184 sps:$4 sm:$0xff]  }
 0x231   : > { %4796 = vmatpush3.bf16.msra.mxu0 %v5317_v12  ;;  %v4586_v8 = vcombine.high %v2733_v39, %v2736_v43  ;;  %v5373_v52 = vld [vmem:[#allocation2 + $0x18] ss:$-24 sps:$4 sm:$0xff]   ;;  %v4585_v20 = vcombine.low %v2733_v39, %v2736_v43  ;;  %v5381_v51 = vld [vmem:[#allocation2 + $0x14] ss:$280 sps:$4 sm:$0xff]   ;;  %v5379_v13 = vld [vmem:[#allocation2 + $0x10] ss:$280 sps:$4 sm:$0xff]  }
 0x232   : > { %4797 = vmatprep.subr.bf16.mxu0 %v5320_v46  ;;  %v5378_v24 = vld [vmem:[#allocation2 + $0x68] ss:$240 sps:$4 sm:$0xff]   ;;  %v5382_v7 = vld [vmem:[#allocation2 + $0x10c] ss:$16 sps:$4 sm:$0xff]   ;;  %v5402_v56 = vld [vmem:[%s5824_s27 + $0x10] sm:$0xff]  }
 0x233   : > { %4860 = vmatpush3.bf16.msra.mxu1 %v5319_v19  ;;  %v5384_v12 = vld [vmem:[#allocation2 + $0x108] ss:$16 sps:$4 sm:$0xff]   ;;  %v5385_v61 = vld [vmem:[#allocation2 + $0x5c] ss:$216 sps:$4 sm:$0xff]   ;;  %v5388_v46 = vld [vmem:[#allocation2 + $0xe4] ss:$136 sps:$4 sm:$0xff]  }
 0x234   : > { %4861 = vmatprep.subr.bf16.mxu1 %v5322_v44  ;;  %v5387_v19 = vld [vmem:[#allocation2 + $0x58] ss:$216 sps:$4 sm:$0xff]   ;;  %v5391_v44 = vld [vmem:[#allocation2 + $0x24] ss:$336 sps:$4 sm:$0xff]  }
 0x235   : > { %4798 = vmatpush3.bf16.msra.mxu0 %v5321_v59  ;;  %v5390_v59 = vld [vmem:[#allocation2 + $0xe0] ss:$136 sps:$4 sm:$0xff]   ;;  %v5394_v63 = vld [vmem:[#allocation2 + $0x64] ss:$-40 sps:$4 sm:$0xff]  }
 0x236   : > { %4911 = vmatprep.subr.bf16.mxu0 %v5327_v40  ;;  %v2732_v40 = vld [vmem:[#allocation2 + $0x78] sm:$0xff] }
 0x237   : > { %4862 = vmatpush3.bf16.msra.mxu1 %v5326_v48  ;;  %v2729_v48 = vld [vmem:[#allocation2 + $0x98] sm:$0xff] }
 0x238   : > { %3403 = vmatmul.mubr.bf16.vlgmr.msra.gmra.mxu0 %v5323_v30  ;;  %v5393_v30 = vld [vmem:[#allocation2 + $0x20] ss:$336 sps:$4 sm:$0xff]   ;;  %v4584_v55 = vcombine.high %v2729_v48, %v2732_v40  ;;  %v5401_v16 = vld [vmem:[%s5824_s27 + $0x18] sm:$0xff]  }
 0x239   : > { %4912 = vmatpush3.bf16.msra.mxu0 %v5331_v0  ;;  %3410 = vmatprep.mubr.bf16.mxu0 %v5332_v32  ;;  %v2735_v0 = vld [vmem:[#allocation2 + $0x70] sm:$0xff] }
 0x23a   : > { %3500 = vmatmul.mubr.bf16.vlgmr.msra.gmra.mxu1 %v5328_v26  ;;  %4913 = vmatprep.subr.bf16.mxu0 %v5335_v3  ;;  %v5396_v26 = vld [vmem:[#allocation2 + $0x60] ss:$-40 sps:$4 sm:$0xff]   ;;  %v2738_v32 = vld [vmem:[#allocation2 + $0x150] sm:$0xff] }
 0x23b   : > { %3507 = vmatprep.mubr.bf16.mxu1 %v5336_v41  ;;  %v4590_v3 = vcombine.high %v2735_v0, %v2738_v32  ;;  %v4589_v41 = vcombine.low %v2735_v0, %v2738_v32 }
 0x23d   : > { %4914 = vmatpush3.bf16.msra.mxu0 %v5338_v31  ;;  %v5397_v31 = vld [vmem:[%s5824_s27 + $0x38] sm:$0xff]  }
 0x23e   : > { %4915 = vmatprep.subr.bf16.mxu0 %v5343_v4  ;;  %4991 = vmatprep.subr.bf16.mxu1 %v5397_v31  ;;  %v5400_v4 = vld [vmem:[%s5824_s27 + $0x20] sm:$0xff]  }
 0x23f   : > { %4992 = vmatpush3.bf16.msra.mxu1 %v5397_v31 }
 0x240   : > { %3411 = vmatmul.mubr.bf16.gmra.mxu0 %v5334_v1  ;;  %v4583_v1 = vcombine.low %v2729_v48, %v2732_v40  ;;  %v7187_v48 = vld [vmem:[%s767_s26] ss:$0 sm:$0xff] }
 0x241   : > { %3418 = vmatprep.mubr.bf16.mxu0 %v5340_v28  ;;  %4916 = vmatpush3.bf16.msra.mxu0 %v5344_v29  ;;  %v5399_v28 = vld [vmem:[%s5824_s27 + $0x28] sm:$0xff]   ;;  %v5404_v29 = vld [vmem:[%s5824_s27] sm:$0xff]  }
 0x242   : > { %3508 = vmatmul.mubr.bf16.gmra.mxu1 %v5339_v6  ;;  %4917 = vmatprep.subr.bf16.mxu0 %v5348_v49  ;;  %v5398_v6 = vld [vmem:[%s5824_s27 + $0x30] sm:$0xff]  }
 0x243   : > { %3515 = vmatprep.mubr.bf16.mxu1 %v4558_v2  ;;  %4993 = vmatprep.subr.bf16.mxu1 %v5398_v6  ;;  %v5403_v2 = vld [vmem:[%s5824_s27 + $0x8] sm:$0xff]  }
 0x244   : > { %4994 = vmatpush3.bf16.msra.mxu1 %v5398_v6 }
 0x245   : > { %4918 = vmatpush3.bf16.msra.mxu0 %v5351_v22  ;;  %4995 = vmatprep.subr.bf16.mxu1 %v5399_v28 }
 0x246   : > { %4919 = vmatprep.subr.bf16.mxu0 %v5353_v35 }
 0x248   : > { %3419 = vmatmul.mubr.bf16.gmra.mxu0 %v5342_v54  ;;  %4996 = vmatpush3.bf16.msra.mxu1 %v5399_v28 }
 0x249   : > { %3426 = vmatprep.mubr.bf16.mxu0 %v5345_v57  ;;  %4920 = vmatpush3.bf16.msra.mxu0 %v5356_v34 }
 0x24a   : > { %3516 = vmatmul.mubr.bf16.gmra.mxu1 %v4557_v42  ;;  %4921 = vmatprep.subr.bf16.mxu0 %v5361_v36 }
 0x24b   : > { %3523 = vmatprep.mubr.bf16.mxu1 %v5349_v50  ;;  %4997 = vmatprep.subr.bf16.mxu1 %v5400_v4 }
 0x24c   : > { %4998 = vmatpush3.bf16.msra.mxu1 %v5400_v4 }
 0x24d   : > { %4922 = vmatpush3.bf16.msra.mxu0 %v5364_v11  ;;  %4999 = vmatprep.subr.bf16.mxu1 %v5401_v16 }
 0x24e   : > { %4923 = vmatprep.subr.bf16.mxu0 %v5369_v23 }
 0x250   : > { %3427 = vmatmul.mubr.bf16.gmra.mxu0 %v5347_v21  ;;  %5000 = vmatpush3.bf16.msra.mxu1 %v5401_v16 }
 0x251   : > { %3434 = vmatprep.mubr.bf16.mxu0 %v4568_v58  ;;  %4924 = vmatpush3.bf16.msra.mxu0 %v5372_v17 }
 0x252   : > { %3524 = vmatmul.mubr.bf16.gmra.mxu1 %v5352_v60  ;;  %4925 = vmatprep.subr.bf16.mxu0 %v5374_v33 }
 0x253   : > { %3531 = vmatprep.mubr.bf16.mxu1 %v5354_v9  ;;  %5001 = vmatprep.subr.bf16.mxu1 %v5402_v56 }
 0x254   : > { %5002 = vmatpush3.bf16.msra.mxu1 %v5402_v56 }
 0x255   : > { %4926 = vmatpush3.bf16.msra.mxu0 %v5377_v53  ;;  %5003 = vmatprep.subr.bf16.mxu1 %v5403_v2 }
 0x258   : > { %3435 = vmatmul.mubr.bf16.gmra.mxu0 %v4567_v37  ;;  %5004 = vmatpush3.bf16.msra.mxu1 %v5403_v2 }
 0x259   : > { %3442 = vmatprep.mubr.bf16.mxu0 %v5358_v18  ;;  %5005 = vmatprep.subr.bf16.mxu1 %v5404_v29 }
 0x25a   : > { %3532 = vmatmul.mubr.bf16.gmra.mxu1 %v5357_v62 }
 0x25b   : > { %3539 = vmatprep.mubr.bf16.mxu1 %v5362_v47 }
 0x25c   : > { %5006 = vmatpush3.bf16.msra.mxu1 %v5404_v29 }
 0x260   : > { %3443 = vmatmul.mubr.bf16.gmra.mxu0 %v5360_v25 }
 0x261   : > { %3450 = vmatprep.mubr.bf16.mxu0 %v5366_v45 }
 0x262   : > { %3540 = vmatmul.mubr.bf16.gmra.mxu1 %v5365_v10 }
 0x263   : > { %3547 = vmatprep.mubr.bf16.mxu1 %v5370_v14 }
 0x268   : > { %3451 = vmatmul.mubr.bf16.gmra.mxu0 %v5368_v38 }
 0x269   : > { %3458 = vmatprep.mubr.bf16.mxu0 %v4586_v8 }
 0x26a   : > { %3548 = vmatmul.mubr.bf16.gmra.mxu1 %v5373_v52 }
 0x26b   : > { %3555 = vmatprep.mubr.bf16.mxu1 %v5375_v27 }
 0x270   : > { %3459 = vmatmul.mubr.bf16.gmra.mxu0 %v4585_v20 }
 0x271   : > { %3596 = vmatprep.mubr.bf16.mxu0 %v5381_v51 }
 0x272   : > { %3556 = vmatmul.mubr.bf16.gmra.mxu1 %v5378_v24 }
 0x278   : > { %3597 = vmatmul.mubr.bf16.vlgmr.msra.gmra.mxu0 %v5379_v13 }
 0x279   : > { %3604 = vmatprep.mubr.bf16.mxu0 %v5382_v7 }
 0x280   : > { %3605 = vmatmul.mubr.bf16.gmra.mxu0 %v5384_v12 }
 0x281   : > { %3612 = vmatprep.mubr.bf16.mxu0 %v5385_v61 }
 0x288   : > { %3613 = vmatmul.mubr.bf16.gmra.mxu0 %v5387_v19 }
 0x289   : > { %3620 = vmatprep.mubr.bf16.mxu0 %v5388_v46 }
 0x290   : > { %3621 = vmatmul.mubr.bf16.gmra.mxu0 %v5390_v59 }
 0x291   : > { %3628 = vmatprep.mubr.bf16.mxu0 %v5391_v44 }
 0x298   : > { %3629 = vmatmul.mubr.bf16.gmra.mxu0 %v5393_v30 }
 0x299   : > { %3636 = vmatprep.mubr.bf16.mxu0 %v5394_v63 }
 0x2a0   : > { %3637 = vmatmul.mubr.bf16.gmra.mxu0 %v5396_v26 }
 0x2a1   : > { %3644 = vmatprep.mubr.bf16.mxu0 %v4584_v55 }
 0x2a8   : > { %3645 = vmatmul.mubr.bf16.gmra.mxu0 %v4583_v1 }
 0x2a9   : > { %3652 = vmatprep.mubr.bf16.mxu0 %v4590_v3 }
 0x2b0   : > { %3653 = vmatmul.mubr.bf16.gmra.mxu0 %v4589_v41 }
 0x2f8   : > { %v4799_v54 = vpop.f32.mrf.mxu0 }
 0x2fa   : > { %v4800_v49 = vpop.f32.mrf.mxu0  ;;  %v4863_v57 = vpop.f32.mrf.mxu1 }
 0x2fb   : > { %v4801_v63 = vadd.f32 %v4800_v49, %v4799_v54 }
 0x2fc   : > { %v4802_v22 = vpop.f32.mrf.mxu0  ;;  %v4864_v42 = vpop.f32.mrf.mxu1 }
 0x2fd   : > { %v3405_v0 = vadd.f32 %v4801_v63, %v7187_v48  ;;  %v4865_v32 = vadd.f32 %v4864_v42, %v4863_v57 }
 0x2fe   : > { %v4803_v50 = vpop.f32.mrf.mxu0  ;;  %v4866_v35 = vpop.f32.mrf.mxu1 }
 0x2ff   : > { %v4804_v1 = vadd.f32 %v4803_v50, %v4802_v22  ;;  %v3502_v28 = vadd.f32 %v4865_v32, %v3405_v0 }
 0x300   : > { %v4805_v5 = vpop.f32.mrf.mxu0  ;;  %v4867_v15 = vpop.f32.mrf.mxu1 }
 0x301   : > { %v3408_v4 = vadd.f32 %v4804_v1, %v7187_v48  ;;  %v4868_v16 = vadd.f32 %v4867_v15, %v4866_v35 }
 0x302   : > { %v4806_v34 = vpop.f32.mrf.mxu0  ;;  %v4869_v21 = vpop.f32.mrf.mxu1 }
 0x303   : > { %v4807_v31 = vadd.f32 %v4806_v34, %v4805_v5  ;;  %v3505_v22 = vadd.f32 %v4868_v16, %v3408_v4 }
 0x304   : > { %v4808_v58 = vpop.f32.mrf.mxu0  ;;  %v4870_v60 = vpop.f32.mrf.mxu1 }
 0x305   : > { %v3413_v49 = vadd.f32 %v4807_v31, %v7187_v48 }
 0x306   : > { %v4809_v36 = vpop.f32.mrf.mxu0  ;;  %v7122_v23 = vpop.f32.mrf.mxu1 }
 0x307   : > { %v4810_v63 = vadd.f32 %v4809_v36, %v4808_v58 }
 0x308   : > { %v4811_v11 = vpop.f32.mrf.mxu0  ;;  %v7128_v18 = vpop.f32.mrf.mxu1 }
 0x309   : > { %v3416_v1 = vadd.f32 %v4810_v63, %v7187_v48 }
 0x30a   : > { %v4812_v9 = vpop.f32.mrf.mxu0  ;;  %v7134_v53 = vpop.f32.mrf.mxu1 }
 0x30b   : > { %v4813_v0 = vadd.f32 %v4812_v9, %v4811_v11 }
 0x30c   : > { %v7124_v17 = vpop.f32.mrf.mxu0  ;;  %v7140_v45 = vpop.f32.mrf.mxu1 }
 0x30d   : > { %v3421_v11 = vadd.f32 %v4813_v0, %v7187_v48 }
 0x30e   : > { %v7126_v37 = vpop.f32.mrf.mxu0  ;;  %v7146_v39 = vpop.f32.mrf.mxu1 }
 0x30f   : > { %v4816_v4 = vadd.f32 %v7126_v37, %v7124_v17 }
 0x310   : > { %v7130_v33 = vpop.f32.mrf.mxu0  ;;  %v7152_v8 = vpop.f32.mrf.mxu1 }
 0x311   : > { %v3424_v17 = vadd.f32 %v4816_v4, %v7187_v48 }
 0x312   : > { %v7132_v62 = vpop.f32.mrf.mxu0  ;;  %v7158_v20 = vpop.f32.mrf.mxu1 }
 0x314   : > { %v7136_v47 = vpop.f32.mrf.mxu0  ;;  %v7164_v13 = vpop.f32.mrf.mxu1 }
 0x316   : > { %v7138_v25 = vpop.f32.mrf.mxu0  ;;  %v7170_v61 = vpop.f32.mrf.mxu1 }
 0x318   : > { %v7142_v10 = vpop.f32.mrf.mxu0  ;;  %v7176_v59 = vpop.f32.mrf.mxu1 }
 0x319   : > { %v4886_v4 = vadd.f32 %v7176_v59, %v7170_v61 }
 0x31a   : > { %v7144_v14 = vpop.f32.mrf.mxu0  ;;  %v7189_v40 = vpop.f32.mrf.mxu1 }
 0x31c   : > { %v7148_v43 = vpop.f32.mrf.mxu0  ;;  %v7196_v3 = vpop.f32.mrf.mxu1 }
 0x31e   : > { %v7150_v38 = vpop.f32.mrf.mxu0  ;;  %v7199_v2 = vpop.f32.mrf.mxu1 }
 0x320   : > { %v7154_v52 = vpop.f32.mrf.mxu0  ;;  %v7202_v5 = vpop.f32.mrf.mxu1 }
 0x322   : > { %v7156_v27 = vpop.f32.mrf.mxu0 }
 0x324   : > { %v7160_v51 = vpop.f32.mrf.mxu0 }
 0x326   : > { %v7162_v24 = vpop.f32.mrf.mxu0 }
 0x328   : > { %v7166_v7 = vpop.f32.mrf.mxu0 }
 0x32a   : > { %v7168_v12 = vpop.f32.mrf.mxu0 }
 0x32c   : > { %v7172_v19 = vpop.f32.mrf.mxu0 }
 0x32e   : > { %v7174_v46 = vpop.f32.mrf.mxu0 }
 0x330   : > { %v7178_v44 = vpop.f32.mrf.mxu0 }
 0x332   : > { %v7180_v30 = vpop.f32.mrf.mxu0 }
 0x334   : > { %v7191_v26 = vpop.f32.mrf.mxu0 }
 0x336   : > { %v7193_v55 = vpop.f32.mrf.mxu0 }
 0x337   : > { %7444 = vst [vmem:[#allocation12_spill] sm:$0xff] %v7193_v55  ;;  %v4871_v55 = vadd.f32 %v4870_v60, %v4869_v21  ;;  %v4874_v21 = vadd.f32 %v7128_v18, %v7122_v23  ;;  %v7207_v60 = vpop.f32.mrf.mxu1 }
 0x338   : > { %v4927_v41 = vpop.f32.mrf.mxu0 }
 0x339   : > { %v3510_v15 = vadd.f32 %v4871_v55, %v3413_v49  ;;  %v4877_v55 = vadd.f32 %v7140_v45, %v7134_v53  ;;  %v7214_v49 = vpop.f32.mrf.mxu1 }
 0x33a   : > { %v4928_v6 = vpop.f32.mrf.mxu0 }
 0x33b   : > { %v4929_v56 = vadd.f32 %v4928_v6, %v4927_v41 }
 0x33c   : > { %v4930_v29 = vpop.f32.mrf.mxu0 }
 0x33d   : > { %v3599_v54 = vadd.f32 %v4929_v56, %v3502_v28  ;;  %v3513_v56 = vadd.f32 %v4874_v21, %v3416_v1  ;;  %v4883_v1 = vadd.f32 %v7164_v13, %v7158_v20 }
 0x33e   : > { %v4931_v57 = vpop.f32.mrf.mxu0 }
 0x33f   : > { %v4932_v42 = vadd.f32 %v4931_v57, %v4930_v29  ;;  %vm3661_vm0 = vcmp.gt.f32.partialorder %v3599_v54, 0.0  ;;  %v3677_v50 = vmul.f32 0.01, %v3599_v54  ;;  %v4819_v57 = vadd.f32 %v7132_v62, %v7130_v33 }
 0x340   : > { %v4933_v34 = vpop.f32.mrf.mxu0 }
 0x341   : > { %v3602_v32 = vadd.f32 %v4932_v42, %v3505_v22  ;;  %v3693_v35 = vsel %vm3661_vm0, %v3599_v54, %v3677_v50  ;;  %v3518_v22 = vadd.f32 %v4877_v55, %v3421_v11  ;;  %v4880_v50 = vadd.f32 %v7152_v8, %v7146_v39 }
 0x342   : > { %v4934_v41 = vpop.f32.mrf.mxu0  ;;  %v3805_v6 = vmul.f32 %v3693_v35, %v3693_v35  ;;  %v3429_v33 = vadd.f32 %v4819_v57, %v7187_v48 }
 0x343   : > { %v3678_v58 = vmul.f32 0.01, %v3602_v32  ;;  %v4935_v36 = vadd.f32 %v4934_v41, %v4933_v34  ;;  %vm3662_vm1 = vcmp.gt.f32.partialorder %v3602_v32, 0.0  ;;  %v4822_v41 = vadd.f32 %v7138_v25, %v7136_v47 }
 0x344   : > { %v4936_v31 = vpop.f32.mrf.mxu0  ;;  %3821 = vadd.xlane.f32.xlu0 %v3805_v6  ;;  %v3521_v21 = vadd.f32 %v4880_v50, %v3424_v17 }
 0x345   : > { %v3607_v9 = vadd.f32 %v4935_v36, %v3510_v15  ;;  %v3694_v28 = vsel %vm3662_vm1, %v3602_v32, %v3678_v58  ;;  %v7222_v32 = vpop.f32.mrf.mxu1  ;;  %v3432_v47 = vadd.f32 %v4822_v41, %v7187_v48  ;;  %v4895_v41 = vadd.f32 %v7214_v49, %v7207_v60 }
 0x346   : > { %v3709_v16 = vpack.c.bf16 %v3694_v28, %v3693_v35  ;;  %v4937_v23 = vpop.f32.mrf.mxu0  ;;  %v3806_v18 = vmul.f32 %v3694_v28, %v3694_v28  ;;  %v3526_v28 = vadd.f32 %v4883_v1, %v3429_v33  ;;  %vm4051_vm1 = vcmask 64512  }
 0x347   : > { %v4938_v29 = vadd.f32 %v4937_v23, %v4936_v31  ;;  %vm3663_vm5 = vcmp.gt.f32.partialorder %v3607_v9, 0.0  ;;  %v3679_v54 = vmul.f32 0.01, %v3607_v9  ;;  %v7229_v31 = vpop.f32.mrf.mxu1 }
 0x348   : > { %4740 = vst [vmem:[%s5828_s14] sm:$0xff] %v3709_v16   ;;  %v4939_v63 = vpop.f32.mrf.mxu0  ;;  %3823 = vadd.xlane.f32.xlu0 %v3806_v18  ;;  %5007 = vmatprep.mubr.bf16.mxu1 %v3709_v16 }
 0x349   : > { %v3610_v53 = vadd.f32 %v4938_v29, %v3513_v56  ;;  %v3695_v45 = vsel %vm3663_vm5, %v3607_v9, %v3679_v54  ;;  %v4825_v9 = vadd.f32 %v7144_v14, %v7142_v10  ;;  %v7237_v18 = vpop.f32.mrf.mxu1  ;;  %v4889_v54 = vadd.f32 %v7196_v3, %v7189_v40 }
 0x34a   : > { %v4940_v37 = vpop.f32.mrf.mxu0  ;;  %v3807_v42 = vmul.f32 %v3695_v45, %v3695_v45 }
 0x34b   : > { %v3680_v34 = vmul.f32 0.01, %v3610_v53  ;;  %v4941_v0 = vadd.f32 %v4940_v37, %v4939_v63  ;;  %vm3664_vm6 = vcmp.gt.f32.partialorder %v3610_v53, 0.0  ;;  %v3437_v10 = vadd.f32 %v4825_v9, %v7187_v48  ;;  %v4900_v17 = vpop.f32.mrf.mxu1 }
 0x34c   : > { %v4942_v35 = vpop.f32.mrf.mxu0  ;;  %3825 = vadd.xlane.f32.xlu1 %v3807_v42  ;;  %v4828_v63 = vadd.f32 %v7150_v38, %v7148_v43  ;;  %v4831_v42 = vadd.f32 %v7156_v27, %v7154_v52  ;;  %v4837_v9 = vadd.f32 %v7168_v12, %v7166_v7 }
 0x34d   : > { %v3615_v62 = vadd.f32 %v4941_v0, %v3518_v22  ;;  %v3696_v15 = vsel %vm3664_vm6, %v3610_v53, %v3680_v34  ;;  %v3529_v53 = vadd.f32 %v4886_v4, %v3432_v47  ;;  %v3534_v3 = vadd.f32 %v4889_v54, %v3437_v10 }
 0x34e   : > { %v3710_v6 = vpack.c.bf16 %v3696_v15, %v3695_v45  ;;  %v4943_v39 = vpop.f32.mrf.mxu0  ;;  %v3808_v8 = vmul.f32 %v3696_v15, %v3696_v15  ;;  %v3440_v43 = vadd.f32 %v4828_v63, %v7187_v48  ;;  %v4892_v0 = vadd.f32 %v7202_v5, %v7199_v2 }
 0x34f   : > { %v4944_v58 = vadd.f32 %v4943_v39, %v4942_v35  ;;  %vm3665_vm4 = vcmp.gt.f32.partialorder %v3615_v62, 0.0  ;;  %v3681_v36 = vmul.f32 0.01, %v3615_v62  ;;  %v3445_v1 = vadd.f32 %v4831_v42, %v7187_v48 }
 0x350   : > { %4776 = vst [vmem:[%s5828_s14 + $0x8] sm:$0xff] %v3710_v6   ;;  %v4945_v11 = vpop.f32.mrf.mxu0  ;;  %3827 = vadd.xlane.f32.xlu1 %v3808_v8  ;;  %5008 = vmatmul.mubr.bf16.vlgmr.msra.gmra.mxu1 %v3710_v6  ;;  %v4834_v6 = vadd.f32 %v7162_v24, %v7160_v51  ;;  %v3537_v5 = vadd.f32 %v4892_v0, %v3440_v43 }
 0x351   : > { %v3618_v20 = vadd.f32 %v4944_v58, %v3521_v21  ;;  %v3697_v13 = vsel %vm3665_vm4, %v3615_v62, %v3681_v36  ;;  %v4902_v62 = vpop.f32.mrf.mxu1  ;;  %v3542_v49 = vadd.f32 %v4895_v41, %v3445_v1 }
 0x352   : > { %v4946_v25 = vpop.f32.mrf.mxu0  ;;  %v3809_v55 = vmul.f32 %v3697_v13, %v3697_v13  ;;  %v3448_v51 = vadd.f32 %v4834_v6, %v7187_v48 }
 0x353   : > { %v4947_v16 = vadd.f32 %v4946_v25, %v4945_v11  ;;  %vm3666_vm7 = vcmp.gt.f32.partialorder %v3618_v20, 0.0  ;;  %v3682_v23 = vmul.f32 0.01, %v3618_v20  ;;  %v4903_v36 = vpop.f32.mrf.mxu1 }
 0x354   : > { %v4948_v56 = vpop.f32.mrf.mxu0  ;;  %3829 = vadd.xlane.f32.xlu0 %v3809_v55 }
 0x355   : > { %v3623_v14 = vadd.f32 %v4947_v16, %v3526_v28  ;;  %v3698_v29 = vsel %vm3666_vm7, %v3618_v20, %v3682_v23  ;;  %v4898_v28 = vadd.f32 %v7229_v31, %v7222_v32  ;;  %v4905_v55 = vpop.f32.mrf.mxu1  ;;  %v3453_v16 = vadd.f32 %v4837_v9, %v7187_v48 }
 0x356   : > { %v4949_v57 = vpop.f32.mrf.mxu0  ;;  %v3711_v61 = vpack.c.bf16 %v3698_v29, %v3697_v13  ;;  %v3810_v59 = vmul.f32 %v3698_v29, %v3698_v29  ;;  %v4901_v23 = vadd.f32 %v4900_v17, %v7237_v18 }
 0x357   : > { %v4950_v45 = vadd.f32 %v4949_v57, %v4948_v56  ;;  %vm3667_vm8 = vcmp.gt.f32.partialorder %v3623_v14, 0.0  ;;  %v3683_v22 = vmul.f32 0.01, %v3623_v14  ;;  %v4840_v56 = vadd.f32 %v7174_v46, %v7172_v19  ;;  %v4906_v63 = vpop.f32.mrf.mxu1 }
 0x358   : > { %v4951_v37 = vpop.f32.mrf.mxu0  ;;  %4777 = vst [vmem:[%s5828_s14 + $0x10] sm:$0xff] %v3711_v61   ;;  %3831 = vadd.xlane.f32.xlu1 %v3810_v59  ;;  %5011 = vmatprep.mubr.bf16.mxu1 %v3711_v61  ;;  %v3545_v32 = vadd.f32 %v4898_v28, %v3448_v51  ;;  %v4843_v61 = vadd.f32 %v7180_v30, %v7178_v44  ;;  %v7445_v30 = vld [vmem:[#allocation12_spill] sm:$0xff] }
 0x359   : > { %v3626_v50 = vadd.f32 %v4950_v45, %v3529_v53  ;;  %v3699_v40 = vsel %vm3667_vm8, %v3623_v14, %v3683_v22  ;;  %v3550_v53 = vadd.f32 %v4901_v23, %v3453_v16  ;;  %v3456_v19 = vadd.f32 %v4840_v56, %v7187_v48  ;;  %v4908_v42 = vpop.f32.mrf.mxu1 }
 0x35a   : > { %v4952_v38 = vpop.f32.mrf.mxu0  ;;  %v3811_v34 = vmul.f32 %v3699_v40, %v3699_v40  ;;  %v4904_v22 = vadd.f32 %v4903_v36, %v4902_v62  ;;  %v4907_v44 = vadd.f32 %v4906_v63, %v4905_v55  ;;  %v3853_v16 = vlaneseq }
 0x35b   : > { %v4953_v35 = vadd.f32 %v4952_v38, %v4951_v37  ;;  %vm3668_vm9 = vcmp.gt.f32.partialorder %v3626_v50, 0.0  ;;  %v3684_v33 = vmul.f32 0.01, %v3626_v50  ;;  %v4846_v38 = vadd.f32 %v7445_v30, %v7191_v26  ;;  %v4909_v1 = vpop.f32.mrf.mxu1 }
 0x35c   : > { %v4954_v15 = vpop.f32.mrf.mxu0  ;;  %3833 = vadd.xlane.f32.xlu0 %v3811_v34  ;;  %v4910_v26 = vadd.f32 %v4909_v1, %v4908_v42  ;;  %v5479_v56 = vmov 0.0   ;;  %v3859_v42 = vld [vmem:[#allocation3 + $0x8] sm:$0xff]  ;;  %v3862_v1 = vld [vmem:[#allocation3 + $0x20] sm:$0xff] }
 0x35d   : > { %v3631_v52 = vadd.f32 %v4953_v35, %v3534_v3  ;;  %v3700_v27 = vsel %vm3668_vm9, %v3626_v50, %v3684_v33  ;;  %v3553_v33 = vadd.f32 %v4904_v22, %v3456_v19 }
 0x35e   : > { %v4955_v39 = vpop.f32.mrf.mxu0  ;;  %v3712_v8 = vpack.c.bf16 %v3700_v27, %v3699_v40  ;;  %v3812_v2 = vmul.f32 %v3700_v27, %v3700_v27  ;;  %v3461_v40 = vadd.f32 %v4843_v61, %v7187_v48  ;;  %v3858_v61 = vld [vmem:[#allocation3] sm:$0xff] }
 0x35f   : > { %v4956_v21 = vadd.f32 %v4955_v39, %v4954_v15  ;;  %vm3669_vm10 = vcmp.gt.f32.partialorder %v3631_v52, 0.0  ;;  %v3685_v58 = vmul.f32 0.01, %v3631_v52  ;;  %v3464_v39 = vadd.f32 %v4846_v38, %v7187_v48 }
 0x360   : > { %v4957_v11 = vpop.f32.mrf.mxu0  ;;  %4778 = vst [vmem:[%s5828_s14 + $0x18] sm:$0xff] %v3712_v8   ;;  %3835 = vadd.xlane.f32.xlu1 %v3812_v2  ;;  %5012 = vmatmul.mubr.bf16.gmra.mxu1 %v3712_v8  ;;  %v3558_v6 = vadd.f32 %v4907_v44, %v3461_v40 }
 0x361   : > { %v3634_v20 = vadd.f32 %v4956_v21, %v3537_v5  ;;  %v3701_v60 = vsel %vm3669_vm10, %v3631_v52, %v3685_v58 }
 0x362   : > { %v4958_v24 = vpop.f32.mrf.mxu0  ;;  %v3813_v13 = vmul.f32 %v3701_v60, %v3701_v60 }
 0x363   : > { %v4959_v47 = vadd.f32 %v4958_v24, %v4957_v11  ;;  %vm3670_vm11 = vcmp.gt.f32.partialorder %v3634_v20, 0.0  ;;  %v3686_v25 = vmul.f32 0.01, %v3634_v20 }
 0x364   : > { %v4960_v4 = vpop.f32.mrf.mxu0  ;;  %3837 = vadd.xlane.f32.xlu0 %v3813_v13 }
 0x365   : > { %v3639_v7 = vadd.f32 %v4959_v47, %v3542_v49  ;;  %v3702_v12 = vsel %vm3670_vm11, %v3634_v20, %v3686_v25  ;;  %v3561_v49 = vadd.f32 %v4910_v26, %v3464_v39  ;;  %v3865_v39 = vld [vmem:[#allocation3 + $0x38] sm:$0xff] }
 0x366   : > { %v4961_v10 = vpop.f32.mrf.mxu0  ;;  %v3713_v14 = vpack.c.bf16 %v3702_v12, %v3701_v60  ;;  %v3814_v29 = vmul.f32 %v3702_v12, %v3702_v12 }
 0x367   : > { %v4962_v31 = vadd.f32 %v4961_v10, %v4960_v4  ;;  %vm3671_vm12 = vcmp.gt.f32.partialorder %v3639_v7, 0.0  ;;  %v3687_v54 = vmul.f32 0.01, %v3639_v7 }
 0x368   : > { %v4963_v57 = vpop.f32.mrf.mxu0  ;;  %4779 = vst [vmem:[%s5828_s14 + $0x20] sm:$0xff] %v3713_v14   ;;  %3839 = vadd.xlane.f32.xlu1 %v3814_v29  ;;  %5015 = vmatprep.mubr.bf16.mxu1 %v3713_v14 }
 0x369   : > { %v3642_v59 = vadd.f32 %v4962_v31, %v3545_v32  ;;  %v3703_v18 = vsel %vm3671_vm12, %v3639_v7, %v3687_v54  ;;  %v3854_v7 = vand.u32 127, %v3853_v16  ;;  %v3860_v32 = vld [vmem:[#allocation3 + $0x10] sm:$0xff] }
 0x36a   : > { %v4964_v46 = vpop.f32.mrf.mxu0  ;;  %v3815_v45 = vmul.f32 %v3703_v18, %v3703_v18 }
 0x36b   : > { %v4965_v17 = vadd.f32 %v4964_v46, %v4963_v57  ;;  %vm3672_vm13 = vcmp.gt.f32.partialorder %v3642_v59, 0.0  ;;  %v3688_v37 = vmul.f32 0.01, %v3642_v59  ;;  %vm3855_vm0 = vcmp.eq.s32.totalorder %v3854_v7, 3  ;;  %v3861_v46 = vld [vmem:[#allocation3 + $0x18] sm:$0xff] }
 0x36c   : > { %v4966_v50 = vpop.f32.mrf.mxu0  ;;  %3841 = vadd.xlane.f32.xlu0 %v3815_v45  ;;  %v7276_v10 = vsel %vm3855_vm0, 1.0, %v5479_v56 }
 0x36d   : > { %v3647_v3 = vadd.f32 %v4965_v17, %v3550_v53  ;;  %v3704_v43 = vsel %vm3672_vm13, %v3642_v59, %v3688_v37 }
 0x36e   : > { %v4967_v34 = vpop.f32.mrf.mxu0  ;;  %v3714_v0 = vpack.c.bf16 %v3704_v43, %v3703_v18  ;;  %v3816_v35 = vmul.f32 %v3704_v43, %v3704_v43 }
 0x36f   : > { %v4968_v62 = vadd.f32 %v4967_v34, %v4966_v50  ;;  %vm3673_vm14 = vcmp.gt.f32.partialorder %v3647_v3, 0.0  ;;  %v3689_v15 = vmul.f32 0.01, %v3647_v3 }
 0x370   : > { %v4969_v52 = vpop.f32.mrf.mxu0  ;;  %4780 = vst [vmem:[%s5828_s14 + $0x28] sm:$0xff] %v3714_v0   ;;  %3843 = vadd.xlane.f32.xlu1 %v3816_v35  ;;  %5016 = vmatmul.mubr.bf16.gmra.mxu1 %v3714_v0  ;;  %v3864_v35 = vld [vmem:[#allocation3 + $0x30] sm:$0xff] }
 0x371   : > { %v3650_v27 = vadd.f32 %v4968_v62, %v3553_v33  ;;  %v3705_v41 = vsel %vm3673_vm14, %v3647_v3, %v3689_v15 }
 0x372   : > { %v4970_v8 = vpop.f32.mrf.mxu0  ;;  %v3817_v2 = vmul.f32 %v3705_v41, %v3705_v41 }
 0x373   : > { %v4971_v5 = vadd.f32 %v4970_v8, %v4969_v52  ;;  %vm3674_vm15 = vcmp.gt.f32.partialorder %v3650_v27, 0.0  ;;  %v3690_v21 = vmul.f32 0.01, %v3650_v27 }
 0x374   : > { %v4972_v58 = vpop.f32.mrf.mxu0  ;;  %3845 = vadd.xlane.f32.xlu0 %v3817_v2 }
 0x375   : > { %v3655_v36 = vadd.f32 %v4971_v5, %v3558_v6  ;;  %v3706_v11 = vsel %vm3674_vm15, %v3650_v27, %v3690_v21  ;;  %v3863_v21 = vld [vmem:[#allocation3 + $0x28] sm:$0xff] }
 0x376   : > { %v4973_v9 = vpop.f32.mrf.mxu0  ;;  %v3715_v20 = vpack.c.bf16 %v3706_v11, %v3705_v41  ;;  %v3818_v60 = vmul.f32 %v3706_v11, %v3706_v11 }
 0x377   : > { %v4974_v51 = vadd.f32 %v4973_v9, %v4972_v58  ;;  %vm3675_vm2 = vcmp.gt.f32.partialorder %v3655_v36, 0.0  ;;  %v3691_v24 = vmul.f32 0.01, %v3655_v36 }
 0x378   : > { %4781 = vst [vmem:[%s5828_s14 + $0x30] sm:$0xff] %v3715_v20   ;;  %3847 = vadd.xlane.f32.xlu1 %v3818_v60  ;;  %5019 = vmatprep.mubr.bf16.mxu1 %v3715_v20 }
 0x379   : > { %v3658_v48 = vadd.f32 %v4974_v51, %v3561_v49  ;;  %v3707_v13 = vsel %vm3675_vm2, %v3655_v36, %v3691_v24 }
 0x37a   : > { %v3819_v28 = vmul.f32 %v3707_v13, %v3707_v13 }
 0x37b   : > { %vm3676_vm3 = vcmp.gt.f32.partialorder %v3658_v48, 0.0  ;;  %v3692_v47 = vmul.f32 0.01, %v3658_v48 }
 0x37c   : > { %3849 = vadd.xlane.f32.xlu0 %v3819_v28 }
 0x37d   : > { %v3708_v25 = vsel %vm3676_vm3, %v3658_v48, %v3692_v47  ;;  %v3868_v48 = vld [vmem:[#allocation3 + $0x50] sm:$0xff] }
 0x37e   : > { %v3716_v55 = vpack.c.bf16 %v3708_v25, %v3707_v13  ;;  %v3820_v4 = vmul.f32 %v3708_v25, %v3708_v25  ;;  %v3866_v25 = vld [vmem:[#allocation3 + $0x40] sm:$0xff] }
 0x380   : > { %4782 = vst [vmem:[%s5828_s14 + $0x38] sm:$0xff] %v3716_v55   ;;  %3851 = vadd.xlane.f32.xlu1 %v3820_v4  ;;  %5020 = vmatmul.mubr.bf16.gmra.mxu1 %v3716_v55 }
 0x3cd   : > { %v3822_v23 = vpop.xlane.xlu0 %3821 }
 0x3ce   : > { %v3874_v54 = vmul.f32 %v7276_v10, %v3822_v23 }
 0x3d1   : > { %v3824_v57 = vpop.xlane.xlu0 %3823 }
 0x3d2   : > { %v3875_v22 = vmul.f32 %v7276_v10, %v3824_v57 }
 0x3d5   : > { %v3826_v12 = vpop.xlane.xlu1 %3825 }
 0x3d6   : > { %v3876_v14 = vmul.f32 %v7276_v10, %v3826_v12  ;;  %v3869_v12 = vld [vmem:[#allocation3 + $0x58] sm:$0xff] }
 0x3d9   : > { %v3828_v29 = vpop.xlane.xlu1 %3827 }
 0x3da   : > { %v3877_v18 = vmul.f32 %v7276_v10, %v3828_v29 }
 0x3dd   : > { %v3830_v43 = vpop.xlane.xlu0 %3829 }
 0x3de   : > { %v3878_v62 = vmul.f32 %v7276_v10, %v3830_v43  ;;  %v3873_v43 = vld [vmem:[#allocation3 + $0x78] sm:$0xff] }
 0x3e1   : > { %v3832_v30 = vpop.xlane.xlu1 %3831 }
 0x3e2   : > { %v3879_v2 = vmul.f32 %v7276_v10, %v3832_v30 }
 0x3e5   : > { %v3834_v38 = vpop.xlane.xlu0 %3833 }
 0x3e6   : > { %v3880_v34 = vmul.f32 %v7276_v10, %v3834_v38 }
 0x3e9   : > { %v3836_v0 = vpop.xlane.xlu1 %3835 }
 0x3ea   : > { %v3881_v27 = vmul.f32 %v7276_v10, %v3836_v0  ;;  %v3871_v0 = vld [vmem:[#allocation3 + $0x68] sm:$0xff] }
 0x3ed   : > { %v3838_v9 = vpop.xlane.xlu0 %3837 }
 0x3ee   : > { %v3882_v28 = vmul.f32 %v7276_v10, %v3838_v9 }
 0x3f1   : > { %v3840_v60 = vpop.xlane.xlu1 %3839 }
 0x3f2   : > { %v3883_v56 = vmul.f32 %v7276_v10, %v3840_v60 }
 0x3f5   : > { %v3842_v49 = vpop.xlane.xlu0 %3841 }
 0x3f6   : > { %v3884_v51 = vmul.f32 %v7276_v10, %v3842_v49 }
 0x3f9   : > { %v3844_v24 = vpop.xlane.xlu1 %3843 }
 0x3fa   : > { %v3885_v4 = vmul.f32 %v7276_v10, %v3844_v24 }
 0x3fd   : > { %v3846_v57 = vpop.xlane.xlu0 %3845 }
 0x410   : > { %v5009_v31 = vpop.f32.mrf.mxu1 }
 0x411   : > { %v3981_v63 = vadd.f32 %v5009_v31, %v3876_v14 }
 0x412   : > { %v3972_v59 = vpop.f32.mrf.mxu1 }
 0x413   : > { %v4037_v53 = vadd.f32 %v3981_v63, %v3860_v32  ;;  %v3973_v19 = vadd.f32 %v3972_v59, %v3874_v54  ;;  %v3867_v32 = vld [vmem:[#allocation3 + $0x48] sm:$0xff]  ;;  %v3848_v59 = vpop.xlane.xlu1 %3847 }
 0x414   : > { %v5010_v45 = vpop.f32.mrf.mxu1  ;;  %v3887_v30 = vmul.f32 %v7276_v10, %v3848_v59 }
 0x415   : > { %4054 = vst.msk [vmem:[#allocation3 + $0x10] sm:$0xff] %vm4051_vm1, %v4037_v53  ;;  %v4035_v17 = vadd.f32 %v3973_v19, %v3858_v61  ;;  %v3984_v37 = vadd.f32 %v5010_v45, %v3877_v18  ;;  %v3850_v18 = vpop.xlane.xlu0 %3849 }
 0x416   : > { %v3975_v50 = vpop.f32.mrf.mxu1  ;;  %v3888_v53 = vmul.f32 %v7276_v10, %v3850_v18 }
 0x417   : > { %4052 = vst.msk [vmem:[#allocation3] sm:$0xff] %vm4051_vm1, %v4035_v17  ;;  %v4038_v40 = vadd.f32 %v3984_v37, %v3861_v46  ;;  %v3976_v3 = vadd.f32 %v3975_v50, %v3875_v22  ;;  %v3852_v19 = vpop.xlane.xlu1 %3851  ;;  %v3872_v46 = vld [vmem:[#allocation3 + $0x70] sm:$0xff]  ;;  %v3886_v22 = vmul.f32 %v7276_v10, %v3846_v57  ;;  %v3870_v37 = vld [vmem:[#allocation3 + $0x60] sm:$0xff] }
 0x418   : > { %v3889_v50 = vmul.f32 %v7276_v10, %v3852_v19 }
 0x419   : > { %4055 = vst.msk [vmem:[#allocation3 + $0x18] sm:$0xff] %vm4051_vm1, %v4038_v40  ;;  %v4036_v44 = vadd.f32 %v3976_v3, %v3859_v42 }
 0x41b   : > { %4053 = vst.msk [vmem:[#allocation3 + $0x8] sm:$0xff] %vm4051_vm1, %v4036_v44 }
 0x420   : > { %v5013_v33 = vpop.f32.mrf.mxu1 }
 0x421   : > { %v3997_v15 = vadd.f32 %v5013_v33, %v3880_v34 }
 0x422   : > { %v3988_v52 = vpop.f32.mrf.mxu1 }
 0x423   : > { %v4041_v41 = vadd.f32 %v3997_v15, %v3864_v35  ;;  %v3989_v6 = vadd.f32 %v3988_v52, %v3878_v62 }
 0x424   : > { %v5014_v8 = vpop.f32.mrf.mxu1 }
 0x425   : > { %4058 = vst.msk [vmem:[#allocation3 + $0x30] sm:$0xff] %vm4051_vm1, %v4041_v41  ;;  %v4039_v26 = vadd.f32 %v3989_v6, %v3862_v1  ;;  %v4000_v5 = vadd.f32 %v5014_v8, %v3881_v27 }
 0x426   : > { %v3991_v58 = vpop.f32.mrf.mxu1 }
 0x427   : > { %4056 = vst.msk [vmem:[#allocation3 + $0x20] sm:$0xff] %vm4051_vm1, %v4039_v26  ;;  %v4042_v36 = vadd.f32 %v4000_v5, %v3865_v39  ;;  %v3992_v11 = vadd.f32 %v3991_v58, %v3879_v2 }
 0x429   : > { %4059 = vst.msk [vmem:[#allocation3 + $0x38] sm:$0xff] %vm4051_vm1, %v4042_v36  ;;  %v4040_v20 = vadd.f32 %v3992_v11, %v3863_v21 }
 0x42b   : > { %4057 = vst.msk [vmem:[#allocation3 + $0x28] sm:$0xff] %vm4051_vm1, %v4040_v20 }
 0x430   : > { %v5017_v13 = vpop.f32.mrf.mxu1 }
 0x431   : > { %v4013_v47 = vadd.f32 %v5017_v13, %v3884_v51 }
 0x432   : > { %v4004_v55 = vpop.f32.mrf.mxu1 }
 0x433   : > { %v4045_v16 = vadd.f32 %v4013_v47, %v3868_v48  ;;  %v4005_v7 = vadd.f32 %v4004_v55, %v3882_v28 }
 0x434   : > { %v5018_v23 = vpop.f32.mrf.mxu1 }
 0x435   : > { %4062 = vst.msk [vmem:[#allocation3 + $0x50] sm:$0xff] %vm4051_vm1, %v4045_v16  ;;  %v4043_v14 = vadd.f32 %v4005_v7, %v3866_v25  ;;  %v4016_v29 = vadd.f32 %v5018_v23, %v3885_v4 }
 0x436   : > { %v4007_v31 = vpop.f32.mrf.mxu1 }
 0x437   : > { %4060 = vst.msk [vmem:[#allocation3 + $0x40] sm:$0xff] %vm4051_vm1, %v4043_v14  ;;  %v4046_v54 = vadd.f32 %v4016_v29, %v3869_v12  ;;  %v4008_v63 = vadd.f32 %v4007_v31, %v3883_v56 }
 0x439   : > { %4063 = vst.msk [vmem:[#allocation3 + $0x58] sm:$0xff] %vm4051_vm1, %v4046_v54  ;;  %v4044_v61 = vadd.f32 %v4008_v63, %v3867_v32 }
 0x43b   : > { %4061 = vst.msk [vmem:[#allocation3 + $0x48] sm:$0xff] %vm4051_vm1, %v4044_v61 }
 0x440   : > { %v5021_v45 = vpop.f32.mrf.mxu1 }
 0x441   : > { %v4029_v17 = vadd.f32 %v5021_v45, %v3888_v53 }
 0x442   : > { %v4020_v42 = vpop.f32.mrf.mxu1 }
 0x443   : > { %v4049_v40 = vadd.f32 %v4029_v17, %v3872_v46  ;;  %v4021_v3 = vadd.f32 %v4020_v42, %v3886_v22 }
 0x444   : > { %v5022_v44 = vpop.f32.mrf.mxu1 }
 0x445   : > { %4066 = vst.msk [vmem:[#allocation3 + $0x70] sm:$0xff] %vm4051_vm1, %v4049_v40  ;;  %v4047_v38 = vadd.f32 %v4021_v3, %v3870_v37  ;;  %v4032_v34 = vadd.f32 %v5022_v44, %v3889_v50 }
 0x446   : > { %v4023_v35 = vpop.f32.mrf.mxu1 }
 0x447   : > { %4064 = vst.msk [vmem:[#allocation3 + $0x60] sm:$0xff] %vm4051_vm1, %v4047_v38  ;;  %v4050_v33 = vadd.f32 %v4032_v34, %v3873_v43  ;;  %v4024_v62 = vadd.f32 %v4023_v35, %v3887_v30  ;;  %4071 = sbr.rel (%p4664_p4) target bundleno = 1109 (0x455), region = 93 }
 0x449   : > { %4067 = vst.msk [vmem:[#allocation3 + $0x78] sm:$0xff] %vm4051_vm1, %v4050_v33  ;;  %v4048_v15 = vadd.f32 %v4024_v62, %v3871_v0 }
 0x44b   : > { %4065 = vst.msk [vmem:[#allocation3 + $0x68] sm:$0xff] %vm4051_vm1, %v4048_v15 }
 0x44c   : > { %v4072_v1 = vld [vmem:[#allocation3] sm:$0xff]  ;;  %v4073_v10 = vld [vmem:[#allocation3 + $0x8] sm:$0xff]  ;;  %v4074_v52 = vld [vmem:[#allocation3 + $0x10] sm:$0xff] }
 0x44d   : > { %4088 = vst.msk [vmem:[%s5819_s15] sm:$0xff] %vm4051_vm1, %v4072_v1  ;;  %4089 = vst.msk [vmem:[%s5819_s15 + $0x8] sm:$0xff] %vm4051_vm1, %v4073_v10  ;;  %v4075_v27 = vld [vmem:[#allocation3 + $0x18] sm:$0xff]  ;;  %v4076_v41 = vld [vmem:[#allocation3 + $0x20] sm:$0xff] }
 0x44e   : > { %4090 = vst.msk [vmem:[%s5819_s15 + $0x10] sm:$0xff] %vm4051_vm1, %v4074_v52  ;;  %v4077_v6 = vld [vmem:[#allocation3 + $0x28] sm:$0xff]  ;;  %4091 = vst.msk [vmem:[%s5819_s15 + $0x18] sm:$0xff] %vm4051_vm1, %v4075_v27  ;;  %v4078_v39 = vld [vmem:[#allocation3 + $0x30] sm:$0xff] }
 0x44f   : > { %4092 = vst.msk [vmem:[%s5819_s15 + $0x20] sm:$0xff] %vm4051_vm1, %v4076_v41  ;;  %4093 = vst.msk [vmem:[%s5819_s15 + $0x28] sm:$0xff] %vm4051_vm1, %v4077_v6  ;;  %v4079_v8 = vld [vmem:[#allocation3 + $0x38] sm:$0xff]  ;;  %v4080_v2 = vld [vmem:[#allocation3 + $0x40] sm:$0xff] }
 0x450   : > { %4094 = vst.msk [vmem:[%s5819_s15 + $0x30] sm:$0xff] %vm4051_vm1, %v4078_v39  ;;  %4095 = vst.msk [vmem:[%s5819_s15 + $0x38] sm:$0xff] %vm4051_vm1, %v4079_v8  ;;  %v4081_v26 = vld [vmem:[#allocation3 + $0x48] sm:$0xff]  ;;  %v4082_v5 = vld [vmem:[#allocation3 + $0x50] sm:$0xff] }
 0x451   : > { %4096 = vst.msk [vmem:[%s5819_s15 + $0x40] sm:$0xff] %vm4051_vm1, %v4080_v2  ;;  %v4083_v21 = vld [vmem:[#allocation3 + $0x58] sm:$0xff]  ;;  %4097 = vst.msk [vmem:[%s5819_s15 + $0x48] sm:$0xff] %vm4051_vm1, %v4081_v26  ;;  %v4084_v58 = vld [vmem:[#allocation3 + $0x60] sm:$0xff] }
 0x452   : > { %4098 = vst.msk [vmem:[%s5819_s15 + $0x50] sm:$0xff] %vm4051_vm1, %v4082_v5  ;;  %4099 = vst.msk [vmem:[%s5819_s15 + $0x58] sm:$0xff] %vm4051_vm1, %v4083_v21  ;;  %v4085_v36 = vld [vmem:[#allocation3 + $0x68] sm:$0xff]  ;;  %v4086_v11 = vld [vmem:[#allocation3 + $0x70] sm:$0xff] }
 0x453   : > { %4100 = vst.msk [vmem:[%s5819_s15 + $0x60] sm:$0xff] %vm4051_vm1, %v4084_v58  ;;  %4101 = vst.msk [vmem:[%s5819_s15 + $0x68] sm:$0xff] %vm4051_vm1, %v4085_v36  ;;  %v4087_v9 = vld [vmem:[#allocation3 + $0x78] sm:$0xff] }
 0x454   : > { %4102 = vst.msk [vmem:[%s5819_s15 + $0x70] sm:$0xff] %vm4051_vm1, %v4086_v11  ;;  %4103 = vst.msk [vmem:[%s5819_s15 + $0x78] sm:$0xff] %vm4051_vm1, %v4087_v9 }
 0x455 PF: > { %4115 = sbr.rel (!%p5587_p9) target bundleno = 1121 (0x461), region = 97  ;;  %s4666_s22 = sshll.u32 (%p5587_p9), %s5463_s29, 5  ;;  %v4136_v20 = vld [vmem:[%s5828_s14] sm:$0xf] (%p5587_p9)  ;;  %v4138_v60 = vld [vmem:[%s5828_s14 + $0x4] sm:$0xf] (%p5587_p9) }
 0x456   : > { %s4117_s26 = sadd.s32 (%p5587_p9), %s5459_s28, %s4666_s22  ;;  %v4140_v49 = vld [vmem:[%s5828_s14 + $0x8] sm:$0xf] (%p5587_p9)  ;;  %v4142_v51 = vld [vmem:[%s5828_s14 + $0xc] sm:$0xf] (%p5587_p9)  ;;  %v4144_v24 = vld [vmem:[%s5828_s14 + $0x10] sm:$0xf] (%p5587_p9) }
 0x457   : > { %s4667_s19 = sshll.u32 (%p5587_p9), %s4117_s26, 2  ;;  %v4146_v48 = vld [vmem:[%s5828_s14 + $0x14] sm:$0xf] (%p5587_p9)  ;;  %v4148_v13 = vld [vmem:[%s5828_s14 + $0x18] sm:$0xf] (%p5587_p9) }
 0x458   : > { %s4119_s16 = scalar_lea.vmem (%p5587_p9), %s7399_s6, %s4667_s19  ;;  %v4150_v28 = vld [vmem:[%s5828_s14 + $0x1c] sm:$0xf] (%p5587_p9)  ;;  %v4152_v47 = vld [vmem:[%s5828_s14 + $0x20] sm:$0xf] (%p5587_p9)  ;;  %v4154_v25 = vld [vmem:[%s5828_s14 + $0x24] sm:$0xf] (%p5587_p9) }
 0x459   : > { %4137 = vst [vmem:[%s4119_s16] sm:$0xf] (%p5587_p9), %v4136_v20  ;;  %4139 = vst [vmem:[%s4119_s16 + $0x8] sm:$0xf] (%p5587_p9), %v4138_v60  ;;  %v4156_v55 = vld [vmem:[%s5828_s14 + $0x28] sm:$0xf] (%p5587_p9) }
 0x45a   : > { %4141 = vst [vmem:[%s4119_s16 + $0x10] sm:$0xf] %v4140_v49  ;;  %4143 = vst [vmem:[%s4119_s16 + $0x18] sm:$0xf] %v4142_v51  ;;  %v4158_v4 = vld [vmem:[%s5828_s14 + $0x2c] sm:$0xf] }
 0x45b   : > { %4145 = vst [vmem:[%s4119_s16 + $0x20] sm:$0xf] %v4144_v24  ;;  %4147 = vst [vmem:[%s4119_s16 + $0x28] sm:$0xf] %v4146_v48  ;;  %v4160_v16 = vld [vmem:[%s5828_s14 + $0x30] sm:$0xf] }
 0x45c   : > { %4149 = vst [vmem:[%s4119_s16 + $0x30] sm:$0xf] %v4148_v13  ;;  %4151 = vst [vmem:[%s4119_s16 + $0x38] sm:$0xf] %v4150_v28  ;;  %v4162_v7 = vld [vmem:[%s5828_s14 + $0x34] sm:$0xf] }
 0x45d   : > { %4153 = vst [vmem:[%s4119_s16 + $0x40] sm:$0xf] %v4152_v47  ;;  %4155 = vst [vmem:[%s4119_s16 + $0x48] sm:$0xf] %v4154_v25  ;;  %v4164_v12 = vld [vmem:[%s5828_s14 + $0x38] sm:$0xf] }
 0x45e   : > { %4157 = vst [vmem:[%s4119_s16 + $0x50] sm:$0xf] %v4156_v55  ;;  %4159 = vst [vmem:[%s4119_s16 + $0x58] sm:$0xf] %v4158_v4  ;;  %v4166_v23 = vld [vmem:[%s5828_s14 + $0x3c] sm:$0xf] }
 0x45f   : > { %4161 = vst [vmem:[%s4119_s16 + $0x60] sm:$0xf] %v4160_v16  ;;  %4163 = vst [vmem:[%s4119_s16 + $0x68] sm:$0xf] %v4162_v7 }
 0x460   : > { %4165 = vst [vmem:[%s4119_s16 + $0x70] sm:$0xf] %v4164_v12  ;;  %4167 = vst [vmem:[%s4119_s16 + $0x78] sm:$0xf] %v4166_v23 }
 0x461 PF: > { %s18_s9 = sadd.s32 1, %s5475_s9   ;;  %s7446_s26 = sld [smem:[#allocation6_spill]] }
 0x462   : > { %p15_p5 = scmp.ge.s32.totalorder %s18_s9, 6   ;;  %s7447_s27 = sld [smem:[#allocation11_spill]] }
 0x463   : > { %s7448_s28 = sld [smem:[#allocation7_spill]]  ;;  %s7452_s24 = smov %s5447_s25 }
 0x464   : > { %s7449_s29 = sld [smem:[#allocation8_spill]]  ;;  %s7453_s25 = smov %s5592_s20 }
 0x465   : > { %s7450_s30 = sld [smem:[#allocation9_spill]]  ;;  %17 = sbr.rel (!%p15_p5) target bundleno = 7 (0x7), region = 190 }
 0x466   : > { %s7451_s8 = sld [smem:[#allocation10_spill]] }

// kernel: network_forward.3
= control target key start
LH: loop header
LB: loop body
LE: loop exit
PB: predicated region body
PF: predicated region fallthrough
CT: control target
= control target key end

     0   :  { %s6889_s0 = inlined_call_operand.vmem [shape: bf16[2,128,256], index: 0, kind: input, shape index: {}]   ;;  %s6890_s1 = inlined_call_operand.vmem [shape: bf16[768,256], index: 1, kind: input, shape index: {}]   ;;  %s6891_s2 = inlined_call_operand.vmem [shape: f32[1,256], index: 2, kind: input, shape index: {}]   ;;  %s6892_s3 = inlined_call_operand.hbm [shape: bf16[768,256], index: 3, kind: input, shape index: {}]   ;;  %s6893_s4 = inlined_call_operand.vmem [shape: f32[1,256], index: 4, kind: input, shape index: {}]   ;;  %s6894_s5 = inlined_call_operand.vmem [shape: bf16[256,8], index: 5, kind: input, shape index: {}]   ;;  %s6895_s6 = inlined_call_operand.vmem [shape: bf16[2,128,256], index: 6, kind: output, shape index: {0}]   ;;  %s6896_s7 = inlined_call_operand.vmem [shape: f32[2,128,8], index: 7, kind: output, shape index: {1}]  }
   0x1   :  { %6914 = sst [smem:[#allocation17_spill]] %s6892_s3 }
   0x2   :  { %13 = vsyncpa [#allocation5], 0 }
   0x3   :  { %15 = vsyncpa [#allocation5 + $0x1], 0  ;;  %s5183_s24 = smov 0   ;;  %s5185_s25 = smov 0  }
   0x4   :  { %s5187_s26 = smov 0   ;;  %s5189_s27 = smov 0  }
   0x5   :  { %s5191_s28 = smov 0   ;;  %s5193_s29 = smov 0  }
   0x6   :  { %s5195_s30 = smov 0   ;;  %s5197_s8 = smov 0  }
   0x7   :  { %s5199_s9 = smov 0   ;;  %s5201_s10 = smov 0  }
   0x8 LB: > { %6915 = sst [smem:[#allocation8_spill]] %s5110_s27  ;;  %s3953_s11 = sadd.s32 4294967295, %s5134_s10   ;;  %s5134_s10 = sphi %s5201_s10, %s21_s10   ;;  %s5130_s9 = sphi %s5199_s9, %s6955_s9   ;;  %s5126_s8 = sphi %s5197_s8, %s6954_s8   ;;  %s5122_s30 = sphi %s5195_s30, %s6959_s30   ;;  %s5118_s29 = sphi %s5193_s29, %s6958_s29   ;;  %s5114_s28 = sphi %s5191_s28, %s6951_s28   ;;  %s5110_s27 = sphi %s5189_s27, %s6950_s27   ;;  %s5106_s26 = sphi %s5187_s26, %s6949_s26   ;;  %s5102_s25 = sphi %s5185_s25, %s6957_s25   ;;  %s5098_s24 = sphi %s5183_s24, %s6956_s24  }
   0x9   : > { %6916 = sst [smem:[#allocation9_spill]] %s5114_s28  ;;  %s30_s12 = sadd.s32 1, %s5126_s8 }
   0xa   : > { %6917 = sst [smem:[#allocation10_spill]] %s5126_s8  ;;  %p31_p0 = scmp.ge.s32.totalorder %s30_s12, 2 }
   0xb   : > { %6918 = sst [smem:[#allocation11_spill]] %s5130_s9  ;;  %s33_s13 = sadd.s32 1, %s5130_s9 }
   0xc   : > { %s108_s14 = sadd.s32 1, %s5114_s28  ;;  %p115_p1 = scmp.ne.s32.totalorder %s5114_s28, %s5110_s27 }
   0xd   : > { %s6961_s12 = smov (%p31_p0, %s30_s12), 0  ;;  %s6963_s13 = smov (!%p31_p0, %s33_s13), %s5130_s9 }
   0xe   : > { %6919 = sst [smem:[#allocation12_spill]] %s6961_s12  ;;  %s105_s15 = ssub.s32 %s5126_s8, %s6961_s12 }
   0xf   : > { %p116_p2 = scmp.eq.s32.totalorder %s5134_s10, 0  ;;  %p35_p3 = scmp.ge.s32.totalorder %s6963_s13, 2 }
  0x10   : > { %p106_p4 = scmp.eq.s32.totalorder %s105_s15, 0  ;;  %p121_p6 = scmp.ne.s32.totalorder %s5110_s27, %s5106_s26 }
  0x11   : > { %p5243_p5 = por %p116_p2, %p115_p1  ;;  %s6965_s13 = smov (%p35_p3, %s6963_s13), 0 }
  0x12   : > { %6921 = sst [smem:[#allocation13_spill]] %s6965_s13  ;;  %p122_p7 = scmp.eq.s32.totalorder %s3953_s11, 0 }
  0x13   : > { %s5251_s17 = scalar_select %p106_p4, %s5114_s28, %s108_s14  }
  0x14   : > { %s183_s18 = ssub.s32 %s5130_s9, %s6965_s13  ;;  %s188_s20 = sadd.s32 1, %s5102_s25 }
  0x15   : > { %6922 = sst [smem:[#allocation14_spill]] %s5251_s17  ;;  %s185_s19 = sor.u32 %s183_s18, %s105_s15 }
  0x16   : > { %p5256_p8 = por %p122_p7, %p121_p6  ;;  %p186_p9 = scmp.eq.s32.totalorder %s185_s19, 0 }
  0x17   : > { %p198_p10 = scmp.ne.s32.totalorder %s5102_s25, %s5098_s24  ;;  %p199_p11 = scmp.eq.s32.totalorder %s3953_s11, 3 }
  0x18   : > { %s5263_s22 = scalar_select %p186_p9, %s5102_s25, %s188_s20  }
  0x19   : > { %p5265_p12 = por %p199_p11, %p198_p10  ;;  %p4664_p13 = scmp.lt.s32.totalorder %s5134_s10, 4 }
  0x1a   : > { %6924 = sst [smem:[#allocation15_spill]] %s5263_s22  ;;  %s265_s26 = sand.u32 1, %s5114_s28  }
  0x1b   : > { %s4656_s14 = smul.u32 384, %s265_s26  ;;  %s3957_s12 = sshll.u32 %s5126_s8, 6 }
  0x1c   : > { %p5274_p0 = pnand %p4664_p13, %p5243_p5  ;;  %s6927_s3 = sld [smem:[#allocation17_spill]] }
  0x1d   : > { %s269_s19 = scalar_lea.vmem [#allocation4], %s4656_s14  ;;  %s266_s9 = scalar_lea.sflag [#allocation5], %s265_s26 }
  0x1e   : > { %s275_s20 = sshll.u32 %s269_s19, 4  ;;  %p5026_p1 = pneg %p5274_p0  ;;  %s276_s20 = int_to_ptr.vmem [resolvable:$true] %s275_s20 }
  0x1f   : > { %s5037_s17 = scalar_lea.vmem %s276_s20, 6144  ;;  %s5136_s16 = smov [#allocation4]  }
  0x20   : > { %p5038_p2 = scmp.ne.s32.totalorder %s276_s20, %s5037_s17  ;;  %s5042_s8 = sshll.u32 %s5136_s16, 4  ;;  %s5043_s8 = int_to_ptr.vmem [resolvable:$false] %s5042_s8 }
  0x21   : > { %s5044_s28 = scalar_lea.vmem %s5043_s8, 12288  ;;  %p5045_p5 = scmp.lt.s32.totalorder %s276_s20, %s5043_s8 }
  0x22   : > { %s274_s11 = scalar_lea.hbm %s6927_s3, %s3957_s12  ;;  %p5040_p3 = pnand %p5038_p2, %p5026_p1 }
  0x23   : > { %p5046_p6 = scmp.lt.s32.totalorder %s5044_s28, %s5037_s17 }
  0x24   : > { %p5041_p4 = pneg %p5040_p3 }
  0x25   : > { %p5047_p7 = por %p5046_p6, %p5045_p5 }
  0x27   : > { %p5048_p9 = pnand %p5047_p7, %p5041_p4 }
  0x29   : > { %5051 = shalt.err (!%p5048_p9)
}
  0x2a   : > { %s5137_s12 = smov 128   ;;  %s5138_s13 = smov 64  }
  0x2b   : > { %s5139_s26 = smov 4   ;;  %p3958_p10 = scmp.ge.s32.totalorder %s5134_s10, 1 }
  0x2c   : > { %4663 = dma.hbm_to_vmem [thread:$0]  (!%p5274_p0), %s274_s11, 6144, %s276_s20, %s266_s9, %s5137_s12, %s5138_s13, %s5139_s26  }
  0x2d   : > { %p298_p11 = scmp.lt.s32.totalorder %s5134_s10, 5 }
  0x2f   : > { %p299_p13 = pnand %p3958_p10, %p298_p11 }
  0x31   : > { %302 = sbr.rel (%p299_p13) target bundleno = 1067 (0x42b), region = 44 }
  0x36   : > { %s304_s14 = sand.u32 1, %s5110_s27  }
  0x37   : > { %s4657_s8 = smul.u32 384, %s304_s14  ;;  %s305_s28 = scalar_lea.sflag [#allocation5], %s304_s14 }
  0x39   : > { %s5288_s17 = scalar_lea.vmem [#allocation4], %s4657_s8 }
  0x3a   : > { %5093 = dma.done.wait (%p5256_p8), %s305_s28, 6144  }
  0x3b   : > { %5095 = vsyncadd (%p5256_p8), %s305_s28, 4294961152  ;;  %s346_s9 = sand.u32 1, %s5098_s24   ;;  %p356_p0 = scmp.lt.s32.totalorder %s5122_s30, 1 }
  0x3c   : > { %s3959_s15 = sshll.u32 %s346_s9, 6  ;;  %p361_p1 = scmp.lt.s32.totalorder %s5118_s29, 1 }
  0x3d   : > { %s3962_s18 = sshll.u32 %s5118_s29, 4  ;;  %s5321_s22 = scalar_lea.vmem [#allocation6], %s3959_s15 }
  0x3e   : > { %s357_s11 = scalar_select %p356_p0, %s5122_s30, 1 }
  0x3f   : > { %s5300_s19 = scalar_select %p361_p1, %s5118_s29, 1 }
  0x40   : > { %s4271_s20 = sshll.u32 %s357_s11, 7  ;;  %p365_p2 = scmp.lt.s32.totalorder %s3962_s18, 31 }
  0x41   : > { %s5305_s12 = scalar_lea.vmem %s6889_s0, %s4271_s20  ;;  %s363_s14 = scalar_lea.vmem %s6893_s4, %s5300_s19 }
  0x42   : > { %s6967_s18 = smov (!%p365_p2, %s3962_s18), 31  ;;  %s5314_s28 = scalar_lea.vmem %s6896_s7, %s4271_s20 }
  0x43   : > { %s3963_s9 = sshll.u32 %s6967_s18, 2  ;;  %p3966_p8 = scmp.ne.s32.totalorder %s5118_s29, 0 }
  0x44   : > { %s5319_s11 = scalar_lea.vmem %s6894_s5, %s3963_s9 }
  0x45   : > { %379 = sbr.rel (%p3966_p8) target bundleno = 481 (0x1e1), region = 52 }
  0x4a   : > { %v4751_v0 = vld [vmem:[%s6890_s1 + $0x74] ss:$8 sps:$4 sm:$0xff]   ;;  %v4755_v2 = vld [vmem:[%s6890_s1 + $0x70] ss:$8 sps:$4 sm:$0xff]   ;;  %v4757_v4 = vld [vmem:[%s6890_s1 + $0x64] ss:$8 sps:$4 sm:$0xff]   ;;  %v428_v38 = vlaneseq }
  0x4b   : > { %v4753_v1 = vld [vmem:[%s6890_s1 + $0x174] ss:$8 sps:$4 sm:$0xff]   ;;  %1307 = vmatprep.subr.bf16.mxu0 %v4751_v0  ;;  %v4756_v3 = vld [vmem:[%s6890_s1 + $0x170] ss:$8 sps:$4 sm:$0xff]   ;;  %v4759_v5 = vld [vmem:[%s6890_s1 + $0x164] ss:$8 sps:$4 sm:$0xff]  }
  0x4c   : > { %1420 = vmatprep.subr.bf16.mxu1 %v4753_v1  ;;  %1308 = vmatpush1.bf16.msra.mxu0 %v4755_v2  ;;  %v4761_v6 = vld [vmem:[%s6890_s1 + $0x60] ss:$8 sps:$4 sm:$0xff]   ;;  %v4763_v8 = vld [vmem:[%s6890_s1 + $0x54] ss:$8 sps:$4 sm:$0xff]   ;;  %v4767_v10 = vld [vmem:[%s6890_s1 + $0x50] ss:$8 sps:$4 sm:$0xff]  }
  0x4d   : > { %1421 = vmatpush1.bf16.msra.mxu1 %v4756_v3  ;;  %1309 = vmatprep.subr.bf16.mxu0 %v4757_v4  ;;  %v4762_v7 = vld [vmem:[%s6890_s1 + $0x160] ss:$8 sps:$4 sm:$0xff]   ;;  %v4765_v9 = vld [vmem:[%s6890_s1 + $0x154] ss:$8 sps:$4 sm:$0xff]   ;;  %v4768_v11 = vld [vmem:[%s6890_s1 + $0x150] ss:$8 sps:$4 sm:$0xff]  }
  0x4e   : > { %1422 = vmatprep.subr.bf16.mxu1 %v4759_v5  ;;  %v4769_v12 = vld [vmem:[%s6890_s1 + $0x44] ss:$8 sps:$4 sm:$0xff]   ;;  %v4773_v14 = vld [vmem:[%s6890_s1 + $0x40] ss:$8 sps:$4 sm:$0xff]   ;;  %v4775_v16 = vld [vmem:[%s6890_s1 + $0x34] ss:$8 sps:$4 sm:$0xff]  }
  0x4f   : > { %v4771_v13 = vld [vmem:[%s6890_s1 + $0x144] ss:$8 sps:$4 sm:$0xff]   ;;  %v4774_v15 = vld [vmem:[%s6890_s1 + $0x140] ss:$8 sps:$4 sm:$0xff]   ;;  %v4777_v17 = vld [vmem:[%s6890_s1 + $0x134] ss:$8 sps:$4 sm:$0xff]  }
  0x50   : > { %1310 = vmatpush1.bf16.msra.mxu0 %v4761_v6  ;;  %v4779_v18 = vld [vmem:[%s6890_s1 + $0x30] ss:$8 sps:$4 sm:$0xff]   ;;  %v4781_v20 = vld [vmem:[%s6890_s1 + $0x24] ss:$8 sps:$4 sm:$0xff]   ;;  %v4785_v22 = vld [vmem:[%s6890_s1 + $0x20] ss:$8 sps:$4 sm:$0xff]  }
  0x51   : > { %1423 = vmatpush1.bf16.msra.mxu1 %v4762_v7  ;;  %1311 = vmatprep.subr.bf16.mxu0 %v4763_v8  ;;  %v4780_v19 = vld [vmem:[%s6890_s1 + $0x130] ss:$8 sps:$4 sm:$0xff]   ;;  %v4783_v21 = vld [vmem:[%s6890_s1 + $0x124] ss:$8 sps:$4 sm:$0xff]   ;;  %v4786_v23 = vld [vmem:[%s6890_s1 + $0x120] ss:$8 sps:$4 sm:$0xff]  }
  0x52   : > { %1424 = vmatprep.subr.bf16.mxu1 %v4765_v9  ;;  %v4787_v24 = vld [vmem:[%s6890_s1 + $0x14] ss:$8 sps:$4 sm:$0xff]   ;;  %v4791_v26 = vld [vmem:[%s6890_s1 + $0x10] ss:$8 sps:$4 sm:$0xff]   ;;  %v4793_v28 = vld [vmem:[%s6890_s1 + $0x4] ss:$8 sps:$4 sm:$0xff]  }
  0x53   : > { %v4789_v25 = vld [vmem:[%s6890_s1 + $0x114] ss:$8 sps:$4 sm:$0xff]   ;;  %v4792_v27 = vld [vmem:[%s6890_s1 + $0x110] ss:$8 sps:$4 sm:$0xff]   ;;  %v4795_v29 = vld [vmem:[%s6890_s1 + $0x104] ss:$8 sps:$4 sm:$0xff]  }
  0x54   : > { %1312 = vmatpush1.bf16.msra.mxu0 %v4767_v10  ;;  %v4797_v30 = vld [vmem:[%s6890_s1] ss:$8 sps:$4 sm:$0xff]   ;;  %v4799_v32 = vld [vmem:[%s6890_s1 + $0xf4] ss:$8 sps:$4 sm:$0xff]   ;;  %v4803_v34 = vld [vmem:[%s6890_s1 + $0xf0] ss:$8 sps:$4 sm:$0xff]  }
  0x55   : > { %1425 = vmatpush1.bf16.msra.mxu1 %v4768_v11  ;;  %1313 = vmatprep.subr.bf16.mxu0 %v4769_v12  ;;  %v4798_v31 = vld [vmem:[%s6890_s1 + $0x100] ss:$8 sps:$4 sm:$0xff]   ;;  %v4801_v33 = vld [vmem:[%s6890_s1 + $0x1f4] ss:$8 sps:$4 sm:$0xff]   ;;  %v4804_v35 = vld [vmem:[%s6890_s1 + $0x1f0] ss:$8 sps:$4 sm:$0xff]  }
  0x56   : > { %1426 = vmatprep.subr.bf16.mxu1 %v4771_v13  ;;  %v4805_v36 = vld [vmem:[%s6890_s1 + $0xe4] ss:$8 sps:$4 sm:$0xff]   ;;  %v4809_v39 = vld [vmem:[%s6890_s1 + $0xe0] ss:$8 sps:$4 sm:$0xff]   ;;  %v4811_v41 = vld [vmem:[%s6890_s1 + $0xd4] ss:$8 sps:$4 sm:$0xff]  }
  0x57   : > { %v4807_v37 = vld [vmem:[%s6890_s1 + $0x1e4] ss:$8 sps:$4 sm:$0xff]   ;;  %v4810_v40 = vld [vmem:[%s6890_s1 + $0x1e0] ss:$8 sps:$4 sm:$0xff]   ;;  %v4813_v42 = vld [vmem:[%s6890_s1 + $0x1d4] ss:$8 sps:$4 sm:$0xff]  }
  0x58   : > { %1314 = vmatpush1.bf16.msra.mxu0 %v4773_v14  ;;  %v5450_v43 = vshrl.u32 %v428_v38, 7  ;;  %v4815_v44 = vld [vmem:[%s6890_s1 + $0xd0] ss:$8 sps:$4 sm:$0xff]   ;;  %v4817_v46 = vld [vmem:[%s6890_s1 + $0xc4] ss:$8 sps:$4 sm:$0xff]   ;;  %vm5140_vm3 = vmmov 1  }
  0x59   : > { %1427 = vmatpush1.bf16.msra.mxu1 %v4774_v15  ;;  %1315 = vmatprep.subr.bf16.mxu0 %v4775_v16  ;;  %v4816_v45 = vld [vmem:[%s6890_s1 + $0x1d0] ss:$8 sps:$4 sm:$0xff]   ;;  %v4819_v47 = vld [vmem:[%s6890_s1 + $0x1c4] ss:$8 sps:$4 sm:$0xff]   ;;  %v4821_v48 = vld [vmem:[%s6890_s1 + $0xc0] ss:$8 sps:$4 sm:$0xff]  }
  0x5a   : > { %1428 = vmatprep.subr.bf16.mxu1 %v4777_v17  ;;  %v5468_v49 = vld [vmem:[%s5305_s12] sm:$0xff]  ;;  %vm445_vm0 = vcmp.eq.s32.totalorder %v5450_v43, 0  ;;  %v5475_v51 = vld [vmem:[%s5305_s12 + $0x8] sm:$0xff]  ;;  %v5478_v52 = vld [vmem:[%s5305_s12 + $0x78] sm:$0xff]  ;;  %vm493_vm1 = vcmp.lt.s32.totalorder %v5450_v43, 1  ;;  %vm606_vm5 = vcmp.lt.s32.totalorder %v5450_v43, 7 }
  0x5b   : > { %v4822_v50 = vld [vmem:[%s6890_s1 + $0x1c0] ss:$8 sps:$4 sm:$0xff]   ;;  %v397_v53 = vunpack.c.h.bf16 %v5468_v49  ;;  %v4823_v54 = vld [vmem:[%s6890_s1 + $0xb4] ss:$8 sps:$4 sm:$0xff]   ;;  %v399_v55 = vunpack.c.h.bf16 %v5475_v51  ;;  %v427_v56 = vunpack.c.h.bf16 %v5478_v52  ;;  %v3968_v57 = vcombine.high %v5468_v49, %v5475_v51  ;;  %vm5496_vm2 = vmneg %vm445_vm0 }
  0x5c   : > { %1316 = vmatpush1.bf16.msra.mxu0 %v4779_v18  ;;  %v4825_v58 = vld [vmem:[%s6890_s1 + $0x1b4] ss:$8 sps:$4 sm:$0xff]   ;;  %v396_v61 = vunpack.c.l.bf16 %v5468_v49  ;;  %v398_v62 = vunpack.c.l.bf16 %v5475_v51  ;;  %v4827_v1 = vld [vmem:[%s6890_s1 + $0xb0] ss:$8 sps:$4 sm:$0xff]   ;;  %vm5529_vm4 = vmpackc.low %vm5140_vm3, %vm5496_vm2  ;;  %v426_v16 = vunpack.c.l.bf16 %v5478_v52  ;;  %vm2270_vm9 = vcmask 64512  }
  0x5d   : > { %1429 = vmatpush1.bf16.msra.mxu1 %v4780_v19  ;;  %1317 = vmatprep.subr.bf16.mxu0 %v4781_v20  ;;  %v462_v59 = vrot.slane %v397_v53, 7  ;;  %v5504_v63 = vrot.slane %v399_v55, 7  ;;  %v5508_v0 = vrot.slane %v427_v56, 7  ;;  %v4828_v4 = vld [vmem:[%s6890_s1 + $0x1b0] ss:$8 sps:$4 sm:$0xff]  }
  0x5e   : > { %1430 = vmatprep.subr.bf16.mxu1 %v4783_v21  ;;  %1452 = vmatprep.mubr.bf16.mxu1 %v3968_v57  ;;  %v5513_v2 = vrot.slane %v396_v61, 1  ;;  %v5515_v3 = vrot.slane %v398_v62, 1  ;;  %v4829_v8 = vld [vmem:[%s6890_s1 + $0xa4] ss:$8 sps:$4 sm:$0xff]   ;;  %v4833_v11 = vld [vmem:[%s6890_s1 + $0xa0] ss:$8 sps:$4 sm:$0xff]  }
  0x5f   : > { %v523_v5 = vsel %vm493_vm1, %v462_v59, %v5504_v63  ;;  %v525_v6 = vsel %vm493_vm1, %v5508_v0, %v462_v59  ;;  %v4831_v9 = vld [vmem:[%s6890_s1 + $0x1a4] ss:$8 sps:$4 sm:$0xff]   ;;  %v4834_v12 = vld [vmem:[%s6890_s1 + $0x1a0] ss:$8 sps:$4 sm:$0xff]   ;;  %v5549_v13 = vld [vmem:[%s5305_s12 + $0x10] sm:$0xff] }
  0x60   : > { %1318 = vmatpush1.bf16.msra.mxu0 %v4785_v22  ;;  %v4081_v10 = vpack.c.bf16 %v523_v5, %v525_v6  ;;  %v5552_v14 = vld [vmem:[%s5305_s12 + $0x18] sm:$0xff]  ;;  %v5558_v15 = vsel %vm606_vm5, %v5513_v2, %v5515_v3  ;;  %v401_v20 = vunpack.c.h.bf16 %v5549_v13 }
  0x61   : > { %1431 = vmatpush1.bf16.msra.mxu1 %v4786_v23  ;;  %1319 = vmatprep.subr.bf16.mxu0 %v4787_v24  ;;  %v4835_v17 = vld [vmem:[%s6890_s1 + $0x94] ss:$8 sps:$4 sm:$0xff]   ;;  %v4839_v19 = vld [vmem:[%s6890_s1 + $0x90] ss:$8 sps:$4 sm:$0xff]   ;;  %v403_v21 = vunpack.c.h.bf16 %v5552_v14  ;;  %v461_v23 = vrot.slane %v396_v61, 7  ;;  %v463_v24 = vrot.slane %v398_v62, 7 }
  0x62   : > { %1432 = vmatprep.subr.bf16.mxu1 %v4789_v25  ;;  %4082 = vmatprep.mubr.msk.bf16.mxu0 %vm5529_vm4, %v4081_v10  ;;  %v4837_v18 = vld [vmem:[%s6890_s1 + $0x194] ss:$8 sps:$4 sm:$0xff]   ;;  %v4840_v22 = vld [vmem:[%s6890_s1 + $0x190] ss:$8 sps:$4 sm:$0xff]   ;;  %v5577_v25 = vrot.slane %v426_v16, 7 }
  0x63   : > { %v4851_v38 = vld [vmem:[%s6890_s1 + $0x274] ss:$8 sps:$4 sm:$0xff]  }
  0x64   : > { %1320 = vmatpush1.bf16.msra.mxu0 %v4791_v26  ;;  %v4841_v26 = vld [vmem:[%s6890_s1 + $0x84] ss:$8 sps:$4 sm:$0xff]   ;;  %v5639_v62 = vld [vmem:[%s5305_s12 + $0x30] sm:$0xff] }
  0x65   : > { %1433 = vmatpush1.bf16.msra.mxu1 %v4792_v27  ;;  %1321 = vmatprep.subr.bf16.mxu0 %v4793_v28  ;;  %v4843_v27 = vld [vmem:[%s6890_s1 + $0x184] ss:$8 sps:$4 sm:$0xff]   ;;  %v4845_v28 = vld [vmem:[%s6890_s1 + $0x80] ss:$8 sps:$4 sm:$0xff]   ;;  %v4859_v6 = vld [vmem:[%s6890_s1 + $0x254] ss:$8 sps:$4 sm:$0xff]  }
  0x66   : > { %1434 = vmatprep.subr.bf16.mxu1 %v4795_v29  ;;  %v466_v29 = vrot.slane %v401_v20, 7 }
  0x68   : > { %1322 = vmatpush1.bf16.msra.mxu0 %v4797_v30  ;;  %v468_v30 = vrot.slane %v403_v21, 7 }
  0x69   : > { %1435 = vmatpush1.bf16.msra.mxu1 %v4798_v31  ;;  %1323 = vmatprep.subr.bf16.mxu0 %v4799_v32  ;;  %v5593_v31 = vld [vmem:[%s5305_s12 + $0x20] sm:$0xff]  ;;  %v5596_v32 = vld [vmem:[%s5305_s12 + $0x28] sm:$0xff] }
  0x6a   : > { %1436 = vmatprep.subr.bf16.mxu1 %v4801_v33  ;;  %v4846_v33 = vld [vmem:[%s6890_s1 + $0x180] ss:$8 sps:$4 sm:$0xff]   ;;  %v404_v57 = vunpack.c.l.bf16 %v5593_v31  ;;  %v6906_v61 = vunpack.c.l.bf16 %v5596_v32 }
  0x6c   : > { %1324 = vmatpush2.bf16.msra.mxu0 %v4803_v34  ;;  %v522_v34 = vsel %vm493_vm1, %v461_v23, %v463_v24  ;;  %v469_v7 = vrot.slane %v404_v57, 7 }
  0x6d   : > { %1437 = vmatpush2.bf16.msra.mxu1 %v4804_v35  ;;  %1325 = vmatprep.subr.bf16.mxu0 %v4805_v36  ;;  %v524_v35 = vsel %vm493_vm1, %v5577_v25, %v461_v23  ;;  %v400_v36 = vunpack.c.l.bf16 %v5549_v13 }
  0x6e   : > { %1438 = vmatprep.subr.bf16.mxu1 %v4807_v37  ;;  %v402_v37 = vunpack.c.l.bf16 %v5552_v14 }
  0x70   : > { %1326 = vmatpush2.bf16.msra.mxu0 %v4809_v39  ;;  %v405_v39 = vunpack.c.h.bf16 %v5593_v31 }
  0x71   : > { %1439 = vmatpush2.bf16.msra.mxu1 %v4810_v40  ;;  %1327 = vmatprep.subr.bf16.mxu0 %v4811_v41  ;;  %v407_v40 = vunpack.c.h.bf16 %v5596_v32  ;;  %v4085_v41 = vpack.c.bf16 %v522_v34, %v524_v35  ;;  %v5689_v34 = vld [vmem:[%s5305_s12 + $0x40] sm:$0xff]  ;;  %v5693_v35 = vrot.slane %v397_v53, 1  ;;  %v3971_v53 = vcombine.low %v5593_v31, %v5596_v32 }
  0x72   : > { %1440 = vmatprep.subr.bf16.mxu1 %v4813_v42  ;;  %v3967_v42 = vcombine.low %v5468_v49, %v5475_v51  ;;  %v470_v59 = vrot.slane %v405_v39, 7  ;;  %v5709_v49 = vrot.slane %v401_v20, 1 }
  0x73   : > { %v472_v60 = vrot.slane %v407_v40, 7 }
  0x74   : > { %1328 = vmatpush2.bf16.msra.mxu0 %v4815_v44  ;;  %v519_v44 = vsel %vm493_vm1, %v466_v29, %v468_v30  ;;  %v517_v10 = vsel %vm493_vm1, %v468_v30, %v470_v59  ;;  %v6905_v30 = vunpack.c.l.bf16 %v5639_v62 }
  0x75   : > { %1441 = vmatpush2.bf16.msra.mxu1 %v4816_v45  ;;  %1329 = vmatprep.subr.bf16.mxu0 %v4817_v46  ;;  %v521_v45 = vsel %vm493_vm1, %v5504_v63, %v466_v29  ;;  %v4849_v46 = vld [vmem:[%s6890_s1 + $0x270] ss:$8 sps:$4 sm:$0xff]  }
  0x76   : > { %1442 = vmatprep.subr.bf16.mxu1 %v4819_v47  ;;  %v465_v47 = vrot.slane %v400_v36, 7  ;;  %v5644_v63 = vld [vmem:[%s5305_s12 + $0x38] sm:$0xff]  ;;  %v473_v20 = vrot.slane %v6905_v30, 7 }
  0x78   : > { %1330 = vmatpush2.bf16.msra.mxu0 %v4821_v48  ;;  %v467_v48 = vrot.slane %v402_v37, 7  ;;  %v520_v5 = vsel %vm493_vm1, %v463_v24, %v465_v47  ;;  %v3972_v24 = vcombine.high %v5593_v31, %v5596_v32 }
  0x79   : > { %1443 = vmatpush2.bf16.msra.mxu1 %v4822_v50  ;;  %1331 = vmatprep.subr.bf16.mxu0 %v4823_v54  ;;  %v4854_v50 = vld [vmem:[%s6890_s1 + $0x264] ss:$8 sps:$4 sm:$0xff]   ;;  %v3970_v54 = vcombine.high %v5549_v13, %v5552_v14 }
  0x7a   : > { %1444 = vmatprep.subr.bf16.mxu1 %v4825_v58  ;;  %v678_v58 = vpack.c.bf16 %v519_v44, %v521_v45  ;;  %v5705_v44 = vld [vmem:[%s5305_s12 + $0x48] sm:$0xff]  ;;  %v413_v45 = vunpack.c.h.bf16 %v5689_v34 }
  0x7c   : > { %1332 = vmatpush2.bf16.msra.mxu0 %v4827_v1  ;;  %v4852_v1 = vld [vmem:[%s6890_s1 + $0x260] ss:$8 sps:$4 sm:$0xff]  }
  0x7d   : > { %1445 = vmatpush2.bf16.msra.mxu1 %v4828_v4  ;;  %1333 = vmatprep.subr.bf16.mxu0 %v4829_v8  ;;  %v518_v4 = vsel %vm493_vm1, %v465_v47, %v467_v48  ;;  %v409_v8 = vunpack.c.h.bf16 %v5639_v62  ;;  %v415_v47 = vunpack.c.h.bf16 %v5705_v44 }
  0x7e   : > { %1446 = vmatprep.subr.bf16.mxu1 %v4831_v9  ;;  %v515_v9 = vsel %vm493_vm1, %v470_v59, %v472_v60 }
  0x7f   : > { %v684_v23 = vpack.c.bf16 %v515_v9, %v517_v10  ;;  %v478_v10 = vrot.slane %v413_v45, 7 }
  0x80   : > { %1334 = vmatpush2.bf16.msra.mxu0 %v4833_v11  ;;  %v471_v11 = vrot.slane %v6906_v61, 7 }
  0x81   : > { %1447 = vmatpush2.bf16.msra.mxu1 %v4834_v12  ;;  %1335 = vmatprep.subr.bf16.mxu0 %v4835_v17  ;;  %v6904_v12 = vunpack.c.h.bf16 %v5644_v63  ;;  %v677_v17 = vpack.c.bf16 %v518_v4, %v520_v5  ;;  %v3974_v5 = vcombine.high %v5639_v62, %v5644_v63 }
  0x82   : > { %1448 = vmatprep.subr.bf16.mxu1 %v4837_v18  ;;  %v3969_v18 = vcombine.low %v5549_v13, %v5552_v14  ;;  %v512_v9 = vsel %vm493_vm1, %v471_v11, %v473_v20  ;;  %v587_v14 = vrot.slane %v409_v8, 1 }
  0x83   : > { %v5684_v29 = vrot.slane %v6904_v12, 7 }
  0x84   : > { %1336 = vmatpush2.bf16.msra.mxu0 %v4839_v19  ;;  %v4857_v19 = vld [vmem:[%s6890_s1 + $0x250] ss:$8 sps:$4 sm:$0xff]  }
  0x85   : > { %1449 = vmatpush2.bf16.msra.mxu1 %v4840_v22  ;;  %1337 = vmatprep.subr.bf16.mxu0 %v4841_v26  ;;  %v4862_v22 = vld [vmem:[%s6890_s1 + $0x244] ss:$8 sps:$4 sm:$0xff]   ;;  %v516_v26 = vsel %vm493_vm1, %v467_v48, %v469_v7 }
  0x86   : > { %1450 = vmatprep.subr.bf16.mxu1 %v4843_v27  ;;  %v514_v27 = vsel %vm493_vm1, %v469_v7, %v471_v11  ;;  %v605_v11 = vrot.slane %v427_v56, 1 }
  0x87   : > { %v683_v51 = vpack.c.bf16 %v514_v27, %v516_v26  ;;  %v4875_v26 = vld [vmem:[%s6890_s1 + $0x214] ss:$8 sps:$4 sm:$0xff]  }
  0x88   : > { %1338 = vmatpush2.bf16.msra.mxu0 %v4845_v28  ;;  %v474_v28 = vrot.slane %v409_v8, 7 }
  0x89   : > { %1451 = vmatpush2.bf16.msra.mxu1 %v4846_v33  ;;  %1533 = vmatprep.subr.bf16.mxu0 %v4851_v38  ;;  %v6903_v33 = vunpack.c.l.bf16 %v5644_v63 }
  0x8a   : > { %4624 = vmatprep.subr.bf16.mxu1 %v4851_v38  ;;  %v577_v38 = vrot.slane %v399_v55, 1  ;;  %v4867_v55 = vld [vmem:[%s6890_s1 + $0x234] ss:$8 sps:$4 sm:$0xff]   ;;  %v513_v13 = vsel %vm493_vm1, %v472_v60, %v474_v28  ;;  %v4870_v60 = vld [vmem:[%s6890_s1 + $0x224] ss:$8 sps:$4 sm:$0xff]  }
  0x8b   : > { %4086 = vmatmul.mubr.msk.bf16.vlgmr.msra.gmra.mxu0 %vm5529_vm4, %v4085_v41  ;;  %v5699_v41 = vrot.slane %v400_v36, 1  ;;  %v511_v36 = vsel %vm493_vm1, %v474_v28, %v5684_v29 }
  0x8c   : > { %1453 = vmatmul.mubr.bf16.vlgmr.msra.gmra.mxu1 %v3967_v42  ;;  %1534 = vmatpush1.bf16.msra.mxu0 %v4849_v46  ;;  %v4860_v42 = vld [vmem:[%s6890_s1 + $0x240] ss:$8 sps:$4 sm:$0xff]   ;;  %v5730_v48 = vsel %vm606_vm5, %v577_v38, %v5709_v49  ;;  %v690_v4 = vpack.c.bf16 %v511_v36, %v513_v13  ;;  %v4873_v36 = vld [vmem:[%s6890_s1 + $0x210] ss:$8 sps:$4 sm:$0xff]   ;;  %v4878_v13 = vld [vmem:[%s6890_s1 + $0x204] ss:$8 sps:$4 sm:$0xff]  }
  0x8d   : > { %4640 = vmatpush1.bf16.msra.mxu1 %v4849_v46  ;;  %1535 = vmatprep.subr.bf16.mxu0 %v4854_v50  ;;  %v475_v46 = vrot.slane %v6903_v33, 7  ;;  %v5746_v59 = vsel %vm606_vm5, %v5515_v3, %v5699_v41  ;;  %v414_v3 = vunpack.c.l.bf16 %v5705_v44 }
  0x8e   : > { %4625 = vmatprep.subr.bf16.mxu1 %v4854_v50  ;;  %1349 = vmatprep.mubr.bf16.mxu0 %v678_v58  ;;  %v5735_v50 = vsel %vm606_vm5, %v5693_v35, %v577_v38 }
  0x8f   : > { %1462 = vmatprep.mubr.bf16.mxu1 %v3970_v54  ;;  %v4865_v54 = vld [vmem:[%s6890_s1 + $0x230] ss:$8 sps:$4 sm:$0xff]   ;;  %v676_v58 = vpack.c.bf16 %v5730_v48, %v5735_v50  ;;  %v510_v7 = vsel %vm493_vm1, %v473_v20, %v475_v46  ;;  %v5788_v38 = vrot.slane %v414_v3, 7  ;;  %v585_v48 = vrot.slane %v407_v40, 1 }
  0x90   : > { %1536 = vmatpush1.bf16.msra.mxu0 %v4852_v1  ;;  %v689_v27 = vpack.c.bf16 %v510_v7, %v512_v9  ;;  %v5820_v9 = vld [vmem:[%s5305_s12 + $0x60] sm:$0xff] }
  0x91   : > { %4641 = vmatpush1.bf16.msra.mxu1 %v4852_v1  ;;  %1537 = vmatprep.subr.bf16.mxu0 %v4859_v6 }
  0x92   : > { %4626 = vmatprep.subr.bf16.mxu1 %v4859_v6  ;;  %v412_v6 = vunpack.c.l.bf16 %v5689_v34 }
  0x93   : > { %1350 = vmatmul.mubr.bf16.gmra.mxu0 %v677_v17  ;;  %v480_v17 = vrot.slane %v415_v47, 7 }
  0x94   : > { %1463 = vmatmul.mubr.bf16.gmra.mxu1 %v3969_v18  ;;  %1538 = vmatpush1.bf16.msra.mxu0 %v4857_v19  ;;  %v5766_v18 = vld [vmem:[%s5305_s12 + $0x50] sm:$0xff]  ;;  %v477_v28 = vrot.slane %v412_v6, 7 }
  0x95   : > { %4642 = vmatpush1.bf16.msra.mxu1 %v4857_v19  ;;  %1539 = vmatprep.subr.bf16.mxu0 %v4862_v22  ;;  %v4868_v19 = vld [vmem:[%s6890_s1 + $0x220] ss:$8 sps:$4 sm:$0xff]   ;;  %v417_v56 = vunpack.c.h.bf16 %v5766_v18 }
  0x96   : > { %4627 = vmatprep.subr.bf16.mxu1 %v4862_v22  ;;  %1359 = vmatprep.mubr.bf16.mxu0 %v684_v23  ;;  %v5772_v22 = vld [vmem:[%s5305_s12 + $0x58] sm:$0xff]  ;;  %v5775_v23 = vld [vmem:[%s5305_s12 + $0x70] sm:$0xff] }
  0x97   : > { %1472 = vmatprep.mubr.bf16.mxu1 %v3972_v24  ;;  %v3973_v24 = vcombine.low %v5639_v62, %v5644_v63  ;;  %v3977_v1 = vcombine.low %v5766_v18, %v5772_v22 }
  0x98   : > { %1540 = vmatpush1.bf16.msra.mxu0 %v4860_v42 }
  0x99   : > { %4643 = vmatpush1.bf16.msra.mxu1 %v4860_v42  ;;  %1541 = vmatprep.subr.bf16.mxu0 %v4867_v55  ;;  %v507_v42 = vsel %vm493_vm1, %v478_v10, %v480_v17 }
  0x9a   : > { %4628 = vmatprep.subr.bf16.mxu1 %v4867_v55  ;;  %v425_v55 = vunpack.c.h.bf16 %v5775_v23 }
  0x9b   : > { %1360 = vmatmul.mubr.bf16.gmra.mxu0 %v683_v51  ;;  %v509_v51 = vsel %vm493_vm1, %v5684_v29, %v478_v10  ;;  %v424_v10 = vunpack.c.l.bf16 %v5775_v23 }
  0x9c   : > { %1473 = vmatmul.mubr.bf16.gmra.mxu1 %v3971_v53  ;;  %1542 = vmatpush1.bf16.msra.mxu0 %v4865_v54  ;;  %v419_v53 = vunpack.c.h.bf16 %v5772_v22  ;;  %v5806_v29 = vrot.slane %v425_v55, 1  ;;  %v696_v20 = vpack.c.bf16 %v507_v42, %v509_v51  ;;  %v604_v42 = vrot.slane %v426_v16, 1 }
  0x9d   : > { %4644 = vmatpush1.bf16.msra.mxu1 %v4865_v54  ;;  %1543 = vmatprep.subr.bf16.mxu0 %v4870_v60  ;;  %v3976_v54 = vcombine.high %v5689_v34, %v5705_v44  ;;  %v3975_v51 = vcombine.low %v5689_v34, %v5705_v44  ;;  %v5850_v33 = vrot.slane %v424_v10, 1  ;;  %v421_v16 = vunpack.c.h.bf16 %v5820_v9  ;;  %v4910_v34 = vld [vmem:[%s6890_s1 + $0x284] ss:$8 sps:$4 sm:$0xff]  }
  0x9e   : > { %4629 = vmatprep.subr.bf16.mxu1 %v4870_v60  ;;  %1369 = vmatprep.mubr.bf16.mxu0 %v690_v4  ;;  %v506_v60 = vsel %vm493_vm1, %v477_v28, %v5788_v38  ;;  %v482_v4 = vrot.slane %v417_v56, 7  ;;  %v484_v7 = vrot.slane %v419_v53, 7  ;;  %v583_v44 = vrot.slane %v405_v39, 1 }
  0x9f   : > { %1482 = vmatprep.mubr.bf16.mxu1 %v3974_v5  ;;  %v508_v5 = vsel %vm493_vm1, %v475_v46, %v477_v28  ;;  %v416_v46 = vunpack.c.l.bf16 %v5766_v18  ;;  %v5839_v28 = vsel %vm606_vm5, %v605_v11, %v5693_v35  ;;  %v5863_v61 = vsel %vm606_vm5, %v5850_v33, %v604_v42 }
  0xa0   : > { %1544 = vmatpush1.bf16.msra.mxu0 %v4868_v19  ;;  %v695_v35 = vpack.c.bf16 %v506_v60, %v508_v5  ;;  %v503_v12 = vsel %vm493_vm1, %v482_v4, %v484_v7 }
  0xa1   : > { %4645 = vmatpush1.bf16.msra.mxu1 %v4868_v19  ;;  %1545 = vmatprep.subr.bf16.mxu0 %v4875_v26  ;;  %v5826_v19 = vsel %vm606_vm5, %v5806_v29, %v605_v11  ;;  %v505_v11 = vsel %vm493_vm1, %v480_v17, %v482_v4  ;;  %v4881_v17 = vld [vmem:[%s6890_s1 + $0x2f0] ss:$8 sps:$4 sm:$0xff]  }
  0xa2   : > { %4630 = vmatprep.subr.bf16.mxu1 %v4875_v26  ;;  %v418_v26 = vunpack.c.l.bf16 %v5772_v22  ;;  %v702_v5 = vpack.c.bf16 %v503_v12, %v505_v11 }
  0xa3   : > { %1370 = vmatmul.mubr.bf16.gmra.mxu0 %v689_v27  ;;  %v5834_v27 = vld [vmem:[%s5305_s12 + $0x68] sm:$0xff] }
  0xa4   : > { %1483 = vmatmul.mubr.bf16.gmra.mxu1 %v3973_v24  ;;  %1546 = vmatpush1.bf16.msra.mxu0 %v4873_v36  ;;  %v4876_v24 = vld [vmem:[%s6890_s1 + $0x200] ss:$8 sps:$4 sm:$0xff]   ;;  %v6907_v30 = vunpack.c.h.bf16 %v5834_v27  ;;  %v483_v60 = vrot.slane %v418_v26, 7  ;;  %v422_v11 = vunpack.c.l.bf16 %v5834_v27 }
  0xa5   : > { %4646 = vmatpush1.bf16.msra.mxu1 %v4873_v36  ;;  %1547 = vmatprep.subr.bf16.mxu0 %v4878_v13  ;;  %v4883_v36 = vld [vmem:[%s6890_s1 + $0x2f4] ss:$8 sps:$4 sm:$0xff]  }
  0xa6   : > { %4631 = vmatprep.subr.bf16.mxu1 %v4878_v13  ;;  %1379 = vmatprep.mubr.bf16.mxu0 %v696_v20  ;;  %v5868_v20 = vsel %vm606_vm5, %v604_v42, %v5513_v2  ;;  %v4886_v2 = vld [vmem:[%s6890_s1 + $0x2e4] ss:$8 sps:$4 sm:$0xff]   ;;  %v486_v42 = vrot.slane %v421_v16, 7  ;;  %v488_v13 = vrot.slane %v6907_v30, 7 }
  0xa7   : > { %1492 = vmatprep.mubr.bf16.mxu1 %v3976_v54  ;;  %v481_v54 = vrot.slane %v416_v46, 7 }
  0xa8   : > { %1548 = vmatpush1.bf16.msra.mxu0 %v4876_v24  ;;  %v499_v30 = vsel %vm493_vm1, %v486_v42, %v488_v13 }
  0xa9   : > { %4647 = vmatpush1.bf16.msra.mxu1 %v4876_v24  ;;  %1549 = vmatprep.subr.bf16.mxu0 %v4883_v36  ;;  %v3978_v24 = vcombine.high %v5766_v18, %v5772_v22  ;;  %v502_v12 = vsel %vm493_vm1, %v481_v54, %v483_v60 }
  0xaa   : > { %4632 = vmatprep.subr.bf16.mxu1 %v4883_v36  ;;  %v4884_v36 = vld [vmem:[%s6890_s1 + $0x2e0] ss:$8 sps:$4 sm:$0xff]  }
  0xab   : > { %1380 = vmatmul.mubr.bf16.gmra.mxu0 %v695_v35  ;;  %v504_v35 = vsel %vm493_vm1, %v5788_v38, %v481_v54  ;;  %v501_v38 = vsel %vm493_vm1, %v484_v7, %v486_v42  ;;  %v4889_v54 = vld [vmem:[%s6890_s1 + $0x2d0] ss:$8 sps:$4 sm:$0xff]   ;;  %v3980_v7 = vcombine.high %v5820_v9, %v5834_v27  ;;  %v490_v42 = vrot.slane %v425_v55, 7 }
  0xac   : > { %1493 = vmatmul.mubr.bf16.gmra.mxu1 %v3975_v51  ;;  %1550 = vmatpush2.bf16.msra.mxu0 %v4881_v17  ;;  %v420_v51 = vunpack.c.l.bf16 %v5820_v9  ;;  %v701_v4 = vpack.c.bf16 %v502_v12, %v504_v35  ;;  %v708_v12 = vpack.c.bf16 %v499_v30, %v501_v38 }
  0xad   : > { %4648 = vmatpush2.bf16.msra.mxu1 %v4881_v17  ;;  %1551 = vmatprep.subr.bf16.mxu0 %v4886_v2  ;;  %v4891_v17 = vld [vmem:[%s6890_s1 + $0x2d4] ss:$8 sps:$4 sm:$0xff]   ;;  %v497_v38 = vsel %vm493_vm1, %v488_v13, %v490_v42  ;;  %v5950_v13 = vrot.slane %v413_v45, 1 }
  0xae   : > { %4633 = vmatprep.subr.bf16.mxu1 %v4886_v2  ;;  %1389 = vmatprep.mubr.bf16.mxu0 %v702_v5  ;;  %v485_v2 = vrot.slane %v420_v51, 7  ;;  %v487_v5 = vrot.slane %v422_v11, 7 }
  0xaf   : > { %1502 = vmatprep.mubr.bf16.mxu1 %v3978_v24  ;;  %v4894_v24 = vld [vmem:[%s6890_s1 + $0x2c4] ss:$8 sps:$4 sm:$0xff]  }
  0xb0   : > { %1552 = vmatpush2.bf16.msra.mxu0 %v4884_v36  ;;  %v498_v35 = vsel %vm493_vm1, %v485_v2, %v487_v5  ;;  %v500_v30 = vsel %vm493_vm1, %v483_v60, %v485_v2  ;;  %v4897_v60 = vld [vmem:[%s6890_s1 + $0x2b0] ss:$8 sps:$4 sm:$0xff]   ;;  %v4902_v2 = vld [vmem:[%s6890_s1 + $0x2a4] ss:$8 sps:$4 sm:$0xff]  }
  0xb1   : > { %4649 = vmatpush2.bf16.msra.mxu1 %v4884_v36  ;;  %1553 = vmatprep.subr.bf16.mxu0 %v4891_v17  ;;  %v4892_v36 = vld [vmem:[%s6890_s1 + $0x2c0] ss:$8 sps:$4 sm:$0xff]   ;;  %v707_v55 = vpack.c.bf16 %v498_v35, %v500_v30  ;;  %v592_v30 = vrot.slane %v414_v3, 1  ;;  %v599_v3 = vrot.slane %v421_v16, 1 }
  0xb2   : > { %4634 = vmatprep.subr.bf16.mxu1 %v4891_v17  ;;  %v495_v17 = vsel %vm493_vm1, %v490_v42, %v5508_v0  ;;  %v3982_v0 = vcombine.high %v5775_v23, %v5478_v52 }
  0xb3   : > { %1390 = vmatmul.mubr.bf16.gmra.mxu0 %v701_v4  ;;  %v3979_v4 = vcombine.low %v5820_v9, %v5834_v27 }
  0xb4   : > { %1503 = vmatmul.mubr.bf16.gmra.mxu1 %v3977_v1  ;;  %1554 = vmatpush2.bf16.msra.mxu0 %v4889_v54  ;;  %v4899_v1 = vld [vmem:[%s6890_s1 + $0x2b4] ss:$8 sps:$4 sm:$0xff]  }
  0xb5   : > { %4650 = vmatpush2.bf16.msra.mxu1 %v4889_v54  ;;  %1555 = vmatprep.subr.bf16.mxu0 %v4894_v24  ;;  %v489_v54 = vrot.slane %v424_v10, 7  ;;  %v595_v10 = vrot.slane %v417_v56, 1 }
  0xb6   : > { %4635 = vmatprep.subr.bf16.mxu1 %v4894_v24  ;;  %1399 = vmatprep.mubr.bf16.mxu0 %v708_v12  ;;  %v714_v24 = vpack.c.bf16 %v495_v17, %v497_v38  ;;  %v593_v12 = vrot.slane %v415_v47, 1  ;;  %v4907_v47 = vld [vmem:[%s6890_s1 + $0x294] ss:$8 sps:$4 sm:$0xff]   ;;  %v582_v38 = vrot.slane %v404_v57, 1  ;;  %v6933_v57 = vpack.c.bf16 %v5746_v59, %v5558_v15 }
  0xb7   : > { %1512 = vmatprep.mubr.bf16.mxu1 %v3980_v7  ;;  %v4900_v7 = vld [vmem:[%s6890_s1 + $0x2a0] ss:$8 sps:$4 sm:$0xff]   ;;  %v494_v42 = vsel %vm493_vm1, %v489_v54, %v5577_v25  ;;  %v496_v45 = vsel %vm493_vm1, %v487_v5, %v489_v54  ;;  %v5976_v5 = vrot.slane %v412_v6, 1  ;;  %v597_v6 = vrot.slane %v419_v53, 1 }
  0xb8   : > { %1556 = vmatpush2.bf16.msra.mxu0 %v4892_v36  ;;  %v713_v56 = vpack.c.bf16 %v494_v42, %v496_v45  ;;  %v618_v35 = vsel %vm606_vm5, %v593_v12, %v595_v10  ;;  %v620_v25 = vsel %vm606_vm5, %v5950_v13, %v593_v12  ;;  %v626_v15 = vsel %vm606_vm5, %v585_v48, %v587_v14 }
  0xb9   : > { %4651 = vmatpush2.bf16.msra.mxu1 %v4892_v36  ;;  %1557 = vmatprep.subr.bf16.mxu0 %v4899_v1  ;;  %v3981_v36 = vcombine.low %v5775_v23, %v5478_v52  ;;  %v4905_v52 = vld [vmem:[%s6890_s1 + $0x290] ss:$8 sps:$4 sm:$0xff]   ;;  %v581_v23 = vrot.slane %v403_v21, 1  ;;  %v700_v18 = vpack.c.bf16 %v618_v35, %v620_v25  ;;  %v4908_v21 = vld [vmem:[%s6890_s1 + $0x280] ss:$8 sps:$4 sm:$0xff]   ;;  %v619_v39 = vsel %vm606_vm5, %v5976_v5, %v592_v30 }
  0xba   : > { %4636 = vmatprep.subr.bf16.mxu1 %v4899_v1  ;;  %v594_v1 = vrot.slane %v416_v46, 1  ;;  %v628_v59 = vsel %vm606_vm5, %v583_v44, %v585_v48 }
  0xbb   : > { %1400 = vmatmul.mubr.bf16.gmra.mxu0 %v707_v55  ;;  %v632_v53 = vsel %vm606_vm5, %v5709_v49, %v581_v23  ;;  %v630_v16 = vsel %vm606_vm5, %v581_v23, %v583_v44  ;;  %v614_v55 = vsel %vm606_vm5, %v597_v6, %v599_v3  ;;  %v580_v49 = vrot.slane %v402_v37, 1 }
  0xbc   : > { %1513 = vmatmul.mubr.bf16.gmra.mxu1 %v3979_v4  ;;  %1558 = vmatpush2.bf16.msra.mxu0 %v4897_v60  ;;  %v617_v46 = vsel %vm606_vm5, %v592_v30, %v594_v1  ;;  %v616_v4 = vsel %vm606_vm5, %v595_v10, %v597_v6  ;;  %v6932_v37 = vunpack.c.h.bf16 %v5834_v27  ;;  %v6935_v10 = vunpack.c.l.bf16 %v5639_v62 }
  0xbd   : > { %4652 = vmatpush2.bf16.msra.mxu1 %v4897_v60  ;;  %1559 = vmatprep.subr.bf16.mxu0 %v4902_v2  ;;  %v699_v17 = vpack.c.bf16 %v617_v46, %v619_v39  ;;  %v682_v60 = vpack.c.bf16 %v630_v16, %v632_v53  ;;  %v706_v54 = vpack.c.bf16 %v614_v55, %v616_v4  ;;  %v819_v6 = vsub.s32 0, %v5450_v43 }
  0xbe   : > { %4637 = vmatprep.subr.bf16.mxu1 %v4902_v2  ;;  %1409 = vmatprep.mubr.bf16.mxu0 %v714_v24  ;;  %v596_v2 = vrot.slane %v418_v26, 1  ;;  %v598_v24 = vrot.slane %v420_v51, 1  ;;  %v601_v31 = vrot.slane %v6932_v37, 1  ;;  %v629_v50 = vsel %vm606_vm5, %v580_v49, %v582_v38 }
  0xbf   : > { %1522 = vmatprep.mubr.bf16.mxu1 %v3982_v0  ;;  %v631_v40 = vsel %vm606_vm5, %v5699_v41, %v580_v49  ;;  %v6052_v41 = vadd.s32 120, %v5450_v43  ;;  %v6934_v0 = vunpack.c.l.bf16 %v5596_v32  ;;  %v688_v42 = vpack.c.bf16 %v626_v15, %v628_v59 }
  0xc0   : > { %1560 = vmatpush2.bf16.msra.mxu0 %v4900_v7  ;;  %v613_v8 = vsel %vm606_vm5, %v596_v2, %v598_v24  ;;  %v610_v22 = vsel %vm606_vm5, %v601_v31, %v5806_v29  ;;  %v612_v9 = vsel %vm606_vm5, %v599_v3, %v601_v31  ;;  %v681_v26 = vpack.c.bf16 %v629_v50, %v631_v40 }
  0xc1   : > { %4653 = vmatpush2.bf16.msra.mxu1 %v4900_v7  ;;  %1561 = vmatprep.subr.bf16.mxu0 %v4907_v47  ;;  %v584_v12 = vrot.slane %v6934_v0, 1  ;;  %v586_v7 = vrot.slane %v6935_v10, 1  ;;  %v712_v45 = vpack.c.bf16 %v610_v22, %v612_v9  ;;  %v6936_v29 = vunpack.c.h.bf16 %v5644_v63 }
  0xc2   : > { %4638 = vmatprep.subr.bf16.mxu1 %v4907_v47  ;;  %v600_v47 = vrot.slane %v422_v11, 1  ;;  %vm573_vm6 = vcmp.eq.s32.totalorder %v6052_v41, 127 }
  0xc3   : > { %1410 = vmatmul.mubr.bf16.gmra.mxu0 %v713_v56  ;;  %v589_v56 = vrot.slane %v6936_v29, 1  ;;  %v627_v32 = vsel %vm606_vm5, %v582_v38, %v584_v12  ;;  %vm4087_vm7 = vmneg %vm573_vm6 }
  0xc4   : > { %1523 = vmatmul.mubr.bf16.gmra.mxu1 %v3981_v36  ;;  %1562 = vmatpush2.bf16.msra.mxu0 %v4905_v52  ;;  %v625_v36 = vsel %vm606_vm5, %v584_v12, %v586_v7  ;;  %v609_v62 = vsel %vm606_vm5, %v600_v47, %v5850_v33  ;;  %v611_v27 = vsel %vm606_vm5, %v598_v24, %v600_v47  ;;  %vm4088_vm8 = vmpackc.low %vm4087_vm7, %vm5140_vm3 }
  0xc5   : > { %4654 = vmatpush2.bf16.msra.mxu1 %v4905_v52  ;;  %1563 = vmatprep.subr.bf16.mxu0 %v4910_v34  ;;  %v622_v11 = vsel %vm606_vm5, %v589_v56, %v5950_v13  ;;  %v624_v35 = vsel %vm606_vm5, %v587_v14, %v589_v56  ;;  %v687_v25 = vpack.c.bf16 %v625_v36, %v627_v32  ;;  %v6937_v52 = vunpack.c.l.bf16 %v5644_v63 }
  0xc6   : > { %4639 = vmatprep.subr.bf16.mxu1 %v4910_v34  ;;  %1565 = vmatprep.mubr.bf16.mxu0 %v676_v58  ;;  %v615_v58 = vsel %vm606_vm5, %v594_v1, %v596_v2  ;;  %v711_v30 = vpack.c.bf16 %v609_v62, %v611_v27  ;;  %v694_v1 = vpack.c.bf16 %v622_v11, %v624_v35 }
  0xc7   : > { %1605 = vmatprep.mubr.bf16.mxu1 %v700_v18  ;;  %v705_v51 = vpack.c.bf16 %v613_v8, %v615_v58  ;;  %v588_v23 = vrot.slane %v6937_v52, 1  ;;  %v6938_v33 = vpack.c.bf16 %v5839_v28, %v5826_v19  ;;  %v6939_v63 = vpack.c.bf16 %v5868_v20, %v5863_v61  ;;  %v815_v19 = vld [vmem:[%s6891_s2] sm:$0x3] }
  0xc8   : > { %1564 = vmatpush2.bf16.msra.mxu0 %v4908_v21  ;;  %v823_v61 = vsub.s32 1, %v5450_v43 }
  0xc9   : > { %4655 = vmatpush2.bf16.msra.mxu1 %v4908_v21  ;;  %v621_v13 = vsel %vm606_vm5, %v588_v23, %v5976_v5  ;;  %v623_v34 = vsel %vm606_vm5, %v586_v7, %v588_v23  ;;  %v6105_v21 = vrot.slane %v815_v19, %v819_v6 }
  0xca   : > { %v693_v44 = vpack.c.bf16 %v621_v13, %v623_v34  ;;  %v6115_v49 = vrot.slane %v815_v19, %v823_v61 }
  0xcb   : > { %1566 = vmatmul.mubr.bf16.vlgmr.msra.gmra.mxu0 %v6933_v57 }
  0xcc   : > { %1606 = vmatmul.mubr.bf16.vlgmr.msra.gmra.mxu1 %v699_v17  ;;  %1575 = vmatprep.mubr.bf16.mxu0 %v682_v60 }
  0xcd   : > { %1615 = vmatprep.mubr.bf16.mxu1 %v706_v54 }
  0xd3   : > { %1576 = vmatmul.mubr.bf16.gmra.mxu0 %v681_v26 }
  0xd4   : > { %1616 = vmatmul.mubr.bf16.gmra.mxu1 %v705_v51  ;;  %1585 = vmatprep.mubr.bf16.mxu0 %v688_v42 }
  0xd5   : > { %1625 = vmatprep.mubr.bf16.mxu1 %v712_v45  ;;  %v5141_v45 = vmov 0.0  }
  0xd6   : > { %2271 = vst.msk [vmem:[#allocation3] sm:$0xff] %vm2270_vm9, %v5141_v45  ;;  %2272 = vst.msk [vmem:[#allocation3 + $0x8] sm:$0xff] %vm2270_vm9, %v5141_v45 }
  0xd7   : > { %2273 = vst.msk [vmem:[#allocation3 + $0x10] sm:$0xff] %vm2270_vm9, %v5141_v45  ;;  %2274 = vst.msk [vmem:[#allocation3 + $0x18] sm:$0xff] %vm2270_vm9, %v5141_v45 }
  0xd8   : > { %2275 = vst.msk [vmem:[#allocation3 + $0x20] sm:$0xff] %vm2270_vm9, %v5141_v45  ;;  %2276 = vst.msk [vmem:[#allocation3 + $0x28] sm:$0xff] %vm2270_vm9, %v5141_v45 }
  0xd9   : > { %2277 = vst.msk [vmem:[#allocation3 + $0x30] sm:$0xff] %vm2270_vm9, %v5141_v45  ;;  %2278 = vst.msk [vmem:[#allocation3 + $0x38] sm:$0xff] %vm2270_vm9, %v5141_v45 }
  0xda   : > { %2279 = vst.msk [vmem:[#allocation3 + $0x40] sm:$0xff] %vm2270_vm9, %v5141_v45  ;;  %2280 = vst.msk [vmem:[#allocation3 + $0x48] sm:$0xff] %vm2270_vm9, %v5141_v45 }
  0xdb   : > { %1586 = vmatmul.mubr.bf16.gmra.mxu0 %v687_v25  ;;  %2281 = vst.msk [vmem:[#allocation3 + $0x50] sm:$0xff] %vm2270_vm9, %v5141_v45  ;;  %2282 = vst.msk [vmem:[#allocation3 + $0x58] sm:$0xff] %vm2270_vm9, %v5141_v45 }
  0xdc   : > { %1626 = vmatmul.mubr.bf16.gmra.mxu1 %v711_v30  ;;  %1595 = vmatprep.mubr.bf16.mxu0 %v694_v1  ;;  %2283 = vst.msk [vmem:[#allocation3 + $0x60] sm:$0xff] %vm2270_vm9, %v5141_v45  ;;  %2284 = vst.msk [vmem:[#allocation3 + $0x68] sm:$0xff] %vm2270_vm9, %v5141_v45 }
  0xdd   : > { %4090 = vmatprep.mubr.msk.bf16.mxu1 %vm4088_vm8, %v6938_v33  ;;  %2285 = vst.msk [vmem:[#allocation3 + $0x70] sm:$0xff] %vm2270_vm9, %v5141_v45  ;;  %2286 = vst.msk [vmem:[#allocation3 + $0x78] sm:$0xff] %vm2270_vm9, %v5141_v45 }
  0xe3   : > { %1596 = vmatmul.mubr.bf16.gmra.mxu0 %v693_v44 }
  0xe4   : > { %4094 = vmatmul.mubr.msk.bf16.gmra.mxu1 %vm4088_vm8, %v6939_v63 }
 0x14b   : > { %v6097_v28 = vpop.f32.mrf.mxu0 }
 0x14c   : > { %v6099_v3 = vpop.f32.mrf.mxu1 }
 0x14d   : > { %v6101_v5 = vpop.f32.mrf.mxu0 }
 0x14e   : > { %v6103_v18 = vpop.f32.mrf.mxu1  ;;  %v1344_v45 = vadd.f32 %v6101_v5, %v6115_v49 }
 0x14f   : > { %v1345_v46 = vpop.f32.mrf.mxu0 }
 0x150   : > { %v1458_v39 = vpop.f32.mrf.mxu1  ;;  %v1346_v20 = vadd.f32 %v1345_v46, %v6105_v21 }
 0x151   : > { %v6109_v53 = vpop.f32.mrf.mxu0 }
 0x152   : > { %v6111_v16 = vpop.f32.mrf.mxu1  ;;  %v6113_v55 = vadd.f32 %v1458_v39, %v1346_v20 }
 0x153   : > { %v1351_v4 = vpop.f32.mrf.mxu0 }
 0x154   : > { %v1464_v17 = vpop.f32.mrf.mxu1  ;;  %v1352_v38 = vadd.f32 %v1351_v4, %v6105_v21 }
 0x155   : > { %v1353_v60 = vpop.f32.mrf.mxu0 }
 0x156   : > { %v1466_v54 = vpop.f32.mrf.mxu1  ;;  %v6118_v2 = vadd.f32 %v1464_v17, %v1352_v38  ;;  %v1354_v24 = vadd.f32 %v1353_v60, %v6115_v49 }
 0x157   : > { %v1355_v48 = vpop.f32.mrf.mxu0 }
 0x158   : > { %v1468_v14 = vpop.f32.mrf.mxu1  ;;  %v6121_v37 = vadd.f32 %v1466_v54, %v1354_v24  ;;  %v1356_v31 = vadd.f32 %v1355_v48, %v6105_v21 }
 0x159   : > { %v1357_v57 = vpop.f32.mrf.mxu0 }
 0x15a   : > { %v1470_v50 = vpop.f32.mrf.mxu1  ;;  %v6124_v40 = vadd.f32 %v1468_v14, %v1356_v31  ;;  %v1358_v8 = vadd.f32 %v1357_v57, %v6115_v49 }
 0x15b   : > { %v1361_v58 = vpop.f32.mrf.mxu0 }
 0x15c   : > { %v1474_v15 = vpop.f32.mrf.mxu1  ;;  %v6127_v59 = vadd.f32 %v1470_v50, %v1358_v8  ;;  %v1362_v22 = vadd.f32 %v1361_v58, %v6105_v21 }
 0x15d   : > { %v1363_v9 = vpop.f32.mrf.mxu0 }
 0x15e   : > { %v1476_v26 = vpop.f32.mrf.mxu1  ;;  %v6130_v51 = vadd.f32 %v1474_v15, %v1362_v22  ;;  %v1364_v0 = vadd.f32 %v1363_v9, %v6115_v49 }
 0x15f   : > { %v1365_v12 = vpop.f32.mrf.mxu0 }
 0x160   : > { %v1478_v10 = vpop.f32.mrf.mxu1  ;;  %v6133_v7 = vadd.f32 %v1476_v26, %v1364_v0  ;;  %v1366_v42 = vadd.f32 %v1365_v12, %v6105_v21 }
 0x161   : > { %v1367_v47 = vpop.f32.mrf.mxu0 }
 0x162   : > { %v1480_v29 = vpop.f32.mrf.mxu1  ;;  %v6152_v56 = vadd.f32 %v1478_v10, %v1366_v42  ;;  %v1368_v36 = vadd.f32 %v1367_v47, %v6115_v49  ;;  %v1342_v42 = vadd.f32 %v6097_v28, %v6105_v21  ;;  %v1348_v47 = vadd.f32 %v6109_v53, %v6115_v49 }
 0x163   : > { %v1371_v32 = vpop.f32.mrf.mxu0  ;;  %v1457_v28 = vadd.f32 %v6103_v18, %v1344_v45 }
 0x164   : > { %v1484_v62 = vpop.f32.mrf.mxu1  ;;  %v6155_v27 = vadd.f32 %v1480_v29, %v1368_v36  ;;  %v1372_v11 = vadd.f32 %v1371_v32, %v6105_v21  ;;  %v6183_v53 = vadd.f32 %v6111_v16, %v1348_v47 }
 0x165   : > { %v1373_v35 = vpop.f32.mrf.mxu0 }
 0x166   : > { %v1486_v25 = vpop.f32.mrf.mxu1  ;;  %v6158_v30 = vadd.f32 %v1484_v62, %v1372_v11  ;;  %v1374_v1 = vadd.f32 %v1373_v35, %v6115_v49 }
 0x167   : > { %v1375_v52 = vpop.f32.mrf.mxu0 }
 0x168   : > { %v1488_v23 = vpop.f32.mrf.mxu1  ;;  %v6161_v33 = vadd.f32 %v1486_v25, %v1374_v1  ;;  %v1376_v13 = vadd.f32 %v1375_v52, %v6105_v21  ;;  %v1455_v1 = vadd.f32 %v6099_v3, %v1342_v42 }
 0x169   : > { %v1377_v34 = vpop.f32.mrf.mxu0 }
 0x16a   : > { %v1490_v44 = vpop.f32.mrf.mxu1  ;;  %v6164_v63 = vadd.f32 %v1488_v23, %v1376_v13  ;;  %v1378_v6 = vadd.f32 %v1377_v34, %v6115_v49 }
 0x16b   : > { %v1381_v19 = vpop.f32.mrf.mxu0 }
 0x16c   : > { %v1494_v46 = vpop.f32.mrf.mxu1  ;;  %v6167_v39 = vadd.f32 %v1490_v44, %v1378_v6  ;;  %v1382_v29 = vadd.f32 %v1381_v19, %v6105_v21 }
 0x16d   : > { %v1383_v61 = vpop.f32.mrf.mxu0 }
 0x16e   : > { %v1496_v20 = vpop.f32.mrf.mxu1  ;;  %v1384_v62 = vadd.f32 %v1383_v61, %v6115_v49  ;;  %v1495_v23 = vadd.f32 %v1494_v46, %v1382_v29 }
 0x16f   : > { %v1385_v4 = vpop.f32.mrf.mxu0 }
 0x170   : > { %v1498_v17 = vpop.f32.mrf.mxu1  ;;  %v1386_v11 = vadd.f32 %v1385_v4, %v6105_v21  ;;  %v1497_v19 = vadd.f32 %v1496_v20, %v1384_v62 }
 0x171   : > { %v1387_v38 = vpop.f32.mrf.mxu0 }
 0x172   : > { %v1500_v60 = vpop.f32.mrf.mxu1  ;;  %v1388_v52 = vadd.f32 %v1387_v38, %v6115_v49  ;;  %v1499_v61 = vadd.f32 %v1498_v17, %v1386_v11 }
 0x173   : > { %v1391_v54 = vpop.f32.mrf.mxu0 }
 0x174   : > { %v1504_v24 = vpop.f32.mrf.mxu1  ;;  %v1392_v5 = vadd.f32 %v1391_v54, %v6105_v21  ;;  %v1501_v42 = vadd.f32 %v1500_v60, %v1388_v52 }
 0x175   : > { %v1393_v48 = vpop.f32.mrf.mxu0 }
 0x176   : > { %v1506_v14 = vpop.f32.mrf.mxu1  ;;  %v1394_v13 = vadd.f32 %v1393_v48, %v6115_v49 }
 0x177   : > { %v1395_v31 = vpop.f32.mrf.mxu0 }
 0x178   : > { %v1508_v57 = vpop.f32.mrf.mxu1  ;;  %v1396_v34 = vadd.f32 %v1395_v31, %v6105_v21  ;;  %v6193_v31 = vadd.f32 %v1504_v24, %v1392_v5  ;;  %v6198_v17 = vadd.f32 %v1506_v14, %v1394_v13 }
 0x179   : > { %v1397_v50 = vpop.f32.mrf.mxu0 }
 0x17a   : > { %v1510_v8 = vpop.f32.mrf.mxu1  ;;  %v1398_v3 = vadd.f32 %v1397_v50, %v6115_v49  ;;  %v6200_v50 = vadd.f32 %v1508_v57, %v1396_v34 }
 0x17b   : > { %v1401_v58 = vpop.f32.mrf.mxu0 }
 0x17c   : > { %v1514_v15 = vpop.f32.mrf.mxu1  ;;  %v1402_v4 = vadd.f32 %v1401_v58, %v6105_v21 }
 0x17d   : > { %v1403_v22 = vpop.f32.mrf.mxu0 }
 0x17e   : > { %v1516_v9 = vpop.f32.mrf.mxu1  ;;  %v1404_v38 = vadd.f32 %v1403_v22, %v6115_v49  ;;  %v6208_v62 = vadd.f32 %v1514_v15, %v1402_v4 }
 0x17f   : > { %v1405_v26 = vpop.f32.mrf.mxu0 }
 0x180   : > { %v1518_v0 = vpop.f32.mrf.mxu1  ;;  %v1406_v16 = vadd.f32 %v1405_v26, %v6105_v21  ;;  %v6210_v11 = vadd.f32 %v1516_v9, %v1404_v38 }
 0x181   : > { %v1407_v12 = vpop.f32.mrf.mxu0 }
 0x182   : > { %v1520_v10 = vpop.f32.mrf.mxu1  ;;  %v1408_v46 = vadd.f32 %v1407_v12, %v6115_v49  ;;  %v6204_v12 = vadd.f32 %v1510_v8, %v1398_v3  ;;  %v6212_v14 = vadd.f32 %v1518_v0, %v1406_v16 }
 0x183   : > { %v1411_v36 = vpop.f32.mrf.mxu0 }
 0x184   : > { %v1524_v32 = vpop.f32.mrf.mxu1  ;;  %v1412_v58 = vadd.f32 %v1411_v36, %v6105_v21  ;;  %v6214_v57 = vadd.f32 %v1520_v10, %v1408_v46 }
 0x185   : > { %v1413_v35 = vpop.f32.mrf.mxu0 }
 0x186   : > { %v1526_v25 = vpop.f32.mrf.mxu1  ;;  %v1414_v22 = vadd.f32 %v1413_v35, %v6115_v49  ;;  %v6216_v8 = vadd.f32 %v1524_v32, %v1412_v58 }
 0x187   : > { %v1415_v44 = vpop.f32.mrf.mxu0 }
 0x188   : > { %v1528_v6 = vpop.f32.mrf.mxu1  ;;  %v1416_v18 = vadd.f32 %v1415_v44, %v6105_v21  ;;  %v6218_v35 = vadd.f32 %v1526_v25, %v1414_v22 }
 0x189   : > { %v1417_v54 = vpop.f32.mrf.mxu0 }
 0x18a   : > { %v1530_v48 = vpop.f32.mrf.mxu1  ;;  %v6195_v45 = vadd.f32 %v1528_v6, %v1416_v18  ;;  %v1418_v20 = vadd.f32 %v1417_v54, %v6115_v49 }
 0x18b   : > { %v1567_v26 = vpop.f32.mrf.mxu0 }
 0x18c   : > { %v1607_v47 = vpop.f32.mrf.mxu1  ;;  %v6206_v29 = vadd.f32 %v1530_v48, %v1418_v20  ;;  %v1568_v60 = vadd.f32 %v1567_v26, %v1455_v1 }
 0x18d   : > { %v1608_v24 = vadd.f32 %v1607_v47, %v1495_v23  ;;  %v1569_v52 = vpop.f32.mrf.mxu0 }
 0x18e   : > { %v1609_v21 = vpop.f32.mrf.mxu1  ;;  %vm1646_vm10 = vcmp.gt.f32.partialorder %v1568_v60, 0.0  ;;  %v1678_v49 = vmul.f32 0.01, %v1568_v60  ;;  %v1570_v1 = vadd.f32 %v1569_v52, %v1457_v28 }
 0x18f   : > { %vm1662_vm11 = vcmp.gt.f32.partialorder %v1608_v24, 0.0  ;;  %v1694_v36 = vmul.f32 0.01, %v1608_v24  ;;  %v1610_v5 = vadd.f32 %v1609_v21, %v1497_v19  ;;  %v1571_v15 = vpop.f32.mrf.mxu0 }
 0x190   : > { %v1611_v23 = vpop.f32.mrf.mxu1  ;;  %v6220_v9 = vsel %vm1646_vm10, %v1568_v60, %v1678_v49  ;;  %v1572_v10 = vadd.f32 %v1571_v15, %v6113_v55  ;;  %vm1647_vm12 = vcmp.gt.f32.partialorder %v1570_v1, 0.0  ;;  %v1679_v19 = vmul.f32 0.01, %v1570_v1 }
 0x191   : > { %v6222_v0 = vsel %vm1662_vm11, %v1608_v24, %v1694_v36  ;;  %v1612_v13 = vadd.f32 %v1611_v23, %v1499_v61  ;;  %v6909_v34 = vrot.slane %v6220_v9, 7  ;;  %v6908_v44 = vrot.slane %v6220_v9, 1  ;;  %v1573_v6 = vpop.f32.mrf.mxu0 }
 0x192   : > { %v1758_v32 = vrot.slane %v6222_v0, 7  ;;  %v6910_v25 = vrot.slane %v6222_v0, 1  ;;  %v1613_v28 = vpop.f32.mrf.mxu1  ;;  %vm1663_vm13 = vcmp.gt.f32.partialorder %v1610_v5, 0.0  ;;  %v1695_v3 = vmul.f32 0.01, %v1610_v5 }
 0x193   : > { %vm1648_vm14 = vcmp.gt.f32.partialorder %v1572_v10, 0.0  ;;  %v1680_v18 = vmul.f32 0.01, %v1572_v10  ;;  %vm1664_vm15 = vcmp.gt.f32.partialorder %v1612_v13, 0.0  ;;  %v1696_v4 = vmul.f32 0.01, %v1612_v13  ;;  %v1577_v58 = vpop.f32.mrf.mxu0 }
 0x194   : > { %v6229_v55 = vsel %vm1647_vm12, %v1570_v1, %v1679_v19  ;;  %v6231_v61 = vsel %vm1663_vm13, %v1610_v5, %v1695_v3  ;;  %v1574_v38 = vadd.f32 %v1573_v6, %v6183_v53  ;;  %v1614_v16 = vadd.f32 %v1613_v28, %v1501_v42  ;;  %v1617_v53 = vpop.f32.mrf.mxu1 }
 0x195   : > { %v6912_v46 = vrot.slane %v6229_v55, 7  ;;  %v6911_v54 = vrot.slane %v6229_v55, 1  ;;  %v4274_v48 = vpack.c.bf16 %v6229_v55, %v6220_v9  ;;  %v6913_v20 = vrot.slane %v6231_v61, 7 }
 0x196   : > { %v1855_v22 = vrot.slane %v6231_v61, 1  ;;  %v4298_v26 = vpack.c.bf16 %v6231_v61, %v6222_v0  ;;  %v1712_v47 = vsel %vm1648_vm14, %v1572_v10, %v1680_v18  ;;  %v6242_v60 = vsel %vm1664_vm15, %v1612_v13, %v1696_v4  ;;  %v1579_v10 = vpop.f32.mrf.mxu0  ;;  %v1619_v3 = vpop.f32.mrf.mxu1 }
 0x197   : > { %2223 = vst [vmem:[#allocation2 + $0xd0] sm:$0xff] %v4274_v48  ;;  %v1744_v42 = vrot.slane %v1712_v47, 7  ;;  %v1840_v24 = vrot.slane %v1712_v47, 1  ;;  %v1760_v52 = vrot.slane %v6242_v60, 7  ;;  %v1856_v21 = vrot.slane %v6242_v60, 1 }
 0x198   : > { %2247 = vst [vmem:[#allocation2 + $0xf8] sm:$0xff] %v4298_v26  ;;  %vm1649_vm2 = vcmp.gt.f32.partialorder %v1574_v38, 0.0  ;;  %v1681_v49 = vmul.f32 0.01, %v1574_v38  ;;  %vm1665_vm3 = vcmp.gt.f32.partialorder %v1614_v16, 0.0  ;;  %v1578_v28 = vadd.f32 %v1577_v58, %v6118_v2 }
 0x199   : > { %v1697_v36 = vmul.f32 0.01, %v1614_v16  ;;  %v1802_v1 = vsel %vm493_vm1, %v6909_v34, %v1744_v42  ;;  %v1898_v5 = vsel %vm606_vm5, %v6908_v44, %v1840_v24  ;;  %v1786_v15 = vsel %vm493_vm1, %v1758_v32, %v1760_v52 }
 0x19a   : > { %v1882_v23 = vsel %vm606_vm5, %v6910_v25, %v1856_v21  ;;  %v1713_v13 = vsel %vm1649_vm2, %v1574_v38, %v1681_v49  ;;  %v1618_v19 = vadd.f32 %v1617_v53, %v6193_v31  ;;  %vm1650_vm4 = vcmp.gt.f32.partialorder %v1578_v28, 0.0 }
 0x19b   : > { %v6266_v6 = vsel %vm1665_vm3, %v1614_v16, %v1697_v36  ;;  %v1745_v18 = vrot.slane %v1713_v13, 7  ;;  %v1841_v4 = vrot.slane %v1713_v13, 1  ;;  %v4277_v48 = vpack.c.bf16 %v1713_v13, %v1712_v47  ;;  %v1581_v16 = vpop.f32.mrf.mxu0  ;;  %v1621_v36 = vpop.f32.mrf.mxu1 }
 0x19c   : > { %v1761_v26 = vrot.slane %v6266_v6, 7  ;;  %v1857_v44 = vrot.slane %v6266_v6, 1  ;;  %v4301_v34 = vpack.c.bf16 %v6266_v6, %v6242_v60  ;;  %v1682_v25 = vmul.f32 0.01, %v1578_v28 }
 0x19d   : > { %v1803_v2 = vsel %vm493_vm1, %v6912_v46, %v1745_v18  ;;  %v1899_v31 = vsel %vm606_vm5, %v6911_v54, %v1841_v4  ;;  %2226 = vst [vmem:[#allocation2 + $0x160] sm:$0xff] %v4277_v48  ;;  %vm1666_vm7 = vcmp.gt.f32.partialorder %v1618_v19, 0.0  ;;  %v1698_v48 = vmul.f32 0.01, %v1618_v19 }
 0x19e   : > { %v1787_v38 = vsel %vm493_vm1, %v6913_v20, %v1761_v26  ;;  %v4275_v58 = vpack.c.bf16 %v1899_v31, %v1898_v5  ;;  %v4276_v47 = vpack.c.bf16 %v1803_v2, %v1802_v1  ;;  %v1883_v53 = vsel %vm606_vm5, %v1855_v22, %v1857_v44  ;;  %2250 = vst [vmem:[#allocation2 + $0xa0] sm:$0xff] %v4301_v34 }
 0x19f   : > { %v4300_v49 = vpack.c.bf16 %v1787_v38, %v1786_v15  ;;  %v4299_v13 = vpack.c.bf16 %v1883_v53, %v1882_v23  ;;  %v1714_v6 = vsel %vm1650_vm4, %v1578_v28, %v1682_v25  ;;  %v1580_v54 = vadd.f32 %v1579_v10, %v6121_v37  ;;  %v1583_v10 = vpop.f32.mrf.mxu0 }
 0x1a0   : > { %2224 = vst [vmem:[#allocation2 + $0x10] sm:$0xff] %v4275_v58  ;;  %2225 = vst [vmem:[#allocation2 + $0x48] sm:$0xff] %v4276_v47  ;;  %v1746_v46 = vrot.slane %v1714_v6, 7  ;;  %v1842_v20 = vrot.slane %v1714_v6, 1  ;;  %v1620_v1 = vadd.f32 %v1619_v3, %v6198_v17  ;;  %v1582_v5 = vadd.f32 %v1581_v16, %v6124_v40  ;;  %v1623_v3 = vpop.f32.mrf.mxu1 }
 0x1a1   : > { %2249 = vst [vmem:[#allocation2 + $0x88] sm:$0xff] %v4300_v49  ;;  %2248 = vst [vmem:[#allocation2 + $0x20] sm:$0xff] %v4299_v13  ;;  %v6294_v2 = vsel %vm1666_vm7, %v1618_v19, %v1698_v48  ;;  %vm1651_vm8 = vcmp.gt.f32.partialorder %v1580_v54, 0.0  ;;  %v1683_v34 = vmul.f32 0.01, %v1580_v54  ;;  %v1622_v25 = vadd.f32 %v1621_v36, %v6200_v50  ;;  %v1587_v58 = vpop.f32.mrf.mxu0 }
 0x1a2   : > { %v1800_v37 = vsel %vm493_vm1, %v1744_v42, %v1746_v46  ;;  %v1896_v15 = vsel %vm606_vm5, %v1840_v24, %v1842_v20  ;;  %v1762_v23 = vrot.slane %v6294_v2, 7  ;;  %v1858_v17 = vrot.slane %v6294_v2, 1  ;;  %v1627_v48 = vpop.f32.mrf.mxu1 }
 0x1a3   : > { %v6303_v40 = vsel %vm1651_vm8, %v1580_v54, %v1683_v34  ;;  %vm1667_vm9 = vcmp.gt.f32.partialorder %v1620_v1, 0.0  ;;  %v1699_v28 = vmul.f32 0.01, %v1620_v1  ;;  %vm1652_vm10 = vcmp.gt.f32.partialorder %v1582_v5, 0.0 }
 0x1a4   : > { %v1784_v50 = vsel %vm493_vm1, %v1760_v52, %v1762_v23  ;;  %v1880_v42 = vsel %vm606_vm5, %v1856_v21, %v1858_v17  ;;  %v1747_v24 = vrot.slane %v6303_v40, 7  ;;  %v1843_v19 = vrot.slane %v6303_v40, 1 }
 0x1a5   : > { %v4280_v54 = vpack.c.bf16 %v6303_v40, %v1714_v6  ;;  %v6316_v31 = vsel %vm1667_vm9, %v1620_v1, %v1699_v28  ;;  %v1684_v38 = vmul.f32 0.01, %v1582_v5  ;;  %vm1668_vm11 = vcmp.gt.f32.partialorder %v1622_v25, 0.0  ;;  %v1589_v40 = vpop.f32.mrf.mxu0 }
 0x1a6   : > { %v1801_v16 = vsel %vm493_vm1, %v1745_v18, %v1747_v24  ;;  %v1897_v60 = vsel %vm606_vm5, %v1841_v4, %v1843_v19  ;;  %v1763_v52 = vrot.slane %v6316_v31, 7  ;;  %v1859_v21 = vrot.slane %v6316_v31, 1 }
 0x1a7   : > { %v4278_v47 = vpack.c.bf16 %v1897_v60, %v1896_v15  ;;  %v4279_v53 = vpack.c.bf16 %v1801_v16, %v1800_v37  ;;  %2229 = vst [vmem:[#allocation2 + $0x178] sm:$0xff] %v4280_v54  ;;  %v4304_v49 = vpack.c.bf16 %v6316_v31, %v6294_v2  ;;  %v6327_v36 = vsel %vm1652_vm10, %v1582_v5, %v1684_v38  ;;  %v1591_v31 = vpop.f32.mrf.mxu0 }
 0x1a8   : > { %v1785_v18 = vsel %vm493_vm1, %v1761_v26, %v1763_v52  ;;  %v1881_v4 = vsel %vm606_vm5, %v1857_v44, %v1859_v21  ;;  %v1748_v13 = vrot.slane %v6327_v36, 7  ;;  %v1844_v6 = vrot.slane %v6327_v36, 1 }
 0x1a9   : > { %2227 = vst [vmem:[#allocation2 + $0x128] sm:$0xff] %v4278_v47  ;;  %2228 = vst [vmem:[#allocation2 + $0x40] sm:$0xff] %v4279_v53  ;;  %v4302_v1 = vpack.c.bf16 %v1881_v4, %v1880_v42  ;;  %v4303_v34 = vpack.c.bf16 %v1785_v18, %v1784_v50  ;;  %v1700_v2 = vmul.f32 0.01, %v1622_v25  ;;  %v1584_v5 = vadd.f32 %v1583_v10, %v6127_v59 }
 0x1aa   : > { %2253 = vst [vmem:[#allocation2 + $0x140] sm:$0xff] %v4304_v49  ;;  %v1798_v37 = vsel %vm493_vm1, %v1746_v46, %v1748_v13  ;;  %v1894_v26 = vsel %vm606_vm5, %v1842_v20, %v1844_v6  ;;  %v1624_v44 = vadd.f32 %v1623_v3, %v6204_v12  ;;  %v1588_v15 = vadd.f32 %v1587_v58, %v6130_v51 }
 0x1ab   : > { %2251 = vst [vmem:[#allocation2 + $0x170] sm:$0xff] %v4302_v1  ;;  %2252 = vst [vmem:[#allocation2 + $0xf0] sm:$0xff] %v4303_v34  ;;  %v1732_v28 = vsel %vm1668_vm11, %v1622_v25, %v1700_v2  ;;  %vm1653_vm12 = vcmp.gt.f32.partialorder %v1584_v5, 0.0  ;;  %v1685_v50 = vmul.f32 0.01, %v1584_v5  ;;  %v1628_v42 = vadd.f32 %v1627_v48, %v6208_v62  ;;  %v1629_v62 = vpop.f32.mrf.mxu1  ;;  %v1593_v2 = vpop.f32.mrf.mxu0 }
 0x1ac   : > { %v1764_v59 = vrot.slane %v1732_v28, 7  ;;  %v1860_v10 = vrot.slane %v1732_v28, 1  ;;  %vm1669_vm13 = vcmp.gt.f32.partialorder %v1624_v44, 0.0  ;;  %v1701_v46 = vmul.f32 0.01, %v1624_v44 }
 0x1ad   : > { %v6344_v54 = vsel %vm1653_vm12, %v1584_v5, %v1685_v50  ;;  %vm1654_vm14 = vcmp.gt.f32.partialorder %v1588_v15, 0.0  ;;  %v1686_v20 = vmul.f32 0.01, %v1588_v15  ;;  %vm1670_vm15 = vcmp.gt.f32.partialorder %v1628_v42, 0.0  ;;  %v1631_v34 = vpop.f32.mrf.mxu1 }
 0x1ae   : > { %v1782_v51 = vsel %vm493_vm1, %v1762_v23, %v1764_v59  ;;  %v1878_v12 = vsel %vm606_vm5, %v1858_v17, %v1860_v10  ;;  %v1749_v25 = vrot.slane %v6344_v54, 7  ;;  %v1845_v3 = vrot.slane %v6344_v54, 1 }
 0x1af   : > { %v4283_v38 = vpack.c.bf16 %v6344_v54, %v6327_v36  ;;  %v6354_v16 = vsel %vm1669_vm13, %v1624_v44, %v1701_v46  ;;  %v6356_v60 = vsel %vm1654_vm14, %v1588_v15, %v1686_v20  ;;  %v1702_v58 = vmul.f32 0.01, %v1628_v42 }
 0x1b0   : > { %v1799_v23 = vsel %vm493_vm1, %v1747_v24, %v1749_v25  ;;  %v1895_v17 = vsel %vm606_vm5, %v1843_v19, %v1845_v3  ;;  %v1765_v47 = vrot.slane %v6354_v16, 7  ;;  %v1861_v53 = vrot.slane %v6354_v16, 1 }
 0x1b1   : > { %v4281_v49 = vpack.c.bf16 %v1895_v17, %v1894_v26  ;;  %v4282_v36 = vpack.c.bf16 %v1799_v23, %v1798_v37  ;;  %2232 = vst [vmem:[#allocation2 + $0x90] sm:$0xff] %v4283_v38  ;;  %v4307_v18 = vpack.c.bf16 %v6354_v16, %v1732_v28  ;;  %v1750_v4 = vrot.slane %v6356_v60, 7 }
 0x1b2   : > { %v1783_v48 = vsel %vm493_vm1, %v1763_v52, %v1765_v47  ;;  %v1879_v24 = vsel %vm606_vm5, %v1859_v21, %v1861_v53  ;;  %v1846_v1 = vrot.slane %v6356_v60, 1  ;;  %v6376_v19 = vsel %vm1670_vm15, %v1628_v42, %v1702_v58 }
 0x1b3   : > { %2230 = vst [vmem:[#allocation2 + $0x108] sm:$0xff] %v4281_v49  ;;  %2231 = vst [vmem:[#allocation2 + $0x110] sm:$0xff] %v4282_v36  ;;  %v4305_v5 = vpack.c.bf16 %v1879_v24, %v1878_v12  ;;  %v4306_v37 = vpack.c.bf16 %v1783_v48, %v1782_v51  ;;  %v1796_v26 = vsel %vm493_vm1, %v1748_v13, %v1750_v4  ;;  %v1766_v52 = vrot.slane %v6376_v19, 7 }
 0x1b4   : > { %2256 = vst [vmem:[#allocation2 + $0x28] sm:$0xff] %v4307_v18  ;;  %v1892_v21 = vsel %vm606_vm5, %v1844_v6, %v1846_v1  ;;  %v1862_v44 = vrot.slane %v6376_v19, 1  ;;  %v1590_v15 = vadd.f32 %v1589_v40, %v6133_v7  ;;  %v1630_v28 = vadd.f32 %v1629_v62, %v6210_v11  ;;  %v1633_v62 = vpop.f32.mrf.mxu1 }
 0x1b5   : > { %2254 = vst [vmem:[#allocation2 + $0x60] sm:$0xff] %v4305_v5  ;;  %2255 = vst [vmem:[#allocation2 + $0xc8] sm:$0xff] %v4306_v37  ;;  %v1780_v50 = vsel %vm493_vm1, %v1764_v59, %v1766_v52  ;;  %v1592_v13 = vadd.f32 %v1591_v31, %v6152_v56  ;;  %v1632_v42 = vadd.f32 %v1631_v34, %v6212_v14  ;;  %v1597_v31 = vpop.f32.mrf.mxu0 }
 0x1b6   : > { %v1594_v46 = vadd.f32 %v1593_v2, %v6155_v27  ;;  %v1876_v7 = vsel %vm606_vm5, %v1860_v10, %v1862_v44  ;;  %vm1655_vm2 = vcmp.gt.f32.partialorder %v1590_v15, 0.0  ;;  %v1687_v11 = vmul.f32 0.01, %v1590_v15  ;;  %v1637_v2 = vpop.f32.mrf.mxu1 }
 0x1b7   : > { %vm1671_vm3 = vcmp.gt.f32.partialorder %v1630_v28, 0.0  ;;  %v1703_v6 = vmul.f32 0.01, %v1630_v28  ;;  %vm1656_vm4 = vcmp.gt.f32.partialorder %v1592_v13, 0.0  ;;  %v1688_v40 = vmul.f32 0.01, %v1592_v13  ;;  %v1599_v5 = vpop.f32.mrf.mxu0 }
 0x1b8   : > { %vm1672_vm7 = vcmp.gt.f32.partialorder %v1632_v42, 0.0  ;;  %v1719_v20 = vsel %vm1655_vm2, %v1590_v15, %v1687_v11  ;;  %v1704_v59 = vmul.f32 0.01, %v1632_v42  ;;  %vm1657_vm8 = vcmp.gt.f32.partialorder %v1594_v46, 0.0 }
 0x1b9   : > { %v1689_v56 = vmul.f32 0.01, %v1594_v46  ;;  %v1751_v51 = vrot.slane %v1719_v20, 7  ;;  %v1847_v14 = vrot.slane %v1719_v20, 1  ;;  %v4286_v27 = vpack.c.bf16 %v1719_v20, %v6356_v60 }
 0x1ba   : > { %v6398_v12 = vsel %vm1671_vm3, %v1630_v28, %v1703_v6  ;;  %v6405_v58 = vsel %vm1656_vm4, %v1592_v13, %v1688_v40  ;;  %v6426_v37 = vsel %vm1672_vm7, %v1632_v42, %v1704_v59 }
 0x1bb   : > { %v1767_v10 = vrot.slane %v6398_v12, 7  ;;  %v1863_v38 = vrot.slane %v6398_v12, 1  ;;  %v4310_v16 = vpack.c.bf16 %v6398_v12, %v6376_v19  ;;  %v1797_v23 = vsel %vm493_vm1, %v1749_v25, %v1751_v51  ;;  %2235 = vst [vmem:[#allocation2 + $0x100] sm:$0xff] %v4286_v27 }
 0x1bc   : > { %v1893_v60 = vsel %vm606_vm5, %v1845_v3, %v1847_v14  ;;  %v1752_v17 = vrot.slane %v6405_v58, 7  ;;  %v1848_v49 = vrot.slane %v6405_v58, 1  ;;  %v4285_v18 = vpack.c.bf16 %v1797_v23, %v1796_v26 }
 0x1bd   : > { %v4284_v36 = vpack.c.bf16 %v1893_v60, %v1892_v21  ;;  %v1781_v48 = vsel %vm493_vm1, %v1765_v47, %v1767_v10  ;;  %v1877_v24 = vsel %vm606_vm5, %v1861_v53, %v1863_v38  ;;  %2259 = vst [vmem:[#allocation2 + $0x18] sm:$0xff] %v4310_v16  ;;  %v6429_v47 = vsel %vm1657_vm8, %v1594_v46, %v1689_v56  ;;  %v1639_v46 = vpop.f32.mrf.mxu1 }
 0x1be   : > { %v4308_v25 = vpack.c.bf16 %v1877_v24, %v1876_v7  ;;  %v4309_v34 = vpack.c.bf16 %v1781_v48, %v1780_v50  ;;  %v1794_v54 = vsel %vm493_vm1, %v1750_v4, %v1752_v17  ;;  %v1890_v3 = vsel %vm606_vm5, %v1846_v1, %v1848_v49  ;;  %2234 = vst [vmem:[#allocation2 + $0x148] sm:$0xff] %v4285_v18  ;;  %v1601_v7 = vpop.f32.mrf.mxu0 }
 0x1bf   : > { %2233 = vst [vmem:[#allocation2 + $0x118] sm:$0xff] %v4284_v36  ;;  %v1634_v53 = vadd.f32 %v1633_v62, %v6214_v57  ;;  %v1598_v26 = vadd.f32 %v1597_v31, %v6158_v30  ;;  %v1768_v4 = vrot.slane %v6426_v37, 7  ;;  %v1864_v1 = vrot.slane %v6426_v37, 1  ;;  %v1641_v60 = vpop.f32.mrf.mxu1 }
 0x1c0   : > { %2257 = vst [vmem:[#allocation2 + $0x38] sm:$0xff] %v4308_v25  ;;  %2258 = vst [vmem:[#allocation2 + $0xc0] sm:$0xff] %v4309_v34  ;;  %v1753_v21 = vrot.slane %v6429_v47, 7  ;;  %v1849_v15 = vrot.slane %v6429_v47, 1  ;;  %v4289_v28 = vpack.c.bf16 %v6429_v47, %v6405_v58  ;;  %v1638_v56 = vadd.f32 %v1637_v2, %v6216_v8 }
 0x1c1   : > { %vm1673_vm9 = vcmp.gt.f32.partialorder %v1634_v53, 0.0  ;;  %v1705_v50 = vmul.f32 0.01, %v1634_v53  ;;  %vm1658_vm10 = vcmp.gt.f32.partialorder %v1598_v26, 0.0  ;;  %v1778_v30 = vsel %vm493_vm1, %v1766_v52, %v1768_v4 }
 0x1c2   : > { %v1874_v57 = vsel %vm606_vm5, %v1862_v44, %v1864_v1  ;;  %v1795_v13 = vsel %vm493_vm1, %v1751_v51, %v1753_v21  ;;  %v1891_v42 = vsel %vm606_vm5, %v1847_v14, %v1849_v15  ;;  %2238 = vst [vmem:[#allocation2 + $0x80] sm:$0xff] %v4289_v28  ;;  %v1690_v20 = vmul.f32 0.01, %v1598_v26  ;;  %v1643_v28 = vpop.f32.mrf.mxu1 }
 0x1c3   : > { %v4287_v11 = vpack.c.bf16 %v1891_v42, %v1890_v3  ;;  %v4288_v6 = vpack.c.bf16 %v1795_v13, %v1794_v54  ;;  %v1737_v40 = vsel %vm1673_vm9, %v1634_v53, %v1705_v50  ;;  %v1600_v51 = vadd.f32 %v1599_v5, %v6161_v33 }
 0x1c4   : > { %v1769_v59 = vrot.slane %v1737_v40, 7  ;;  %v1865_v52 = vrot.slane %v1737_v40, 1  ;;  %v4313_v19 = vpack.c.bf16 %v1737_v40, %v6426_v37  ;;  %v1722_v44 = vsel %vm1658_vm10, %v1598_v26, %v1690_v20 }
 0x1c5   : > { %2236 = vst [vmem:[#allocation2 + $0x58] sm:$0xff] %v4287_v11  ;;  %2237 = vst [vmem:[#allocation2 + $0xd8] sm:$0xff] %v4288_v6  ;;  %v1640_v14 = vadd.f32 %v1639_v46, %v6218_v35  ;;  %v1602_v27 = vadd.f32 %v1601_v7, %v6164_v63  ;;  %v1754_v31 = vrot.slane %v1722_v44, 7  ;;  %v1850_v16 = vrot.slane %v1722_v44, 1 }
 0x1c6   : > { %v1779_v12 = vsel %vm493_vm1, %v1767_v10, %v1769_v59  ;;  %v1875_v62 = vsel %vm606_vm5, %v1863_v38, %v1865_v52  ;;  %2262 = vst [vmem:[#allocation2] sm:$0xff] %v4313_v19  ;;  %vm1674_vm11 = vcmp.gt.f32.partialorder %v1638_v56, 0.0  ;;  %v1706_v23 = vmul.f32 0.01, %v1638_v56 }
 0x1c7   : > { %v4311_v8 = vpack.c.bf16 %v1875_v62, %v1874_v57  ;;  %v4312_v58 = vpack.c.bf16 %v1779_v12, %v1778_v30  ;;  %v1792_v33 = vsel %vm493_vm1, %v1752_v17, %v1754_v31  ;;  %v1888_v35 = vsel %vm606_vm5, %v1848_v49, %v1850_v16 }
 0x1c8   : > { %vm1659_vm12 = vcmp.gt.f32.partialorder %v1600_v51, 0.0  ;;  %v1691_v63 = vmul.f32 0.01, %v1600_v51  ;;  %v6465_v10 = vsel %vm1674_vm11, %v1638_v56, %v1706_v23  ;;  %vm1675_vm13 = vcmp.gt.f32.partialorder %v1640_v14, 0.0 }
 0x1c9   : > { %2260 = vst [vmem:[#allocation2 + $0x98] sm:$0xff] %v4311_v8  ;;  %2261 = vst [vmem:[#allocation2 + $0x8] sm:$0xff] %v4312_v58  ;;  %v1707_v38 = vmul.f32 0.01, %v1640_v14  ;;  %vm1660_vm14 = vcmp.gt.f32.partialorder %v1602_v27, 0.0  ;;  %v1770_v36 = vrot.slane %v6465_v10, 7  ;;  %v1642_v46 = vadd.f32 %v1641_v60, %v6195_v45 }
 0x1ca   : > { %v1866_v18 = vrot.slane %v6465_v10, 1  ;;  %v1723_v48 = vsel %vm1659_vm12, %v1600_v51, %v1691_v63  ;;  %v1692_v24 = vmul.f32 0.01, %v1602_v27  ;;  %v1644_v11 = vadd.f32 %v1643_v28, %v6206_v29 }
 0x1cb   : > { %v1755_v17 = vrot.slane %v1723_v48, 7  ;;  %v1851_v25 = vrot.slane %v1723_v48, 1  ;;  %v4292_v34 = vpack.c.bf16 %v1723_v48, %v1722_v44  ;;  %v6469_v49 = vsel %vm1675_vm13, %v1640_v14, %v1707_v38 }
 0x1cc   : > { %v1776_v54 = vsel %vm493_vm1, %v1768_v4, %v1770_v36  ;;  %v1872_v3 = vsel %vm606_vm5, %v1864_v1, %v1866_v18  ;;  %v1771_v2 = vrot.slane %v6469_v49, 7  ;;  %v1867_v5 = vrot.slane %v6469_v49, 1  ;;  %v1603_v4 = vpop.f32.mrf.mxu0 }
 0x1cd   : > { %v1793_v37 = vsel %vm493_vm1, %v1753_v21, %v1755_v17  ;;  %v1889_v47 = vsel %vm606_vm5, %v1849_v15, %v1851_v25  ;;  %2241 = vst [vmem:[#allocation2 + $0x120] sm:$0xff] %v4292_v34  ;;  %v4316_v53 = vpack.c.bf16 %v6469_v49, %v6465_v10  ;;  %v1724_v26 = vsel %vm1660_vm14, %v1602_v27, %v1692_v24 }
 0x1ce   : > { %v4290_v50 = vpack.c.bf16 %v1889_v47, %v1888_v35  ;;  %v4291_v1 = vpack.c.bf16 %v1793_v37, %v1792_v33  ;;  %v1777_v30 = vsel %vm493_vm1, %v1769_v59, %v1771_v2  ;;  %v1873_v21 = vsel %vm606_vm5, %v1865_v52, %v1867_v5 }
 0x1cf   : > { %v4314_v15 = vpack.c.bf16 %v1873_v21, %v1872_v3  ;;  %v4315_v57 = vpack.c.bf16 %v1777_v30, %v1776_v54  ;;  %2265 = vst [vmem:[#allocation2 + $0x68] sm:$0xff] %v4316_v53  ;;  %v1756_v13 = vrot.slane %v1724_v26, 7  ;;  %v1852_v42 = vrot.slane %v1724_v26, 1 }
 0x1d0   : > { %2239 = vst [vmem:[#allocation2 + $0x130] sm:$0xff] %v4290_v50  ;;  %2240 = vst [vmem:[#allocation2 + $0x138] sm:$0xff] %v4291_v1  ;;  %v1604_v7 = vadd.f32 %v1603_v4, %v6167_v39  ;;  %vm1676_vm15 = vcmp.gt.f32.partialorder %v1642_v46, 0.0  ;;  %v1708_v20 = vmul.f32 0.01, %v1642_v46  ;;  %vm1677_vm3 = vcmp.gt.f32.partialorder %v1644_v11, 0.0 }
 0x1d1   : > { %2263 = vst [vmem:[#allocation2 + $0x78] sm:$0xff] %v4314_v15  ;;  %2264 = vst [vmem:[#allocation2 + $0x50] sm:$0xff] %v4315_v57  ;;  %v1790_v6 = vsel %vm493_vm1, %v1754_v31, %v1756_v13  ;;  %v1886_v40 = vsel %vm606_vm5, %v1850_v16, %v1852_v42  ;;  %v1709_v52 = vmul.f32 0.01, %v1644_v11  ;;  %v1788_v14 = vsel %vm493_vm1, %v1756_v13, %v1758_v32 }
 0x1d2   : > { %vm1661_vm2 = vcmp.gt.f32.partialorder %v1604_v7, 0.0  ;;  %v1693_v59 = vmul.f32 0.01, %v1604_v7  ;;  %v1740_v19 = vsel %vm1676_vm15, %v1642_v46, %v1708_v20  ;;  %v6940_v27 = vrot.slane %v6222_v0, 1 }
 0x1d3   : > { %v1772_v45 = vrot.slane %v1740_v19, 7  ;;  %v1868_v39 = vrot.slane %v1740_v19, 1  ;;  %v1741_v31 = vsel %vm1677_vm3, %v1644_v11, %v1709_v52  ;;  %v6941_v16 = vrot.slane %v6220_v9, 7 }
 0x1d4   : > { %v1725_v56 = vsel %vm1661_vm2, %v1604_v7, %v1693_v59  ;;  %v1884_v12 = vsel %vm606_vm5, %v1852_v42, %v6940_v27  ;;  %v6942_v58 = vrot.slane %v6220_v9, 1  ;;  %v6943_v32 = vrot.slane %v6231_v61, 7 }
 0x1d5   : > { %v1757_v44 = vrot.slane %v1725_v56, 7  ;;  %v1853_v29 = vrot.slane %v1725_v56, 1  ;;  %v4295_v51 = vpack.c.bf16 %v1725_v56, %v1724_v26  ;;  %v1774_v62 = vsel %vm493_vm1, %v1770_v36, %v1772_v45 }
 0x1d6   : > { %v1804_v8 = vsel %vm493_vm1, %v1772_v45, %v6941_v16  ;;  %v1900_v23 = vsel %vm606_vm5, %v1868_v39, %v6942_v58  ;;  %v1773_v48 = vrot.slane %v1741_v31, 7  ;;  %v1869_v24 = vrot.slane %v1741_v31, 1 }
 0x1d7   : > { %v1789_v0 = vsel %vm493_vm1, %v1757_v44, %v6943_v32  ;;  %v1791_v33 = vsel %vm493_vm1, %v1755_v17, %v1757_v44  ;;  %2244 = vst [vmem:[#allocation2 + $0xb8] sm:$0xff] %v4295_v51  ;;  %v1885_v35 = vsel %vm606_vm5, %v1853_v29, %v1855_v22  ;;  %v1887_v9 = vsel %vm606_vm5, %v1851_v25, %v1853_v29 }
 0x1d8   : > { %v4294_v63 = vpack.c.bf16 %v1791_v33, %v1790_v6  ;;  %v4297_v38 = vpack.c.bf16 %v1789_v0, %v1788_v14  ;;  %v4293_v60 = vpack.c.bf16 %v1887_v9, %v1886_v40  ;;  %v4296_v36 = vpack.c.bf16 %v1885_v35, %v1884_v12 }
 0x1d9   : > { %v1806_v34 = vsel %vm445_vm0, 0.0, %v1804_v8  ;;  %v1870_v61 = vsel %vm606_vm5, %v1866_v18, %v1868_v39  ;;  %v1932_v22 = vsel %vm573_vm6, 0.0, %v1900_v23  ;;  %v4319_v17 = vpack.c.bf16 %v1741_v31, %v1740_v19 }
 0x1da   : > { %2243 = vst [vmem:[#allocation2 + $0xa8] sm:$0xff] %v4294_v63  ;;  %2246 = vst [vmem:[#allocation2 + $0xe8] sm:$0xff] %v4297_v38  ;;  %v1775_v25 = vsel %vm493_vm1, %v1771_v2, %v1773_v48  ;;  %v6944_v54 = vrot.slane %v6229_v55, 7  ;;  %v1871_v18 = vsel %vm606_vm5, %v1867_v5, %v1869_v24  ;;  %v6945_v3 = vrot.slane %v6229_v55, 1 }
 0x1db   : > { %2242 = vst [vmem:[#allocation2 + $0xe0] sm:$0xff] %v4293_v60  ;;  %2245 = vst [vmem:[#allocation2 + $0x168] sm:$0xff] %v4296_v36  ;;  %v4317_v53 = vpack.c.bf16 %v1871_v18, %v1870_v61  ;;  %v4318_v26 = vpack.c.bf16 %v1775_v25, %v1774_v62 }
 0x1dc   : > { %v1805_v10 = vsel %vm493_vm1, %v1773_v48, %v6944_v54  ;;  %v1901_v37 = vsel %vm606_vm5, %v1869_v24, %v6945_v3  ;;  %2268 = vst [vmem:[#allocation2 + $0x158] sm:$0xff] %v4319_v17 }
 0x1dd   : > { %v1807_v47 = vsel %vm445_vm0, 0.0, %v1805_v10  ;;  %v1933_v2 = vsel %vm573_vm6, 0.0, %v1901_v37  ;;  %2266 = vst [vmem:[#allocation2 + $0x70] sm:$0xff] %v4317_v53  ;;  %2267 = vst [vmem:[#allocation2 + $0x30] sm:$0xff] %v4318_v26 }
 0x1de   : > { %v4273_v4 = vpack.c.bf16 %v1807_v47, %v1806_v34  ;;  %v4320_v28 = vpack.c.bf16 %v1933_v2, %v1932_v22 }
 0x1e0   : > { %2222 = vst [vmem:[#allocation2 + $0xb0] sm:$0xff] %v4273_v4  ;;  %2269 = vst [vmem:[#allocation2 + $0x150] sm:$0xff] %v4320_v28 }
 0x1e1 PF: > { %v4911_v43 = vld [vmem:[%s5288_s17 + $0x78] sm:$0xff]   ;;  %v4915_v5 = vld [vmem:[%s5288_s17 + $0x70] sm:$0xff]   ;;  %v4919_v21 = vld [vmem:[%s5288_s17 + $0x68] sm:$0xff]   ;;  %p4265_p3 = scmp.ne.s32.totalorder %s5118_s29, 1 }
 0x1e2   : > { %v4912_v41 = vld [vmem:[%s5288_s17 + $0x38] sm:$0xff]   ;;  %4384 = vmatprep.subr.bf16.mxu0 %v4911_v43  ;;  %v4916_v50 = vld [vmem:[%s5288_s17 + $0x30] sm:$0xff]   ;;  %v4920_v15 = vld [vmem:[%s5288_s17 + $0x28] sm:$0xff]  }
 0x1e3   : > { %v4913_v55 = vld [vmem:[%s5288_s17 + $0xf8] sm:$0xff]   ;;  %4385 = vmatpush3.bf16.msra.mxu0 %v4912_v41  ;;  %v4917_v1 = vld [vmem:[%s5288_s17 + $0xf0] sm:$0xff]   ;;  %v4921_v57 = vld [vmem:[%s5288_s17 + $0xe8] sm:$0xff]  }
 0x1e4   : > { %v4914_v49 = vld [vmem:[%s5288_s17 + $0xb8] sm:$0xff]   ;;  %4448 = vmatprep.subr.bf16.mxu1 %v4913_v55  ;;  %4386 = vmatprep.subr.bf16.mxu0 %v4915_v5  ;;  %v4918_v30 = vld [vmem:[%s5288_s17 + $0xb0] sm:$0xff]   ;;  %v4922_v13 = vld [vmem:[%s5288_s17 + $0xa8] sm:$0xff]  }
 0x1e5   : > { %4449 = vmatpush3.bf16.msra.mxu1 %v4914_v49  ;;  %v4923_v42 = vld [vmem:[%s5288_s17 + $0x60] sm:$0xff]   ;;  %v4927_v6 = vld [vmem:[%s5288_s17 + $0x58] sm:$0xff]   ;;  %v4931_v52 = vld [vmem:[%s5288_s17 + $0x50] sm:$0xff]  }
 0x1e6   : > { %4450 = vmatprep.subr.bf16.mxu1 %v4917_v1  ;;  %v4924_v46 = vld [vmem:[%s5288_s17 + $0x20] sm:$0xff]   ;;  %v4928_v40 = vld [vmem:[%s5288_s17 + $0x18] sm:$0xff]   ;;  %v4932_v19 = vld [vmem:[%s5288_s17 + $0x10] sm:$0xff]  }
 0x1e7   : > { %4387 = vmatpush3.bf16.msra.mxu0 %v4916_v50  ;;  %v4925_v7 = vld [vmem:[%s5288_s17 + $0xe0] sm:$0xff]   ;;  %v4929_v20 = vld [vmem:[%s5288_s17 + $0xd8] sm:$0xff]   ;;  %v4933_v56 = vld [vmem:[%s5288_s17 + $0xd0] sm:$0xff]  }
 0x1e8   : > { %4388 = vmatprep.subr.bf16.mxu0 %v4919_v21  ;;  %v4926_v11 = vld [vmem:[%s5288_s17 + $0xa0] sm:$0xff]   ;;  %v4930_v59 = vld [vmem:[%s5288_s17 + $0x98] sm:$0xff]   ;;  %v4934_v45 = vld [vmem:[%s5288_s17 + $0x90] sm:$0xff]  }
 0x1e9   : > { %4451 = vmatpush3.bf16.msra.mxu1 %v4918_v30  ;;  %v4935_v39 = vld [vmem:[%s5288_s17 + $0x48] sm:$0xff]   ;;  %v4939_v14 = vld [vmem:[%s5288_s17 + $0x40] sm:$0xff]   ;;  %v4946_v8 = vld [vmem:[%s5288_s17 + $0x178] sm:$0xff]  }
 0x1ea   : > { %4452 = vmatprep.subr.bf16.mxu1 %v4921_v57  ;;  %v4936_v44 = vld [vmem:[%s5288_s17 + $0x8] sm:$0xff]   ;;  %v4940_v27 = vld [vmem:[%s5288_s17] sm:$0xff]   ;;  %v4950_v32 = vld [vmem:[%s5288_s17 + $0x138] sm:$0xff]  }
 0x1eb   : > { %4389 = vmatpush3.bf16.msra.mxu0 %v4920_v15  ;;  %v4937_v29 = vld [vmem:[%s5288_s17 + $0xc8] sm:$0xff]   ;;  %v4941_v12 = vld [vmem:[%s5288_s17 + $0xc0] sm:$0xff]   ;;  %v4954_v35 = vld [vmem:[%s5288_s17 + $0x170] sm:$0xff]  }
 0x1ec   : > { %4390 = vmatprep.subr.bf16.mxu0 %v4923_v42  ;;  %v4938_v51 = vld [vmem:[%s5288_s17 + $0x88] sm:$0xff]   ;;  %v4945_v16 = vld [vmem:[%s5288_s17 + $0x80] sm:$0xff]   ;;  %v4955_v9 = vld [vmem:[#allocation2 + $0x17c] ss:$-232 sps:$4 sm:$0xff]  }
 0x1ed   : > { %4453 = vmatpush3.bf16.msra.mxu1 %v4922_v13  ;;  %v4942_v62 = vld [vmem:[#allocation2 + $0xb0] ss:$-104 sps:$4 sm:$0xff]   ;;  %v4944_v31 = vld [vmem:[#allocation2 + $0xb4] ss:$-104 sps:$4 sm:$0xff]   ;;  %v2300_v48 = vld [vmem:[#allocation2 + $0x100] sm:$0xff] }
 0x1ee   : > { %4454 = vmatprep.subr.bf16.mxu1 %v4925_v7  ;;  %2998 = vmatprep.mubr.bf16.mxu0 %v4944_v31  ;;  %v4947_v58 = vld [vmem:[#allocation2 + $0xd0] ss:$144 sps:$4 sm:$0xff]   ;;  %v4949_v23 = vld [vmem:[#allocation2 + $0xd4] ss:$144 sps:$4 sm:$0xff]   ;;  %v4959_v60 = vld [vmem:[#allocation2 + $0x14c] ss:$-112 sps:$4 sm:$0xff]  }
 0x1ef   : > { %4391 = vmatpush3.bf16.msra.mxu0 %v4924_v46  ;;  %3095 = vmatprep.mubr.bf16.mxu1 %v4949_v23  ;;  %v4951_v0 = vld [vmem:[#allocation2 + $0x44] ss:$208 sps:$4 sm:$0xff]   ;;  %v4953_v33 = vld [vmem:[#allocation2 + $0x40] ss:$208 sps:$4 sm:$0xff]   ;;  %v4962_v36 = vld [vmem:[%s5288_s17 + $0x168] sm:$0xff]  }
 0x1f0   : > { %4392 = vmatprep.subr.bf16.mxu0 %v4927_v6  ;;  %v4957_v63 = vld [vmem:[%s5288_s17 + $0x130] sm:$0xff]   ;;  %v2303_v24 = vld [vmem:[#allocation2 + $0x80] sm:$0xff]  ;;  %v4963_v61 = vld [vmem:[%s5288_s17 + $0x128] sm:$0xff]  }
 0x1f1   : > { %4455 = vmatpush3.bf16.msra.mxu1 %v4926_v11  ;;  %v4958_v38 = vld [vmem:[#allocation2 + $0x178] ss:$-232 sps:$4 sm:$0xff]   ;;  %v4159_v34 = vcombine.high %v2300_v48, %v2303_v24  ;;  %v4967_v17 = vld [vmem:[%s5288_s17 + $0x160] sm:$0xff]   ;;  %v4964_v25 = vld [vmem:[#allocation2 + $0x13c] ss:$-144 sps:$4 sm:$0xff]   ;;  %v4158_v10 = vcombine.low %v2300_v48, %v2303_v24 }
 0x1f2   : > { %4456 = vmatprep.subr.bf16.mxu1 %v4929_v20  ;;  %v4961_v22 = vld [vmem:[#allocation2 + $0x148] ss:$-112 sps:$4 sm:$0xff]   ;;  %v4970_v54 = vld [vmem:[%s5288_s17 + $0x120] sm:$0xff]   ;;  %v4980_v4 = vld [vmem:[%s5288_s17 + $0x150] sm:$0xff]  }
 0x1f3   : > { %4393 = vmatpush3.bf16.msra.mxu0 %v4928_v40  ;;  %v4968_v18 = vld [vmem:[#allocation2 + $0x124] ss:$-104 sps:$4 sm:$0xff]   ;;  %v2311_v37 = vld [vmem:[#allocation2 + $0xe8] sm:$0xff]  ;;  %v4971_v28 = vld [vmem:[#allocation2 + $0x120] ss:$-104 sps:$4 sm:$0xff]  }
 0x1f4   : > { %4394 = vmatprep.subr.bf16.mxu0 %v4931_v52  ;;  %v4972_v3 = vld [vmem:[%s5288_s17 + $0x158] sm:$0xff]   ;;  %v2314_v47 = vld [vmem:[#allocation2 + $0x88] sm:$0xff]  ;;  %v4983_v43 = vld [vmem:[%s5288_s17 + $0x110] sm:$0xff]  }
 0x1f5   : > { %4457 = vmatpush3.bf16.msra.mxu1 %v4930_v59  ;;  %v4975_v2 = vld [vmem:[%s5288_s17 + $0x118] sm:$0xff]   ;;  %v4169_v26 = vcombine.high %v2311_v37, %v2314_v47  ;;  %v4988_v55 = vld [vmem:[%s5288_s17 + $0x148] sm:$0xff]   ;;  %v4168_v5 = vcombine.low %v2311_v37, %v2314_v47  ;;  %v4993_v1 = vld [vmem:[%s5288_s17 + $0x140] sm:$0xff]  }
 0x1f6   : > { %4458 = vmatprep.subr.bf16.mxu1 %v4933_v56  ;;  %v4966_v53 = vld [vmem:[#allocation2 + $0x138] ss:$-144 sps:$4 sm:$0xff]   ;;  %v4973_v41 = vld [vmem:[#allocation2 + $0xfc] ss:$-88 sps:$4 sm:$0xff]   ;;  %v4977_v50 = vld [vmem:[#allocation2 + $0xf4] ss:$-40 sps:$4 sm:$0xff]  }
 0x1f7   : > { %4395 = vmatpush3.bf16.msra.mxu0 %v4932_v19  ;;  %v4991_v49 = vld [vmem:[%s5288_s17 + $0x108] sm:$0xff]   ;;  %v4976_v30 = vld [vmem:[#allocation2 + $0xf8] ss:$-88 sps:$4 sm:$0xff]   ;;  %v4989_v46 = vld [vmem:[#allocation2 + $0x1c] ss:$-24 sps:$4 sm:$0xff]  }
 0x1f8   : > { %4396 = vmatprep.subr.bf16.mxu0 %v4935_v39  ;;  %v4996_v21 = vld [vmem:[%s5288_s17 + $0x100] sm:$0xff]   ;;  %v4979_v57 = vld [vmem:[#allocation2 + $0xf0] ss:$-40 sps:$4 sm:$0xff]   ;;  %v4994_v59 = vld [vmem:[#allocation2 + $0x6c] ss:$240 sps:$4 sm:$0xff]  }
 0x1f9   : > { %4459 = vmatpush3.bf16.msra.mxu1 %v4934_v45  ;;  %v4981_v15 = vld [vmem:[#allocation2 + $0x144] ss:$-280 sps:$4 sm:$0xff]   ;;  %v4984_v42 = vld [vmem:[#allocation2 + $0x140] ss:$-280 sps:$4 sm:$0xff]   ;;  %v2329_v7 = vld [vmem:[#allocation2 + $0x50] sm:$0xff] }
 0x1fa   : > { %4460 = vmatprep.subr.bf16.mxu1 %v4937_v29  ;;  %v4985_v13 = vld [vmem:[#allocation2 + $0xc4] ss:$-184 sps:$4 sm:$0xff]   ;;  %v2332_v11 = vld [vmem:[#allocation2 + $0x30] sm:$0xff]  ;;  %v4987_v6 = vld [vmem:[#allocation2 + $0xc0] ss:$-184 sps:$4 sm:$0xff]  }
 0x1fb   : > { %4397 = vmatpush3.bf16.msra.mxu0 %v4936_v44  ;;  %v4187_v40 = vcombine.high %v2329_v7, %v2332_v11  ;;  %v4992_v20 = vld [vmem:[#allocation2 + $0x18] ss:$-24 sps:$4 sm:$0xff]   ;;  %v4186_v52 = vcombine.low %v2329_v7, %v2332_v11  ;;  %v5000_v19 = vld [vmem:[#allocation2 + $0x14] ss:$280 sps:$4 sm:$0xff]   ;;  %v4998_v45 = vld [vmem:[#allocation2 + $0x10] ss:$280 sps:$4 sm:$0xff]  }
 0x1fc   : > { %4398 = vmatprep.subr.bf16.mxu0 %v4939_v14  ;;  %v4997_v56 = vld [vmem:[#allocation2 + $0x68] ss:$240 sps:$4 sm:$0xff]   ;;  %v5001_v39 = vld [vmem:[#allocation2 + $0x10c] ss:$16 sps:$4 sm:$0xff]   ;;  %v5021_v24 = vld [vmem:[%s5319_s11 + $0x10] sm:$0xff]  }
 0x1fd   : > { %4461 = vmatpush3.bf16.msra.mxu1 %v4938_v51  ;;  %v5003_v44 = vld [vmem:[#allocation2 + $0x108] ss:$16 sps:$4 sm:$0xff]   ;;  %v5004_v29 = vld [vmem:[#allocation2 + $0x5c] ss:$216 sps:$4 sm:$0xff]   ;;  %v5007_v14 = vld [vmem:[#allocation2 + $0xe4] ss:$136 sps:$4 sm:$0xff]  }
 0x1fe   : > { %4462 = vmatprep.subr.bf16.mxu1 %v4941_v12  ;;  %v5006_v51 = vld [vmem:[#allocation2 + $0x58] ss:$216 sps:$4 sm:$0xff]   ;;  %v5010_v12 = vld [vmem:[#allocation2 + $0x24] ss:$336 sps:$4 sm:$0xff]  }
 0x1ff   : > { %4399 = vmatpush3.bf16.msra.mxu0 %v4940_v27  ;;  %v5009_v27 = vld [vmem:[#allocation2 + $0xe0] ss:$136 sps:$4 sm:$0xff]   ;;  %v5013_v31 = vld [vmem:[#allocation2 + $0x64] ss:$-40 sps:$4 sm:$0xff]  }
 0x200   : > { %4512 = vmatprep.subr.bf16.mxu0 %v4946_v8  ;;  %v2328_v8 = vld [vmem:[#allocation2 + $0x78] sm:$0xff] }
 0x201   : > { %4463 = vmatpush3.bf16.msra.mxu1 %v4945_v16  ;;  %v2325_v16 = vld [vmem:[#allocation2 + $0x98] sm:$0xff] }
 0x202   : > { %2999 = vmatmul.mubr.bf16.vlgmr.msra.gmra.mxu0 %v4942_v62  ;;  %v5012_v62 = vld [vmem:[#allocation2 + $0x20] ss:$336 sps:$4 sm:$0xff]   ;;  %v4185_v23 = vcombine.high %v2325_v16, %v2328_v8  ;;  %v5020_v48 = vld [vmem:[%s5319_s11 + $0x18] sm:$0xff]  }
 0x203   : > { %4513 = vmatpush3.bf16.msra.mxu0 %v4950_v32  ;;  %3006 = vmatprep.mubr.bf16.mxu0 %v4951_v0  ;;  %v2331_v32 = vld [vmem:[#allocation2 + $0x70] sm:$0xff] }
 0x204   : > { %3096 = vmatmul.mubr.bf16.vlgmr.msra.gmra.mxu1 %v4947_v58  ;;  %4514 = vmatprep.subr.bf16.mxu0 %v4954_v35  ;;  %v5015_v58 = vld [vmem:[#allocation2 + $0x60] ss:$-40 sps:$4 sm:$0xff]   ;;  %v2334_v0 = vld [vmem:[#allocation2 + $0x150] sm:$0xff] }
 0x205   : > { %3103 = vmatprep.mubr.bf16.mxu1 %v4955_v9  ;;  %v4191_v35 = vcombine.high %v2331_v32, %v2334_v0  ;;  %v4190_v9 = vcombine.low %v2331_v32, %v2334_v0 }
 0x207   : > { %4515 = vmatpush3.bf16.msra.mxu0 %v4957_v63  ;;  %v5016_v63 = vld [vmem:[%s5319_s11 + $0x38] sm:$0xff]  }
 0x208   : > { %4516 = vmatprep.subr.bf16.mxu0 %v4962_v36  ;;  %4592 = vmatprep.subr.bf16.mxu1 %v5016_v63  ;;  %v5019_v36 = vld [vmem:[%s5319_s11 + $0x20] sm:$0xff]  }
 0x209   : > { %4593 = vmatpush3.bf16.msra.mxu1 %v5016_v63 }
 0x20a   : > { %3007 = vmatmul.mubr.bf16.gmra.mxu0 %v4953_v33  ;;  %v4184_v33 = vcombine.low %v2325_v16, %v2328_v8  ;;  %v6680_v16 = vld [vmem:[%s363_s14] ss:$0 sm:$0xff] }
 0x20b   : > { %3014 = vmatprep.mubr.bf16.mxu0 %v4959_v60  ;;  %4517 = vmatpush3.bf16.msra.mxu0 %v4963_v61  ;;  %v5018_v60 = vld [vmem:[%s5319_s11 + $0x28] sm:$0xff]   ;;  %v5023_v61 = vld [vmem:[%s5319_s11] sm:$0xff]  }
 0x20c   : > { %3104 = vmatmul.mubr.bf16.gmra.mxu1 %v4958_v38  ;;  %4518 = vmatprep.subr.bf16.mxu0 %v4967_v17  ;;  %v5017_v38 = vld [vmem:[%s5319_s11 + $0x30] sm:$0xff]  }
 0x20d   : > { %3111 = vmatprep.mubr.bf16.mxu1 %v4159_v34  ;;  %4594 = vmatprep.subr.bf16.mxu1 %v5017_v38  ;;  %v5022_v34 = vld [vmem:[%s5319_s11 + $0x8] sm:$0xff]  }
 0x20e   : > { %4595 = vmatpush3.bf16.msra.mxu1 %v5017_v38 }
 0x20f   : > { %4519 = vmatpush3.bf16.msra.mxu0 %v4970_v54  ;;  %4596 = vmatprep.subr.bf16.mxu1 %v5018_v60 }
 0x210   : > { %4520 = vmatprep.subr.bf16.mxu0 %v4972_v3 }
 0x212   : > { %3015 = vmatmul.mubr.bf16.gmra.mxu0 %v4961_v22  ;;  %4597 = vmatpush3.bf16.msra.mxu1 %v5018_v60 }
 0x213   : > { %3022 = vmatprep.mubr.bf16.mxu0 %v4964_v25  ;;  %4521 = vmatpush3.bf16.msra.mxu0 %v4975_v2 }
 0x214   : > { %3112 = vmatmul.mubr.bf16.gmra.mxu1 %v4158_v10  ;;  %4522 = vmatprep.subr.bf16.mxu0 %v4980_v4 }
 0x215   : > { %3119 = vmatprep.mubr.bf16.mxu1 %v4968_v18  ;;  %4598 = vmatprep.subr.bf16.mxu1 %v5019_v36 }
 0x216   : > { %4599 = vmatpush3.bf16.msra.mxu1 %v5019_v36 }
 0x217   : > { %4523 = vmatpush3.bf16.msra.mxu0 %v4983_v43  ;;  %4600 = vmatprep.subr.bf16.mxu1 %v5020_v48 }
 0x218   : > { %4524 = vmatprep.subr.bf16.mxu0 %v4988_v55 }
 0x21a   : > { %3023 = vmatmul.mubr.bf16.gmra.mxu0 %v4966_v53  ;;  %4601 = vmatpush3.bf16.msra.mxu1 %v5020_v48 }
 0x21b   : > { %3030 = vmatprep.mubr.bf16.mxu0 %v4169_v26  ;;  %4525 = vmatpush3.bf16.msra.mxu0 %v4991_v49 }
 0x21c   : > { %3120 = vmatmul.mubr.bf16.gmra.mxu1 %v4971_v28  ;;  %4526 = vmatprep.subr.bf16.mxu0 %v4993_v1 }
 0x21d   : > { %3127 = vmatprep.mubr.bf16.mxu1 %v4973_v41  ;;  %4602 = vmatprep.subr.bf16.mxu1 %v5021_v24 }
 0x21e   : > { %4603 = vmatpush3.bf16.msra.mxu1 %v5021_v24 }
 0x21f   : > { %4527 = vmatpush3.bf16.msra.mxu0 %v4996_v21  ;;  %4604 = vmatprep.subr.bf16.mxu1 %v5022_v34 }
 0x222   : > { %3031 = vmatmul.mubr.bf16.gmra.mxu0 %v4168_v5  ;;  %4605 = vmatpush3.bf16.msra.mxu1 %v5022_v34 }
 0x223   : > { %3038 = vmatprep.mubr.bf16.mxu0 %v4977_v50  ;;  %4606 = vmatprep.subr.bf16.mxu1 %v5023_v61 }
 0x224   : > { %3128 = vmatmul.mubr.bf16.gmra.mxu1 %v4976_v30 }
 0x225   : > { %3135 = vmatprep.mubr.bf16.mxu1 %v4981_v15 }
 0x226   : > { %4607 = vmatpush3.bf16.msra.mxu1 %v5023_v61 }
 0x22a   : > { %3039 = vmatmul.mubr.bf16.gmra.mxu0 %v4979_v57 }
 0x22b   : > { %3046 = vmatprep.mubr.bf16.mxu0 %v4985_v13 }
 0x22c   : > { %3136 = vmatmul.mubr.bf16.gmra.mxu1 %v4984_v42 }
 0x22d   : > { %3143 = vmatprep.mubr.bf16.mxu1 %v4989_v46 }
 0x232   : > { %3047 = vmatmul.mubr.bf16.gmra.mxu0 %v4987_v6 }
 0x233   : > { %3054 = vmatprep.mubr.bf16.mxu0 %v4187_v40 }
 0x234   : > { %3144 = vmatmul.mubr.bf16.gmra.mxu1 %v4992_v20 }
 0x235   : > { %3151 = vmatprep.mubr.bf16.mxu1 %v4994_v59 }
 0x23a   : > { %3055 = vmatmul.mubr.bf16.gmra.mxu0 %v4186_v52 }
 0x23b   : > { %3192 = vmatprep.mubr.bf16.mxu0 %v5000_v19 }
 0x23c   : > { %3152 = vmatmul.mubr.bf16.gmra.mxu1 %v4997_v56 }
 0x242   : > { %3193 = vmatmul.mubr.bf16.vlgmr.msra.gmra.mxu0 %v4998_v45 }
 0x243   : > { %3200 = vmatprep.mubr.bf16.mxu0 %v5001_v39 }
 0x24a   : > { %3201 = vmatmul.mubr.bf16.gmra.mxu0 %v5003_v44 }
 0x24b   : > { %3208 = vmatprep.mubr.bf16.mxu0 %v5004_v29 }
 0x252   : > { %3209 = vmatmul.mubr.bf16.gmra.mxu0 %v5006_v51 }
 0x253   : > { %3216 = vmatprep.mubr.bf16.mxu0 %v5007_v14 }
 0x25a   : > { %3217 = vmatmul.mubr.bf16.gmra.mxu0 %v5009_v27 }
 0x25b   : > { %3224 = vmatprep.mubr.bf16.mxu0 %v5010_v12 }
 0x262   : > { %3225 = vmatmul.mubr.bf16.gmra.mxu0 %v5012_v62 }
 0x263   : > { %3232 = vmatprep.mubr.bf16.mxu0 %v5013_v31 }
 0x26a   : > { %3233 = vmatmul.mubr.bf16.gmra.mxu0 %v5015_v58 }
 0x26b   : > { %3240 = vmatprep.mubr.bf16.mxu0 %v4185_v23 }
 0x272   : > { %3241 = vmatmul.mubr.bf16.gmra.mxu0 %v4184_v33 }
 0x273   : > { %3248 = vmatprep.mubr.bf16.mxu0 %v4191_v35 }
 0x27a   : > { %3249 = vmatmul.mubr.bf16.gmra.mxu0 %v4190_v9 }
 0x2c2   : > { %v4400_v22 = vpop.f32.mrf.mxu0 }
 0x2c4   : > { %v4401_v17 = vpop.f32.mrf.mxu0  ;;  %v4464_v25 = vpop.f32.mrf.mxu1 }
 0x2c5   : > { %v4402_v31 = vadd.f32 %v4401_v17, %v4400_v22 }
 0x2c6   : > { %v4403_v54 = vpop.f32.mrf.mxu0  ;;  %v4465_v10 = vpop.f32.mrf.mxu1 }
 0x2c7   : > { %v3001_v32 = vadd.f32 %v4402_v31, %v6680_v16  ;;  %v4466_v0 = vadd.f32 %v4465_v10, %v4464_v25 }
 0x2c8   : > { %v4404_v18 = vpop.f32.mrf.mxu0  ;;  %v4467_v3 = vpop.f32.mrf.mxu1 }
 0x2c9   : > { %v4405_v33 = vadd.f32 %v4404_v18, %v4403_v54  ;;  %v3098_v60 = vadd.f32 %v4466_v0, %v3001_v32 }
 0x2ca   : > { %v4406_v37 = vpop.f32.mrf.mxu0  ;;  %v4468_v47 = vpop.f32.mrf.mxu1 }
 0x2cb   : > { %v3004_v36 = vadd.f32 %v4405_v33, %v6680_v16  ;;  %v4469_v48 = vadd.f32 %v4468_v47, %v4467_v3 }
 0x2cc   : > { %v4407_v2 = vpop.f32.mrf.mxu0  ;;  %v4470_v53 = vpop.f32.mrf.mxu1 }
 0x2cd   : > { %v4408_v63 = vadd.f32 %v4407_v2, %v4406_v37  ;;  %v3101_v54 = vadd.f32 %v4469_v48, %v3004_v36 }
 0x2ce   : > { %v4409_v26 = vpop.f32.mrf.mxu0  ;;  %v4471_v28 = vpop.f32.mrf.mxu1 }
 0x2cf   : > { %v3009_v17 = vadd.f32 %v4408_v63, %v6680_v16 }
 0x2d0   : > { %v4410_v4 = vpop.f32.mrf.mxu0  ;;  %v6615_v55 = vpop.f32.mrf.mxu1 }
 0x2d1   : > { %v4411_v31 = vadd.f32 %v4410_v4, %v4409_v26 }
 0x2d2   : > { %v4412_v43 = vpop.f32.mrf.mxu0  ;;  %v6621_v50 = vpop.f32.mrf.mxu1 }
 0x2d3   : > { %v3012_v33 = vadd.f32 %v4411_v31, %v6680_v16 }
 0x2d4   : > { %v4413_v41 = vpop.f32.mrf.mxu0  ;;  %v6627_v21 = vpop.f32.mrf.mxu1 }
 0x2d5   : > { %v4414_v32 = vadd.f32 %v4413_v41, %v4412_v43 }
 0x2d6   : > { %v6617_v49 = vpop.f32.mrf.mxu0  ;;  %v6633_v13 = vpop.f32.mrf.mxu1 }
 0x2d7   : > { %v3017_v43 = vadd.f32 %v4414_v32, %v6680_v16 }
 0x2d8   : > { %v6619_v5 = vpop.f32.mrf.mxu0  ;;  %v6639_v7 = vpop.f32.mrf.mxu1 }
 0x2d9   : > { %v4417_v36 = vadd.f32 %v6619_v5, %v6617_v49 }
 0x2da   : > { %v6623_v1 = vpop.f32.mrf.mxu0  ;;  %v6645_v40 = vpop.f32.mrf.mxu1 }
 0x2db   : > { %v3020_v49 = vadd.f32 %v4417_v36, %v6680_v16 }
 0x2dc   : > { %v6625_v30 = vpop.f32.mrf.mxu0  ;;  %v6651_v52 = vpop.f32.mrf.mxu1 }
 0x2de   : > { %v6629_v15 = vpop.f32.mrf.mxu0  ;;  %v6657_v45 = vpop.f32.mrf.mxu1 }
 0x2e0   : > { %v6631_v57 = vpop.f32.mrf.mxu0  ;;  %v6663_v29 = vpop.f32.mrf.mxu1 }
 0x2e2   : > { %v6635_v42 = vpop.f32.mrf.mxu0  ;;  %v6669_v27 = vpop.f32.mrf.mxu1 }
 0x2e3   : > { %v4487_v36 = vadd.f32 %v6669_v27, %v6663_v29 }
 0x2e4   : > { %v6637_v46 = vpop.f32.mrf.mxu0  ;;  %v6682_v8 = vpop.f32.mrf.mxu1 }
 0x2e6   : > { %v6641_v11 = vpop.f32.mrf.mxu0  ;;  %v6689_v35 = vpop.f32.mrf.mxu1 }
 0x2e8   : > { %v6643_v6 = vpop.f32.mrf.mxu0  ;;  %v6692_v34 = vpop.f32.mrf.mxu1 }
 0x2ea   : > { %v6647_v20 = vpop.f32.mrf.mxu0  ;;  %v6695_v37 = vpop.f32.mrf.mxu1 }
 0x2ec   : > { %v6649_v59 = vpop.f32.mrf.mxu0 }
 0x2ee   : > { %v6653_v19 = vpop.f32.mrf.mxu0 }
 0x2f0   : > { %v6655_v56 = vpop.f32.mrf.mxu0 }
 0x2f2   : > { %v6659_v39 = vpop.f32.mrf.mxu0 }
 0x2f4   : > { %v6661_v44 = vpop.f32.mrf.mxu0 }
 0x2f6   : > { %v6665_v51 = vpop.f32.mrf.mxu0 }
 0x2f8   : > { %v6667_v14 = vpop.f32.mrf.mxu0 }
 0x2fa   : > { %v6671_v12 = vpop.f32.mrf.mxu0 }
 0x2fc   : > { %v6673_v62 = vpop.f32.mrf.mxu0 }
 0x2fe   : > { %v6684_v58 = vpop.f32.mrf.mxu0 }
 0x300   : > { %v6686_v23 = vpop.f32.mrf.mxu0 }
 0x301   : > { %6946 = vst [vmem:[#allocation16_spill] sm:$0xff] %v6686_v23  ;;  %v4472_v23 = vadd.f32 %v4471_v28, %v4470_v53  ;;  %v4475_v53 = vadd.f32 %v6621_v50, %v6615_v55  ;;  %v6700_v28 = vpop.f32.mrf.mxu1 }
 0x302   : > { %v4528_v9 = vpop.f32.mrf.mxu0 }
 0x303   : > { %v3106_v47 = vadd.f32 %v4472_v23, %v3009_v17  ;;  %v4478_v23 = vadd.f32 %v6633_v13, %v6627_v21  ;;  %v6707_v17 = vpop.f32.mrf.mxu1 }
 0x304   : > { %v4529_v38 = vpop.f32.mrf.mxu0 }
 0x305   : > { %v4530_v24 = vadd.f32 %v4529_v38, %v4528_v9 }
 0x306   : > { %v4531_v61 = vpop.f32.mrf.mxu0 }
 0x307   : > { %v3195_v22 = vadd.f32 %v4530_v24, %v3098_v60  ;;  %v3109_v24 = vadd.f32 %v4475_v53, %v3012_v33  ;;  %v4484_v33 = vadd.f32 %v6657_v45, %v6651_v52 }
 0x308   : > { %v4532_v25 = vpop.f32.mrf.mxu0 }
 0x309   : > { %v4533_v10 = vadd.f32 %v4532_v25, %v4531_v61  ;;  %vm3257_vm0 = vcmp.gt.f32.partialorder %v3195_v22, 0.0  ;;  %v3273_v18 = vmul.f32 0.01, %v3195_v22  ;;  %v4420_v25 = vadd.f32 %v6625_v30, %v6623_v1 }
 0x30a   : > { %v4534_v2 = vpop.f32.mrf.mxu0 }
 0x30b   : > { %v3198_v0 = vadd.f32 %v4533_v10, %v3101_v54  ;;  %v3289_v3 = vsel %vm3257_vm0, %v3195_v22, %v3273_v18  ;;  %v3114_v54 = vadd.f32 %v4478_v23, %v3017_v43  ;;  %v4481_v18 = vadd.f32 %v6645_v40, %v6639_v7 }
 0x30c   : > { %v4535_v9 = vpop.f32.mrf.mxu0  ;;  %v3401_v38 = vmul.f32 %v3289_v3, %v3289_v3  ;;  %v3025_v1 = vadd.f32 %v4420_v25, %v6680_v16 }
 0x30d   : > { %v3274_v26 = vmul.f32 0.01, %v3198_v0  ;;  %v4536_v4 = vadd.f32 %v4535_v9, %v4534_v2  ;;  %vm3258_vm1 = vcmp.gt.f32.partialorder %v3198_v0, 0.0  ;;  %v4423_v9 = vadd.f32 %v6631_v57, %v6629_v15 }
 0x30e   : > { %v4537_v63 = vpop.f32.mrf.mxu0  ;;  %3417 = vadd.xlane.f32.xlu0 %v3401_v38  ;;  %v3117_v53 = vadd.f32 %v4481_v18, %v3020_v49 }
 0x30f   : > { %v3203_v41 = vadd.f32 %v4536_v4, %v3106_v47  ;;  %v3290_v60 = vsel %vm3258_vm1, %v3198_v0, %v3274_v26  ;;  %v6715_v0 = vpop.f32.mrf.mxu1  ;;  %v3028_v15 = vadd.f32 %v4423_v9, %v6680_v16  ;;  %v4496_v9 = vadd.f32 %v6707_v17, %v6700_v28 }
 0x310   : > { %v3305_v48 = vpack.c.bf16 %v3290_v60, %v3289_v3  ;;  %v4538_v55 = vpop.f32.mrf.mxu0  ;;  %v3402_v50 = vmul.f32 %v3290_v60, %v3290_v60  ;;  %v3122_v60 = vadd.f32 %v4484_v33, %v3025_v1  ;;  %vm3647_vm1 = vcmask 64512  }
 0x311   : > { %v4539_v61 = vadd.f32 %v4538_v55, %v4537_v63  ;;  %vm3259_vm5 = vcmp.gt.f32.partialorder %v3203_v41, 0.0  ;;  %v3275_v22 = vmul.f32 0.01, %v3203_v41  ;;  %v6722_v63 = vpop.f32.mrf.mxu1 }
 0x312   : > { %4341 = vst [vmem:[%s5321_s22] sm:$0xff] %v3305_v48   ;;  %v4540_v31 = vpop.f32.mrf.mxu0  ;;  %3419 = vadd.xlane.f32.xlu0 %v3402_v50  ;;  %4608 = vmatprep.mubr.bf16.mxu1 %v3305_v48 }
 0x313   : > { %v3206_v21 = vadd.f32 %v4539_v61, %v3109_v24  ;;  %v3291_v13 = vsel %vm3259_vm5, %v3203_v41, %v3275_v22  ;;  %v4426_v41 = vadd.f32 %v6637_v46, %v6635_v42  ;;  %v6730_v50 = vpop.f32.mrf.mxu1  ;;  %v4490_v22 = vadd.f32 %v6689_v35, %v6682_v8 }
 0x314   : > { %v4541_v5 = vpop.f32.mrf.mxu0  ;;  %v3403_v10 = vmul.f32 %v3291_v13, %v3291_v13 }
 0x315   : > { %v3276_v2 = vmul.f32 0.01, %v3206_v21  ;;  %v4542_v32 = vadd.f32 %v4541_v5, %v4540_v31  ;;  %vm3260_vm6 = vcmp.gt.f32.partialorder %v3206_v21, 0.0  ;;  %v3033_v42 = vadd.f32 %v4426_v41, %v6680_v16  ;;  %v4501_v49 = vpop.f32.mrf.mxu1 }
 0x316   : > { %v4543_v3 = vpop.f32.mrf.mxu0  ;;  %3421 = vadd.xlane.f32.xlu1 %v3403_v10  ;;  %v4429_v31 = vadd.f32 %v6643_v6, %v6641_v11  ;;  %v4432_v10 = vadd.f32 %v6649_v59, %v6647_v20  ;;  %v4438_v41 = vadd.f32 %v6661_v44, %v6659_v39 }
 0x317   : > { %v3211_v30 = vadd.f32 %v4542_v32, %v3114_v54  ;;  %v3292_v47 = vsel %vm3260_vm6, %v3206_v21, %v3276_v2  ;;  %v3125_v21 = vadd.f32 %v4487_v36, %v3028_v15  ;;  %v3130_v35 = vadd.f32 %v4490_v22, %v3033_v42 }
 0x318   : > { %v3306_v38 = vpack.c.bf16 %v3292_v47, %v3291_v13  ;;  %v4544_v7 = vpop.f32.mrf.mxu0  ;;  %v3404_v40 = vmul.f32 %v3292_v47, %v3292_v47  ;;  %v3036_v11 = vadd.f32 %v4429_v31, %v6680_v16  ;;  %v4493_v32 = vadd.f32 %v6695_v37, %v6692_v34 }
 0x319   : > { %v4545_v26 = vadd.f32 %v4544_v7, %v4543_v3  ;;  %vm3261_vm4 = vcmp.gt.f32.partialorder %v3211_v30, 0.0  ;;  %v3277_v4 = vmul.f32 0.01, %v3211_v30  ;;  %v3041_v33 = vadd.f32 %v4432_v10, %v6680_v16 }
 0x31a   : > { %4377 = vst [vmem:[%s5321_s22 + $0x8] sm:$0xff] %v3306_v38   ;;  %v4546_v43 = vpop.f32.mrf.mxu0  ;;  %3423 = vadd.xlane.f32.xlu1 %v3404_v40  ;;  %4609 = vmatmul.mubr.bf16.vlgmr.msra.gmra.mxu1 %v3306_v38  ;;  %v4435_v38 = vadd.f32 %v6655_v56, %v6653_v19  ;;  %v3133_v37 = vadd.f32 %v4493_v32, %v3036_v11 }
 0x31b   : > { %v3214_v52 = vadd.f32 %v4545_v26, %v3117_v53  ;;  %v3293_v45 = vsel %vm3261_vm4, %v3211_v30, %v3277_v4  ;;  %v4503_v30 = vpop.f32.mrf.mxu1  ;;  %v3138_v17 = vadd.f32 %v4496_v9, %v3041_v33 }
 0x31c   : > { %v4547_v57 = vpop.f32.mrf.mxu0  ;;  %v3405_v23 = vmul.f32 %v3293_v45, %v3293_v45  ;;  %v3044_v19 = vadd.f32 %v4435_v38, %v6680_v16 }
 0x31d   : > { %v4548_v48 = vadd.f32 %v4547_v57, %v4546_v43  ;;  %vm3262_vm7 = vcmp.gt.f32.partialorder %v3214_v52, 0.0  ;;  %v3278_v55 = vmul.f32 0.01, %v3214_v52  ;;  %v4504_v4 = vpop.f32.mrf.mxu1 }
 0x31e   : > { %v4549_v24 = vpop.f32.mrf.mxu0  ;;  %3425 = vadd.xlane.f32.xlu0 %v3405_v23 }
 0x31f   : > { %v3219_v46 = vadd.f32 %v4548_v48, %v3122_v60  ;;  %v3294_v61 = vsel %vm3262_vm7, %v3214_v52, %v3278_v55  ;;  %v4499_v60 = vadd.f32 %v6722_v63, %v6715_v0  ;;  %v4506_v23 = vpop.f32.mrf.mxu1  ;;  %v3049_v48 = vadd.f32 %v4438_v41, %v6680_v16 }
 0x320   : > { %v4550_v25 = vpop.f32.mrf.mxu0  ;;  %v3307_v29 = vpack.c.bf16 %v3294_v61, %v3293_v45  ;;  %v3406_v27 = vmul.f32 %v3294_v61, %v3294_v61  ;;  %v4502_v55 = vadd.f32 %v4501_v49, %v6730_v50 }
 0x321   : > { %v4551_v13 = vadd.f32 %v4550_v25, %v4549_v24  ;;  %vm3263_vm8 = vcmp.gt.f32.partialorder %v3219_v46, 0.0  ;;  %v3279_v54 = vmul.f32 0.01, %v3219_v46  ;;  %v4441_v24 = vadd.f32 %v6667_v14, %v6665_v51  ;;  %v4507_v31 = vpop.f32.mrf.mxu1 }
 0x322   : > { %v4552_v5 = vpop.f32.mrf.mxu0  ;;  %4378 = vst [vmem:[%s5321_s22 + $0x10] sm:$0xff] %v3307_v29   ;;  %3427 = vadd.xlane.f32.xlu1 %v3406_v27  ;;  %4612 = vmatprep.mubr.bf16.mxu1 %v3307_v29  ;;  %v3141_v0 = vadd.f32 %v4499_v60, %v3044_v19  ;;  %v4444_v29 = vadd.f32 %v6673_v62, %v6671_v12  ;;  %v6947_v62 = vld [vmem:[#allocation16_spill] sm:$0xff] }
 0x323   : > { %v3222_v18 = vadd.f32 %v4551_v13, %v3125_v21  ;;  %v3295_v8 = vsel %vm3263_vm8, %v3219_v46, %v3279_v54  ;;  %v3146_v21 = vadd.f32 %v4502_v55, %v3049_v48  ;;  %v3052_v51 = vadd.f32 %v4441_v24, %v6680_v16  ;;  %v4509_v10 = vpop.f32.mrf.mxu1 }
 0x324   : > { %v4553_v6 = vpop.f32.mrf.mxu0  ;;  %v3407_v2 = vmul.f32 %v3295_v8, %v3295_v8  ;;  %v4505_v54 = vadd.f32 %v4504_v4, %v4503_v30  ;;  %v4508_v12 = vadd.f32 %v4507_v31, %v4506_v23  ;;  %v3449_v48 = vlaneseq }
 0x325   : > { %v4554_v3 = vadd.f32 %v4553_v6, %v4552_v5  ;;  %vm3264_vm9 = vcmp.gt.f32.partialorder %v3222_v18, 0.0  ;;  %v3280_v1 = vmul.f32 0.01, %v3222_v18  ;;  %v4447_v6 = vadd.f32 %v6947_v62, %v6684_v58  ;;  %v4510_v33 = vpop.f32.mrf.mxu1 }
 0x326   : > { %v4555_v47 = vpop.f32.mrf.mxu0  ;;  %3429 = vadd.xlane.f32.xlu0 %v3407_v2  ;;  %v4511_v58 = vadd.f32 %v4510_v33, %v4509_v10  ;;  %v5142_v24 = vmov 0.0   ;;  %v3455_v10 = vld [vmem:[#allocation3 + $0x8] sm:$0xff]  ;;  %v3458_v33 = vld [vmem:[#allocation3 + $0x20] sm:$0xff] }
 0x327   : > { %v3227_v20 = vadd.f32 %v4554_v3, %v3130_v35  ;;  %v3296_v59 = vsel %vm3264_vm9, %v3222_v18, %v3280_v1  ;;  %v3149_v1 = vadd.f32 %v4505_v54, %v3052_v51 }
 0x328   : > { %v4556_v7 = vpop.f32.mrf.mxu0  ;;  %v3308_v40 = vpack.c.bf16 %v3296_v59, %v3295_v8  ;;  %v3408_v34 = vmul.f32 %v3296_v59, %v3296_v59  ;;  %v3057_v8 = vadd.f32 %v4444_v29, %v6680_v16  ;;  %v3454_v29 = vld [vmem:[#allocation3] sm:$0xff] }
 0x329   : > { %v4557_v53 = vadd.f32 %v4556_v7, %v4555_v47  ;;  %vm3265_vm10 = vcmp.gt.f32.partialorder %v3227_v20, 0.0  ;;  %v3281_v26 = vmul.f32 0.01, %v3227_v20  ;;  %v3060_v7 = vadd.f32 %v4447_v6, %v6680_v16 }
 0x32a   : > { %v4558_v43 = vpop.f32.mrf.mxu0  ;;  %4379 = vst [vmem:[%s5321_s22 + $0x18] sm:$0xff] %v3308_v40   ;;  %3431 = vadd.xlane.f32.xlu1 %v3408_v34  ;;  %4613 = vmatmul.mubr.bf16.gmra.mxu1 %v3308_v40  ;;  %v3154_v38 = vadd.f32 %v4508_v12, %v3057_v8 }
 0x32b   : > { %v3230_v52 = vadd.f32 %v4557_v53, %v3133_v37  ;;  %v3297_v28 = vsel %vm3265_vm10, %v3227_v20, %v3281_v26 }
 0x32c   : > { %v4559_v56 = vpop.f32.mrf.mxu0  ;;  %v3409_v45 = vmul.f32 %v3297_v28, %v3297_v28 }
 0x32d   : > { %v4560_v15 = vadd.f32 %v4559_v56, %v4558_v43  ;;  %vm3266_vm11 = vcmp.gt.f32.partialorder %v3230_v52, 0.0  ;;  %v3282_v57 = vmul.f32 0.01, %v3230_v52 }
 0x32e   : > { %v4561_v36 = vpop.f32.mrf.mxu0  ;;  %3433 = vadd.xlane.f32.xlu0 %v3409_v45 }
 0x32f   : > { %v3235_v39 = vadd.f32 %v4560_v15, %v3138_v17  ;;  %v3298_v44 = vsel %vm3266_vm11, %v3230_v52, %v3282_v57  ;;  %v3157_v17 = vadd.f32 %v4511_v58, %v3060_v7  ;;  %v3461_v7 = vld [vmem:[#allocation3 + $0x38] sm:$0xff] }
 0x330   : > { %v4562_v42 = vpop.f32.mrf.mxu0  ;;  %v3309_v46 = vpack.c.bf16 %v3298_v44, %v3297_v28  ;;  %v3410_v61 = vmul.f32 %v3298_v44, %v3298_v44 }
 0x331   : > { %v4563_v63 = vadd.f32 %v4562_v42, %v4561_v36  ;;  %vm3267_vm12 = vcmp.gt.f32.partialorder %v3235_v39, 0.0  ;;  %v3283_v22 = vmul.f32 0.01, %v3235_v39 }
 0x332   : > { %v4564_v25 = vpop.f32.mrf.mxu0  ;;  %4380 = vst [vmem:[%s5321_s22 + $0x20] sm:$0xff] %v3309_v46   ;;  %3435 = vadd.xlane.f32.xlu1 %v3410_v61  ;;  %4616 = vmatprep.mubr.bf16.mxu1 %v3309_v46 }
 0x333   : > { %v3238_v27 = vadd.f32 %v4563_v63, %v3141_v0  ;;  %v3299_v50 = vsel %vm3267_vm12, %v3235_v39, %v3283_v22  ;;  %v3450_v39 = vand.u32 127, %v3449_v48  ;;  %v3456_v0 = vld [vmem:[#allocation3 + $0x10] sm:$0xff] }
 0x334   : > { %v4565_v14 = vpop.f32.mrf.mxu0  ;;  %v3411_v13 = vmul.f32 %v3299_v50, %v3299_v50 }
 0x335   : > { %v4566_v49 = vadd.f32 %v4565_v14, %v4564_v25  ;;  %vm3268_vm13 = vcmp.gt.f32.partialorder %v3238_v27, 0.0  ;;  %v3284_v5 = vmul.f32 0.01, %v3238_v27  ;;  %vm3451_vm0 = vcmp.eq.s32.totalorder %v3450_v39, 3  ;;  %v3457_v14 = vld [vmem:[#allocation3 + $0x18] sm:$0xff] }
 0x336   : > { %v4567_v18 = vpop.f32.mrf.mxu0  ;;  %3437 = vadd.xlane.f32.xlu0 %v3411_v13  ;;  %v6769_v42 = vsel %vm3451_vm0, 1.0, %v5142_v24 }
 0x337   : > { %v3243_v35 = vadd.f32 %v4566_v49, %v3146_v21  ;;  %v3300_v11 = vsel %vm3268_vm13, %v3238_v27, %v3284_v5 }
 0x338   : > { %v4568_v2 = vpop.f32.mrf.mxu0  ;;  %v3310_v32 = vpack.c.bf16 %v3300_v11, %v3299_v50  ;;  %v3412_v3 = vmul.f32 %v3300_v11, %v3300_v11 }
 0x339   : > { %v4569_v30 = vadd.f32 %v4568_v2, %v4567_v18  ;;  %vm3269_vm14 = vcmp.gt.f32.partialorder %v3243_v35, 0.0  ;;  %v3285_v47 = vmul.f32 0.01, %v3243_v35 }
 0x33a   : > { %v4570_v20 = vpop.f32.mrf.mxu0  ;;  %4381 = vst [vmem:[%s5321_s22 + $0x28] sm:$0xff] %v3310_v32   ;;  %3439 = vadd.xlane.f32.xlu1 %v3412_v3  ;;  %4617 = vmatmul.mubr.bf16.gmra.mxu1 %v3310_v32  ;;  %v3460_v3 = vld [vmem:[#allocation3 + $0x30] sm:$0xff] }
 0x33b   : > { %v3246_v59 = vadd.f32 %v4569_v30, %v3149_v1  ;;  %v3301_v9 = vsel %vm3269_vm14, %v3243_v35, %v3285_v47 }
 0x33c   : > { %v4571_v40 = vpop.f32.mrf.mxu0  ;;  %v3413_v34 = vmul.f32 %v3301_v9, %v3301_v9 }
 0x33d   : > { %v4572_v37 = vadd.f32 %v4571_v40, %v4570_v20  ;;  %vm3270_vm15 = vcmp.gt.f32.partialorder %v3246_v59, 0.0  ;;  %v3286_v53 = vmul.f32 0.01, %v3246_v59 }
 0x33e   : > { %v4573_v26 = vpop.f32.mrf.mxu0  ;;  %3441 = vadd.xlane.f32.xlu0 %v3413_v34 }
 0x33f   : > { %v3251_v4 = vadd.f32 %v4572_v37, %v3154_v38  ;;  %v3302_v43 = vsel %vm3270_vm15, %v3246_v59, %v3286_v53  ;;  %v3459_v53 = vld [vmem:[#allocation3 + $0x28] sm:$0xff] }
 0x340   : > { %v4574_v41 = vpop.f32.mrf.mxu0  ;;  %v3311_v52 = vpack.c.bf16 %v3302_v43, %v3301_v9  ;;  %v3414_v28 = vmul.f32 %v3302_v43, %v3302_v43 }
 0x341   : > { %v4575_v19 = vadd.f32 %v4574_v41, %v4573_v26  ;;  %vm3271_vm2 = vcmp.gt.f32.partialorder %v3251_v4, 0.0  ;;  %v3287_v56 = vmul.f32 0.01, %v3251_v4 }
 0x342   : > { %4382 = vst [vmem:[%s5321_s22 + $0x30] sm:$0xff] %v3311_v52   ;;  %3443 = vadd.xlane.f32.xlu1 %v3414_v28  ;;  %4620 = vmatprep.mubr.bf16.mxu1 %v3311_v52 }
 0x343   : > { %v3254_v16 = vadd.f32 %v4575_v19, %v3157_v17  ;;  %v3303_v45 = vsel %vm3271_vm2, %v3251_v4, %v3287_v56 }
 0x344   : > { %v3415_v60 = vmul.f32 %v3303_v45, %v3303_v45 }
 0x345   : > { %vm3272_vm3 = vcmp.gt.f32.partialorder %v3254_v16, 0.0  ;;  %v3288_v15 = vmul.f32 0.01, %v3254_v16 }
 0x346   : > { %3445 = vadd.xlane.f32.xlu0 %v3415_v60 }
 0x347   : > { %v3304_v57 = vsel %vm3272_vm3, %v3254_v16, %v3288_v15  ;;  %v3464_v16 = vld [vmem:[#allocation3 + $0x50] sm:$0xff] }
 0x348   : > { %v3312_v23 = vpack.c.bf16 %v3304_v57, %v3303_v45  ;;  %v3416_v36 = vmul.f32 %v3304_v57, %v3304_v57  ;;  %v3462_v57 = vld [vmem:[#allocation3 + $0x40] sm:$0xff] }
 0x34a   : > { %4383 = vst [vmem:[%s5321_s22 + $0x38] sm:$0xff] %v3312_v23   ;;  %3447 = vadd.xlane.f32.xlu1 %v3416_v36  ;;  %4621 = vmatmul.mubr.bf16.gmra.mxu1 %v3312_v23 }
 0x397   : > { %v3418_v55 = vpop.xlane.xlu0 %3417 }
 0x398   : > { %v3470_v22 = vmul.f32 %v6769_v42, %v3418_v55 }
 0x39b   : > { %v3420_v25 = vpop.xlane.xlu0 %3419 }
 0x39c   : > { %v3471_v54 = vmul.f32 %v6769_v42, %v3420_v25 }
 0x39f   : > { %v3422_v44 = vpop.xlane.xlu1 %3421 }
 0x3a0   : > { %v3472_v46 = vmul.f32 %v6769_v42, %v3422_v44  ;;  %v3465_v44 = vld [vmem:[#allocation3 + $0x58] sm:$0xff] }
 0x3a3   : > { %v3424_v61 = vpop.xlane.xlu1 %3423 }
 0x3a4   : > { %v3473_v50 = vmul.f32 %v6769_v42, %v3424_v61 }
 0x3a7   : > { %v3426_v11 = vpop.xlane.xlu0 %3425 }
 0x3a8   : > { %v3474_v30 = vmul.f32 %v6769_v42, %v3426_v11  ;;  %v3469_v11 = vld [vmem:[#allocation3 + $0x78] sm:$0xff] }
 0x3ab   : > { %v3428_v62 = vpop.xlane.xlu1 %3427 }
 0x3ac   : > { %v3475_v34 = vmul.f32 %v6769_v42, %v3428_v62 }
 0x3af   : > { %v3430_v6 = vpop.xlane.xlu0 %3429 }
 0x3b0   : > { %v3476_v2 = vmul.f32 %v6769_v42, %v3430_v6 }
 0x3b3   : > { %v3432_v32 = vpop.xlane.xlu1 %3431 }
 0x3b4   : > { %v3477_v59 = vmul.f32 %v6769_v42, %v3432_v32  ;;  %v3467_v32 = vld [vmem:[#allocation3 + $0x68] sm:$0xff] }
 0x3b7   : > { %v3434_v41 = vpop.xlane.xlu0 %3433 }
 0x3b8   : > { %v3478_v60 = vmul.f32 %v6769_v42, %v3434_v41 }
 0x3bb   : > { %v3436_v28 = vpop.xlane.xlu1 %3435 }
 0x3bc   : > { %v3479_v24 = vmul.f32 %v6769_v42, %v3436_v28 }
 0x3bf   : > { %v3438_v17 = vpop.xlane.xlu0 %3437 }
 0x3c0   : > { %v3480_v19 = vmul.f32 %v6769_v42, %v3438_v17 }
 0x3c3   : > { %v3440_v56 = vpop.xlane.xlu1 %3439 }
 0x3c4   : > { %v3481_v36 = vmul.f32 %v6769_v42, %v3440_v56 }
 0x3c7   : > { %v3442_v25 = vpop.xlane.xlu0 %3441 }
 0x3da   : > { %v4610_v63 = vpop.f32.mrf.mxu1 }
 0x3db   : > { %v3577_v31 = vadd.f32 %v4610_v63, %v3472_v46 }
 0x3dc   : > { %v3568_v27 = vpop.f32.mrf.mxu1 }
 0x3dd   : > { %v3633_v21 = vadd.f32 %v3577_v31, %v3456_v0  ;;  %v3569_v51 = vadd.f32 %v3568_v27, %v3470_v22  ;;  %v3463_v0 = vld [vmem:[#allocation3 + $0x48] sm:$0xff]  ;;  %v3444_v27 = vpop.xlane.xlu1 %3443 }
 0x3de   : > { %v4611_v13 = vpop.f32.mrf.mxu1  ;;  %v3483_v62 = vmul.f32 %v6769_v42, %v3444_v27 }
 0x3df   : > { %3650 = vst.msk [vmem:[#allocation3 + $0x10] sm:$0xff] %vm3647_vm1, %v3633_v21  ;;  %v3631_v49 = vadd.f32 %v3569_v51, %v3454_v29  ;;  %v3580_v5 = vadd.f32 %v4611_v13, %v3473_v50  ;;  %v3446_v50 = vpop.xlane.xlu0 %3445 }
 0x3e0   : > { %v3571_v18 = vpop.f32.mrf.mxu1  ;;  %v3484_v21 = vmul.f32 %v6769_v42, %v3446_v50 }
 0x3e1   : > { %3648 = vst.msk [vmem:[#allocation3] sm:$0xff] %vm3647_vm1, %v3631_v49  ;;  %v3634_v8 = vadd.f32 %v3580_v5, %v3457_v14  ;;  %v3572_v35 = vadd.f32 %v3571_v18, %v3471_v54  ;;  %v3448_v51 = vpop.xlane.xlu1 %3447  ;;  %v3468_v14 = vld [vmem:[#allocation3 + $0x70] sm:$0xff]  ;;  %v3482_v54 = vmul.f32 %v6769_v42, %v3442_v25  ;;  %v3466_v5 = vld [vmem:[#allocation3 + $0x60] sm:$0xff] }
 0x3e2   : > { %v3485_v18 = vmul.f32 %v6769_v42, %v3448_v51 }
 0x3e3   : > { %3651 = vst.msk [vmem:[#allocation3 + $0x18] sm:$0xff] %vm3647_vm1, %v3634_v8  ;;  %v3632_v12 = vadd.f32 %v3572_v35, %v3455_v10 }
 0x3e5   : > { %3649 = vst.msk [vmem:[#allocation3 + $0x8] sm:$0xff] %vm3647_vm1, %v3632_v12 }
 0x3ea   : > { %v4614_v1 = vpop.f32.mrf.mxu1 }
 0x3eb   : > { %v3593_v47 = vadd.f32 %v4614_v1, %v3476_v2 }
 0x3ec   : > { %v3584_v20 = vpop.f32.mrf.mxu1 }
 0x3ed   : > { %v3637_v9 = vadd.f32 %v3593_v47, %v3460_v3  ;;  %v3585_v38 = vadd.f32 %v3584_v20, %v3474_v30 }
 0x3ee   : > { %v4615_v40 = vpop.f32.mrf.mxu1 }
 0x3ef   : > { %3654 = vst.msk [vmem:[#allocation3 + $0x30] sm:$0xff] %vm3647_vm1, %v3637_v9  ;;  %v3635_v58 = vadd.f32 %v3585_v38, %v3458_v33  ;;  %v3596_v37 = vadd.f32 %v4615_v40, %v3477_v59 }
 0x3f0   : > { %v3587_v26 = vpop.f32.mrf.mxu1 }
 0x3f1   : > { %3652 = vst.msk [vmem:[#allocation3 + $0x20] sm:$0xff] %vm3647_vm1, %v3635_v58  ;;  %v3638_v4 = vadd.f32 %v3596_v37, %v3461_v7  ;;  %v3588_v43 = vadd.f32 %v3587_v26, %v3475_v34 }
 0x3f3   : > { %3655 = vst.msk [vmem:[#allocation3 + $0x38] sm:$0xff] %vm3647_vm1, %v3638_v4  ;;  %v3636_v52 = vadd.f32 %v3588_v43, %v3459_v53 }
 0x3f5   : > { %3653 = vst.msk [vmem:[#allocation3 + $0x28] sm:$0xff] %vm3647_vm1, %v3636_v52 }
 0x3fa   : > { %v4618_v45 = vpop.f32.mrf.mxu1 }
 0x3fb   : > { %v3609_v15 = vadd.f32 %v4618_v45, %v3480_v19 }
 0x3fc   : > { %v3600_v23 = vpop.f32.mrf.mxu1 }
 0x3fd   : > { %v3641_v48 = vadd.f32 %v3609_v15, %v3464_v16  ;;  %v3601_v39 = vadd.f32 %v3600_v23, %v3478_v60 }
 0x3fe   : > { %v4619_v55 = vpop.f32.mrf.mxu1 }
 0x3ff   : > { %3658 = vst.msk [vmem:[#allocation3 + $0x50] sm:$0xff] %vm3647_vm1, %v3641_v48  ;;  %v3639_v46 = vadd.f32 %v3601_v39, %v3462_v57  ;;  %v3612_v61 = vadd.f32 %v4619_v55, %v3481_v36 }
 0x400   : > { %v3603_v63 = vpop.f32.mrf.mxu1 }
 0x401   : > { %3656 = vst.msk [vmem:[#allocation3 + $0x40] sm:$0xff] %vm3647_vm1, %v3639_v46  ;;  %v3642_v22 = vadd.f32 %v3612_v61, %v3465_v44  ;;  %v3604_v31 = vadd.f32 %v3603_v63, %v3479_v24 }
 0x403   : > { %3659 = vst.msk [vmem:[#allocation3 + $0x58] sm:$0xff] %vm3647_vm1, %v3642_v22  ;;  %v3640_v29 = vadd.f32 %v3604_v31, %v3463_v0 }
 0x405   : > { %3657 = vst.msk [vmem:[#allocation3 + $0x48] sm:$0xff] %vm3647_vm1, %v3640_v29 }
 0x40a   : > { %v4622_v13 = vpop.f32.mrf.mxu1 }
 0x40b   : > { %v3625_v49 = vadd.f32 %v4622_v13, %v3484_v21 }
 0x40c   : > { %v3616_v10 = vpop.f32.mrf.mxu1 }
 0x40d   : > { %v3645_v8 = vadd.f32 %v3625_v49, %v3468_v14  ;;  %v3617_v35 = vadd.f32 %v3616_v10, %v3482_v54 }
 0x40e   : > { %v4623_v12 = vpop.f32.mrf.mxu1 }
 0x40f   : > { %3662 = vst.msk [vmem:[#allocation3 + $0x70] sm:$0xff] %vm3647_vm1, %v3645_v8  ;;  %v3643_v6 = vadd.f32 %v3617_v35, %v3466_v5  ;;  %v3628_v2 = vadd.f32 %v4623_v12, %v3485_v18 }
 0x410   : > { %v3619_v3 = vpop.f32.mrf.mxu1 }
 0x411   : > { %3660 = vst.msk [vmem:[#allocation3 + $0x60] sm:$0xff] %vm3647_vm1, %v3643_v6  ;;  %v3646_v1 = vadd.f32 %v3628_v2, %v3469_v11  ;;  %v3620_v30 = vadd.f32 %v3619_v3, %v3483_v62  ;;  %3667 = sbr.rel (%p4265_p3) target bundleno = 1055 (0x41f), region = 56 }
 0x413   : > { %3663 = vst.msk [vmem:[#allocation3 + $0x78] sm:$0xff] %vm3647_vm1, %v3646_v1  ;;  %v3644_v47 = vadd.f32 %v3620_v30, %v3467_v32 }
 0x415   : > { %3661 = vst.msk [vmem:[#allocation3 + $0x68] sm:$0xff] %vm3647_vm1, %v3644_v47 }
 0x416   : > { %v3668_v33 = vld [vmem:[#allocation3] sm:$0xff]  ;;  %v3669_v42 = vld [vmem:[#allocation3 + $0x8] sm:$0xff]  ;;  %v3670_v20 = vld [vmem:[#allocation3 + $0x10] sm:$0xff] }
 0x417   : > { %3684 = vst.msk [vmem:[%s5314_s28] sm:$0xff] %vm3647_vm1, %v3668_v33  ;;  %3685 = vst.msk [vmem:[%s5314_s28 + $0x8] sm:$0xff] %vm3647_vm1, %v3669_v42  ;;  %v3671_v59 = vld [vmem:[#allocation3 + $0x18] sm:$0xff]  ;;  %v3672_v9 = vld [vmem:[#allocation3 + $0x20] sm:$0xff] }
 0x418   : > { %3686 = vst.msk [vmem:[%s5314_s28 + $0x10] sm:$0xff] %vm3647_vm1, %v3670_v20  ;;  %v3673_v38 = vld [vmem:[#allocation3 + $0x28] sm:$0xff]  ;;  %3687 = vst.msk [vmem:[%s5314_s28 + $0x18] sm:$0xff] %vm3647_vm1, %v3671_v59  ;;  %v3674_v7 = vld [vmem:[#allocation3 + $0x30] sm:$0xff] }
 0x419   : > { %3688 = vst.msk [vmem:[%s5314_s28 + $0x20] sm:$0xff] %vm3647_vm1, %v3672_v9  ;;  %3689 = vst.msk [vmem:[%s5314_s28 + $0x28] sm:$0xff] %vm3647_vm1, %v3673_v38  ;;  %v3675_v40 = vld [vmem:[#allocation3 + $0x38] sm:$0xff]  ;;  %v3676_v34 = vld [vmem:[#allocation3 + $0x40] sm:$0xff] }
 0x41a   : > { %3690 = vst.msk [vmem:[%s5314_s28 + $0x30] sm:$0xff] %vm3647_vm1, %v3674_v7  ;;  %3691 = vst.msk [vmem:[%s5314_s28 + $0x38] sm:$0xff] %vm3647_vm1, %v3675_v40  ;;  %v3677_v58 = vld [vmem:[#allocation3 + $0x48] sm:$0xff]  ;;  %v3678_v37 = vld [vmem:[#allocation3 + $0x50] sm:$0xff] }
 0x41b   : > { %3692 = vst.msk [vmem:[%s5314_s28 + $0x40] sm:$0xff] %vm3647_vm1, %v3676_v34  ;;  %v3679_v53 = vld [vmem:[#allocation3 + $0x58] sm:$0xff]  ;;  %3693 = vst.msk [vmem:[%s5314_s28 + $0x48] sm:$0xff] %vm3647_vm1, %v3677_v58  ;;  %v3680_v26 = vld [vmem:[#allocation3 + $0x60] sm:$0xff] }
 0x41c   : > { %3694 = vst.msk [vmem:[%s5314_s28 + $0x50] sm:$0xff] %vm3647_vm1, %v3678_v37  ;;  %3695 = vst.msk [vmem:[%s5314_s28 + $0x58] sm:$0xff] %vm3647_vm1, %v3679_v53  ;;  %v3681_v4 = vld [vmem:[#allocation3 + $0x68] sm:$0xff]  ;;  %v3682_v43 = vld [vmem:[#allocation3 + $0x70] sm:$0xff] }
 0x41d   : > { %3696 = vst.msk [vmem:[%s5314_s28 + $0x60] sm:$0xff] %vm3647_vm1, %v3680_v26  ;;  %3697 = vst.msk [vmem:[%s5314_s28 + $0x68] sm:$0xff] %vm3647_vm1, %v3681_v4  ;;  %v3683_v41 = vld [vmem:[#allocation3 + $0x78] sm:$0xff] }
 0x41e   : > { %3698 = vst.msk [vmem:[%s5314_s28 + $0x70] sm:$0xff] %vm3647_vm1, %v3682_v43  ;;  %3699 = vst.msk [vmem:[%s5314_s28 + $0x78] sm:$0xff] %vm3647_vm1, %v3683_v41 }
 0x41f PF: > { %3711 = sbr.rel (!%p5265_p12) target bundleno = 1067 (0x42b), region = 60  ;;  %s4267_s19 = sshll.u32 (%p5265_p12), %s5122_s30, 5  ;;  %v3732_v52 = vld [vmem:[%s5321_s22] sm:$0xf] (%p5265_p12)  ;;  %v3734_v28 = vld [vmem:[%s5321_s22 + $0x4] sm:$0xf] (%p5265_p12) }
 0x420   : > { %s3713_s14 = sadd.s32 (%p5265_p12), %s5118_s29, %s4267_s19  ;;  %v3736_v17 = vld [vmem:[%s5321_s22 + $0x8] sm:$0xf] (%p5265_p12)  ;;  %v3738_v19 = vld [vmem:[%s5321_s22 + $0xc] sm:$0xf] (%p5265_p12)  ;;  %v3740_v56 = vld [vmem:[%s5321_s22 + $0x10] sm:$0xf] (%p5265_p12) }
 0x421   : > { %s4268_s23 = sshll.u32 (%p5265_p12), %s3713_s14, 2  ;;  %v3742_v16 = vld [vmem:[%s5321_s22 + $0x14] sm:$0xf] (%p5265_p12)  ;;  %v3744_v45 = vld [vmem:[%s5321_s22 + $0x18] sm:$0xf] (%p5265_p12) }
 0x422   : > { %s3715_s16 = scalar_lea.vmem (%p5265_p12), %s6895_s6, %s4268_s23  ;;  %v3746_v60 = vld [vmem:[%s5321_s22 + $0x1c] sm:$0xf] (%p5265_p12)  ;;  %v3748_v15 = vld [vmem:[%s5321_s22 + $0x20] sm:$0xf] (%p5265_p12)  ;;  %v3750_v57 = vld [vmem:[%s5321_s22 + $0x24] sm:$0xf] (%p5265_p12) }
 0x423   : > { %3733 = vst [vmem:[%s3715_s16] sm:$0xf] (%p5265_p12), %v3732_v52  ;;  %3735 = vst [vmem:[%s3715_s16 + $0x8] sm:$0xf] (%p5265_p12), %v3734_v28  ;;  %v3752_v23 = vld [vmem:[%s5321_s22 + $0x28] sm:$0xf] (%p5265_p12) }
 0x424   : > { %3737 = vst [vmem:[%s3715_s16 + $0x10] sm:$0xf] %v3736_v17  ;;  %3739 = vst [vmem:[%s3715_s16 + $0x18] sm:$0xf] %v3738_v19  ;;  %v3754_v36 = vld [vmem:[%s5321_s22 + $0x2c] sm:$0xf] }
 0x425   : > { %3741 = vst [vmem:[%s3715_s16 + $0x20] sm:$0xf] %v3740_v56  ;;  %3743 = vst [vmem:[%s3715_s16 + $0x28] sm:$0xf] %v3742_v16  ;;  %v3756_v48 = vld [vmem:[%s5321_s22 + $0x30] sm:$0xf] }
 0x426   : > { %3745 = vst [vmem:[%s3715_s16 + $0x30] sm:$0xf] %v3744_v45  ;;  %3747 = vst [vmem:[%s3715_s16 + $0x38] sm:$0xf] %v3746_v60  ;;  %v3758_v39 = vld [vmem:[%s5321_s22 + $0x34] sm:$0xf] }
 0x427   : > { %3749 = vst [vmem:[%s3715_s16 + $0x40] sm:$0xf] %v3748_v15  ;;  %3751 = vst [vmem:[%s3715_s16 + $0x48] sm:$0xf] %v3750_v57  ;;  %v3760_v44 = vld [vmem:[%s5321_s22 + $0x38] sm:$0xf] }
 0x428   : > { %3753 = vst [vmem:[%s3715_s16 + $0x50] sm:$0xf] %v3752_v23  ;;  %3755 = vst [vmem:[%s3715_s16 + $0x58] sm:$0xf] %v3754_v36  ;;  %v3762_v55 = vld [vmem:[%s5321_s22 + $0x3c] sm:$0xf] }
 0x429   : > { %3757 = vst [vmem:[%s3715_s16 + $0x60] sm:$0xf] %v3756_v48  ;;  %3759 = vst [vmem:[%s3715_s16 + $0x68] sm:$0xf] %v3758_v39 }
 0x42a   : > { %3761 = vst [vmem:[%s3715_s16 + $0x70] sm:$0xf] %v3760_v44  ;;  %3763 = vst [vmem:[%s3715_s16 + $0x78] sm:$0xf] %v3762_v55 }
 0x42b PF: > { %s21_s10 = sadd.s32 1, %s5134_s10   ;;  %s6948_s29 = sld [smem:[#allocation15_spill]] }
 0x42c   : > { %p18_p12 = scmp.ge.s32.totalorder %s21_s10, 6   ;;  %s6949_s26 = sld [smem:[#allocation8_spill]] }
 0x42d   : > { %s6950_s27 = sld [smem:[#allocation9_spill]]  ;;  %s6956_s24 = smov %s5102_s25 }
 0x42e   : > { %s6951_s28 = sld [smem:[#allocation14_spill]] }
 0x42f   : > { %s6952_s30 = sld [smem:[#allocation10_spill]] }
 0x430   : > { %s6953_s21 = sld [smem:[#allocation11_spill]] }
 0x431   : > { %s6954_s8 = sld [smem:[#allocation12_spill]]  ;;  %s6957_s25 = smov %s6948_s29 }
 0x432   : > { %s6955_s9 = sld [smem:[#allocation13_spill]]  ;;  %20 = sbr.rel (!%p18_p12) target bundleno = 8 (0x8), region = 154 }
 0x435   : > { %s6958_s29 = smov %s6952_s30 }
 0x436   : > { %s6959_s30 = smov %s6953_s21 }
 0x437   :  { %3840 = vsyncpa [#allocation5], 1 }
 0x438   :  { %3842 = vsyncpa [#allocation5 + $0x1], 1 }

// kernel: network_forward.5
= control target key start
LH: loop header
LB: loop body
LE: loop exit
PB: predicated region body
PF: predicated region fallthrough
CT: control target
= control target key end

     0   :  { %s2709_s0 = inlined_call_operand.vmem [shape: bf16[2,128,256], index: 0, kind: input, shape index: {}]   ;;  %s2710_s1 = inlined_call_operand.vmem [shape: bf16[2,128,256], index: 1, kind: input, shape index: {}]   ;;  %s2711_s2 = inlined_call_operand.vmem [shape: f32[2,128,1], index: 2, kind: input, shape index: {}]   ;;  %s2712_s3 = inlined_call_operand.vmem [shape: f32[2,128,1], index: 3, kind: input, shape index: {}]   ;;  %s2713_s4 = inlined_call_operand.vmem [shape: bf16[256,2], index: 4, kind: input, shape index: {}]   ;;  %s2714_s5 = inlined_call_operand.vmem [shape: bf16[256,2], index: 5, kind: input, shape index: {}]   ;;  %s2715_s6 = inlined_call_operand.vmem [shape: f32[1,2], index: 6, kind: input, shape index: {}]   ;;  %s2716_s7 = inlined_call_operand.hbm [shape: f32[2,128,512], index: 7, kind: output, shape index: {0}]   ;;  %s2717_s8 = inlined_call_operand.hbm [shape: f32[2,1,2], index: 8, kind: output, shape index: {1}]  }
   0x1   :  { %2738 = sst [smem:[#allocation9_spill]] %s2709_s0 }
   0x2   :  { %2739 = sst [smem:[#allocation10_spill]] %s2710_s1 }
   0x3   :  { %14 = vsyncpa [#allocation3], 0 }
   0x4   :  { %16 = vsyncpa [#allocation3 + $0x1], 0 }
   0x5   :  { %17 = vsyncpa [#allocation5], 0 }
   0x6   :  { %19 = vsyncpa [#allocation5 + $0x1], 0  ;;  %s1900_s27 = smov 0   ;;  %s1902_s28 = smov 0  }
   0x7   :  { %s1904_s29 = smov 0   ;;  %s1906_s30 = smov 0  }
   0x8 LB: > { %s1921_s9 = sadd.s32 4294967295, %s1847_s30   ;;  %s1571_s10 = sadd.s32 4294967294, %s1847_s30   ;;  %s1847_s30 = sphi %s1906_s30, %s2859_s30   ;;  %s1843_s29 = sphi %s1904_s29, %s2858_s29   ;;  %s1839_s28 = sphi %s1902_s28, %s2857_s28   ;;  %s1835_s27 = sphi %s1900_s27, %s2856_s27  }
   0x9   : > { %s1925_s11 = sadd.s32 1, %s1847_s30   ;;  %s199_s12 = sadd.s32 1, %s1843_s29 }
   0xa   : > { %s196_s13 = ssub.s32 %s1847_s30, %s1925_s11  ;;  %p209_p0 = scmp.ne.s32.totalorder %s1843_s29, %s1839_s28 }
   0xb   : > { %p197_p1 = scmp.eq.s32.totalorder %s196_s13, 0  ;;  %p210_p2 = scmp.eq.s32.totalorder %s1921_s9, 1 }
   0xc   : > { %p215_p3 = scmp.ne.s32.totalorder %s1839_s28, %s1835_s27  ;;  %p216_p4 = scmp.eq.s32.totalorder %s1571_s10, 1 }
   0xd   : > { %s1936_s14 = scalar_select %p197_p1, %s1843_s29, %s199_s12  }
   0xe   : > { %p1938_p5 = por %p210_p2, %p209_p0  ;;  %p1942_p6 = por %p216_p4, %p215_p3 }
   0xf   : > { %p1574_p7 = scmp.ge.s32.totalorder %s1847_s30, 1  ;;  %p301_p8 = scmp.lt.s32.totalorder %s1847_s30, 3 }
  0x11   : > { %p302_p9 = pnand %p1574_p7, %p301_p8 }
  0x13   : > { %305 = sbr.rel (%p302_p9) target bundleno = 1018 (0x3fa), region = 48 }
  0x18   : > { %p354_p10 = scmp.lt.s32.totalorder %s1921_s9, 1  ;;  %v1849_v0 = vmov 0   ;;  %v1721_v11 = vld [vmem:[%s2714_s5 + $0x78] sm:$0xff]   ;;  %v1725_v17 = vld [vmem:[%s2714_s5 + $0x70] sm:$0xff]   ;;  %v1729_v23 = vld [vmem:[%s2714_s5 + $0x68] sm:$0xff]   ;;  %s2742_s0 = sld [smem:[#allocation9_spill]] }
  0x19   : > { %1720 = vset.pattern.permute.xlu1 %v1849_v0  ;;  %1719 = vset.pattern.permute.xlu0 %v1849_v0  ;;  %v1722_v12 = vld [vmem:[%s2713_s4 + $0x78] sm:$0xff]   ;;  %v1726_v18 = vld [vmem:[%s2713_s4 + $0x70] sm:$0xff]   ;;  %v1730_v24 = vld [vmem:[%s2713_s4 + $0x68] sm:$0xff]   ;;  %s2743_s1 = sld [smem:[#allocation10_spill]]  ;;  %vm1073_vm0 = vcmask 8192   ;;  %s2376_s24 = sand.u32 1, %s1839_s28  }
  0x1a   : > { %s355_s17 = scalar_select %p354_p10, %s1921_s9, 1  ;;  %1627 = vmatprep.subr.bf16.mxu0 %v1721_v11  ;;  %1649 = vmatprep.subr.bf16.mxu1 %v1722_v12  ;;  %v1723_v15 = vld [vmem:[%s2714_s5 + $0x38] sm:$0xff]   ;;  %v1727_v21 = vld [vmem:[%s2714_s5 + $0x30] sm:$0xff]   ;;  %v1731_v27 = vld [vmem:[%s2714_s5 + $0x28] sm:$0xff]  }
  0x1b   : > { %v1724_v16 = vld [vmem:[%s2713_s4 + $0x38] sm:$0xff]   ;;  %1628 = vmatpush3.bf16.msra.mxu0 %v1723_v15  ;;  %v1728_v22 = vld [vmem:[%s2713_s4 + $0x30] sm:$0xff]   ;;  %v1732_v28 = vld [vmem:[%s2713_s4 + $0x28] sm:$0xff]   ;;  %s1850_s12 = smov 127   ;;  %s1420_s25 = scalar_lea.sflag [#allocation5], %s2376_s24 }
  0x1c   : > { %s1950_s18 = sshll.u32 %s355_s17, 7  ;;  %1650 = vmatpush3.bf16.msra.mxu1 %v1724_v16  ;;  %1629 = vmatprep.subr.bf16.mxu0 %v1725_v17  ;;  %v1733_v29 = vld [vmem:[%s2714_s5 + $0x60] sm:$0xff]   ;;  %v1737_v33 = vld [vmem:[%s2714_s5 + $0x58] sm:$0xff]   ;;  %v1741_v37 = vld [vmem:[%s2714_s5 + $0x50] sm:$0xff]   ;;  %s1619_s17 = sshll.u32 %s1921_s9, 4 }
  0x1d   : > { %s1956_s21 = scalar_lea.vmem %s2711_s2, %s1950_s18  ;;  %1651 = vmatprep.subr.bf16.mxu1 %v1726_v18  ;;  %v1734_v30 = vld [vmem:[%s2713_s4 + $0x60] sm:$0xff]   ;;  %v1738_v34 = vld [vmem:[%s2713_s4 + $0x58] sm:$0xff]   ;;  %v1742_v38 = vld [vmem:[%s2713_s4 + $0x50] sm:$0xff]   ;;  %s2382_s10 = scalar_lea.vmem %s2712_s3, %s1950_s18 }
  0x1e   : > { %v473_v1 = vld [vmem:[%s1956_s21 + $0x10] sm:$0xff]  ;;  %v471_v2 = vld [vmem:[%s1956_s21] sm:$0xff]  ;;  %v474_v3 = vld [vmem:[%s1956_s21 + $0x18] sm:$0xff]  ;;  %s2074_s13 = scalar_lea.vmem %s2742_s0, %s1950_s18  ;;  %s1446_s23 = scalar_lea.hbm %s2717_s8, %s1619_s17 }
  0x1f   : > { %515 = vperm.xlu1 %1720, %v473_v1   ;;  %505 = vperm.xlu0 %1719, %v471_v2   ;;  %v472_v4 = vld [vmem:[%s1956_s21 + $0x8] sm:$0xff]  ;;  %v475_v6 = vld [vmem:[%s1956_s21 + $0x20] sm:$0xff]  ;;  %v478_v7 = vld [vmem:[%s1956_s21 + $0x38] sm:$0xff]  ;;  %s2080_s20 = scalar_lea.vmem %s2743_s1, %s1950_s18  ;;  %s1575_s18 = sshll.u32 %s2376_s24, 9 }
  0x20   : > { %v476_v5 = vld [vmem:[%s1956_s21 + $0x28] sm:$0xff]  ;;  %v477_v8 = vld [vmem:[%s1956_s21 + $0x30] sm:$0xff]  ;;  %v479_v10 = vld [vmem:[%s1956_s21 + $0x40] sm:$0xff]  ;;  %1630 = vmatpush3.bf16.msra.mxu0 %v1727_v21  ;;  %1652 = vmatpush3.bf16.msra.mxu1 %v1728_v22 }
  0x21   : > { %v480_v9 = vld [vmem:[%s1956_s21 + $0x48] sm:$0xff]  ;;  %v482_v13 = vld [vmem:[%s1956_s21 + $0x58] sm:$0xff]  ;;  %v481_v14 = vld [vmem:[%s1956_s21 + $0x50] sm:$0xff]  ;;  %1631 = vmatprep.subr.bf16.mxu0 %v1729_v23  ;;  %1653 = vmatprep.subr.bf16.mxu1 %v1730_v24 }
  0x22   : > { %v484_v19 = vld [vmem:[%s1956_s21 + $0x68] sm:$0xff]  ;;  %v483_v20 = vld [vmem:[%s1956_s21 + $0x60] sm:$0xff]  ;;  %v486_v25 = vld [vmem:[%s1956_s21 + $0x78] sm:$0xff] }
  0x23   : > { %520 = vperm.xlu1 %1720, %v474_v3   ;;  %510 = vperm.xlu0 %1719, %v472_v4   ;;  %v485_v26 = vld [vmem:[%s1956_s21 + $0x70] sm:$0xff]  ;;  %v1735_v31 = vld [vmem:[%s2714_s5 + $0x20] sm:$0xff]   ;;  %v1739_v35 = vld [vmem:[%s2714_s5 + $0x18] sm:$0xff]   ;;  %s353_s21 = scalar_lea.vmem [#allocation4], %s2376_s24 }
  0x24   : > { %1632 = vmatpush3.bf16.msra.mxu0 %v1731_v27  ;;  %1654 = vmatpush3.bf16.msra.mxu1 %v1732_v28  ;;  %v1736_v32 = vld [vmem:[%s2713_s4 + $0x20] sm:$0xff]   ;;  %v1740_v36 = vld [vmem:[%s2713_s4 + $0x18] sm:$0xff]   ;;  %v1743_v39 = vld [vmem:[%s2714_s5 + $0x10] sm:$0xff]   ;;  %s1448_s19 = sshll.u32 %s353_s21, 4  ;;  %s1449_s19 = int_to_ptr.vmem [resolvable:$true] %s1448_s19 }
  0x25   : > { %1633 = vmatprep.subr.bf16.mxu0 %v1733_v29  ;;  %1655 = vmatprep.subr.bf16.mxu1 %v1734_v30  ;;  %v1744_v40 = vld [vmem:[%s2713_s4 + $0x10] sm:$0xff]   ;;  %v1745_v41 = vld [vmem:[%s2714_s5 + $0x48] sm:$0xff]   ;;  %v1749_v45 = vld [vmem:[%s2714_s5 + $0x40] sm:$0xff]   ;;  %s1757_s26 = scalar_lea.vmem %s1449_s19, 16 }
  0x26   : > { %v1746_v42 = vld [vmem:[%s2713_s4 + $0x48] sm:$0xff]   ;;  %v1750_v46 = vld [vmem:[%s2713_s4 + $0x40] sm:$0xff]   ;;  %v2083_v49 = vld [vmem:[%s2074_s13 + $0x10] sm:$0xff]  ;;  %p1758_p11 = scmp.ne.s32.totalorder %s1449_s19, %s1757_s26 }
  0x27   : > { %530 = vperm.xlu1 %1720, %v476_v5   ;;  %525 = vperm.xlu0 %1719, %v475_v6   ;;  %v1747_v43 = vld [vmem:[%s2714_s5 + $0x8] sm:$0xff]   ;;  %v1751_v47 = vld [vmem:[%s2714_s5] sm:$0xff]   ;;  %v2086_v50 = vld [vmem:[%s2080_s20 + $0x10] sm:$0xff]  ;;  %v2728_v55 = vunpack.c.l.bf16 %v2083_v49  ;;  %v2726_v56 = vunpack.c.h.bf16 %v2083_v49 }
  0x28   : > { %1634 = vmatpush3.bf16.msra.mxu0 %v1735_v31  ;;  %1656 = vmatpush3.bf16.msra.mxu1 %v1736_v32  ;;  %v1748_v44 = vld [vmem:[%s2713_s4 + $0x8] sm:$0xff]   ;;  %v1752_v48 = vld [vmem:[%s2713_s4] sm:$0xff]   ;;  %v2095_v53 = vld [vmem:[%s2074_s13 + $0x18] sm:$0xff]  ;;  %v2727_v57 = vunpack.c.l.bf16 %v2086_v50  ;;  %v2729_v58 = vunpack.c.h.bf16 %v2086_v50  ;;  %p1759_p12 = pnand %p1758_p11, %p1938_p5 }
  0x29   : > { %1635 = vmatprep.subr.bf16.mxu0 %v1737_v33  ;;  %1657 = vmatprep.subr.bf16.mxu1 %v1738_v34  ;;  %v2089_v51 = vld [vmem:[%s2074_s13] sm:$0xff]  ;;  %v2098_v54 = vld [vmem:[%s2080_s20 + $0x18] sm:$0xff]  ;;  %v2105_v59 = vld [vmem:[%s2074_s13 + $0x8] sm:$0xff]  ;;  %v2735_v3 = vunpack.c.l.bf16 %v2095_v53  ;;  %v2731_v4 = vunpack.c.h.bf16 %v2095_v53 }
  0x2a   : > { %v2092_v52 = vld [vmem:[%s2080_s20] sm:$0xff]  ;;  %v2108_v60 = vld [vmem:[%s2080_s20 + $0x8] sm:$0xff]  ;;  %v2718_v61 = vunpack.c.l.bf16 %v2089_v51  ;;  %v2719_v62 = vunpack.c.h.bf16 %v2089_v51  ;;  %v2730_v5 = vunpack.c.l.bf16 %v2098_v54  ;;  %v2732_v6 = vunpack.c.h.bf16 %v2098_v54  ;;  %v2218_v30 = vld [vmem:[%s2080_s20 + $0x78] sm:$0xff]  ;;  %p1760_p13 = pneg %p1759_p12 }
  0x2b   : > { %540 = vperm.xlu1 %1720, %v478_v7   ;;  %535 = vperm.xlu0 %1719, %v477_v8   ;;  %v2720_v63 = vunpack.c.l.bf16 %v2092_v52  ;;  %v2721_v0 = vunpack.c.h.bf16 %v2092_v52  ;;  %v2115_v1 = vld [vmem:[%s2074_s13 + $0x28] sm:$0xff]  ;;  %v2125_v7 = vld [vmem:[%s2074_s13 + $0x20] sm:$0xff]  ;;  %v2724_v11 = vunpack.c.l.bf16 %v2108_v60  ;;  %v2725_v12 = vunpack.c.h.bf16 %v2108_v60  ;;  %v2225_v18 = vld [vmem:[%s2074_s13 + $0x70] sm:$0xff] }
  0x2c   : > { %1636 = vmatpush3.bf16.msra.mxu0 %v1739_v35  ;;  %1658 = vmatpush3.bf16.msra.mxu1 %v1740_v36  ;;  %v2118_v2 = vld [vmem:[%s2080_s20 + $0x28] sm:$0xff]  ;;  %v2128_v8 = vld [vmem:[%s2080_s20 + $0x20] sm:$0xff]  ;;  %v2734_v21 = vunpack.c.l.bf16 %v2125_v7  ;;  %v2733_v22 = vunpack.c.h.bf16 %v2125_v7  ;;  %v2215_v36 = vld [vmem:[%s2074_s13 + $0x78] sm:$0xff] }
  0x2d   : > { %1637 = vmatprep.subr.bf16.mxu0 %v1741_v37  ;;  %1659 = vmatprep.subr.bf16.mxu1 %v1742_v38  ;;  %v2165_v31 = vld [vmem:[%s2074_s13 + $0x40] sm:$0xff]  ;;  %v2175_v37 = vld [vmem:[%s2074_s13 + $0x58] sm:$0xff]  ;;  %v2228_v28 = vld [vmem:[%s2080_s20 + $0x70] sm:$0xff] }
  0x2e   : > { %v2168_v32 = vld [vmem:[%s2080_s20 + $0x40] sm:$0xff]  ;;  %v2178_v38 = vld [vmem:[%s2080_s20 + $0x58] sm:$0xff]  ;;  %2744 = vst [vmem:[#allocation8_spill] sm:$0xff] %v2228_v28 }
  0x2f   : > { %550 = vperm.xlu1 %1720, %v480_v9   ;;  %545 = vperm.xlu0 %1719, %v479_v10   ;;  %v2722_v9 = vunpack.c.l.bf16 %v2105_v59  ;;  %v2723_v10 = vunpack.c.h.bf16 %v2105_v59 }
  0x30   : > { %1638 = vmatpush3.bf16.msra.mxu0 %v1743_v39  ;;  %1660 = vmatpush3.bf16.msra.mxu1 %v1744_v40  ;;  %v2195_v40 = vld [vmem:[%s2074_s13 + $0x68] sm:$0xff] }
  0x31   : > { %1639 = vmatprep.subr.bf16.mxu0 %v1745_v41  ;;  %1661 = vmatprep.subr.bf16.mxu1 %v1746_v42  ;;  %v2198_v39 = vld [vmem:[%s2080_s20 + $0x68] sm:$0xff] }
  0x33   : > { %560 = vperm.xlu1 %1720, %v482_v13   ;;  %555 = vperm.xlu0 %1719, %v481_v14   ;;  %v2135_v13 = vld [vmem:[%s2074_s13 + $0x38] sm:$0xff] }
  0x34   : > { %1640 = vmatpush3.bf16.msra.mxu0 %v1747_v43  ;;  %1662 = vmatpush3.bf16.msra.mxu1 %v1748_v44  ;;  %v2138_v14 = vld [vmem:[%s2080_s20 + $0x38] sm:$0xff]  ;;  %v2185_v43 = vld [vmem:[%s2074_s13 + $0x50] sm:$0xff] }
  0x35   : > { %1641 = vmatprep.subr.bf16.mxu0 %v1749_v45  ;;  %1663 = vmatprep.subr.bf16.mxu1 %v1750_v46  ;;  %v2188_v44 = vld [vmem:[%s2080_s20 + $0x50] sm:$0xff]  ;;  %v2205_v46 = vld [vmem:[%s2074_s13 + $0x60] sm:$0xff] }
  0x37   : > { %570 = vperm.xlu1 %1720, %v484_v19   ;;  %565 = vperm.xlu0 %1719, %v483_v20   ;;  %v2145_v19 = vld [vmem:[%s2074_s13 + $0x30] sm:$0xff] }
  0x38   : > { %1642 = vmatpush3.bf16.msra.mxu0 %v1751_v47  ;;  %1664 = vmatpush3.bf16.msra.mxu1 %v1752_v48  ;;  %v2148_v20 = vld [vmem:[%s2080_s20 + $0x30] sm:$0xff]  ;;  %v2208_v47 = vld [vmem:[%s2080_s20 + $0x60] sm:$0xff] }
  0x3b   : > { %580 = vperm.xlu1 %1720, %v486_v25   ;;  %575 = vperm.xlu0 %1719, %v485_v26   ;;  %v2155_v25 = vld [vmem:[%s2074_s13 + $0x48] sm:$0xff]  ;;  %s2437_s13 = scalar_lea.vmem [#allocation2], %s1575_s18 }
  0x3c   : > { %v2158_v26 = vld [vmem:[%s2080_s20 + $0x48] sm:$0xff] }
  0x9a   : > { %v516_v48 = vpop.permute.xlu1 %515  ;;  %v506_v29 = vpop.permute.xlu0 %505 }
  0x9b   : > { %v583_v17 = vmul.f32 %v506_v29, %v2718_v61  ;;  %v584_v35 = vmul.f32 %v506_v29, %v2719_v62  ;;  %v657_v34 = vmul.f32 %v506_v29, %v2720_v63  ;;  %v658_v33 = vmul.f32 %v506_v29, %v2721_v0 }
  0x9c   : > { %v587_v62 = vmul.f32 %v516_v48, %v2728_v55  ;;  %v588_v63 = vmul.f32 %v516_v48, %v2726_v56  ;;  %v661_v29 = vmul.f32 %v516_v48, %v2727_v57  ;;  %v662_v0 = vmul.f32 %v516_v48, %v2729_v58 }
  0x9e   : > { %v521_v16 = vpop.permute.xlu1 %520  ;;  %v511_v15 = vpop.permute.xlu0 %510 }
  0x9f   : > { %v585_v45 = vmul.f32 %v511_v15, %v2722_v9  ;;  %v586_v41 = vmul.f32 %v511_v15, %v2723_v10  ;;  %v659_v27 = vmul.f32 %v511_v15, %v2724_v11  ;;  %v660_v61 = vmul.f32 %v511_v15, %v2725_v12 }
  0xa0   : > { %v589_v15 = vmul.f32 %v521_v16, %v2735_v3  ;;  %v590_v12 = vmul.f32 %v521_v16, %v2731_v4  ;;  %v663_v56 = vmul.f32 %v521_v16, %v2730_v5  ;;  %v664_v57 = vmul.f32 %v521_v16, %v2732_v6 }
  0xa1   : > { %v615_v9 = vadd.f32 %v585_v45, %v583_v17  ;;  %v636_v10 = vadd.f32 %v586_v41, %v584_v35  ;;  %v689_v42 = vadd.f32 %v659_v27, %v657_v34  ;;  %v710_v24 = vadd.f32 %v660_v61, %v658_v33 }
  0xa2   : > { %v531_v11 = vpop.permute.xlu1 %530  ;;  %v526_v23 = vpop.permute.xlu0 %525  ;;  %v2745_v33 = vunpack.c.l.bf16 %v2128_v8  ;;  %v2746_v41 = vunpack.c.h.bf16 %v2128_v8 }
  0xa3   : > { %v616_v55 = vadd.f32 %v615_v9, %v587_v62  ;;  %v637_v48 = vadd.f32 %v636_v10, %v588_v63  ;;  %v690_v17 = vadd.f32 %v689_v42, %v661_v29  ;;  %v711_v35 = vadd.f32 %v710_v24, %v662_v0 }
  0xa4   : > { %v591_v61 = vmul.f32 %v526_v23, %v2734_v21  ;;  %v592_v27 = vmul.f32 %v526_v23, %v2733_v22  ;;  %v665_v34 = vmul.f32 %v526_v23, %v2745_v33  ;;  %v666_v45 = vmul.f32 %v526_v23, %v2746_v41 }
  0xa5   : > { %v617_v58 = vadd.f32 %v616_v55, %v589_v15  ;;  %v638_v5 = vadd.f32 %v637_v48, %v590_v12  ;;  %v691_v4 = vadd.f32 %v690_v17, %v663_v56  ;;  %v712_v16 = vadd.f32 %v711_v35, %v664_v57 }
  0xa6   : > { %v541_v62 = vpop.permute.xlu1 %540  ;;  %v536_v63 = vpop.permute.xlu0 %535  ;;  %v2747_v0 = vunpack.c.l.bf16 %v2115_v1  ;;  %v2748_v10 = vunpack.c.h.bf16 %v2115_v1  ;;  %v2749_v42 = vunpack.c.l.bf16 %v2118_v2  ;;  %v2750_v33 = vunpack.c.h.bf16 %v2118_v2 }
  0xa7   : > { %v618_v22 = vadd.f32 %v617_v58, %v591_v61  ;;  %v639_v23 = vadd.f32 %v638_v5, %v592_v27  ;;  %v692_v55 = vadd.f32 %v691_v4, %v665_v34  ;;  %v713_v12 = vadd.f32 %v712_v16, %v666_v45 }
  0xa8   : > { %v593_v9 = vmul.f32 %v531_v11, %v2747_v0  ;;  %v594_v24 = vmul.f32 %v531_v11, %v2748_v10  ;;  %v667_v29 = vmul.f32 %v531_v11, %v2749_v42  ;;  %v668_v6 = vmul.f32 %v531_v11, %v2750_v33 }
  0xa9   : > { %v2751_v56 = vunpack.c.l.bf16 %v2145_v19  ;;  %v2752_v15 = vunpack.c.h.bf16 %v2145_v19  ;;  %v2753_v17 = vunpack.c.l.bf16 %v2148_v20  ;;  %v2754_v41 = vunpack.c.h.bf16 %v2148_v20 }
  0xaa   : > { %v619_v10 = vadd.f32 %v618_v22, %v593_v9  ;;  %v640_v42 = vadd.f32 %v639_v23, %v594_v24  ;;  %v693_v21 = vadd.f32 %v692_v55, %v667_v29  ;;  %v714_v11 = vadd.f32 %v713_v12, %v668_v6  ;;  %v551_v58 = vpop.permute.xlu1 %550  ;;  %v546_v5 = vpop.permute.xlu0 %545 }
  0xab   : > { %v595_v57 = vmul.f32 %v536_v63, %v2751_v56  ;;  %v596_v48 = vmul.f32 %v536_v63, %v2752_v15  ;;  %v669_v35 = vmul.f32 %v536_v63, %v2753_v17  ;;  %v670_v0 = vmul.f32 %v536_v63, %v2754_v41 }
  0xac   : > { %v2755_v4 = vunpack.c.l.bf16 %v2135_v13  ;;  %v2756_v27 = vunpack.c.h.bf16 %v2135_v13  ;;  %v2757_v45 = vunpack.c.l.bf16 %v2138_v14  ;;  %v2758_v33 = vunpack.c.h.bf16 %v2138_v14 }
  0xad   : > { %v620_v15 = vadd.f32 %v619_v10, %v595_v57  ;;  %v641_v63 = vadd.f32 %v640_v42, %v596_v48  ;;  %v694_v22 = vadd.f32 %v693_v21, %v669_v35  ;;  %v715_v9 = vadd.f32 %v714_v11, %v670_v0 }
  0xae   : > { %v597_v61 = vmul.f32 %v541_v62, %v2755_v4  ;;  %v598_v34 = vmul.f32 %v541_v62, %v2756_v27  ;;  %v671_v16 = vmul.f32 %v541_v62, %v2757_v45  ;;  %v672_v56 = vmul.f32 %v541_v62, %v2758_v33  ;;  %v561_v57 = vpop.permute.xlu1 %560  ;;  %v556_v48 = vpop.permute.xlu0 %555 }
  0xaf   : > { %v2759_v6 = vunpack.c.l.bf16 %v2165_v31  ;;  %v2760_v29 = vunpack.c.h.bf16 %v2165_v31  ;;  %v2761_v55 = vunpack.c.l.bf16 %v2168_v32  ;;  %v2762_v17 = vunpack.c.h.bf16 %v2168_v32 }
  0xb0   : > { %v621_v4 = vadd.f32 %v620_v15, %v597_v61  ;;  %v642_v27 = vadd.f32 %v641_v63, %v598_v34  ;;  %v695_v45 = vadd.f32 %v694_v22, %v671_v16  ;;  %v716_v62 = vadd.f32 %v715_v9, %v672_v56 }
  0xb1   : > { %v599_v24 = vmul.f32 %v546_v5, %v2759_v6  ;;  %v600_v23 = vmul.f32 %v546_v5, %v2760_v29  ;;  %v673_v12 = vmul.f32 %v546_v5, %v2761_v55  ;;  %v674_v41 = vmul.f32 %v546_v5, %v2762_v17 }
  0xb2   : > { %v2763_v21 = vunpack.c.l.bf16 %v2155_v25  ;;  %v2764_v0 = vunpack.c.h.bf16 %v2155_v25  ;;  %v2765_v42 = vunpack.c.l.bf16 %v2158_v26  ;;  %v2766_v33 = vunpack.c.h.bf16 %v2158_v26 }
  0xb3   : > { %v622_v29 = vadd.f32 %v621_v4, %v599_v24  ;;  %v643_v5 = vadd.f32 %v642_v27, %v600_v23  ;;  %v696_v61 = vadd.f32 %v695_v45, %v673_v12  ;;  %v717_v34 = vadd.f32 %v716_v62, %v674_v41  ;;  %v571_v24 = vpop.permute.xlu1 %570  ;;  %v566_v23 = vpop.permute.xlu0 %565 }
  0xb4   : > { %v601_v35 = vmul.f32 %v551_v58, %v2763_v21  ;;  %v602_v10 = vmul.f32 %v551_v58, %v2764_v0  ;;  %v675_v11 = vmul.f32 %v551_v58, %v2765_v42  ;;  %v676_v6 = vmul.f32 %v551_v58, %v2766_v33 }
  0xb5   : > { %v2767_v16 = vunpack.c.l.bf16 %v2185_v43  ;;  %v2768_v15 = vunpack.c.h.bf16 %v2185_v43  ;;  %v2769_v22 = vunpack.c.l.bf16 %v2188_v44  ;;  %v2770_v55 = vunpack.c.h.bf16 %v2188_v44 }
  0xb6   : > { %v623_v21 = vadd.f32 %v622_v29, %v601_v35  ;;  %v644_v0 = vadd.f32 %v643_v5, %v602_v10  ;;  %v697_v42 = vadd.f32 %v696_v61, %v675_v11  ;;  %v718_v58 = vadd.f32 %v717_v34, %v676_v6 }
  0xb7   : > { %v603_v56 = vmul.f32 %v556_v48, %v2767_v16  ;;  %v604_v63 = vmul.f32 %v556_v48, %v2768_v15  ;;  %v677_v9 = vmul.f32 %v556_v48, %v2769_v22  ;;  %v678_v17 = vmul.f32 %v556_v48, %v2770_v55 }
  0xb8   : > { %v2771_v12 = vunpack.c.l.bf16 %v2175_v37  ;;  %v2772_v4 = vunpack.c.h.bf16 %v2175_v37  ;;  %v2773_v45 = vunpack.c.l.bf16 %v2178_v38  ;;  %v2774_v33 = vunpack.c.h.bf16 %v2178_v38 }
  0xb9   : > { %v624_v15 = vadd.f32 %v623_v21, %v603_v56  ;;  %v645_v48 = vadd.f32 %v644_v0, %v604_v63  ;;  %v698_v35 = vadd.f32 %v697_v42, %v677_v9  ;;  %v719_v10 = vadd.f32 %v718_v58, %v678_v17  ;;  %v576_v56 = vpop.permute.xlu0 %575 }
  0xba   : > { %v605_v41 = vmul.f32 %v561_v57, %v2771_v12  ;;  %v606_v27 = vmul.f32 %v561_v57, %v2772_v4  ;;  %v679_v62 = vmul.f32 %v561_v57, %v2773_v45  ;;  %v680_v16 = vmul.f32 %v561_v57, %v2774_v33 }
  0xbb   : > { %v2775_v11 = vunpack.c.l.bf16 %v2205_v46  ;;  %v2776_v29 = vunpack.c.h.bf16 %v2205_v46  ;;  %v2777_v61 = vunpack.c.l.bf16 %v2208_v47  ;;  %v2778_v22 = vunpack.c.h.bf16 %v2208_v47 }
  0xbc   : > { %v625_v12 = vadd.f32 %v624_v15, %v605_v41  ;;  %v646_v4 = vadd.f32 %v645_v48, %v606_v27  ;;  %v699_v45 = vadd.f32 %v698_v35, %v679_v62  ;;  %v720_v57 = vadd.f32 %v719_v10, %v680_v16  ;;  %v581_v27 = vpop.permute.xlu1 %580 }
  0xbd   : > { %v607_v6 = vmul.f32 %v566_v23, %v2775_v11  ;;  %v608_v5 = vmul.f32 %v566_v23, %v2776_v29  ;;  %v681_v34 = vmul.f32 %v566_v23, %v2777_v61  ;;  %v682_v55 = vmul.f32 %v566_v23, %v2778_v22 }
  0xbe   : > { %v2779_v63 = vunpack.c.l.bf16 %v2195_v40  ;;  %v2780_v17 = vunpack.c.h.bf16 %v2195_v40  ;;  %v2781_v0 = vunpack.c.l.bf16 %v2198_v39  ;;  %v2782_v58 = vunpack.c.h.bf16 %v2198_v39 }
  0xbf   : > { %v626_v11 = vadd.f32 %v625_v12, %v607_v6  ;;  %v647_v29 = vadd.f32 %v646_v4, %v608_v5  ;;  %v700_v23 = vadd.f32 %v699_v45, %v681_v34  ;;  %v721_v41 = vadd.f32 %v720_v57, %v682_v55 }
  0xc0   : > { %v609_v9 = vmul.f32 %v571_v24, %v2779_v63  ;;  %v610_v21 = vmul.f32 %v571_v24, %v2780_v17  ;;  %v683_v42 = vmul.f32 %v571_v24, %v2781_v0  ;;  %v684_v33 = vmul.f32 %v571_v24, %v2782_v58 }
  0xc1   : > { %v2783_v62 = vunpack.c.l.bf16 %v2225_v18  ;;  %v2784_v15 = vunpack.c.h.bf16 %v2225_v18  ;;  %v2785_v35 = vunpack.c.l.bf16 %v2228_v28  ;;  %v2786_v61 = vunpack.c.h.bf16 %v2228_v28 }
  0xc2   : > { %v627_v63 = vadd.f32 %v626_v11, %v609_v9  ;;  %v648_v17 = vadd.f32 %v647_v29, %v610_v21  ;;  %v701_v24 = vadd.f32 %v700_v23, %v683_v42  ;;  %v722_v6 = vadd.f32 %v721_v41, %v684_v33 }
  0xc3   : > { %v611_v16 = vmul.f32 %v576_v56, %v2783_v62  ;;  %v612_v48 = vmul.f32 %v576_v56, %v2784_v15  ;;  %v685_v10 = vmul.f32 %v576_v56, %v2785_v35  ;;  %v686_v22 = vmul.f32 %v576_v56, %v2786_v61 }
  0xc4   : > { %v2787_v5 = vunpack.c.l.bf16 %v2215_v36  ;;  %v2788_v55 = vunpack.c.h.bf16 %v2215_v36  ;;  %v2789_v4 = vunpack.c.l.bf16 %v2218_v30  ;;  %v2790_v57 = vunpack.c.h.bf16 %v2218_v30 }
  0xc5   : > { %v628_v58 = vadd.f32 %v627_v63, %v611_v16  ;;  %v649_v62 = vadd.f32 %v648_v17, %v612_v48  ;;  %v702_v15 = vadd.f32 %v701_v24, %v685_v10  ;;  %v723_v56 = vadd.f32 %v722_v6, %v686_v22 }
  0xc6   : > { %v613_v34 = vmul.f32 %v581_v27, %v2787_v5  ;;  %v614_v12 = vmul.f32 %v581_v27, %v2788_v55  ;;  %v687_v45 = vmul.f32 %v581_v27, %v2789_v4  ;;  %v688_v0 = vmul.f32 %v581_v27, %v2790_v57 }
  0xc8   : > { %v629_v9 = vadd.f32 %v628_v58, %v613_v34  ;;  %v703_v21 = vadd.f32 %v702_v15, %v687_v45  ;;  %v724_v42 = vadd.f32 %v723_v56, %v688_v0  ;;  %v650_v33 = vadd.f32 %v649_v62, %v614_v12 }
  0xca   : > { %v725_v11 = vrot.slane %v724_v42, 4  ;;  %v651_v29 = vrot.slane %v650_v33, 4  ;;  %v704_v23 = vrot.slane %v703_v21, 4  ;;  %v630_v41 = vrot.slane %v629_v9, 4 }
  0xcc   : > { %v726_v35 = vadd.f32 %v725_v11, %v724_v42  ;;  %v652_v61 = vadd.f32 %v651_v29, %v650_v33  ;;  %v705_v5 = vadd.f32 %v704_v23, %v703_v21  ;;  %v631_v55 = vadd.f32 %v630_v41, %v629_v9  ;;  %v1071_v29 = vld [vmem:[%s2715_s6] sm:$0x1] }
  0xce   : > { %v727_v4 = vrot.slane %v726_v35, 2  ;;  %v653_v3 = vrot.slane %v652_v61, 2  ;;  %v706_v28 = vrot.slane %v705_v5, 2  ;;  %v632_v27 = vrot.slane %v631_v55, 2 }
  0xd0   : > { %v728_v16 = vadd.f32 %v727_v4, %v726_v35  ;;  %v654_v48 = vadd.f32 %v653_v3, %v652_v61  ;;  %v707_v10 = vadd.f32 %v706_v28, %v705_v5  ;;  %v633_v22 = vadd.f32 %v632_v27, %v631_v55 }
  0xd2   : > { %v729_v63 = vrot.slane %v728_v16, 1  ;;  %v655_v17 = vrot.slane %v654_v48, 1  ;;  %v708_v24 = vrot.slane %v707_v10, 1  ;;  %v634_v6 = vrot.slane %v633_v22, 1 }
  0xd4   : > { %v730_v34 = vadd.f32 %v729_v63, %v728_v16  ;;  %v656_v12 = vadd.f32 %v655_v17, %v654_v48  ;;  %v709_v45 = vadd.f32 %v708_v24, %v707_v10  ;;  %v635_v57 = vadd.f32 %v634_v6, %v633_v22 }
  0xd5   : > { %v1086_v22 = vlaneseq }
  0xd6   : > { %v766_v0 = vpack.c.bf16 %v730_v34, %v730_v34  ;;  %v732_v58 = vpack.c.bf16 %v656_v12, %v656_v12  ;;  %v765_v62 = vpack.c.bf16 %v709_v45, %v709_v45  ;;  %v731_v15 = vpack.c.bf16 %v635_v57, %v635_v57  ;;  %v487_v34 = vld [vmem:[%s2382_s10] sm:$0xff]  ;;  %v488_v45 = vld [vmem:[%s2382_s10 + $0x8] sm:$0xff] }
  0xd7   : > { %v1087_v63 = vshrl.u32 %v1086_v22, 7  ;;  %v2414_v22 = vld [vmem:[%s2382_s10 + $0x70] sm:$0xff] }
  0xd8   : > { %927 = vmatprep.mubr.bf16.mxu0 %v766_v0  ;;  %1063 = vmatprep.mubr.bf16.mxu1 %v732_v58  ;;  %v489_v0 = vld [vmem:[%s2382_s10 + $0x10] sm:$0xff] }
  0xd9   : > { %928 = vmatmul.mubr.bf16.vlgmr.msra.gmra.mxu0 %v765_v62  ;;  %1064 = vmatmul.mubr.bf16.vlgmr.msra.gmra.mxu1 %v731_v15  ;;  %v1088_v17 = vsub.s32 0, %v1087_v63  ;;  %v490_v62 = vld [vmem:[%s2382_s10 + $0x18] sm:$0xff] }
 0x199   : > { %v1643_v56 = vpop.f32.mrf.mxu0  ;;  %v1665_v3 = vpop.f32.mrf.mxu1 }
 0x19b   : > { %v1644_v28 = vpop.f32.mrf.mxu0  ;;  %v1666_v9 = vpop.f32.mrf.mxu1 }
 0x19c   : > { %v1645_v21 = vadd.f32 %v1644_v28, %v1643_v56  ;;  %v1667_v42 = vadd.f32 %v1666_v9, %v1665_v3  ;;  %v491_v56 = vld [vmem:[%s2382_s10 + $0x20] sm:$0xff]  ;;  %v492_v28 = vld [vmem:[%s2382_s10 + $0x28] sm:$0xff] }
 0x19d   : > { %v1646_v33 = vpop.f32.mrf.mxu0  ;;  %v1668_v11 = vpop.f32.mrf.mxu1 }
 0x19e   : > { %v1066_v23 = vadd.f32 %v1667_v42, %v1645_v21  ;;  %v493_v21 = vld [vmem:[%s2382_s10 + $0x30] sm:$0xff]  ;;  %v494_v33 = vld [vmem:[%s2382_s10 + $0x38] sm:$0xff] }
 0x19f   : > { %v1647_v41 = vpop.f32.mrf.mxu0  ;;  %v1669_v35 = vpop.f32.mrf.mxu1 }
 0x1a0   : > { %v1072_v61 = vadd.f32 %v1071_v29, %v1066_v23  ;;  %v495_v29 = vld [vmem:[%s2382_s10 + $0x40] sm:$0xff]  ;;  %v496_v41 = vld [vmem:[%s2382_s10 + $0x48] sm:$0xff] }
 0x1a2   : > { %v1074_v5 = vsel %vm1073_vm0, %v1072_v61, -inf }
 0x1a3   : > { %1075 = vmax.xlane.f32.xlu0 %v1074_v5 }
 0x22c   : > { %v1076_v55 = vpop.xlane.xlu0 %1075 }
 0x22d   : > { %v1077_v4 = vsub.f32 %v1072_v61, %v1076_v55  ;;  %v2399_v61 = vld [vmem:[%s2382_s10 + $0x50] sm:$0xff]  ;;  %v2402_v55 = vld [vmem:[%s2382_s10 + $0x58] sm:$0xff] }
 0x22f   : > { %v1078_v27 = vmul.f32 1.442695, %v1077_v4 }
 0x231   : > { %1753 = vpow2.f32 %v1078_v27  ;;  %v2406_v27 = vld [vmem:[%s2382_s10 + $0x60] sm:$0xff] }
 0x23e   : > { %v1754_v16 = vpop.eup %1753 }
 0x23f   : > { %v1080_v48 = vsel %vm1073_vm0, %v1754_v16, 0.0 }
 0x240   : > { %1081 = vadd.xlane.f32.xlu1 %v1080_v48  ;;  %v2410_v48 = vld [vmem:[%s2382_s10 + $0x68] sm:$0xff] }
 0x2c9   : > { %v1082_v10 = vpop.xlane.xlu1 %1081 }
 0x2ca   : > { %1755 = vrcp.f32 %v1082_v10 }
 0x2d7   : > { %v1756_v24 = vpop.eup %1755 }
 0x2d8   : > { %v1084_v6 = vmul.f32 %v1756_v24, %v1754_v16 }
 0x2da   : > { %v1089_v12 = vrot.slane %v1084_v6, %v1088_v17  ;;  %1085 = vst.msk [vmem:[%s353_s21] sm:$0x1] %vm1073_vm0, %v1084_v6  ;;  %v2418_v17 = vld [vmem:[%s2382_s10 + $0x78] sm:$0xff]  ;;  %s1851_s10 = smov [#allocation4]  }
 0x2db   : > { %s1761_s21 = sshll.u32 %s1851_s10, 4  ;;  %s1762_s21 = int_to_ptr.vmem [resolvable:$false] %s1761_s21 }
 0x2dc   : > { %1107 = vrot.lane.b32.xlu0 %v1089_v12, %s1850_s12  ;;  %v1090_v57 = vmul.f32 %v1089_v12, %v487_v34  ;;  %v1091_v58 = vmul.f32 %v1089_v12, %v488_v45  ;;  %v1092_v15 = vmul.f32 %v1089_v12, %v489_v0  ;;  %v1093_v3 = vmul.f32 %v1089_v12, %v490_v62  ;;  %s1763_s12 = scalar_lea.vmem %s1762_s21, 32  ;;  %p1764_p0 = scmp.lt.s32.totalorder %s1449_s19, %s1762_s21 }
 0x2dd   : > { %v1094_v9 = vmul.f32 %v1089_v12, %v491_v56  ;;  %v1095_v42 = vmul.f32 %v1089_v12, %v492_v28  ;;  %v1096_v11 = vmul.f32 %v1089_v12, %v493_v21  ;;  %v1097_v23 = vmul.f32 %v1089_v12, %v494_v33  ;;  %p1765_p1 = scmp.lt.s32.totalorder %s1763_s12, %s1757_s26 }
 0x2de   : > { %1128 = vperm.xlu1 %1720, %v1090_v57   ;;  %v1098_v35 = vmul.f32 %v1089_v12, %v495_v29  ;;  %v1099_v5 = vmul.f32 %v1089_v12, %v496_v41  ;;  %v1100_v4 = vmul.f32 %v1089_v12, %v2399_v61  ;;  %v1101_v16 = vmul.f32 %v1089_v12, %v2402_v55 }
 0x2df   : > { %v1102_v10 = vmul.f32 %v1089_v12, %v2406_v27  ;;  %v1103_v63 = vmul.f32 %v1089_v12, %v2410_v48  ;;  %v1104_v24 = vmul.f32 %v1089_v12, %v2414_v22  ;;  %v1105_v6 = vmul.f32 %v1089_v12, %v2418_v17  ;;  %p1766_p2 = por %p1765_p1, %p1764_p0 }
 0x2e0   : > { %1133 = vperm.xlu0 %1719, %v1091_v58  }
 0x2e1   : > { %p1767_p3 = pnand %p1766_p2, %p1760_p13 }
 0x2e2   : > { %1138 = vperm.xlu1 %1720, %v1092_v15  }
 0x2e4   : > { %1143 = vperm.xlu0 %1719, %v1093_v3  }
 0x2e6   : > { %1148 = vperm.xlu1 %1720, %v1094_v9  }
 0x2e8   : > { %1153 = vperm.xlu0 %1719, %v1095_v42  }
 0x2ea   : > { %1158 = vperm.xlu1 %1720, %v1096_v11  }
 0x2ec   : > { %1163 = vperm.xlu0 %1719, %v1097_v23  }
 0x2ee   : > { %1168 = vperm.xlu1 %1720, %v1098_v35  }
 0x2f0   : > { %1173 = vperm.xlu0 %1719, %v1099_v5  }
 0x2f2   : > { %1178 = vperm.xlu1 %1720, %v1100_v4  }
 0x2f4   : > { %1183 = vperm.xlu0 %1719, %v1101_v16  }
 0x2f6   : > { %1188 = vperm.xlu1 %1720, %v1102_v10   ;;  %v2796_v10 = vunpack.c.h.bf16 %v2083_v49 }
 0x2f8   : > { %1193 = vperm.xlu0 %1719, %v1103_v63  }
 0x2fa   : > { %1198 = vperm.xlu1 %1720, %v1104_v24  }
 0x2fc   : > { %1203 = vperm.xlu0 %1719, %v1105_v6  }
 0x34e   : > { %v2422_v57 = vpop.permute.xlu0 %1107 }
 0x34f   : > { %v1111_v58 = vmul.f32 %v2422_v57, %v488_v45  ;;  %v1110_v15 = vmul.f32 %v2422_v57, %v487_v34  ;;  %v1113_v3 = vmul.f32 %v2422_v57, %v490_v62  ;;  %v1112_v9 = vmul.f32 %v2422_v57, %v489_v0 }
 0x350   : > { %v1115_v42 = vmul.f32 %v2422_v57, %v492_v28  ;;  %v1114_v12 = vmul.f32 %v2422_v57, %v491_v56  ;;  %v2791_v45 = vunpack.c.l.bf16 %v2089_v51  ;;  %v2792_v34 = vunpack.c.h.bf16 %v2089_v51 }
 0x351   : > { %1277 = vperm.xlu0 %1719, %v1111_v58   ;;  %1272 = vperm.xlu1 %1720, %v1110_v15   ;;  %v1117_v62 = vmul.f32 %v2422_v57, %v494_v33  ;;  %v1116_v0 = vmul.f32 %v2422_v57, %v493_v21  ;;  %v2793_v56 = vunpack.c.l.bf16 %v2105_v59  ;;  %v2794_v51 = vunpack.c.h.bf16 %v2105_v59 }
 0x352   : > { %v2795_v33 = vunpack.c.l.bf16 %v2083_v49  ;;  %v1119_v6 = vmul.f32 %v2422_v57, %v496_v41  ;;  %v1118_v59 = vmul.f32 %v2422_v57, %v495_v29  ;;  %v2797_v58 = vunpack.c.l.bf16 %v2095_v53 }
 0x353   : > { %v2799_v41 = vunpack.c.l.bf16 %v2125_v7  ;;  %v2800_v29 = vunpack.c.h.bf16 %v2125_v7 }
 0x355   : > { %1287 = vperm.xlu0 %1719, %v1113_v3   ;;  %1282 = vperm.xlu1 %1720, %v1112_v9   ;;  %v2798_v3 = vunpack.c.h.bf16 %v2095_v53  ;;  %v1120_v53 = vmul.f32 %v2422_v57, %v2399_v61  ;;  %v2804_v61 = vunpack.c.h.bf16 %v2145_v19 }
 0x359   : > { %1297 = vperm.xlu0 %1719, %v1115_v42   ;;  %1292 = vperm.xlu1 %1720, %v1114_v12   ;;  %v1129_v11 = vpop.permute.xlu1 %1128 }
 0x35a   : > { %v1206_v23 = vmul.f32 %v1129_v11, %v2791_v45  ;;  %v1207_v35 = vmul.f32 %v1129_v11, %v2792_v34  ;;  %v1121_v45 = vmul.f32 %v2422_v57, %v2402_v55  ;;  %v2803_v55 = vunpack.c.l.bf16 %v2145_v19 }
 0x35b   : > { %v1134_v5 = vpop.permute.xlu0 %1133 }
 0x35c   : > { %1238 = vst [vmem:[%s2437_s13] sm:$0xff] %v1206_v23  ;;  %1239 = vst [vmem:[%s2437_s13 + $0x8] sm:$0xff] %v1207_v35  ;;  %v1208_v28 = vmul.f32 %v1134_v5, %v2793_v56  ;;  %v1209_v4 = vmul.f32 %v1134_v5, %v2794_v51  ;;  %v2801_v23 = vunpack.c.l.bf16 %v2115_v1  ;;  %v2802_v35 = vunpack.c.h.bf16 %v2115_v1 }
 0x35d   : > { %1307 = vperm.xlu0 %1719, %v1117_v62   ;;  %1302 = vperm.xlu1 %1720, %v1116_v0   ;;  %v1139_v21 = vpop.permute.xlu1 %1138  ;;  %v1122_v1 = vmul.f32 %v2422_v57, %v2406_v27  ;;  %v2805_v51 = vunpack.c.l.bf16 %v2135_v13  ;;  %v2808_v27 = vunpack.c.h.bf16 %v2165_v31 }
 0x35e   : > { %1240 = vst [vmem:[%s2437_s13 + $0x20] sm:$0xff] %v1208_v28  ;;  %1241 = vst [vmem:[%s2437_s13 + $0x28] sm:$0xff] %v1209_v4  ;;  %v1210_v16 = vmul.f32 %v1139_v21, %v2795_v33  ;;  %v1211_v63 = vmul.f32 %v1139_v21, %v2796_v10  ;;  %v1123_v28 = vmul.f32 %v2422_v57, %v2410_v48  ;;  %v2806_v21 = vunpack.c.h.bf16 %v2135_v13 }
 0x35f   : > { %v1144_v24 = vpop.permute.xlu0 %1143  ;;  %v2807_v48 = vunpack.c.l.bf16 %v2165_v31  ;;  %v1125_v13 = vmul.f32 %v2422_v57, %v2418_v17  ;;  %v2811_v17 = vunpack.c.l.bf16 %v2185_v43 }
 0x360   : > { %1242 = vst [vmem:[%s2437_s13 + $0x40] sm:$0xff] %v1210_v16  ;;  %1243 = vst [vmem:[%s2437_s13 + $0x48] sm:$0xff] %v1211_v63  ;;  %v1212_v15 = vmul.f32 %v1144_v24, %v2797_v58  ;;  %v1213_v9 = vmul.f32 %v1144_v24, %v2798_v3  ;;  %v1124_v24 = vmul.f32 %v2422_v57, %v2414_v22  ;;  %v2810_v58 = vunpack.c.h.bf16 %v2155_v25 }
 0x361   : > { %1317 = vperm.xlu0 %1719, %v1119_v6   ;;  %1312 = vperm.xlu1 %1720, %v1118_v59   ;;  %v1149_v49 = vpop.permute.xlu1 %1148  ;;  %v2809_v6 = vunpack.c.l.bf16 %v2155_v25  ;;  %v2812_v22 = vunpack.c.h.bf16 %v2185_v43  ;;  %v2813_v25 = vunpack.c.l.bf16 %v2175_v37 }
 0x362   : > { %1244 = vst [vmem:[%s2437_s13 + $0x60] sm:$0xff] %v1212_v15  ;;  %1245 = vst [vmem:[%s2437_s13 + $0x68] sm:$0xff] %v1213_v9  ;;  %v1214_v42 = vmul.f32 %v1149_v49, %v2799_v41  ;;  %v1215_v12 = vmul.f32 %v1149_v49, %v2800_v29  ;;  %v2814_v41 = vunpack.c.h.bf16 %v2175_v37 }
 0x363   : > { %v1154_v11 = vpop.permute.xlu0 %1153 }
 0x364   : > { %1246 = vst [vmem:[%s2437_s13 + $0x80] sm:$0xff] %v1214_v42  ;;  %1247 = vst [vmem:[%s2437_s13 + $0x88] sm:$0xff] %v1215_v12  ;;  %v1216_v34 = vmul.f32 %v1154_v11, %v2801_v23  ;;  %v1217_v5 = vmul.f32 %v1154_v11, %v2802_v35 }
 0x365   : > { %1327 = vperm.xlu0 %1719, %v1121_v45   ;;  %1322 = vperm.xlu1 %1720, %v1120_v53   ;;  %v1159_v7 = vpop.permute.xlu1 %1158 }
 0x366   : > { %1248 = vst [vmem:[%s2437_s13 + $0xa0] sm:$0xff] %v1216_v34  ;;  %1249 = vst [vmem:[%s2437_s13 + $0xa8] sm:$0xff] %v1217_v5  ;;  %v1218_v62 = vmul.f32 %v1159_v7, %v2803_v55  ;;  %v1219_v0 = vmul.f32 %v1159_v7, %v2804_v61 }
 0x367   : > { %v1164_v56 = vpop.permute.xlu0 %1163 }
 0x368   : > { %1250 = vst [vmem:[%s2437_s13 + $0xc0] sm:$0xff] %v1218_v62  ;;  %1251 = vst [vmem:[%s2437_s13 + $0xc8] sm:$0xff] %v1219_v0  ;;  %v1220_v4 = vmul.f32 %v1164_v56, %v2805_v51  ;;  %v1221_v33 = vmul.f32 %v1164_v56, %v2806_v21 }
 0x369   : > { %1337 = vperm.xlu0 %1719, %v1123_v28   ;;  %1332 = vperm.xlu1 %1720, %v1122_v1   ;;  %v1169_v19 = vpop.permute.xlu1 %1168 }
 0x36a   : > { %1252 = vst [vmem:[%s2437_s13 + $0xe0] sm:$0xff] %v1220_v4  ;;  %1253 = vst [vmem:[%s2437_s13 + $0xe8] sm:$0xff] %v1221_v33  ;;  %v1222_v16 = vmul.f32 %v1169_v19, %v2807_v48  ;;  %v1223_v10 = vmul.f32 %v1169_v19, %v2808_v27 }
 0x36b   : > { %v1174_v63 = vpop.permute.xlu0 %1173 }
 0x36c   : > { %1254 = vst [vmem:[%s2437_s13 + $0x100] sm:$0xff] %v1222_v16  ;;  %1255 = vst [vmem:[%s2437_s13 + $0x108] sm:$0xff] %v1223_v10  ;;  %v1224_v59 = vmul.f32 %v1174_v63, %v2809_v6  ;;  %v1225_v31 = vmul.f32 %v1174_v63, %v2810_v58 }
 0x36d   : > { %1347 = vperm.xlu0 %1719, %v1125_v13   ;;  %1342 = vperm.xlu1 %1720, %v1124_v24   ;;  %v1179_v15 = vpop.permute.xlu1 %1178 }
 0x36e   : > { %1256 = vst [vmem:[%s2437_s13 + $0x120] sm:$0xff] %v1224_v59  ;;  %1257 = vst [vmem:[%s2437_s13 + $0x128] sm:$0xff] %v1225_v31  ;;  %v1226_v3 = vmul.f32 %v1179_v15, %v2811_v17  ;;  %v1227_v57 = vmul.f32 %v1179_v15, %v2812_v22 }
 0x36f   : > { %v1184_v9 = vpop.permute.xlu0 %1183 }
 0x370   : > { %1258 = vst [vmem:[%s2437_s13 + $0x140] sm:$0xff] %v1226_v3  ;;  %1259 = vst [vmem:[%s2437_s13 + $0x148] sm:$0xff] %v1227_v57  ;;  %v1228_v49 = vmul.f32 %v1184_v9, %v2813_v25  ;;  %v1229_v42 = vmul.f32 %v1184_v9, %v2814_v41 }
 0x371   : > { %v1189_v29 = vpop.permute.xlu1 %1188 }
 0x372   : > { %1770 = shalt.err (!%p1767_p3)
}
 0x373   : > { %s1771_s18 = scalar_lea.hbm %s1446_s23, 16  ;;  %s1775_s22 = scalar_lea.hbm %s2717_s8, 32 }
 0x374   : > { %p1772_p4 = scmp.ne.s32.totalorder %s1446_s23, %s1771_s18  ;;  %p1776_p9 = scmp.lt.s32.totalorder %s1446_s23, %s2717_s8 }
 0x375   : > { %p1777_p10 = scmp.lt.s32.totalorder %s1775_s22, %s1771_s18 }
 0x376   : > { %p1773_p7 = pnand %p1772_p4, %p1938_p5 }
 0x377   : > { %p1778_p11 = por %p1777_p10, %p1776_p9 }
 0x378   : > { %p1774_p8 = pneg %p1773_p7 }
 0x37a   : > { %p1779_p12 = pnand %p1778_p11, %p1774_p8 }
 0x37c   : > { %1782 = shalt.err (!%p1779_p12)
}
 0x37d   : > { %1672 = dma.vmem_to_hbm [thread:$0]  (%p1938_p5), %s1449_s19, 16, %s1446_s23, %s1420_s25   ;;  %1260 = vst [vmem:[%s2437_s13 + $0x160] sm:$0xff] %v1228_v49  ;;  %1261 = vst [vmem:[%s2437_s13 + $0x168] sm:$0xff] %v1229_v42  ;;  %v2815_v37 = vunpack.c.l.bf16 %v2205_v46  ;;  %v2816_v12 = vunpack.c.h.bf16 %v2205_v46  ;;  %v1194_v45 = vpop.permute.xlu0 %1193  ;;  %v2817_v53 = vunpack.c.l.bf16 %v2195_v40  ;;  %v2818_v34 = vunpack.c.h.bf16 %v2195_v40  ;;  %v1199_v5 = vpop.permute.xlu1 %1198 }
 0x37e   : > { %v2819_v7 = vunpack.c.l.bf16 %v2225_v18  ;;  %v2820_v46 = vunpack.c.h.bf16 %v2225_v18  ;;  %v2821_v0 = vunpack.c.l.bf16 %v2215_v36  ;;  %v2822_v56 = vunpack.c.h.bf16 %v2215_v36  ;;  %s1626_s0 = sshll.u32 %s1921_s9, 13  ;;  %s1432_s1 = sshll.u32 %s2437_s13, 4  ;;  %s2655_s1 = int_to_ptr.vmem [resolvable:$true] %s1432_s1 }
 0x37f   : > { %v1230_v43 = vmul.f32 %v1189_v29, %v2815_v37  ;;  %v1231_v11 = vmul.f32 %v1189_v29, %v2816_v12  ;;  %v1232_v23 = vmul.f32 %v1194_v45, %v2817_v53  ;;  %v1233_v35 = vmul.f32 %v1194_v45, %v2818_v34  ;;  %s2653_s25 = scalar_lea.hbm %s2716_s7, %s1626_s0  ;;  %s1415_s9 = scalar_lea.sflag [#allocation3], %s2376_s24 }
 0x380   : > { %v1234_v55 = vmul.f32 %v1199_v5, %v2819_v7  ;;  %v1235_v62 = vmul.f32 %v1199_v5, %v2820_v46  ;;  %v2823_v18 = vunpack.c.l.bf16 %v2108_v60  ;;  %v2824_v21 = vunpack.c.h.bf16 %v2108_v60  ;;  %s1783_s26 = scalar_lea.vmem %s2655_s1, 8192  ;;  %s1852_s10 = smov [#allocation2]  }
 0x381   : > { %1262 = vst [vmem:[%s2437_s13 + $0x180] sm:$0xff] %v1230_v43  ;;  %1263 = vst [vmem:[%s2437_s13 + $0x188] sm:$0xff] %v1231_v11  ;;  %v1204_v61 = vpop.permute.xlu0 %1203  ;;  %v2825_v19 = vunpack.c.l.bf16 %v2092_v52  ;;  %v2826_v36 = vunpack.c.h.bf16 %v2092_v52  ;;  %v2827_v63 = vunpack.c.l.bf16 %v2098_v54  ;;  %v2828_v13 = vunpack.c.h.bf16 %v2098_v54  ;;  %p1784_p13 = scmp.ne.s32.totalorder %s2655_s1, %s1783_s26  ;;  %s1787_s21 = sshll.u32 %s1852_s10, 4  ;;  %s1788_s21 = int_to_ptr.vmem [resolvable:$false] %s1787_s21 }
 0x382   : > { %1264 = vst [vmem:[%s2437_s13 + $0x1a0] sm:$0xff] %v1232_v23  ;;  %1265 = vst [vmem:[%s2437_s13 + $0x1a8] sm:$0xff] %v1233_v35  ;;  %v1236_v40 = vmul.f32 %v1204_v61, %v2821_v0  ;;  %v1237_v28 = vmul.f32 %v1204_v61, %v2822_v56  ;;  %v2829_v6 = vunpack.c.l.bf16 %v2086_v50  ;;  %v2830_v59 = vunpack.c.h.bf16 %v2086_v50  ;;  %s1789_s12 = scalar_lea.vmem %s1788_s21, 16384  ;;  %p1790_p2 = scmp.lt.s32.totalorder %s2655_s1, %s1788_s21 }
 0x383   : > { %1266 = vst [vmem:[%s2437_s13 + $0x1c0] sm:$0xff] %v1234_v55  ;;  %1267 = vst [vmem:[%s2437_s13 + $0x1c8] sm:$0xff] %v1235_v62  ;;  %v2831_v17 = vunpack.c.l.bf16 %v2118_v2  ;;  %v2832_v3 = vunpack.c.h.bf16 %v2118_v2  ;;  %v2833_v57 = vunpack.c.l.bf16 %v2128_v8  ;;  %v2834_v9 = vunpack.c.h.bf16 %v2128_v8  ;;  %p1785_p0 = pnand %p1784_p13, %p1938_p5  ;;  %p1791_p3 = scmp.lt.s32.totalorder %s1789_s12, %s1783_s26 }
 0x384   : > { %1268 = vst [vmem:[%s2437_s13 + $0x1e0] sm:$0xff] %v1236_v40  ;;  %1269 = vst [vmem:[%s2437_s13 + $0x1e8] sm:$0xff] %v1237_v28  ;;  %v2835_v42 = vunpack.c.l.bf16 %v2138_v14  ;;  %v2836_v29 = vunpack.c.h.bf16 %v2138_v14  ;;  %v2837_v43 = vunpack.c.l.bf16 %v2148_v20  ;;  %v2838_v12 = vunpack.c.h.bf16 %v2148_v20 }
 0x385   : > { %v2839_v23 = vunpack.c.l.bf16 %v2158_v26  ;;  %v2840_v34 = vunpack.c.h.bf16 %v2158_v26  ;;  %v2841_v5 = vunpack.c.l.bf16 %v2168_v32  ;;  %v2842_v7 = vunpack.c.h.bf16 %v2168_v32  ;;  %p1786_p1 = pneg %p1785_p0  ;;  %p1792_p4 = por %p1791_p3, %p1790_p2 }
 0x386   : > { %v2843_v61 = vunpack.c.l.bf16 %v2178_v38  ;;  %v2844_v0 = vunpack.c.h.bf16 %v2178_v38  ;;  %v2845_v56 = vunpack.c.l.bf16 %v2188_v44  ;;  %v2846_v28 = vunpack.c.h.bf16 %v2188_v44 }
 0x387   : > { %v2850_v44 = vunpack.c.h.bf16 %v2208_v47  ;;  %p1793_p7 = pnand %p1792_p4, %p1786_p1 }
 0x3cc   : > { %v1278_v1 = vpop.permute.xlu0 %1277  ;;  %v1273_v51 = vpop.permute.xlu1 %1272 }
 0x3cd   : > { %v1352_v4 = vmul.f32 %v1278_v1, %v2823_v18  ;;  %v1353_v33 = vmul.f32 %v1278_v1, %v2824_v21  ;;  %v1350_v48 = vmul.f32 %v1273_v51, %v2825_v19  ;;  %v1351_v16 = vmul.f32 %v1273_v51, %v2826_v36 }
 0x3ce   : > { %v2848_v21 = vunpack.c.h.bf16 %v2198_v39  ;;  %v2849_v19 = vunpack.c.l.bf16 %v2208_v47  ;;  %v2851_v47 = vunpack.c.l.bf16 %v2218_v30 }
 0x3cf   : > { %1384 = vst [vmem:[%s2437_s13 + $0x30] sm:$0xff] %v1352_v4  ;;  %1385 = vst [vmem:[%s2437_s13 + $0x38] sm:$0xff] %v1353_v33  ;;  %v2847_v4 = vunpack.c.l.bf16 %v2198_v39 }
 0x3d0   : > { %1382 = vst [vmem:[%s2437_s13 + $0x10] sm:$0xff] %v1350_v48  ;;  %1383 = vst [vmem:[%s2437_s13 + $0x18] sm:$0xff] %v1351_v16  ;;  %v1288_v27 = vpop.permute.xlu0 %1287  ;;  %v1283_v10 = vpop.permute.xlu1 %1282 }
 0x3d1   : > { %v1356_v60 = vmul.f32 %v1288_v27, %v2827_v63  ;;  %v1357_v24 = vmul.f32 %v1288_v27, %v2828_v13  ;;  %v1354_v52 = vmul.f32 %v1283_v10, %v2829_v6  ;;  %v1355_v58 = vmul.f32 %v1283_v10, %v2830_v59 }
 0x3d2   : > { %v2852_v10 = vunpack.c.h.bf16 %v2218_v30 }
 0x3d3   : > { %1388 = vst [vmem:[%s2437_s13 + $0x70] sm:$0xff] %v1356_v60  ;;  %1389 = vst [vmem:[%s2437_s13 + $0x78] sm:$0xff] %v1357_v24  ;;  %v2853_v60 = vld [vmem:[#allocation8_spill] sm:$0xff] }
 0x3d4   : > { %1386 = vst [vmem:[%s2437_s13 + $0x50] sm:$0xff] %v1354_v52  ;;  %1387 = vst [vmem:[%s2437_s13 + $0x58] sm:$0xff] %v1355_v58  ;;  %v1298_v31 = vpop.permute.xlu0 %1297  ;;  %v1293_v15 = vpop.permute.xlu1 %1292  ;;  %v2854_v13 = vunpack.c.l.bf16 %v2853_v60  ;;  %v2855_v6 = vunpack.c.h.bf16 %v2853_v60 }
 0x3d5   : > { %v1360_v54 = vmul.f32 %v1298_v31, %v2831_v17  ;;  %v1361_v22 = vmul.f32 %v1298_v31, %v2832_v3  ;;  %v1358_v50 = vmul.f32 %v1293_v15, %v2833_v57  ;;  %v1359_v25 = vmul.f32 %v1293_v15, %v2834_v9 }
 0x3d7   : > { %1392 = vst [vmem:[%s2437_s13 + $0xb0] sm:$0xff] %v1360_v54  ;;  %1393 = vst [vmem:[%s2437_s13 + $0xb8] sm:$0xff] %v1361_v22 }
 0x3d8   : > { %1390 = vst [vmem:[%s2437_s13 + $0x90] sm:$0xff] %v1358_v50  ;;  %1391 = vst [vmem:[%s2437_s13 + $0x98] sm:$0xff] %v1359_v25  ;;  %v1308_v49 = vpop.permute.xlu0 %1307  ;;  %v1303_v41 = vpop.permute.xlu1 %1302 }
 0x3d9   : > { %v1364_v2 = vmul.f32 %v1308_v49, %v2835_v42  ;;  %v1365_v37 = vmul.f32 %v1308_v49, %v2836_v29  ;;  %v1362_v8 = vmul.f32 %v1303_v41, %v2837_v43  ;;  %v1363_v11 = vmul.f32 %v1303_v41, %v2838_v12 }
 0x3db   : > { %1396 = vst [vmem:[%s2437_s13 + $0xf0] sm:$0xff] %v1364_v2  ;;  %1397 = vst [vmem:[%s2437_s13 + $0xf8] sm:$0xff] %v1365_v37 }
 0x3dc   : > { %1394 = vst [vmem:[%s2437_s13 + $0xd0] sm:$0xff] %v1362_v8  ;;  %1395 = vst [vmem:[%s2437_s13 + $0xd8] sm:$0xff] %v1363_v11  ;;  %v1318_v45 = vpop.permute.xlu0 %1317  ;;  %v1313_v53 = vpop.permute.xlu1 %1312 }
 0x3dd   : > { %v1368_v14 = vmul.f32 %v1318_v45, %v2839_v23  ;;  %v1369_v35 = vmul.f32 %v1318_v45, %v2840_v34  ;;  %v1366_v20 = vmul.f32 %v1313_v53, %v2841_v5  ;;  %v1367_v55 = vmul.f32 %v1313_v53, %v2842_v7 }
 0x3df   : > { %1400 = vst [vmem:[%s2437_s13 + $0x130] sm:$0xff] %v1368_v14  ;;  %1401 = vst [vmem:[%s2437_s13 + $0x138] sm:$0xff] %v1369_v35 }
 0x3e0   : > { %1398 = vst [vmem:[%s2437_s13 + $0x110] sm:$0xff] %v1366_v20  ;;  %1399 = vst [vmem:[%s2437_s13 + $0x118] sm:$0xff] %v1367_v55  ;;  %v1328_v46 = vpop.permute.xlu0 %1327  ;;  %v1323_v62 = vpop.permute.xlu1 %1322 }
 0x3e1   : > { %v1372_v26 = vmul.f32 %v1328_v46, %v2843_v61  ;;  %v1373_v40 = vmul.f32 %v1328_v46, %v2844_v0  ;;  %v1370_v32 = vmul.f32 %v1323_v62, %v2845_v56  ;;  %v1371_v1 = vmul.f32 %v1323_v62, %v2846_v28 }
 0x3e3   : > { %1404 = vst [vmem:[%s2437_s13 + $0x170] sm:$0xff] %v1372_v26  ;;  %1405 = vst [vmem:[%s2437_s13 + $0x178] sm:$0xff] %v1373_v40 }
 0x3e4   : > { %1402 = vst [vmem:[%s2437_s13 + $0x150] sm:$0xff] %v1370_v32  ;;  %1403 = vst [vmem:[%s2437_s13 + $0x158] sm:$0xff] %v1371_v1  ;;  %v1338_v51 = vpop.permute.xlu0 %1337  ;;  %v1333_v18 = vpop.permute.xlu1 %1332 }
 0x3e5   : > { %v1376_v38 = vmul.f32 %v1338_v51, %v2847_v4  ;;  %v1377_v33 = vmul.f32 %v1338_v51, %v2848_v21  ;;  %v1374_v48 = vmul.f32 %v1333_v18, %v2849_v19  ;;  %v1375_v36 = vmul.f32 %v1333_v18, %v2850_v44 }
 0x3e7   : > { %1408 = vst [vmem:[%s2437_s13 + $0x1b0] sm:$0xff] %v1376_v38  ;;  %1409 = vst [vmem:[%s2437_s13 + $0x1b8] sm:$0xff] %v1377_v33 }
 0x3e8   : > { %1406 = vst [vmem:[%s2437_s13 + $0x190] sm:$0xff] %v1374_v48  ;;  %1407 = vst [vmem:[%s2437_s13 + $0x198] sm:$0xff] %v1375_v36  ;;  %v1348_v39 = vpop.permute.xlu0 %1347  ;;  %v1343_v16 = vpop.permute.xlu1 %1342 }
 0x3e9   : > { %v1380_v27 = vmul.f32 %v1348_v39, %v2851_v47  ;;  %v1381_v63 = vmul.f32 %v1348_v39, %v2852_v10  ;;  %v1378_v24 = vmul.f32 %v1343_v16, %v2854_v13  ;;  %v1379_v52 = vmul.f32 %v1343_v16, %v2855_v6 }
 0x3eb   : > { %1412 = vst [vmem:[%s2437_s13 + $0x1f0] sm:$0xff] %v1380_v27  ;;  %1413 = vst [vmem:[%s2437_s13 + $0x1f8] sm:$0xff] %v1381_v63 }
 0x3ec   : > { %1410 = vst [vmem:[%s2437_s13 + $0x1d0] sm:$0xff] %v1378_v24  ;;  %1411 = vst [vmem:[%s2437_s13 + $0x1d8] sm:$0xff] %v1379_v52 }
 0x3ed   : > { %1796 = shalt.err (!%p1793_p7)
}
 0x3ee   : > { %s1797_s13 = scalar_lea.hbm %s2653_s25, 8192  ;;  %s1801_s20 = scalar_lea.hbm %s2716_s7, 16384 }
 0x3ef   : > { %p1798_p8 = scmp.ne.s32.totalorder %s2653_s25, %s1797_s13  ;;  %p1802_p11 = scmp.lt.s32.totalorder %s2653_s25, %s2716_s7 }
 0x3f0   : > { %p1803_p12 = scmp.lt.s32.totalorder %s1801_s20, %s1797_s13 }
 0x3f1   : > { %p1799_p9 = pnand %p1798_p8, %p1938_p5 }
 0x3f2   : > { %p1804_p13 = por %p1803_p12, %p1802_p11 }
 0x3f3   : > { %p1800_p10 = pneg %p1799_p9 }
 0x3f5   : > { %p1805_p0 = pnand %p1804_p13, %p1800_p10 }
 0x3f7   : > { %1808 = shalt.err (!%p1805_p0)
}
 0x3f8   : > { %s1853_s19 = smov 512   ;;  %s1854_s23 = smov 32  }
 0x3f9   : > { %1671 = dma.vmem_to_hbm [thread:$0]  (%p1938_p5), %s2655_s1, 8192, %s2653_s25, %s1415_s9, %s1853_s19, %s1853_s19, %s1854_s23  }
 0x3fa PF: > { %p1682_p1 = scmp.ge.s32.totalorder %s1847_s30, 2  ;;  %s1460_s26 = sand.u32 1, %s1835_s27  }
 0x3fb   : > { %s1461_s10 = scalar_lea.sflag [#allocation3], %s1460_s26 }
 0x3fc   : > { %p1676_p2 = pnand %p1682_p1, %p1942_p6 }
 0x3fe   : > { %p1677_p3 = pneg %p1676_p2 }
 0x400   : > { %1826 = dma.done.wait (%p1677_p3), %s1461_s10, 8192  }
 0x401   : > { %1828 = vsyncadd (%p1677_p3), %s1461_s10, 4294959104  ;;  %s1470_s21 = scalar_lea.sflag [#allocation5], %s1460_s26 }
 0x402   : > { %1830 = dma.done.wait (%p1677_p3), %s1470_s21, 16  }
 0x403   : > { %1832 = vsyncadd (%p1677_p3), %s1470_s21, 4294967280  ;;  %p22_p5 = scmp.ge.s32.totalorder %s1925_s11, 4   ;;  %s2856_s27 = smov %s1839_s28 }
 0x404   : > { %s2857_s28 = smov %s1843_s29  ;;  %s2858_s29 = smov %s1936_s14 }
 0x405   : > { %s2859_s30 = smov %s1925_s11  ;;  %24 = sbr.rel (!%p22_p5) target bundleno = 8 (0x8), region = 109 }
 0x40a   :  { %1474 = vsyncpa [#allocation3], 1 }
 0x40b   :  { %1476 = vsyncpa [#allocation3 + $0x1], 1 }
 0x40c   :  { %1477 = vsyncpa [#allocation5], 1 }
 0x40d   :  { %1479 = vsyncpa [#allocation5 + $0x1], 1 }

</bundles_post_ra>
